<compile_context>
chip_gen: v7x
topology: tpu7x:2x2x1
jax: 0.10.0
libtpu: 0.0.40
codegen_flags: <defaults>
</compile_context>

<pallas_src>
import functools

import numpy as np
import jax
import jax.numpy as jnp
from jax import lax
from jax.experimental import pallas as pl
from jax.experimental.pallas import tpu as pltpu


# ----------------------------------------------------------------------------
# small helpers
# ----------------------------------------------------------------------------
def marginal_prob_std(t, sigma=25.0):
    return jnp.sqrt((jnp.power(sigma, 2.0 * t) - 1.0) / (2.0 * jnp.log(sigma)))


def _silu_eup(z):
    # SiLU with the divide pushed onto the EUP (approximate reciprocal).
    return z * pl.reciprocal(1.0 + jnp.exp(-z), approx=True)


# channels-last convolutions (weights already in HWIO layout)
def conv2d_nhwc(x, w_hwio, stride):
    return lax.conv_general_dilated(
        x, w_hwio, window_strides=(stride, stride), padding="VALID",
        dimension_numbers=("NHWC", "HWIO", "NHWC"))


def conv_transpose2d_nhwc(x, w_hwio, stride, output_padding=0):
    # w_hwio: (kH, kW, C_in, C_out), already spatially flipped (see prepare_params)
    k = w_hwio.shape[0]
    pad = k - 1
    return lax.conv_general_dilated(
        x, w_hwio, window_strides=(1, 1),
        padding=[(pad, pad + output_padding), (pad, pad + output_padding)],
        lhs_dilation=(stride, stride),
        dimension_numbers=("NHWC", "HWIO", "NHWC"))


# ----------------------------------------------------------------------------
# Pallas kernel 1: time-embedding Linear + SiLU + ALL seven Dense projections
#   output: (B, sum(C_i) = 704) -- each fused GroupNorm kernel gets its slice.
# ----------------------------------------------------------------------------
def embed_dense_kernel(sin_ref, cos_ref, w1_ref, b1_ref, wd_ref, bd_ref, o_ref):
    half = sin_ref.shape[1]
    dn = (((1,), (1,)), ((), ()))          # contract last dims (x @ W^T, no transpose)
    emb = (lax.dot_general(sin_ref[...], w1_ref[:, :half], dn,
                           preferred_element_type=jnp.float32)
           + lax.dot_general(cos_ref[...], w1_ref[:, half:], dn,
                             preferred_element_type=jnp.float32)
           + b1_ref[...])
    emb = _silu_eup(emb)                                           # (B, E)
    d_all = lax.dot_general(emb, wd_ref[...], dn,
                            preferred_element_type=jnp.float32) + bd_ref[...]
    o_ref[...] = d_all.astype(o_ref.dtype)                         # (B, Ctot)


def time_embed_dense(t, w_fourier, w1, b1, wd_all, bd_all):
    B = t.shape[0]
    half = w_fourier.shape[0]
    E = w1.shape[0]
    Ctot = wd_all.shape[0]
    x_proj = t[:, None].astype(jnp.float32) * w_fourier[None, :] * (2.0 * np.pi)
    sin_f = jnp.sin(x_proj)
    cos_f = jnp.cos(x_proj)
    flops = int(2 * B * E * E + 2 * B * E * Ctot)
    nbytes = int(4 * (2 * B * half + E * E + E + Ctot * E + Ctot + B * Ctot))
    return pl.pallas_call(
        embed_dense_kernel,
        out_shape=jax.ShapeDtypeStruct((B, Ctot), jnp.float32),
        grid=(1,),
        in_specs=[
            pl.BlockSpec((B, half), lambda i: (0, 0)),
            pl.BlockSpec((B, half), lambda i: (0, 0)),
            pl.BlockSpec((E, E), lambda i: (0, 0)),
            pl.BlockSpec((1, E), lambda i: (0, 0)),
            pl.BlockSpec((Ctot, E), lambda i: (0, 0)),
            pl.BlockSpec((1, Ctot), lambda i: (0, 0)),
        ],
        out_specs=pl.BlockSpec((B, Ctot), lambda i: (0, 0)),
        compiler_params=pltpu.CompilerParams(dimension_semantics=("arbitrary",)),
        cost_estimate=pl.CostEstimate(flops=flops, transcendentals=int(2 * B * E),
                                      bytes_accessed=nbytes),
    )(sin_f, cos_f, w1, b1.reshape(1, E), wd_all, bd_all.reshape(1, Ctot))


# ----------------------------------------------------------------------------
# Pallas kernel 2: fused Dense-bias add + GroupNorm + SiLU, channels-last.
#   grid=(B,) parallel; per-sample block (1, S, C) with channels on lanes.
# ----------------------------------------------------------------------------
def add_gn_swish_kernel(h_ref, d_ref, gamma_ref, beta_ref, member_ref, o_ref,
                        *, cpg, eps):
    S = h_ref.shape[1]
    y = h_ref[0] + d_ref[0]                               # (S, C) + (1, C) -> (S, C)

    # per-channel sublane reductions, then group aggregation via a one-hot
    # (C, G) matmul (no in-kernel reshapes).
    ch_sum = jnp.sum(y, axis=0, keepdims=True)            # (1, C)
    ch_sq = jnp.sum(y * y, axis=0, keepdims=True)         # (1, C)
    member = member_ref[...]                               # (C, G) one-hot constant

    inv_n = 1.0 / float(cpg * S)
    # single-pass E[x^2]-E[x]^2 variance: fine at this activation scale.
    g_mean = jnp.dot(ch_sum, member, preferred_element_type=jnp.float32) * inv_n
    g_msq = jnp.dot(ch_sq, member, preferred_element_type=jnp.float32) * inv_n
    g_var = jnp.maximum(g_msq - g_mean * g_mean, 0.0)
    g_inv = lax.rsqrt(g_var + eps)                         # (1, G)

    dn = (((1,), (1,)), ((), ()))                          # contract on G
    mean_c = lax.dot_general(g_mean, member, dn, preferred_element_type=jnp.float32)
    inv_c = lax.dot_general(g_inv, member, dn, preferred_element_type=jnp.float32)

    scale = inv_c * gamma_ref[...]                         # (1, C)
    shift = beta_ref[...] - mean_c * scale                 # (1, C)
    z = y * scale + shift                                  # (S, C)
    o_ref[0] = _silu_eup(z).astype(o_ref.dtype)


def add_groupnorm_swish(h_nhwc, d, gamma, beta, num_groups, eps=1e-5):
    B, H, W, C = h_nhwc.shape
    S = H * W
    G = num_groups
    cpg = C // G
    # trace-time one-hot group membership (numpy constant, no in-kernel iota)
    member = np.zeros((C, G), np.float32)
    member[np.arange(C), np.arange(C) // cpg] = 1.0

    kernel = functools.partial(add_gn_swish_kernel, cpg=cpg, eps=eps)
    flops = int(B * (10 * S * C + 8 * C * G))
    nbytes = int(4 * (2 * B * S * C + B * C + 2 * C + C * G))
    out = pl.pallas_call(
        kernel,
        out_shape=jax.ShapeDtypeStruct((B, S, C), h_nhwc.dtype),
        grid=(B,),
        in_specs=[
            pl.BlockSpec((1, S, C), lambda b: (b, 0, 0)),
            pl.BlockSpec((1, 1, C), lambda b: (b, 0, 0)),
            pl.BlockSpec((1, C), lambda b: (0, 0)),
            pl.BlockSpec((1, C), lambda b: (0, 0)),
            pl.BlockSpec((C, G), lambda b: (0, 0)),
        ],
        out_specs=pl.BlockSpec((1, S, C), lambda b: (b, 0, 0)),
        compiler_params=pltpu.CompilerParams(dimension_semantics=("parallel",)),
        cost_estimate=pl.CostEstimate(flops=flops, transcendentals=int(2 * B * S * C),
                                      bytes_accessed=nbytes),
    )(h_nhwc.reshape(B, S, C), d.reshape(B, 1, C), gamma.reshape(1, C),
      beta.reshape(1, C), member)
    return out.reshape(B, H, W, C)


# ----------------------------------------------------------------------------
# parameter preparation (one-time, outside jit): torch layout -> optimized layout
# ----------------------------------------------------------------------------
def prepare_params(p, channels=(32, 64, 128, 256)):
    q = {
        "fourier_W": p["fourier_W"], "embed_w": p["embed_w"], "embed_b": p["embed_b"],
        "tconv1_b": p["tconv1_b"],
    }
    # Conv2d OIHW -> HWIO
    for i in (1, 2, 3, 4):
        q[f"conv{i}_w"] = jnp.transpose(p[f"conv{i}_w"], (2, 3, 1, 0))

    # ConvTranspose2d (C_in, C_out, kH, kW) -> equivalent forward-conv HWIO
    # (spatial flip + axis permutation), input channels stay on axis 2.
    def tconv_hwio(w):
        return jnp.transpose(jnp.flip(w, axis=(2, 3)), (2, 3, 0, 1))

    q["tconv4_w"] = tconv_hwio(p["tconv4_w"])
    # split the concat-consuming tconv weights along C_in: conv(h,Wa)+conv(skip,Wb)
    for name, csplit in (("tconv3_w", channels[2]), ("tconv2_w", channels[1]),
                         ("tconv1_w", channels[0])):
        w = tconv_hwio(p[name])
        q[name + "a"] = w[:, :, :csplit, :]
        q[name + "b"] = w[:, :, csplit:, :]

    # all seven Dense(embed) projections as one (sum C, E) weight
    q["dense_all_w"] = jnp.concatenate([p[f"dense{i}_w"] for i in range(1, 8)], axis=0)
    q["dense_all_b"] = jnp.concatenate([p[f"dense{i}_b"] for i in range(1, 8)], axis=0)
    for i in range(1, 8):
        q[f"gn{i}_g"] = p[f"gn{i}_g"]
        q[f"gn{i}_b"] = p[f"gn{i}_b"]
    return q


# ----------------------------------------------------------------------------
# full ScoreNet forward (Pallas path, channels-last internally)
# ----------------------------------------------------------------------------
def scorenet_forward(q, x_nchw, t, sigma=25.0, channels=(32, 64, 128, 256)):
    c = channels
    x = jnp.transpose(x_nchw, (0, 2, 3, 1))          # one boundary transpose in

    d_all = time_embed_dense(t, q["fourier_W"], q["embed_w"], q["embed_b"],
                             q["dense_all_w"], q["dense_all_b"])
    widths = [c[0], c[1], c[2], c[3], c[2], c[1], c[0]]
    d = []
    off = 0
    for w_ in widths:
        d.append(d_all[:, off:off + w_])
        off += w_

    # encoder
    h1 = conv2d_nhwc(x, q["conv1_w"], 1)
    h1 = add_groupnorm_swish(h1, d[0], q["gn1_g"], q["gn1_b"], 4)
    h2 = conv2d_nhwc(h1, q["conv2_w"], 2)
    h2 = add_groupnorm_swish(h2, d[1], q["gn2_g"], q["gn2_b"], 32)
    h3 = conv2d_nhwc(h2, q["conv3_w"], 2)
    h3 = add_groupnorm_swish(h3, d[2], q["gn3_g"], q["gn3_b"], 32)
    h4 = conv2d_nhwc(h3, q["conv4_w"], 2)
    h4 = add_groupnorm_swish(h4, d[3], q["gn4_g"], q["gn4_b"], 32)

    # decoder (skip concatenations replaced by split-weight conv sums)
    h = conv_transpose2d_nhwc(h4, q["tconv4_w"], 2, 0)
    h = add_groupnorm_swish(h, d[4], q["gn5_g"], q["gn5_b"], 32)
    h = (conv_transpose2d_nhwc(h, q["tconv3_wa"], 2, 1)
         + conv_transpose2d_nhwc(h3, q["tconv3_wb"], 2, 1))
    h = add_groupnorm_swish(h, d[5], q["gn6_g"], q["gn6_b"], 32)
    h = (conv_transpose2d_nhwc(h, q["tconv2_wa"], 2, 1)
         + conv_transpose2d_nhwc(h2, q["tconv2_wb"], 2, 1))
    h = add_groupnorm_swish(h, d[6], q["gn7_g"], q["gn7_b"], 32)
    h = (conv_transpose2d_nhwc(h, q["tconv1_wa"], 1, 0)
         + conv_transpose2d_nhwc(h1, q["tconv1_wb"], 1, 0))

    # epilogue: plain jnp so XLA fuses bias + 1/std into the conv output
    inv_std = 1.0 / marginal_prob_std(t, sigma)
    out = (h + q["tconv1_b"][None, None, None, :]) * inv_std[:, None, None, None]
    return jnp.transpose(out, (0, 3, 1, 2))           # one boundary transpose out


# ----------------------------------------------------------------------------
# pure-JAX reference (independent NCHW path, torch-layout weights)
# ----------------------------------------------------------------------------
def ref_conv2d(x, w, stride):
    return lax.conv_general_dilated(
        x, w, window_strides=(stride, stride), padding="VALID",
        dimension_numbers=("NCHW", "OIHW", "NCHW"))


def ref_conv_transpose2d(x, w, stride, output_padding=0):
    # TODO(synk): ConvTranspose2d emulation (flip + lhs_dilation) is validated
    # against the module definition analytically, not against PyTorch directly.
    k = w.shape[2]
    w_t = jnp.flip(w, axis=(2, 3)).transpose(1, 0, 2, 3)
    pad = k - 1
    return lax.conv_general_dilated(
        x, w_t, window_strides=(1, 1),
        padding=[(pad, pad + output_padding), (pad, pad + output_padding)],
        lhs_dilation=(stride, stride),
        dimension_numbers=("NCHW", "OIHW", "NCHW"))


def scorenet_ref(params, x, t, sigma=25.0):
    sigm = lambda v: 1.0 / (1.0 + jnp.exp(-v))
    swish = lambda v: v * sigm(v)

    def gn(v, G, g, b, eps=1e-5):
        B, C, H, W = v.shape
        vg = v.reshape(B, G, (C // G) * H * W)
        m = vg.mean(axis=2, keepdims=True)
        va = vg.var(axis=2, keepdims=True)
        vn = ((vg - m) / jnp.sqrt(va + eps)).reshape(B, C, H, W)
        return vn * g[None, :, None, None] + b[None, :, None, None]

    def dense(e, w, b):
        return (e @ w.T + b)[:, :, None, None]

    xp = t[:, None] * params["fourier_W"][None, :] * (2.0 * np.pi)
    e = jnp.concatenate([jnp.sin(xp), jnp.cos(xp)], axis=-1)
    emb = swish(e @ params["embed_w"].T + params["embed_b"])

    h1 = ref_conv2d(x, params["conv1_w"], 1) + dense(emb, params["dense1_w"], params["dense1_b"])
    h1 = swish(gn(h1, 4, params["gn1_g"], params["gn1_b"]))
    h2 = ref_conv2d(h1, params["conv2_w"], 2) + dense(emb, params["dense2_w"], params["dense2_b"])
    h2 = swish(gn(h2, 32, params["gn2_g"], params["gn2_b"]))
    h3 = ref_conv2d(h2, params["conv3_w"], 2) + dense(emb, params["dense3_w"], params["dense3_b"])
    h3 = swish(gn(h3, 32, params["gn3_g"], params["gn3_b"]))
    h4 = ref_conv2d(h3, params["conv4_w"], 2) + dense(emb, params["dense4_w"], params["dense4_b"])
    h4 = swish(gn(h4, 32, params["gn4_g"], params["gn4_b"]))

    h = ref_conv_transpose2d(h4, params["tconv4_w"], 2, 0) + dense(emb, params["dense5_w"], params["dense5_b"])
    h = swish(gn(h, 32, params["gn5_g"], params["gn5_b"]))
    h = ref_conv_transpose2d(jnp.concatenate([h, h3], axis=1), params["tconv3_w"], 2, 1) \
        + dense(emb, params["dense6_w"], params["dense6_b"])
    h = swish(gn(h, 32, params["gn6_g"], params["gn6_b"]))
    h = ref_conv_transpose2d(jnp.concatenate([h, h2], axis=1), params["tconv2_w"], 2, 1) \
        + dense(emb, params["dense7_w"], params["dense7_b"])
    h = swish(gn(h, 32, params["gn7_g"], params["gn7_b"]))
    h = ref_conv_transpose2d(jnp.concatenate([h, h1], axis=1), params["tconv1_w"], 1, 0) \
        + params["tconv1_b"][None, :, None, None]
    std = marginal_prob_std(t, sigma)
    return h / std[:, None, None, None]


# ----------------------------------------------------------------------------
# deterministic parameter init (PyTorch-style U(-1/sqrt(fan_in), 1/sqrt(fan_in)))
# ----------------------------------------------------------------------------
def init_params(key, channels=(32, 64, 128, 256), embed_dim=256):
    ks = iter(jax.random.split(key, 64))

    def uniform(k, shape, fan_in):
        b = 1.0 / np.sqrt(fan_in)
        return jax.random.uniform(k, shape, jnp.float32, -b, b)

    p = {}
    p["fourier_W"] = jax.random.normal(next(ks), (embed_dim // 2,), jnp.float32) * 30.0
    p["embed_w"] = uniform(next(ks), (embed_dim, embed_dim), embed_dim)
    p["embed_b"] = uniform(next(ks), (embed_dim,), embed_dim)

    p["conv1_w"] = uniform(next(ks), (channels[0], 3, 3, 3), 3 * 9)
    p["conv2_w"] = uniform(next(ks), (channels[1], channels[0], 3, 3), channels[0] * 9)
    p["conv3_w"] = uniform(next(ks), (channels[2], channels[1], 3, 3), channels[1] * 9)
    p["conv4_w"] = uniform(next(ks), (channels[3], channels[2], 3, 3), channels[2] * 9)

    dense_out = [channels[0], channels[1], channels[2], channels[3],
                 channels[2], channels[1], channels[0]]
    for i, c in enumerate(dense_out, start=1):
        p[f"dense{i}_w"] = uniform(next(ks), (c, embed_dim), embed_dim)
        p[f"dense{i}_b"] = uniform(next(ks), (c,), embed_dim)

    gn_ch = {1: channels[0], 2: channels[1], 3: channels[2], 4: channels[3],
             5: channels[2], 6: channels[1], 7: channels[0]}
    for i, c in gn_ch.items():
        p[f"gn{i}_g"] = 1.0 + 0.1 * jax.random.normal(next(ks), (c,), jnp.float32)
        p[f"gn{i}_b"] = 0.1 * jax.random.normal(next(ks), (c,), jnp.float32)

    # ConvTranspose2d weights in PyTorch layout (C_in, C_out, kH, kW)
    p["tconv4_w"] = uniform(next(ks), (channels[3], channels[2], 3, 3), channels[3] * 9)
    p["tconv3_w"] = uniform(next(ks), (channels[2] * 2, channels[1], 3, 3), channels[2] * 2 * 9)
    p["tconv2_w"] = uniform(next(ks), (channels[1] * 2, channels[0], 3, 3), channels[1] * 2 * 9)
    p["tconv1_w"] = uniform(next(ks), (channels[0] * 2, 3, 3, 3), channels[0] * 2 * 9)
    p["tconv1_b"] = uniform(next(ks), (3,), channels[0] * 2 * 9)
    return p


if __name__ == "__main__":
    key = jax.random.PRNGKey(0)
    kp, kx, kt = jax.random.split(key, 3)

    params = init_params(kp)
    opt_params = prepare_params(params)      # one-time layout conversion (outside jit)

    B = 2
    # 28x28 is the smallest spatial size consistent with this exact U-Net
    # (3x3 VALID convs / strided tconvs + skip connections).
    x = jax.random.normal(kx, (B, 3, 28, 28), jnp.float32)
    t = jax.random.uniform(kt, (B,), jnp.float32, 0.1, 1.0)

    fwd = jax.jit(scorenet_forward)
    out = jax.block_until_ready(fwd(opt_params, x, t))

    ref = jax.block_until_ready(jax.jit(scorenet_ref)(params, x, t))

    assert out.shape == (B, 3, 28, 28), out.shape
    # tolerance accounts for the EUP approximate reciprocal used in SiLU; genuine
    # layout / weight-mapping bugs produce O(1) errors and are still caught.
    rel_err = float(jnp.max(jnp.abs(out - ref)) / (jnp.max(jnp.abs(ref)) + 1e-8))
    assert rel_err < 1e-2, f"relative error too large: {rel_err}"

    print("KERNEL_OK")
</pallas_src>

<mosaic_0001>
module attributes {stable_mosaic.version = 11 : i64} {
  func.func @embed_dense_kernel(%arg0: i32, %arg1: memref<2x128xf32, #tpu.memory_space<vmem>>, %arg2: memref<2x128xf32, #tpu.memory_space<vmem>>, %arg3: memref<256x256xf32, #tpu.memory_space<vmem>>, %arg4: memref<1x256xf32, #tpu.memory_space<vmem>>, %arg5: memref<704x256xf32, #tpu.memory_space<vmem>>, %arg6: memref<1x704xf32, #tpu.memory_space<vmem>>, %arg7: memref<2x704xf32, #tpu.memory_space<vmem>>) attributes {dimension_semantics = [#tpu.dimension_semantics<arbitrary>], iteration_bounds = array<i64: 1>, scalar_prefetch = 0 : i64, scratch_operands = 0 : i64, tpu.core_type = #tpu.core_type<tc>, window_params = [{pipeline_mode = #tpu.pipeline_mode<synchronous>, transform_indices = @transform_0, window_bounds = array<i64: 2, 128>}, {pipeline_mode = #tpu.pipeline_mode<synchronous>, transform_indices = @transform_1, window_bounds = array<i64: 2, 128>}, {pipeline_mode = #tpu.pipeline_mode<synchronous>, transform_indices = @transform_2, window_bounds = array<i64: 256, 256>}, {pipeline_mode = #tpu.pipeline_mode<synchronous>, transform_indices = @transform_3, window_bounds = array<i64: 1, 256>}, {pipeline_mode = #tpu.pipeline_mode<synchronous>, transform_indices = @transform_4, window_bounds = array<i64: 704, 256>}, {pipeline_mode = #tpu.pipeline_mode<synchronous>, transform_indices = @transform_5, window_bounds = array<i64: 1, 704>}, {pipeline_mode = #tpu.pipeline_mode<synchronous>, transform_indices = @transform_6, window_bounds = array<i64: 2, 704>}]} {
    %c0 = arith.constant 0 : index
    %c0_0 = arith.constant 0 : index
    %0 = vector.load %arg1[%c0, %c0_0] : memref<2x128xf32, #tpu.memory_space<vmem>>, vector<2x128xf32>
    %c0_1 = arith.constant 0 : index
    %c0_2 = arith.constant 0 : index
    %1 = vector.load %arg3[%c0_1, %c0_2] : memref<256x256xf32, #tpu.memory_space<vmem>>, vector<256x128xf32>
    %cst = arith.constant dense<0.000000e+00> : vector<2x256xf32>
    %2 = tpu.matmul %0, %1, %cst {dimension_numbers = #tpu.dot_dimension_numbers<[1], [1], [0], [0], [0, 0, 1, 0], [], []>} : vector<2x128xf32>, vector<256x128xf32>, vector<2x256xf32> -> vector<2x256xf32>
    %c0_3 = arith.constant 0 : index
    %c0_4 = arith.constant 0 : index
    %3 = vector.load %arg2[%c0_3, %c0_4] : memref<2x128xf32, #tpu.memory_space<vmem>>, vector<2x128xf32>
    %c0_5 = arith.constant 0 : index
    %c128 = arith.constant 128 : index
    %4 = vector.load %arg3[%c0_5, %c128] : memref<256x256xf32, #tpu.memory_space<vmem>>, vector<256x128xf32>
    %cst_6 = arith.constant dense<0.000000e+00> : vector<2x256xf32>
    %5 = tpu.matmul %3, %4, %cst_6 {dimension_numbers = #tpu.dot_dimension_numbers<[1], [1], [0], [0], [0, 0, 1, 0], [], []>} : vector<2x128xf32>, vector<256x128xf32>, vector<2x256xf32> -> vector<2x256xf32>
    %6 = arith.addf %2, %5 : vector<2x256xf32>
    %c0_7 = arith.constant 0 : index
    %c0_8 = arith.constant 0 : index
    %7 = vector.load %arg4[%c0_7, %c0_8] : memref<1x256xf32, #tpu.memory_space<vmem>>, vector<1x256xf32>
    %8 = vector.broadcast %7 : vector<1x256xf32> to vector<2x256xf32>
    %9 = arith.addf %6, %8 : vector<2x256xf32>
    %cst_9 = arith.constant 0.000000e+00 : f32
    %10 = vector.broadcast %cst_9 : f32 to vector<2x256xf32>
    %11 = arith.subf %10, %9 : vector<2x256xf32>
    %12 = math.exp %11 : vector<2x256xf32>
    %cst_10 = arith.constant 1.000000e+00 : f32
    %13 = vector.broadcast %cst_10 : f32 to vector<2x256xf32>
    %14 = arith.addf %13, %12 : vector<2x256xf32>
    %15 = tpu.reciprocal %14 {approx = true} : vector<2x256xf32> -> vector<2x256xf32>
    %16 = arith.mulf %9, %15 : vector<2x256xf32>
    %c0_11 = arith.constant 0 : index
    %c0_12 = arith.constant 0 : index
    %17 = vector.load %arg5[%c0_11, %c0_12] : memref<704x256xf32, #tpu.memory_space<vmem>>, vector<704x256xf32>
    %cst_13 = arith.constant dense<0.000000e+00> : vector<2x704xf32>
    %18 = tpu.matmul %16, %17, %cst_13 {dimension_numbers = #tpu.dot_dimension_numbers<[1], [1], [0], [0], [0, 0, 1, 0], [], []>} : vector<2x256xf32>, vector<704x256xf32>, vector<2x704xf32> -> vector<2x704xf32>
    %c0_14 = arith.constant 0 : index
    %c0_15 = arith.constant 0 : index
    %19 = vector.load %arg6[%c0_14, %c0_15] : memref<1x704xf32, #tpu.memory_space<vmem>>, vector<1x704xf32>
    %20 = vector.broadcast %19 : vector<1x704xf32> to vector<2x704xf32>
    %21 = arith.addf %18, %20 : vector<2x704xf32>
    %c0_16 = arith.constant 0 : index
    %c0_17 = arith.constant 0 : index
    %22 = vector.load %arg7[%c0_16, %c0_17] : memref<2x704xf32, #tpu.memory_space<vmem>>, vector<2x704xf32>
    tpu.vector_store %arg7[%c0_16, %c0_17], %21 {strides = array<i32>} : memref<2x704xf32, #tpu.memory_space<vmem>>, vector<2x704xf32>,
    return
  }
  func.func @transform_0(%arg0: i32) -> (i32, i32) {
    %c0_i32 = arith.constant 0 : i32
    %c0_i32_0 = arith.constant 0 : i32
    %c0_i32_1 = arith.constant 0 : i32
    return %c0_i32, %c0_i32_0 : i32, i32
  }
  func.func @transform_1(%arg0: i32) -> (i32, i32) {
    %c0_i32 = arith.constant 0 : i32
    %c0_i32_0 = arith.constant 0 : i32
    %c0_i32_1 = arith.constant 0 : i32
    return %c0_i32, %c0_i32_0 : i32, i32
  }
  func.func @transform_2(%arg0: i32) -> (i32, i32) {
    %c0_i32 = arith.constant 0 : i32
    %c0_i32_0 = arith.constant 0 : i32
    %c0_i32_1 = arith.constant 0 : i32
    return %c0_i32, %c0_i32_0 : i32, i32
  }
  func.func @transform_3(%arg0: i32) -> (i32, i32) {
    %c0_i32 = arith.constant 0 : i32
    %c0_i32_0 = arith.constant 0 : i32
    %c0_i32_1 = arith.constant 0 : i32
    return %c0_i32, %c0_i32_0 : i32, i32
  }
  func.func @transform_4(%arg0: i32) -> (i32, i32) {
    %c0_i32 = arith.constant 0 : i32
    %c0_i32_0 = arith.constant 0 : i32
    %c0_i32_1 = arith.constant 0 : i32
    return %c0_i32, %c0_i32_0 : i32, i32
  }
  func.func @transform_5(%arg0: i32) -> (i32, i32) {
    %c0_i32 = arith.constant 0 : i32
    %c0_i32_0 = arith.constant 0 : i32
    %c0_i32_1 = arith.constant 0 : i32
    return %c0_i32, %c0_i32_0 : i32, i32
  }
  func.func @transform_6(%arg0: i32) -> (i32, i32) {
    %c0_i32 = arith.constant 0 : i32
    %c0_i32_0 = arith.constant 0 : i32
    %c0_i32_1 = arith.constant 0 : i32
    return %c0_i32, %c0_i32_0 : i32, i32
  }
}

module attributes {stable_mosaic.version = 11 : i64} {
  func.func @add_gn_swish_kernel(%arg0: i32, %arg1: memref<1x676x32xf32, #tpu.memory_space<vmem>>, %arg2: memref<1x1x32xf32, #tpu.memory_space<vmem>>, %arg3: memref<1x32xf32, #tpu.memory_space<vmem>>, %arg4: memref<1x32xf32, #tpu.memory_space<vmem>>, %arg5: memref<32x4xf32, #tpu.memory_space<vmem>>, %arg6: memref<1x676x32xf32, #tpu.memory_space<vmem>>) attributes {dimension_semantics = [#tpu.dimension_semantics<parallel>], iteration_bounds = array<i64: 2>, scalar_prefetch = 0 : i64, scratch_operands = 0 : i64, tpu.core_type = #tpu.core_type<tc>, window_params = [{transform_indices = @transform_0, window_bounds = array<i64: 1, 676, 32>}, {transform_indices = @transform_1, window_bounds = array<i64: 1, 1, 32>}, {pipeline_mode = #tpu.pipeline_mode<synchronous>, transform_indices = @transform_2, window_bounds = array<i64: 1, 32>}, {pipeline_mode = #tpu.pipeline_mode<synchronous>, transform_indices = @transform_3, window_bounds = array<i64: 1, 32>}, {pipeline_mode = #tpu.pipeline_mode<synchronous>, transform_indices = @transform_4, window_bounds = array<i64: 32, 4>}, {transform_indices = @transform_5, window_bounds = array<i64: 1, 676, 32>}]} {
    %c0 = arith.constant 0 : index
    %c0_0 = arith.constant 0 : index
    %c0_1 = arith.constant 0 : index
    %0 = vector.load %arg1[%c0, %c0_0, %c0_1] : memref<1x676x32xf32, #tpu.memory_space<vmem>>, vector<1x676x32xf32>
    %1 = vector.shape_cast %0 : vector<1x676x32xf32> to vector<676x32xf32>
    %c0_2 = arith.constant 0 : index
    %c0_3 = arith.constant 0 : index
    %c0_4 = arith.constant 0 : index
    %2 = vector.load %arg2[%c0_2, %c0_3, %c0_4] : memref<1x1x32xf32, #tpu.memory_space<vmem>>, vector<1x1x32xf32>
    %3 = vector.shape_cast %2 : vector<1x1x32xf32> to vector<1x32xf32>
    %4 = vector.broadcast %3 : vector<1x32xf32> to vector<676x32xf32>
    %5 = arith.addf %1, %4 : vector<676x32xf32>
    %cst = arith.constant dense<0.000000e+00> : vector<32xf32>
    %6 = vector.multi_reduction <add>, %5, %cst [0] : vector<676x32xf32> to vector<32xf32>
    %7 = vector.shape_cast %6 : vector<32xf32> to vector<1x32xf32>
    %8 = arith.mulf %5, %5 : vector<676x32xf32>
    %cst_5 = arith.constant dense<0.000000e+00> : vector<32xf32>
    %9 = vector.multi_reduction <add>, %8, %cst_5 [0] : vector<676x32xf32> to vector<32xf32>
    %10 = vector.shape_cast %9 : vector<32xf32> to vector<1x32xf32>
    %c0_6 = arith.constant 0 : index
    %c0_7 = arith.constant 0 : index
    %11 = vector.load %arg5[%c0_6, %c0_7] : memref<32x4xf32, #tpu.memory_space<vmem>>, vector<32x4xf32>
    %cst_8 = arith.constant dense<0.000000e+00> : vector<1x4xf32>
    %12 = tpu.matmul %7, %11, %cst_8 {dimension_numbers = #tpu.dot_dimension_numbers<[1], [0], [0], [1], [0, 0, 1, 1], [], []>} : vector<1x32xf32>, vector<32x4xf32>, vector<1x4xf32> -> vector<1x4xf32>
    %cst_9 = arith.constant 1.84911245E-4 : f32
    %13 = vector.broadcast %cst_9 : f32 to vector<1x4xf32>
    %14 = arith.mulf %12, %13 : vector<1x4xf32>
    %cst_10 = arith.constant dense<0.000000e+00> : vector<1x4xf32>
    %15 = tpu.matmul %10, %11, %cst_10 {dimension_numbers = #tpu.dot_dimension_numbers<[1], [0], [0], [1], [0, 0, 1, 1], [], []>} : vector<1x32xf32>, vector<32x4xf32>, vector<1x4xf32> -> vector<1x4xf32>
    %cst_11 = arith.constant 1.84911245E-4 : f32
    %16 = vector.broadcast %cst_11 : f32 to vector<1x4xf32>
    %17 = arith.mulf %15, %16 : vector<1x4xf32>
    %18 = arith.mulf %14, %14 : vector<1x4xf32>
    %19 = arith.subf %17, %18 : vector<1x4xf32>
    %cst_12 = arith.constant 0.000000e+00 : f32
    %20 = vector.broadcast %cst_12 : f32 to vector<1x4xf32>
    %21 = arith.maximumf %19, %20 : vector<1x4xf32>
    %cst_13 = arith.constant 9.99999974E-6 : f32
    %22 = vector.broadcast %cst_13 : f32 to vector<1x4xf32>
    %23 = arith.addf %21, %22 : vector<1x4xf32>
    %24 = math.rsqrt %23 : vector<1x4xf32>
    %cst_14 = arith.constant dense<0.000000e+00> : vector<1x32xf32>
    %25 = tpu.matmul %14, %11, %cst_14 {dimension_numbers = #tpu.dot_dimension_numbers<[1], [1], [0], [0], [0, 0, 1, 0], [], []>} : vector<1x4xf32>, vector<32x4xf32>, vector<1x32xf32> -> vector<1x32xf32>
    %cst_15 = arith.constant dense<0.000000e+00> : vector<1x32xf32>
    %26 = tpu.matmul %24, %11, %cst_15 {dimension_numbers = #tpu.dot_dimension_numbers<[1], [1], [0], [0], [0, 0, 1, 0], [], []>} : vector<1x4xf32>, vector<32x4xf32>, vector<1x32xf32> -> vector<1x32xf32>
    %c0_16 = arith.constant 0 : index
    %c0_17 = arith.constant 0 : index
    %27 = vector.load %arg3[%c0_16, %c0_17] : memref<1x32xf32, #tpu.memory_space<vmem>>, vector<1x32xf32>
    %28 = arith.mulf %26, %27 : vector<1x32xf32>
    %c0_18 = arith.constant 0 : index
    %c0_19 = arith.constant 0 : index
    %29 = vector.load %arg4[%c0_18, %c0_19] : memref<1x32xf32, #tpu.memory_space<vmem>>, vector<1x32xf32>
    %30 = arith.mulf %25, %28 : vector<1x32xf32>
    %31 = arith.subf %29, %30 : vector<1x32xf32>
    %32 = vector.broadcast %28 : vector<1x32xf32> to vector<676x32xf32>
    %33 = arith.mulf %5, %32 : vector<676x32xf32>
    %34 = vector.broadcast %31 : vector<1x32xf32> to vector<676x32xf32>
    %35 = arith.addf %33, %34 : vector<676x32xf32>
    %cst_20 = arith.constant 0.000000e+00 : f32
    %36 = vector.broadcast %cst_20 : f32 to vector<676x32xf32>
    %37 = arith.subf %36, %35 : vector<676x32xf32>
    %38 = math.exp %37 : vector<676x32xf32>
    %cst_21 = arith.constant 1.000000e+00 : f32
    %39 = vector.broadcast %cst_21 : f32 to vector<676x32xf32>
    %40 = arith.addf %39, %38 : vector<676x32xf32>
    %41 = tpu.reciprocal %40 {approx = true} : vector<676x32xf32> -> vector<676x32xf32>
    %42 = arith.mulf %35, %41 : vector<676x32xf32>
    %c0_22 = arith.constant 0 : index
    %c0_23 = arith.constant 0 : index
    %c0_24 = arith.constant 0 : index
    %43 = vector.load %arg6[%c0_22, %c0_23, %c0_24] : memref<1x676x32xf32, #tpu.memory_space<vmem>>, vector<1x676x32xf32>
    %44 = vector.shape_cast %43 : vector<1x676x32xf32> to vector<676x32xf32>
    %45 = vector.shape_cast %42 : vector<676x32xf32> to vector<1x676x32xf32>
    tpu.vector_store %arg6[%c0_22, %c0_23, %c0_24], %45 {strides = array<i32>} : memref<1x676x32xf32, #tpu.memory_space<vmem>>, vector<1x676x32xf32>,
    return
  }
  func.func @transform_0(%arg0: i32) -> (i32, i32, i32) {
    %c0_i32 = arith.constant 0 : i32
    %c0_i32_0 = arith.constant 0 : i32
    %c0_i32_1 = arith.constant 0 : i32
    return %arg0, %c0_i32, %c0_i32_0 : i32, i32, i32
  }
  func.func @transform_1(%arg0: i32) -> (i32, i32, i32) {
    %c0_i32 = arith.constant 0 : i32
    %c0_i32_0 = arith.constant 0 : i32
    %c0_i32_1 = arith.constant 0 : i32
    return %arg0, %c0_i32, %c0_i32_0 : i32, i32, i32
  }
  func.func @transform_2(%arg0: i32) -> (i32, i32) {
    %c0_i32 = arith.constant 0 : i32
    %c0_i32_0 = arith.constant 0 : i32
    %c0_i32_1 = arith.constant 0 : i32
    return %c0_i32, %c0_i32_0 : i32, i32
  }
  func.func @transform_3(%arg0: i32) -> (i32, i32) {
    %c0_i32 = arith.constant 0 : i32
    %c0_i32_0 = arith.constant 0 : i32
    %c0_i32_1 = arith.constant 0 : i32
    return %c0_i32, %c0_i32_0 : i32, i32
  }
  func.func @transform_4(%arg0: i32) -> (i32, i32) {
    %c0_i32 = arith.constant 0 : i32
    %c0_i32_0 = arith.constant 0 : i32
    %c0_i32_1 = arith.constant 0 : i32
    return %c0_i32, %c0_i32_0 : i32, i32
  }
  func.func @transform_5(%arg0: i32) -> (i32, i32, i32) {
    %c0_i32 = arith.constant 0 : i32
    %c0_i32_0 = arith.constant 0 : i32
    %c0_i32_1 = arith.constant 0 : i32
    return %arg0, %c0_i32, %c0_i32_0 : i32, i32, i32
  }
}

module attributes {stable_mosaic.version = 11 : i64} {
  func.func @add_gn_swish_kernel(%arg0: i32, %arg1: memref<1x144x64xf32, #tpu.memory_space<vmem>>, %arg2: memref<1x1x64xf32, #tpu.memory_space<vmem>>, %arg3: memref<1x64xf32, #tpu.memory_space<vmem>>, %arg4: memref<1x64xf32, #tpu.memory_space<vmem>>, %arg5: memref<64x32xf32, #tpu.memory_space<vmem>>, %arg6: memref<1x144x64xf32, #tpu.memory_space<vmem>>) attributes {dimension_semantics = [#tpu.dimension_semantics<parallel>], iteration_bounds = array<i64: 2>, scalar_prefetch = 0 : i64, scratch_operands = 0 : i64, tpu.core_type = #tpu.core_type<tc>, window_params = [{transform_indices = @transform_0, window_bounds = array<i64: 1, 144, 64>}, {transform_indices = @transform_1, window_bounds = array<i64: 1, 1, 64>}, {pipeline_mode = #tpu.pipeline_mode<synchronous>, transform_indices = @transform_2, window_bounds = array<i64: 1, 64>}, {pipeline_mode = #tpu.pipeline_mode<synchronous>, transform_indices = @transform_3, window_bounds = array<i64: 1, 64>}, {pipeline_mode = #tpu.pipeline_mode<synchronous>, transform_indices = @transform_4, window_bounds = array<i64: 64, 32>}, {transform_indices = @transform_5, window_bounds = array<i64: 1, 144, 64>}]} {
    %c0 = arith.constant 0 : index
    %c0_0 = arith.constant 0 : index
    %c0_1 = arith.constant 0 : index
    %0 = vector.load %arg1[%c0, %c0_0, %c0_1] : memref<1x144x64xf32, #tpu.memory_space<vmem>>, vector<1x144x64xf32>
    %1 = vector.shape_cast %0 : vector<1x144x64xf32> to vector<144x64xf32>
    %c0_2 = arith.constant 0 : index
    %c0_3 = arith.constant 0 : index
    %c0_4 = arith.constant 0 : index
    %2 = vector.load %arg2[%c0_2, %c0_3, %c0_4] : memref<1x1x64xf32, #tpu.memory_space<vmem>>, vector<1x1x64xf32>
    %3 = vector.shape_cast %2 : vector<1x1x64xf32> to vector<1x64xf32>
    %4 = vector.broadcast %3 : vector<1x64xf32> to vector<144x64xf32>
    %5 = arith.addf %1, %4 : vector<144x64xf32>
    %cst = arith.constant dense<0.000000e+00> : vector<64xf32>
    %6 = vector.multi_reduction <add>, %5, %cst [0] : vector<144x64xf32> to vector<64xf32>
    %7 = vector.shape_cast %6 : vector<64xf32> to vector<1x64xf32>
    %8 = arith.mulf %5, %5 : vector<144x64xf32>
    %cst_5 = arith.constant dense<0.000000e+00> : vector<64xf32>
    %9 = vector.multi_reduction <add>, %8, %cst_5 [0] : vector<144x64xf32> to vector<64xf32>
    %10 = vector.shape_cast %9 : vector<64xf32> to vector<1x64xf32>
    %c0_6 = arith.constant 0 : index
    %c0_7 = arith.constant 0 : index
    %11 = vector.load %arg5[%c0_6, %c0_7] : memref<64x32xf32, #tpu.memory_space<vmem>>, vector<64x32xf32>
    %cst_8 = arith.constant dense<0.000000e+00> : vector<1x32xf32>
    %12 = tpu.matmul %7, %11, %cst_8 {dimension_numbers = #tpu.dot_dimension_numbers<[1], [0], [0], [1], [0, 0, 1, 1], [], []>} : vector<1x64xf32>, vector<64x32xf32>, vector<1x32xf32> -> vector<1x32xf32>
    %cst_9 = arith.constant 0.00347222225 : f32
    %13 = vector.broadcast %cst_9 : f32 to vector<1x32xf32>
    %14 = arith.mulf %12, %13 : vector<1x32xf32>
    %cst_10 = arith.constant dense<0.000000e+00> : vector<1x32xf32>
    %15 = tpu.matmul %10, %11, %cst_10 {dimension_numbers = #tpu.dot_dimension_numbers<[1], [0], [0], [1], [0, 0, 1, 1], [], []>} : vector<1x64xf32>, vector<64x32xf32>, vector<1x32xf32> -> vector<1x32xf32>
    %cst_11 = arith.constant 0.00347222225 : f32
    %16 = vector.broadcast %cst_11 : f32 to vector<1x32xf32>
    %17 = arith.mulf %15, %16 : vector<1x32xf32>
    %18 = arith.mulf %14, %14 : vector<1x32xf32>
    %19 = arith.subf %17, %18 : vector<1x32xf32>
    %cst_12 = arith.constant 0.000000e+00 : f32
    %20 = vector.broadcast %cst_12 : f32 to vector<1x32xf32>
    %21 = arith.maximumf %19, %20 : vector<1x32xf32>
    %cst_13 = arith.constant 9.99999974E-6 : f32
    %22 = vector.broadcast %cst_13 : f32 to vector<1x32xf32>
    %23 = arith.addf %21, %22 : vector<1x32xf32>
    %24 = math.rsqrt %23 : vector<1x32xf32>
    %cst_14 = arith.constant dense<0.000000e+00> : vector<1x64xf32>
    %25 = tpu.matmul %14, %11, %cst_14 {dimension_numbers = #tpu.dot_dimension_numbers<[1], [1], [0], [0], [0, 0, 1, 0], [], []>} : vector<1x32xf32>, vector<64x32xf32>, vector<1x64xf32> -> vector<1x64xf32>
    %cst_15 = arith.constant dense<0.000000e+00> : vector<1x64xf32>
    %26 = tpu.matmul %24, %11, %cst_15 {dimension_numbers = #tpu.dot_dimension_numbers<[1], [1], [0], [0], [0, 0, 1, 0], [], []>} : vector<1x32xf32>, vector<64x32xf32>, vector<1x64xf32> -> vector<1x64xf32>
    %c0_16 = arith.constant 0 : index
    %c0_17 = arith.constant 0 : index
    %27 = vector.load %arg3[%c0_16, %c0_17] : memref<1x64xf32, #tpu.memory_space<vmem>>, vector<1x64xf32>
    %28 = arith.mulf %26, %27 : vector<1x64xf32>
    %c0_18 = arith.constant 0 : index
    %c0_19 = arith.constant 0 : index
    %29 = vector.load %arg4[%c0_18, %c0_19] : memref<1x64xf32, #tpu.memory_space<vmem>>, vector<1x64xf32>
    %30 = arith.mulf %25, %28 : vector<1x64xf32>
    %31 = arith.subf %29, %30 : vector<1x64xf32>
    %32 = vector.broadcast %28 : vector<1x64xf32> to vector<144x64xf32>
    %33 = arith.mulf %5, %32 : vector<144x64xf32>
    %34 = vector.broadcast %31 : vector<1x64xf32> to vector<144x64xf32>
    %35 = arith.addf %33, %34 : vector<144x64xf32>
    %cst_20 = arith.constant 0.000000e+00 : f32
    %36 = vector.broadcast %cst_20 : f32 to vector<144x64xf32>
    %37 = arith.subf %36, %35 : vector<144x64xf32>
    %38 = math.exp %37 : vector<144x64xf32>
    %cst_21 = arith.constant 1.000000e+00 : f32
    %39 = vector.broadcast %cst_21 : f32 to vector<144x64xf32>
    %40 = arith.addf %39, %38 : vector<144x64xf32>
    %41 = tpu.reciprocal %40 {approx = true} : vector<144x64xf32> -> vector<144x64xf32>
    %42 = arith.mulf %35, %41 : vector<144x64xf32>
    %c0_22 = arith.constant 0 : index
    %c0_23 = arith.constant 0 : index
    %c0_24 = arith.constant 0 : index
    %43 = vector.load %arg6[%c0_22, %c0_23, %c0_24] : memref<1x144x64xf32, #tpu.memory_space<vmem>>, vector<1x144x64xf32>
    %44 = vector.shape_cast %43 : vector<1x144x64xf32> to vector<144x64xf32>
    %45 = vector.shape_cast %42 : vector<144x64xf32> to vector<1x144x64xf32>
    tpu.vector_store %arg6[%c0_22, %c0_23, %c0_24], %45 {strides = array<i32>} : memref<1x144x64xf32, #tpu.memory_space<vmem>>, vector<1x144x64xf32>,
    return
  }
  func.func @transform_0(%arg0: i32) -> (i32, i32, i32) {
    %c0_i32 = arith.constant 0 : i32
    %c0_i32_0 = arith.constant 0 : i32
    %c0_i32_1 = arith.constant 0 : i32
    return %arg0, %c0_i32, %c0_i32_0 : i32, i32, i32
  }
  func.func @transform_1(%arg0: i32) -> (i32, i32, i32) {
    %c0_i32 = arith.constant 0 : i32
    %c0_i32_0 = arith.constant 0 : i32
    %c0_i32_1 = arith.constant 0 : i32
    return %arg0, %c0_i32, %c0_i32_0 : i32, i32, i32
  }
  func.func @transform_2(%arg0: i32) -> (i32, i32) {
    %c0_i32 = arith.constant 0 : i32
    %c0_i32_0 = arith.constant 0 : i32
    %c0_i32_1 = arith.constant 0 : i32
    return %c0_i32, %c0_i32_0 : i32, i32
  }
  func.func @transform_3(%arg0: i32) -> (i32, i32) {
    %c0_i32 = arith.constant 0 : i32
    %c0_i32_0 = arith.constant 0 : i32
    %c0_i32_1 = arith.constant 0 : i32
    return %c0_i32, %c0_i32_0 : i32, i32
  }
  func.func @transform_4(%arg0: i32) -> (i32, i32) {
    %c0_i32 = arith.constant 0 : i32
    %c0_i32_0 = arith.constant 0 : i32
    %c0_i32_1 = arith.constant 0 : i32
    return %c0_i32, %c0_i32_0 : i32, i32
  }
  func.func @transform_5(%arg0: i32) -> (i32, i32, i32) {
    %c0_i32 = arith.constant 0 : i32
    %c0_i32_0 = arith.constant 0 : i32
    %c0_i32_1 = arith.constant 0 : i32
    return %arg0, %c0_i32, %c0_i32_0 : i32, i32, i32
  }
}

module attributes {stable_mosaic.version = 11 : i64} {
  func.func @add_gn_swish_kernel(%arg0: i32, %arg1: memref<1x25x128xf32, #tpu.memory_space<vmem>>, %arg2: memref<1x1x128xf32, #tpu.memory_space<vmem>>, %arg3: memref<1x128xf32, #tpu.memory_space<vmem>>, %arg4: memref<1x128xf32, #tpu.memory_space<vmem>>, %arg5: memref<128x32xf32, #tpu.memory_space<vmem>>, %arg6: memref<1x25x128xf32, #tpu.memory_space<vmem>>) attributes {dimension_semantics = [#tpu.dimension_semantics<parallel>], iteration_bounds = array<i64: 2>, scalar_prefetch = 0 : i64, scratch_operands = 0 : i64, tpu.core_type = #tpu.core_type<tc>, window_params = [{transform_indices = @transform_0, window_bounds = array<i64: 1, 25, 128>}, {transform_indices = @transform_1, window_bounds = array<i64: 1, 1, 128>}, {pipeline_mode = #tpu.pipeline_mode<synchronous>, transform_indices = @transform_2, window_bounds = array<i64: 1, 128>}, {pipeline_mode = #tpu.pipeline_mode<synchronous>, transform_indices = @transform_3, window_bounds = array<i64: 1, 128>}, {pipeline_mode = #tpu.pipeline_mode<synchronous>, transform_indices = @transform_4, window_bounds = array<i64: 128, 32>}, {transform_indices = @transform_5, window_bounds = array<i64: 1, 25, 128>}]} {
    %c0 = arith.constant 0 : index
    %c0_0 = arith.constant 0 : index
    %c0_1 = arith.constant 0 : index
    %0 = vector.load %arg1[%c0, %c0_0, %c0_1] : memref<1x25x128xf32, #tpu.memory_space<vmem>>, vector<1x25x128xf32>
    %1 = vector.shape_cast %0 : vector<1x25x128xf32> to vector<25x128xf32>
    %c0_2 = arith.constant 0 : index
    %c0_3 = arith.constant 0 : index
    %c0_4 = arith.constant 0 : index
    %2 = vector.load %arg2[%c0_2, %c0_3, %c0_4] : memref<1x1x128xf32, #tpu.memory_space<vmem>>, vector<1x1x128xf32>
    %3 = vector.shape_cast %2 : vector<1x1x128xf32> to vector<1x128xf32>
    %4 = vector.broadcast %3 : vector<1x128xf32> to vector<25x128xf32>
    %5 = arith.addf %1, %4 : vector<25x128xf32>
    %cst = arith.constant dense<0.000000e+00> : vector<128xf32>
    %6 = vector.multi_reduction <add>, %5, %cst [0] : vector<25x128xf32> to vector<128xf32>
    %7 = vector.shape_cast %6 : vector<128xf32> to vector<1x128xf32>
    %8 = arith.mulf %5, %5 : vector<25x128xf32>
    %cst_5 = arith.constant dense<0.000000e+00> : vector<128xf32>
    %9 = vector.multi_reduction <add>, %8, %cst_5 [0] : vector<25x128xf32> to vector<128xf32>
    %10 = vector.shape_cast %9 : vector<128xf32> to vector<1x128xf32>
    %c0_6 = arith.constant 0 : index
    %c0_7 = arith.constant 0 : index
    %11 = vector.load %arg5[%c0_6, %c0_7] : memref<128x32xf32, #tpu.memory_space<vmem>>, vector<128x32xf32>
    %cst_8 = arith.constant dense<0.000000e+00> : vector<1x32xf32>
    %12 = tpu.matmul %7, %11, %cst_8 {dimension_numbers = #tpu.dot_dimension_numbers<[1], [0], [0], [1], [0, 0, 1, 1], [], []>} : vector<1x128xf32>, vector<128x32xf32>, vector<1x32xf32> -> vector<1x32xf32>
    %cst_9 = arith.constant 0.00999999977 : f32
    %13 = vector.broadcast %cst_9 : f32 to vector<1x32xf32>
    %14 = arith.mulf %12, %13 : vector<1x32xf32>
    %cst_10 = arith.constant dense<0.000000e+00> : vector<1x32xf32>
    %15 = tpu.matmul %10, %11, %cst_10 {dimension_numbers = #tpu.dot_dimension_numbers<[1], [0], [0], [1], [0, 0, 1, 1], [], []>} : vector<1x128xf32>, vector<128x32xf32>, vector<1x32xf32> -> vector<1x32xf32>
    %cst_11 = arith.constant 0.00999999977 : f32
    %16 = vector.broadcast %cst_11 : f32 to vector<1x32xf32>
    %17 = arith.mulf %15, %16 : vector<1x32xf32>
    %18 = arith.mulf %14, %14 : vector<1x32xf32>
    %19 = arith.subf %17, %18 : vector<1x32xf32>
    %cst_12 = arith.constant 0.000000e+00 : f32
    %20 = vector.broadcast %cst_12 : f32 to vector<1x32xf32>
    %21 = arith.maximumf %19, %20 : vector<1x32xf32>
    %cst_13 = arith.constant 9.99999974E-6 : f32
    %22 = vector.broadcast %cst_13 : f32 to vector<1x32xf32>
    %23 = arith.addf %21, %22 : vector<1x32xf32>
    %24 = math.rsqrt %23 : vector<1x32xf32>
    %cst_14 = arith.constant dense<0.000000e+00> : vector<1x128xf32>
    %25 = tpu.matmul %14, %11, %cst_14 {dimension_numbers = #tpu.dot_dimension_numbers<[1], [1], [0], [0], [0, 0, 1, 0], [], []>} : vector<1x32xf32>, vector<128x32xf32>, vector<1x128xf32> -> vector<1x128xf32>
    %cst_15 = arith.constant dense<0.000000e+00> : vector<1x128xf32>
    %26 = tpu.matmul %24, %11, %cst_15 {dimension_numbers = #tpu.dot_dimension_numbers<[1], [1], [0], [0], [0, 0, 1, 0], [], []>} : vector<1x32xf32>, vector<128x32xf32>, vector<1x128xf32> -> vector<1x128xf32>
    %c0_16 = arith.constant 0 : index
    %c0_17 = arith.constant 0 : index
    %27 = vector.load %arg3[%c0_16, %c0_17] : memref<1x128xf32, #tpu.memory_space<vmem>>, vector<1x128xf32>
    %28 = arith.mulf %26, %27 : vector<1x128xf32>
    %c0_18 = arith.constant 0 : index
    %c0_19 = arith.constant 0 : index
    %29 = vector.load %arg4[%c0_18, %c0_19] : memref<1x128xf32, #tpu.memory_space<vmem>>, vector<1x128xf32>
    %30 = arith.mulf %25, %28 : vector<1x128xf32>
    %31 = arith.subf %29, %30 : vector<1x128xf32>
    %32 = vector.broadcast %28 : vector<1x128xf32> to vector<25x128xf32>
    %33 = arith.mulf %5, %32 : vector<25x128xf32>
    %34 = vector.broadcast %31 : vector<1x128xf32> to vector<25x128xf32>
    %35 = arith.addf %33, %34 : vector<25x128xf32>
    %cst_20 = arith.constant 0.000000e+00 : f32
    %36 = vector.broadcast %cst_20 : f32 to vector<25x128xf32>
    %37 = arith.subf %36, %35 : vector<25x128xf32>
    %38 = math.exp %37 : vector<25x128xf32>
    %cst_21 = arith.constant 1.000000e+00 : f32
    %39 = vector.broadcast %cst_21 : f32 to vector<25x128xf32>
    %40 = arith.addf %39, %38 : vector<25x128xf32>
    %41 = tpu.reciprocal %40 {approx = true} : vector<25x128xf32> -> vector<25x128xf32>
    %42 = arith.mulf %35, %41 : vector<25x128xf32>
    %c0_22 = arith.constant 0 : index
    %c0_23 = arith.constant 0 : index
    %c0_24 = arith.constant 0 : index
    %43 = vector.load %arg6[%c0_22, %c0_23, %c0_24] : memref<1x25x128xf32, #tpu.memory_space<vmem>>, vector<1x25x128xf32>
    %44 = vector.shape_cast %43 : vector<1x25x128xf32> to vector<25x128xf32>
    %45 = vector.shape_cast %42 : vector<25x128xf32> to vector<1x25x128xf32>
    tpu.vector_store %arg6[%c0_22, %c0_23, %c0_24], %45 {strides = array<i32>} : memref<1x25x128xf32, #tpu.memory_space<vmem>>, vector<1x25x128xf32>,
    return
  }
  func.func @transform_0(%arg0: i32) -> (i32, i32, i32) {
    %c0_i32 = arith.constant 0 : i32
    %c0_i32_0 = arith.constant 0 : i32
    %c0_i32_1 = arith.constant 0 : i32
    return %arg0, %c0_i32, %c0_i32_0 : i32, i32, i32
  }
  func.func @transform_1(%arg0: i32) -> (i32, i32, i32) {
    %c0_i32 = arith.constant 0 : i32
    %c0_i32_0 = arith.constant 0 : i32
    %c0_i32_1 = arith.constant 0 : i32
    return %arg0, %c0_i32, %c0_i32_0 : i32, i32, i32
  }
  func.func @transform_2(%arg0: i32) -> (i32, i32) {
    %c0_i32 = arith.constant 0 : i32
    %c0_i32_0 = arith.constant 0 : i32
    %c0_i32_1 = arith.constant 0 : i32
    return %c0_i32, %c0_i32_0 : i32, i32
  }
  func.func @transform_3(%arg0: i32) -> (i32, i32) {
    %c0_i32 = arith.constant 0 : i32
    %c0_i32_0 = arith.constant 0 : i32
    %c0_i32_1 = arith.constant 0 : i32
    return %c0_i32, %c0_i32_0 : i32, i32
  }
  func.func @transform_4(%arg0: i32) -> (i32, i32) {
    %c0_i32 = arith.constant 0 : i32
    %c0_i32_0 = arith.constant 0 : i32
    %c0_i32_1 = arith.constant 0 : i32
    return %c0_i32, %c0_i32_0 : i32, i32
  }
  func.func @transform_5(%arg0: i32) -> (i32, i32, i32) {
    %c0_i32 = arith.constant 0 : i32
    %c0_i32_0 = arith.constant 0 : i32
    %c0_i32_1 = arith.constant 0 : i32
    return %arg0, %c0_i32, %c0_i32_0 : i32, i32, i32
  }
}

module attributes {stable_mosaic.version = 11 : i64} {
  func.func @add_gn_swish_kernel(%arg0: i32, %arg1: memref<1x4x256xf32, #tpu.memory_space<vmem>>, %arg2: memref<1x1x256xf32, #tpu.memory_space<vmem>>, %arg3: memref<1x256xf32, #tpu.memory_space<vmem>>, %arg4: memref<1x256xf32, #tpu.memory_space<vmem>>, %arg5: memref<256x32xf32, #tpu.memory_space<vmem>>, %arg6: memref<1x4x256xf32, #tpu.memory_space<vmem>>) attributes {dimension_semantics = [#tpu.dimension_semantics<parallel>], iteration_bounds = array<i64: 2>, scalar_prefetch = 0 : i64, scratch_operands = 0 : i64, tpu.core_type = #tpu.core_type<tc>, window_params = [{transform_indices = @transform_0, window_bounds = array<i64: 1, 4, 256>}, {transform_indices = @transform_1, window_bounds = array<i64: 1, 1, 256>}, {pipeline_mode = #tpu.pipeline_mode<synchronous>, transform_indices = @transform_2, window_bounds = array<i64: 1, 256>}, {pipeline_mode = #tpu.pipeline_mode<synchronous>, transform_indices = @transform_3, window_bounds = array<i64: 1, 256>}, {pipeline_mode = #tpu.pipeline_mode<synchronous>, transform_indices = @transform_4, window_bounds = array<i64: 256, 32>}, {transform_indices = @transform_5, window_bounds = array<i64: 1, 4, 256>}]} {
    %c0 = arith.constant 0 : index
    %c0_0 = arith.constant 0 : index
    %c0_1 = arith.constant 0 : index
    %0 = vector.load %arg1[%c0, %c0_0, %c0_1] : memref<1x4x256xf32, #tpu.memory_space<vmem>>, vector<1x4x256xf32>
    %1 = vector.shape_cast %0 : vector<1x4x256xf32> to vector<4x256xf32>
    %c0_2 = arith.constant 0 : index
    %c0_3 = arith.constant 0 : index
    %c0_4 = arith.constant 0 : index
    %2 = vector.load %arg2[%c0_2, %c0_3, %c0_4] : memref<1x1x256xf32, #tpu.memory_space<vmem>>, vector<1x1x256xf32>
    %3 = vector.shape_cast %2 : vector<1x1x256xf32> to vector<1x256xf32>
    %4 = vector.broadcast %3 : vector<1x256xf32> to vector<4x256xf32>
    %5 = arith.addf %1, %4 : vector<4x256xf32>
    %cst = arith.constant dense<0.000000e+00> : vector<256xf32>
    %6 = vector.multi_reduction <add>, %5, %cst [0] : vector<4x256xf32> to vector<256xf32>
    %7 = vector.shape_cast %6 : vector<256xf32> to vector<1x256xf32>
    %8 = arith.mulf %5, %5 : vector<4x256xf32>
    %cst_5 = arith.constant dense<0.000000e+00> : vector<256xf32>
    %9 = vector.multi_reduction <add>, %8, %cst_5 [0] : vector<4x256xf32> to vector<256xf32>
    %10 = vector.shape_cast %9 : vector<256xf32> to vector<1x256xf32>
    %c0_6 = arith.constant 0 : index
    %c0_7 = arith.constant 0 : index
    %11 = vector.load %arg5[%c0_6, %c0_7] : memref<256x32xf32, #tpu.memory_space<vmem>>, vector<256x32xf32>
    %cst_8 = arith.constant dense<0.000000e+00> : vector<1x32xf32>
    %12 = tpu.matmul %7, %11, %cst_8 {dimension_numbers = #tpu.dot_dimension_numbers<[1], [0], [0], [1], [0, 0, 1, 1], [], []>} : vector<1x256xf32>, vector<256x32xf32>, vector<1x32xf32> -> vector<1x32xf32>
    %cst_9 = arith.constant 3.125000e-02 : f32
    %13 = vector.broadcast %cst_9 : f32 to vector<1x32xf32>
    %14 = arith.mulf %12, %13 : vector<1x32xf32>
    %cst_10 = arith.constant dense<0.000000e+00> : vector<1x32xf32>
    %15 = tpu.matmul %10, %11, %cst_10 {dimension_numbers = #tpu.dot_dimension_numbers<[1], [0], [0], [1], [0, 0, 1, 1], [], []>} : vector<1x256xf32>, vector<256x32xf32>, vector<1x32xf32> -> vector<1x32xf32>
    %cst_11 = arith.constant 3.125000e-02 : f32
    %16 = vector.broadcast %cst_11 : f32 to vector<1x32xf32>
    %17 = arith.mulf %15, %16 : vector<1x32xf32>
    %18 = arith.mulf %14, %14 : vector<1x32xf32>
    %19 = arith.subf %17, %18 : vector<1x32xf32>
    %cst_12 = arith.constant 0.000000e+00 : f32
    %20 = vector.broadcast %cst_12 : f32 to vector<1x32xf32>
    %21 = arith.maximumf %19, %20 : vector<1x32xf32>
    %cst_13 = arith.constant 9.99999974E-6 : f32
    %22 = vector.broadcast %cst_13 : f32 to vector<1x32xf32>
    %23 = arith.addf %21, %22 : vector<1x32xf32>
    %24 = math.rsqrt %23 : vector<1x32xf32>
    %cst_14 = arith.constant dense<0.000000e+00> : vector<1x256xf32>
    %25 = tpu.matmul %14, %11, %cst_14 {dimension_numbers = #tpu.dot_dimension_numbers<[1], [1], [0], [0], [0, 0, 1, 0], [], []>} : vector<1x32xf32>, vector<256x32xf32>, vector<1x256xf32> -> vector<1x256xf32>
    %cst_15 = arith.constant dense<0.000000e+00> : vector<1x256xf32>
    %26 = tpu.matmul %24, %11, %cst_15 {dimension_numbers = #tpu.dot_dimension_numbers<[1], [1], [0], [0], [0, 0, 1, 0], [], []>} : vector<1x32xf32>, vector<256x32xf32>, vector<1x256xf32> -> vector<1x256xf32>
    %c0_16 = arith.constant 0 : index
    %c0_17 = arith.constant 0 : index
    %27 = vector.load %arg3[%c0_16, %c0_17] : memref<1x256xf32, #tpu.memory_space<vmem>>, vector<1x256xf32>
    %28 = arith.mulf %26, %27 : vector<1x256xf32>
    %c0_18 = arith.constant 0 : index
    %c0_19 = arith.constant 0 : index
    %29 = vector.load %arg4[%c0_18, %c0_19] : memref<1x256xf32, #tpu.memory_space<vmem>>, vector<1x256xf32>
    %30 = arith.mulf %25, %28 : vector<1x256xf32>
    %31 = arith.subf %29, %30 : vector<1x256xf32>
    %32 = vector.broadcast %28 : vector<1x256xf32> to vector<4x256xf32>
    %33 = arith.mulf %5, %32 : vector<4x256xf32>
    %34 = vector.broadcast %31 : vector<1x256xf32> to vector<4x256xf32>
    %35 = arith.addf %33, %34 : vector<4x256xf32>
    %cst_20 = arith.constant 0.000000e+00 : f32
    %36 = vector.broadcast %cst_20 : f32 to vector<4x256xf32>
    %37 = arith.subf %36, %35 : vector<4x256xf32>
    %38 = math.exp %37 : vector<4x256xf32>
    %cst_21 = arith.constant 1.000000e+00 : f32
    %39 = vector.broadcast %cst_21 : f32 to vector<4x256xf32>
    %40 = arith.addf %39, %38 : vector<4x256xf32>
    %41 = tpu.reciprocal %40 {approx = true} : vector<4x256xf32> -> vector<4x256xf32>
    %42 = arith.mulf %35, %41 : vector<4x256xf32>
    %c0_22 = arith.constant 0 : index
    %c0_23 = arith.constant 0 : index
    %c0_24 = arith.constant 0 : index
    %43 = vector.load %arg6[%c0_22, %c0_23, %c0_24] : memref<1x4x256xf32, #tpu.memory_space<vmem>>, vector<1x4x256xf32>
    %44 = vector.shape_cast %43 : vector<1x4x256xf32> to vector<4x256xf32>
    %45 = vector.shape_cast %42 : vector<4x256xf32> to vector<1x4x256xf32>
    tpu.vector_store %arg6[%c0_22, %c0_23, %c0_24], %45 {strides = array<i32>} : memref<1x4x256xf32, #tpu.memory_space<vmem>>, vector<1x4x256xf32>,
    return
  }
  func.func @transform_0(%arg0: i32) -> (i32, i32, i32) {
    %c0_i32 = arith.constant 0 : i32
    %c0_i32_0 = arith.constant 0 : i32
    %c0_i32_1 = arith.constant 0 : i32
    return %arg0, %c0_i32, %c0_i32_0 : i32, i32, i32
  }
  func.func @transform_1(%arg0: i32) -> (i32, i32, i32) {
    %c0_i32 = arith.constant 0 : i32
    %c0_i32_0 = arith.constant 0 : i32
    %c0_i32_1 = arith.constant 0 : i32
    return %arg0, %c0_i32, %c0_i32_0 : i32, i32, i32
  }
  func.func @transform_2(%arg0: i32) -> (i32, i32) {
    %c0_i32 = arith.constant 0 : i32
    %c0_i32_0 = arith.constant 0 : i32
    %c0_i32_1 = arith.constant 0 : i32
    return %c0_i32, %c0_i32_0 : i32, i32
  }
  func.func @transform_3(%arg0: i32) -> (i32, i32) {
    %c0_i32 = arith.constant 0 : i32
    %c0_i32_0 = arith.constant 0 : i32
    %c0_i32_1 = arith.constant 0 : i32
    return %c0_i32, %c0_i32_0 : i32, i32
  }
  func.func @transform_4(%arg0: i32) -> (i32, i32) {
    %c0_i32 = arith.constant 0 : i32
    %c0_i32_0 = arith.constant 0 : i32
    %c0_i32_1 = arith.constant 0 : i32
    return %c0_i32, %c0_i32_0 : i32, i32
  }
  func.func @transform_5(%arg0: i32) -> (i32, i32, i32) {
    %c0_i32 = arith.constant 0 : i32
    %c0_i32_0 = arith.constant 0 : i32
    %c0_i32_1 = arith.constant 0 : i32
    return %arg0, %c0_i32, %c0_i32_0 : i32, i32, i32
  }
}

module attributes {stable_mosaic.version = 11 : i64} {
  func.func @add_gn_swish_kernel(%arg0: i32, %arg1: memref<1x676x32xf32, #tpu.memory_space<vmem>>, %arg2: memref<1x1x32xf32, #tpu.memory_space<vmem>>, %arg3: memref<1x32xf32, #tpu.memory_space<vmem>>, %arg4: memref<1x32xf32, #tpu.memory_space<vmem>>, %arg5: memref<32x32xf32, #tpu.memory_space<vmem>>, %arg6: memref<1x676x32xf32, #tpu.memory_space<vmem>>) attributes {dimension_semantics = [#tpu.dimension_semantics<parallel>], iteration_bounds = array<i64: 2>, scalar_prefetch = 0 : i64, scratch_operands = 0 : i64, tpu.core_type = #tpu.core_type<tc>, window_params = [{transform_indices = @transform_0, window_bounds = array<i64: 1, 676, 32>}, {transform_indices = @transform_1, window_bounds = array<i64: 1, 1, 32>}, {pipeline_mode = #tpu.pipeline_mode<synchronous>, transform_indices = @transform_2, window_bounds = array<i64: 1, 32>}, {pipeline_mode = #tpu.pipeline_mode<synchronous>, transform_indices = @transform_3, window_bounds = array<i64: 1, 32>}, {pipeline_mode = #tpu.pipeline_mode<synchronous>, transform_indices = @transform_4, window_bounds = array<i64: 32, 32>}, {transform_indices = @transform_5, window_bounds = array<i64: 1, 676, 32>}]} {
    %c0 = arith.constant 0 : index
    %c0_0 = arith.constant 0 : index
    %c0_1 = arith.constant 0 : index
    %0 = vector.load %arg1[%c0, %c0_0, %c0_1] : memref<1x676x32xf32, #tpu.memory_space<vmem>>, vector<1x676x32xf32>
    %1 = vector.shape_cast %0 : vector<1x676x32xf32> to vector<676x32xf32>
    %c0_2 = arith.constant 0 : index
    %c0_3 = arith.constant 0 : index
    %c0_4 = arith.constant 0 : index
    %2 = vector.load %arg2[%c0_2, %c0_3, %c0_4] : memref<1x1x32xf32, #tpu.memory_space<vmem>>, vector<1x1x32xf32>
    %3 = vector.shape_cast %2 : vector<1x1x32xf32> to vector<1x32xf32>
    %4 = vector.broadcast %3 : vector<1x32xf32> to vector<676x32xf32>
    %5 = arith.addf %1, %4 : vector<676x32xf32>
    %cst = arith.constant dense<0.000000e+00> : vector<32xf32>
    %6 = vector.multi_reduction <add>, %5, %cst [0] : vector<676x32xf32> to vector<32xf32>
    %7 = vector.shape_cast %6 : vector<32xf32> to vector<1x32xf32>
    %8 = arith.mulf %5, %5 : vector<676x32xf32>
    %cst_5 = arith.constant dense<0.000000e+00> : vector<32xf32>
    %9 = vector.multi_reduction <add>, %8, %cst_5 [0] : vector<676x32xf32> to vector<32xf32>
    %10 = vector.shape_cast %9 : vector<32xf32> to vector<1x32xf32>
    %c0_6 = arith.constant 0 : index
    %c0_7 = arith.constant 0 : index
    %11 = vector.load %arg5[%c0_6, %c0_7] : memref<32x32xf32, #tpu.memory_space<vmem>>, vector<32x32xf32>
    %cst_8 = arith.constant dense<0.000000e+00> : vector<1x32xf32>
    %12 = tpu.matmul %7, %11, %cst_8 {dimension_numbers = #tpu.dot_dimension_numbers<[1], [0], [0], [1], [0, 0, 1, 1], [], []>} : vector<1x32xf32>, vector<32x32xf32>, vector<1x32xf32> -> vector<1x32xf32>
    %cst_9 = arith.constant 1.479290e-03 : f32
    %13 = vector.broadcast %cst_9 : f32 to vector<1x32xf32>
    %14 = arith.mulf %12, %13 : vector<1x32xf32>
    %cst_10 = arith.constant dense<0.000000e+00> : vector<1x32xf32>
    %15 = tpu.matmul %10, %11, %cst_10 {dimension_numbers = #tpu.dot_dimension_numbers<[1], [0], [0], [1], [0, 0, 1, 1], [], []>} : vector<1x32xf32>, vector<32x32xf32>, vector<1x32xf32> -> vector<1x32xf32>
    %cst_11 = arith.constant 1.479290e-03 : f32
    %16 = vector.broadcast %cst_11 : f32 to vector<1x32xf32>
    %17 = arith.mulf %15, %16 : vector<1x32xf32>
    %18 = arith.mulf %14, %14 : vector<1x32xf32>
    %19 = arith.subf %17, %18 : vector<1x32xf32>
    %cst_12 = arith.constant 0.000000e+00 : f32
    %20 = vector.broadcast %cst_12 : f32 to vector<1x32xf32>
    %21 = arith.maximumf %19, %20 : vector<1x32xf32>
    %cst_13 = arith.constant 9.99999974E-6 : f32
    %22 = vector.broadcast %cst_13 : f32 to vector<1x32xf32>
    %23 = arith.addf %21, %22 : vector<1x32xf32>
    %24 = math.rsqrt %23 : vector<1x32xf32>
    %cst_14 = arith.constant dense<0.000000e+00> : vector<1x32xf32>
    %25 = tpu.matmul %14, %11, %cst_14 {dimension_numbers = #tpu.dot_dimension_numbers<[1], [1], [0], [0], [0, 0, 1, 0], [], []>} : vector<1x32xf32>, vector<32x32xf32>, vector<1x32xf32> -> vector<1x32xf32>
    %cst_15 = arith.constant dense<0.000000e+00> : vector<1x32xf32>
    %26 = tpu.matmul %24, %11, %cst_15 {dimension_numbers = #tpu.dot_dimension_numbers<[1], [1], [0], [0], [0, 0, 1, 0], [], []>} : vector<1x32xf32>, vector<32x32xf32>, vector<1x32xf32> -> vector<1x32xf32>
    %c0_16 = arith.constant 0 : index
    %c0_17 = arith.constant 0 : index
    %27 = vector.load %arg3[%c0_16, %c0_17] : memref<1x32xf32, #tpu.memory_space<vmem>>, vector<1x32xf32>
    %28 = arith.mulf %26, %27 : vector<1x32xf32>
    %c0_18 = arith.constant 0 : index
    %c0_19 = arith.constant 0 : index
    %29 = vector.load %arg4[%c0_18, %c0_19] : memref<1x32xf32, #tpu.memory_space<vmem>>, vector<1x32xf32>
    %30 = arith.mulf %25, %28 : vector<1x32xf32>
    %31 = arith.subf %29, %30 : vector<1x32xf32>
    %32 = vector.broadcast %28 : vector<1x32xf32> to vector<676x32xf32>
    %33 = arith.mulf %5, %32 : vector<676x32xf32>
    %34 = vector.broadcast %31 : vector<1x32xf32> to vector<676x32xf32>
    %35 = arith.addf %33, %34 : vector<676x32xf32>
    %cst_20 = arith.constant 0.000000e+00 : f32
    %36 = vector.broadcast %cst_20 : f32 to vector<676x32xf32>
    %37 = arith.subf %36, %35 : vector<676x32xf32>
    %38 = math.exp %37 : vector<676x32xf32>
    %cst_21 = arith.constant 1.000000e+00 : f32
    %39 = vector.broadcast %cst_21 : f32 to vector<676x32xf32>
    %40 = arith.addf %39, %38 : vector<676x32xf32>
    %41 = tpu.reciprocal %40 {approx = true} : vector<676x32xf32> -> vector<676x32xf32>
    %42 = arith.mulf %35, %41 : vector<676x32xf32>
    %c0_22 = arith.constant 0 : index
    %c0_23 = arith.constant 0 : index
    %c0_24 = arith.constant 0 : index
    %43 = vector.load %arg6[%c0_22, %c0_23, %c0_24] : memref<1x676x32xf32, #tpu.memory_space<vmem>>, vector<1x676x32xf32>
    %44 = vector.shape_cast %43 : vector<1x676x32xf32> to vector<676x32xf32>
    %45 = vector.shape_cast %42 : vector<676x32xf32> to vector<1x676x32xf32>
    tpu.vector_store %arg6[%c0_22, %c0_23, %c0_24], %45 {strides = array<i32>} : memref<1x676x32xf32, #tpu.memory_space<vmem>>, vector<1x676x32xf32>,
    return
  }
  func.func @transform_0(%arg0: i32) -> (i32, i32, i32) {
    %c0_i32 = arith.constant 0 : i32
    %c0_i32_0 = arith.constant 0 : i32
    %c0_i32_1 = arith.constant 0 : i32
    return %arg0, %c0_i32, %c0_i32_0 : i32, i32, i32
  }
  func.func @transform_1(%arg0: i32) -> (i32, i32, i32) {
    %c0_i32 = arith.constant 0 : i32
    %c0_i32_0 = arith.constant 0 : i32
    %c0_i32_1 = arith.constant 0 : i32
    return %arg0, %c0_i32, %c0_i32_0 : i32, i32, i32
  }
  func.func @transform_2(%arg0: i32) -> (i32, i32) {
    %c0_i32 = arith.constant 0 : i32
    %c0_i32_0 = arith.constant 0 : i32
    %c0_i32_1 = arith.constant 0 : i32
    return %c0_i32, %c0_i32_0 : i32, i32
  }
  func.func @transform_3(%arg0: i32) -> (i32, i32) {
    %c0_i32 = arith.constant 0 : i32
    %c0_i32_0 = arith.constant 0 : i32
    %c0_i32_1 = arith.constant 0 : i32
    return %c0_i32, %c0_i32_0 : i32, i32
  }
  func.func @transform_4(%arg0: i32) -> (i32, i32) {
    %c0_i32 = arith.constant 0 : i32
    %c0_i32_0 = arith.constant 0 : i32
    %c0_i32_1 = arith.constant 0 : i32
    return %c0_i32, %c0_i32_0 : i32, i32
  }
  func.func @transform_5(%arg0: i32) -> (i32, i32, i32) {
    %c0_i32 = arith.constant 0 : i32
    %c0_i32_0 = arith.constant 0 : i32
    %c0_i32_1 = arith.constant 0 : i32
    return %arg0, %c0_i32, %c0_i32_0 : i32, i32, i32
  }
}

</mosaic_0001>

<bundles_post_ra>
// kernel: scorenet_forward.8
= control target key start
LH: loop header
LB: loop body
LE: loop exit
PB: predicated region body
PF: predicated region fallthrough
CT: control target
= control target key end

     0   :  { %11 = vsyncpa [#allocation3], 0  ;;  %s1284_s0 = inlined_call_operand.vmem [shape: f32[2,128], index: 0, kind: input, shape index: {}]   ;;  %s1285_s1 = inlined_call_operand.vmem [shape: f32[2,128], index: 1, kind: input, shape index: {}]   ;;  %s1286_s2 = inlined_call_operand.hbm [shape: f32[256,256], index: 2, kind: input, shape index: {}]   ;;  %s1287_s3 = inlined_call_operand.hbm [shape: f32[1,256], index: 3, kind: input, shape index: {}]   ;;  %s1288_s4 = inlined_call_operand.hbm [shape: f32[704,256], index: 4, kind: input, shape index: {}]   ;;  %s1289_s5 = inlined_call_operand.vmem [shape: f32[1,704], index: 5, kind: input, shape index: {}]   ;;  %s1290_s6 = inlined_call_operand.vmem [shape: f32[2,704], index: 6, kind: output, shape index: {}]  }
   0x1   :  { %12 = vsyncpa [#allocation5], 0  ;;  %s1155_s21 = smov [#allocation4]   ;;  %s1156_s23 = smov [#allocation2]  }
   0x2   :  { %s35_s22 = sshll.u32 %s1155_s21, 4  ;;  %s22_s24 = sshll.u32 %s1156_s23, 4  ;;  %s36_s22 = int_to_ptr.vmem [resolvable:$true] %s35_s22  ;;  %s1196_s24 = int_to_ptr.vmem [resolvable:$true] %s22_s24 }
   0x3   :  { %s1085_s27 = scalar_lea.hbm %s1287_s3, 32 }
   0x4   :  { %p1086_p0 = scmp.ne.s32.totalorder %s1287_s3, %s1085_s27  ;;  %p1089_p1 = scmp.lt.u32.totalorder %s1085_s27, %s1287_s3 }
   0x6   :  { %p1091_p2 = pnand %p1089_p1, %p1086_p0 }
   0x8   :  { %1094 = shalt.err (!%p1091_p2)
}
   0x9   :  { %s1095_s8 = scalar_lea.vmem %s36_s22, 32  ;;  %p1100_p4 = scmp.lt.s32.totalorder %s36_s22, %s36_s22 }
   0xa   :  { %p1096_p3 = scmp.ne.s32.totalorder %s36_s22, %s1095_s8  ;;  %p1101_p5 = scmp.lt.s32.totalorder %s1095_s8, %s1095_s8 }
   0xc   :  { %p1102_p6 = por %p1101_p5, %p1100_p4 }
   0xe   :  { %p1103_p7 = pnand %p1102_p6, %p1096_p3 }
  0x10   :  { %1106 = shalt.err (!%p1103_p7)
}
  0x11   :  { %38 = dma.hbm_to_vmem [thread:$0]  %s1287_s3, 32, %s36_s22, [#allocation5]  }
  0x12   :  { %s1107_s13 = scalar_lea.hbm %s1286_s2, 8192 }
  0x13   :  { %p1108_p8 = scmp.ne.s32.totalorder %s1286_s2, %s1107_s13  ;;  %p1111_p9 = scmp.lt.u32.totalorder %s1107_s13, %s1286_s2 }
  0x15   :  { %p1113_p10 = pnand %p1111_p9, %p1108_p8 }
  0x17   :  { %1116 = shalt.err (!%p1113_p10)
}
  0x18   :  { %s1117_s18 = scalar_lea.vmem %s1196_s24, 8192  ;;  %p1122_p12 = scmp.lt.s32.totalorder %s1196_s24, %s1196_s24 }
  0x19   :  { %p1118_p11 = scmp.ne.s32.totalorder %s1196_s24, %s1117_s18  ;;  %p1123_p13 = scmp.lt.s32.totalorder %s1117_s18, %s1117_s18 }
  0x1b   :  { %p1124_p0 = por %p1123_p13, %p1122_p12 }
  0x1d   :  { %p1125_p1 = pnand %p1124_p0, %p1118_p11 }
  0x1f   :  { %1128 = shalt.err (!%p1125_p1)
}
  0x20   :  { %s1157_s3 = smov 256   ;;  %s1158_s19 = smov 16  }
  0x21   :  { %28 = dma.hbm_to_vmem [thread:$0]  %s1286_s2, 8192, %s1196_s24, [#allocation3], %s1157_s3, %s1157_s3, %s1158_s19  }
  0x22   :  { %s1159_s22 = smov [#allocation6]   ;;  %s1129_s27 = scalar_lea.hbm %s1288_s4, 22528 }
  0x23   :  { %s44_s23 = sshll.u32 %s1159_s22, 4  ;;  %p1130_p2 = scmp.ne.s32.totalorder %s1288_s4, %s1129_s27  ;;  %s45_s23 = int_to_ptr.vmem [resolvable:$true] %s44_s23 }
  0x24   :  { %p1133_p3 = scmp.lt.u32.totalorder %s1129_s27, %s1288_s4 }
  0x26   :  { %p1135_p4 = pnand %p1133_p3, %p1130_p2 }
  0x28   :  { %1138 = shalt.err (!%p1135_p4)
}
  0x29   :  { %s1139_s8 = scalar_lea.vmem %s45_s23, 22528  ;;  %p1144_p6 = scmp.lt.s32.totalorder %s45_s23, %s45_s23 }
  0x2a   :  { %p1140_p5 = scmp.ne.s32.totalorder %s45_s23, %s1139_s8  ;;  %p1145_p7 = scmp.lt.s32.totalorder %s1139_s8, %s1139_s8 }
  0x2c   :  { %p1146_p8 = por %p1145_p7, %p1144_p6 }
  0x2e   :  { %p1147_p9 = pnand %p1146_p8, %p1140_p5 }
  0x30   :  { %1150 = shalt.err (!%p1147_p9)
}
  0x31   :  { %50 = dma.hbm_to_vmem [thread:$0]  %s1288_s4, 22528, %s45_s23, [#allocation5], %s1157_s3, %s1157_s3, %s1158_s19  }
  0x32   :  { %1151 = dma.done.wait [#allocation3], 8192  }
  0x33   :  { %1152 = vsyncadd [#allocation3], 4294959104 }
  0x34   :  { %1153 = dma.done.wait [#allocation5], 22560  }
  0x35   :  { %1154 = vsyncadd [#allocation5], 4294944736  ;;  %v112_v0 = vld [vmem:[#allocation2 + $0x108] sm:$0xff]  ;;  %v113_v1 = vld [vmem:[#allocation2 + $0x118] sm:$0xff]  ;;  %vm751_vm0 = vcmask 1041408   ;;  %vm752_vm1 = vcmask 519170  }
  0x36   :  { %v96_v2 = vld [vmem:[#allocation2 + $0x8] sm:$0xff]  ;;  %v829_v3 = vpack.c.bf16 %v113_v1, %v112_v0  ;;  %v97_v4 = vld [vmem:[#allocation2 + $0x18] sm:$0xff]  ;;  %v1242_v15 = vld [vmem:[%s1285_s1] sm:$0x3] }
  0x37   :  { %v114_v5 = vld [vmem:[#allocation2 + $0x128] sm:$0xff]  ;;  %v115_v6 = vld [vmem:[#allocation2 + $0x138] sm:$0xff]  ;;  %v831_v7 = vpack.c.bf16 %v97_v4, %v96_v2  ;;  %793 = vmatprep.mubr.f32.mxu0 %v1242_v15  ;;  %vm753_vm2 = vmor %vm752_vm1, %vm751_vm0 }
  0x38   :  { %v833_v8 = vpack.c.bf16 %v115_v6, %v114_v5  ;;  %830 = vmatprep.subr.bf16.mxu0 %v829_v3  ;;  %v98_v9 = vld [vmem:[#allocation2 + $0x28] sm:$0xff]  ;;  %v99_v10 = vld [vmem:[#allocation2 + $0x38] sm:$0xff] }
  0x39   :  { %832 = vmatpush3.bf16.xpose.msra.mxu0 %v831_v7  ;;  %v116_v11 = vld [vmem:[#allocation2 + $0x148] sm:$0xff]  ;;  %v117_v12 = vld [vmem:[#allocation2 + $0x158] sm:$0xff]  ;;  %v835_v13 = vpack.c.bf16 %v99_v10, %v98_v9 }
  0x3a   :  { %834 = vmatprep.subr.bf16.mxu0 %v833_v8  ;;  %v837_v14 = vpack.c.bf16 %v117_v12, %v116_v11  ;;  %v100_v16 = vld [vmem:[#allocation2 + $0x48] sm:$0xff]  ;;  %v101_v17 = vld [vmem:[#allocation2 + $0x58] sm:$0xff] }
  0x3b   :  { %v118_v18 = vld [vmem:[#allocation2 + $0x168] sm:$0xff]  ;;  %v119_v19 = vld [vmem:[#allocation2 + $0x178] sm:$0xff]  ;;  %v839_v20 = vpack.c.bf16 %v101_v17, %v100_v16  ;;  %v79_v16 = vld [vmem:[#allocation2 + $0x100] sm:$0xff] }
  0x3c   :  { %v841_v21 = vpack.c.bf16 %v119_v19, %v118_v18  ;;  %v102_v22 = vld [vmem:[#allocation2 + $0x68] sm:$0xff]  ;;  %v103_v23 = vld [vmem:[#allocation2 + $0x78] sm:$0xff]  ;;  %v80_v17 = vld [vmem:[#allocation2 + $0x110] sm:$0xff] }
  0x3d   :  { %v120_v24 = vld [vmem:[#allocation2 + $0x188] sm:$0xff]  ;;  %v121_v25 = vld [vmem:[#allocation2 + $0x198] sm:$0xff]  ;;  %v843_v31 = vpack.c.bf16 %v103_v23, %v102_v22 }
  0x3e   :  { %v297_v26 = vld [vmem:[#allocation6 + $0x8] sm:$0xff]  ;;  %v299_v27 = vld [vmem:[#allocation6 + $0x18] sm:$0xff]  ;;  %v296_v28 = vld [vmem:[#allocation6] sm:$0xff]  ;;  %v845_v34 = vpack.c.bf16 %v121_v25, %v120_v24 }
  0x3f   :  { %v893_v29 = vpack.c.bf16 %v299_v27, %v297_v26  ;;  %v298_v30 = vld [vmem:[#allocation6 + $0x10] sm:$0xff]  ;;  %v301_v33 = vld [vmem:[#allocation6 + $0x28] sm:$0xff]  ;;  %v303_v35 = vld [vmem:[#allocation6 + $0x38] sm:$0xff] }
  0x40   :  { %v895_v32 = vpack.c.bf16 %v298_v30, %v296_v28  ;;  %v897_v36 = vpack.c.bf16 %v303_v35, %v301_v33  ;;  %v300_v37 = vld [vmem:[#allocation6 + $0x20] sm:$0xff]  ;;  %v302_v38 = vld [vmem:[#allocation6 + $0x30] sm:$0xff]  ;;  %v305_v39 = vld [vmem:[#allocation6 + $0x48] sm:$0xff] }
  0x41   :  { %836 = vmatpush3.bf16.xpose.msra.mxu0 %v835_v13  ;;  %894 = vmatprep.subr.bf16.mxu1 %v893_v29  ;;  %v307_v40 = vld [vmem:[#allocation6 + $0x58] sm:$0xff]  ;;  %v104_v41 = vld [vmem:[#allocation2 + $0x88] sm:$0xff]  ;;  %v899_v45 = vpack.c.bf16 %v302_v38, %v300_v37  ;;  %v306_v50 = vld [vmem:[#allocation6 + $0x50] sm:$0xff] }
  0x42   :  { %838 = vmatprep.subr.bf16.mxu0 %v837_v14  ;;  %896 = vmatpush1.bf16.xpose.msra.mxu1 %v895_v32  ;;  %v105_v42 = vld [vmem:[#allocation2 + $0x98] sm:$0xff]  ;;  %v122_v43 = vld [vmem:[#allocation2 + $0x1a8] sm:$0xff]  ;;  %v901_v46 = vpack.c.bf16 %v307_v40, %v305_v39  ;;  %v63_v26 = vld [vmem:[#allocation2] sm:$0xff] }
  0x43   :  { %898 = vmatprep.subr.bf16.mxu1 %v897_v36  ;;  %v123_v44 = vld [vmem:[#allocation2 + $0x1b8] sm:$0xff]  ;;  %v847_v47 = vpack.c.bf16 %v105_v42, %v104_v41  ;;  %v304_v49 = vld [vmem:[#allocation6 + $0x40] sm:$0xff]  ;;  %v309_v51 = vld [vmem:[#allocation6 + $0x68] sm:$0xff] }
  0x44   :  { %v849_v48 = vpack.c.bf16 %v123_v44, %v122_v43  ;;  %v311_v52 = vld [vmem:[#allocation6 + $0x78] sm:$0xff]  ;;  %v106_v53 = vld [vmem:[#allocation2 + $0xa8] sm:$0xff]  ;;  %v903_v57 = vpack.c.bf16 %v306_v50, %v304_v49  ;;  %v310_v62 = vld [vmem:[#allocation6 + $0x70] sm:$0xff] }
  0x45   :  { %v107_v54 = vld [vmem:[#allocation2 + $0xb8] sm:$0xff]  ;;  %v124_v55 = vld [vmem:[#allocation2 + $0x1c8] sm:$0xff]  ;;  %v905_v58 = vpack.c.bf16 %v311_v52, %v309_v51  ;;  %v64_v27 = vld [vmem:[#allocation2 + $0x10] sm:$0xff] }
  0x46   :  { %v125_v56 = vld [vmem:[#allocation2 + $0x1d8] sm:$0xff]  ;;  %v851_v59 = vpack.c.bf16 %v107_v54, %v106_v53  ;;  %v308_v61 = vld [vmem:[#allocation6 + $0x60] sm:$0xff]  ;;  %v313_v63 = vld [vmem:[#allocation6 + $0x88] sm:$0xff]  ;;  %v863_v32 = vpack.c.bf16 %v64_v27, %v63_v26 }
  0x47   :  { %v853_v60 = vpack.c.bf16 %v125_v56, %v124_v55  ;;  %v315_v0 = vld [vmem:[#allocation6 + $0x98] sm:$0xff]  ;;  %v108_v1 = vld [vmem:[#allocation2 + $0xc8] sm:$0xff]  ;;  %v907_v5 = vpack.c.bf16 %v310_v62, %v308_v61  ;;  %v314_v10 = vld [vmem:[#allocation6 + $0x90] sm:$0xff] }
  0x48   :  { %v109_v2 = vld [vmem:[#allocation2 + $0xd8] sm:$0xff]  ;;  %v126_v3 = vld [vmem:[#allocation2 + $0x1e8] sm:$0xff]  ;;  %v909_v6 = vpack.c.bf16 %v315_v0, %v313_v63  ;;  %v81_v28 = vld [vmem:[#allocation2 + $0x120] sm:$0xff] }
  0x49   :  { %840 = vmatpush3.bf16.xpose.msra.mxu0 %v839_v20  ;;  %v127_v4 = vld [vmem:[#allocation2 + $0x1f8] sm:$0xff]  ;;  %v855_v7 = vpack.c.bf16 %v109_v2, %v108_v1  ;;  %v312_v9 = vld [vmem:[#allocation6 + $0x80] sm:$0xff]  ;;  %v317_v11 = vld [vmem:[#allocation6 + $0xa8] sm:$0xff] }
  0x4a   :  { %842 = vmatprep.subr.bf16.mxu0 %v841_v21  ;;  %900 = vmatpush1.bf16.xpose.msra.mxu1 %v899_v45  ;;  %v857_v8 = vpack.c.bf16 %v127_v4, %v126_v3  ;;  %v319_v12 = vld [vmem:[#allocation6 + $0xb8] sm:$0xff]  ;;  %v110_v13 = vld [vmem:[#allocation2 + $0xe8] sm:$0xff]  ;;  %v911_v18 = vpack.c.bf16 %v314_v10, %v312_v9  ;;  %v861_v21 = vpack.c.bf16 %v80_v17, %v79_v16  ;;  %v318_v23 = vld [vmem:[#allocation6 + $0xb0] sm:$0xff] }
  0x4b   :  { %902 = vmatprep.subr.bf16.mxu1 %v901_v46  ;;  %v111_v14 = vld [vmem:[#allocation2 + $0xf8] sm:$0xff]  ;;  %v913_v19 = vpack.c.bf16 %v319_v12, %v317_v11  ;;  %v316_v22 = vld [vmem:[#allocation6 + $0xa0] sm:$0xff]  ;;  %v321_v24 = vld [vmem:[#allocation6 + $0xc8] sm:$0xff] }
  0x4c   :  { %v859_v20 = vpack.c.bf16 %v111_v14, %v110_v13  ;;  %v323_v25 = vld [vmem:[#allocation6 + $0xd8] sm:$0xff]  ;;  %v82_v29 = vld [vmem:[#allocation2 + $0x130] sm:$0xff]  ;;  %v915_v30 = vpack.c.bf16 %v318_v23, %v316_v22  ;;  %v320_v35 = vld [vmem:[#allocation6 + $0xc0] sm:$0xff] }
  0x4d   :  { %v865_v33 = vpack.c.bf16 %v82_v29, %v81_v28  ;;  %v322_v36 = vld [vmem:[#allocation6 + $0xd0] sm:$0xff]  ;;  %v325_v37 = vld [vmem:[#allocation6 + $0xe8] sm:$0xff]  ;;  %v327_v38 = vld [vmem:[#allocation6 + $0xf8] sm:$0xff] }
  0x4e   :  { %v65_v39 = vld [vmem:[#allocation2 + $0x20] sm:$0xff]  ;;  %v66_v40 = vld [vmem:[#allocation2 + $0x30] sm:$0xff]  ;;  %v919_v43 = vpack.c.bf16 %v322_v36, %v320_v35  ;;  %v921_v44 = vpack.c.bf16 %v327_v38, %v325_v37 }
  0x4f   :  { %v83_v41 = vld [vmem:[#allocation2 + $0x140] sm:$0xff]  ;;  %v84_v42 = vld [vmem:[#allocation2 + $0x150] sm:$0xff]  ;;  %v867_v45 = vpack.c.bf16 %v66_v40, %v65_v39 }
  0x50   :  { %v869_v46 = vpack.c.bf16 %v84_v42, %v83_v41  ;;  %v331_v49 = vld [vmem:[#allocation6 + $0x118] sm:$0xff]  ;;  %v68_v51 = vld [vmem:[#allocation2 + $0x50] sm:$0xff] }
  0x51   :  { %844 = vmatpush3.bf16.xpose.msra.mxu0 %v843_v31  ;;  %v917_v31 = vpack.c.bf16 %v323_v25, %v321_v24  ;;  %v67_v50 = vld [vmem:[#allocation2 + $0x40] sm:$0xff]  ;;  %v86_v53 = vld [vmem:[#allocation2 + $0x170] sm:$0xff] }
  0x52   :  { %846 = vmatprep.subr.bf16.mxu0 %v845_v34  ;;  %904 = vmatpush1.bf16.xpose.msra.mxu1 %v903_v57  ;;  %v1248_v34 = vld [vmem:[%s1284_s0] sm:$0x3]  ;;  %v871_v56 = vpack.c.bf16 %v68_v51, %v67_v50  ;;  %v70_v63 = vld [vmem:[#allocation2 + $0x70] sm:$0xff] }
  0x53   :  { %906 = vmatprep.subr.bf16.mxu1 %v905_v58  ;;  %v85_v52 = vld [vmem:[#allocation2 + $0x160] sm:$0xff]  ;;  %v88_v1 = vld [vmem:[#allocation2 + $0x190] sm:$0xff] }
  0x54   :  { %v873_v57 = vpack.c.bf16 %v86_v53, %v85_v52  ;;  %v328_v58 = vld [vmem:[#allocation6 + $0x100] sm:$0xff]  ;;  %v335_v61 = vld [vmem:[#allocation6 + $0x138] sm:$0xff]  ;;  %v72_v11 = vld [vmem:[#allocation2 + $0x90] sm:$0xff] }
  0x55   :  { %v69_v62 = vld [vmem:[#allocation2 + $0x60] sm:$0xff]  ;;  %v90_v13 = vld [vmem:[#allocation2 + $0x1b0] sm:$0xff] }
  0x56   :  { %v87_v0 = vld [vmem:[#allocation2 + $0x180] sm:$0xff]  ;;  %v875_v4 = vpack.c.bf16 %v70_v63, %v69_v62  ;;  %v74_v24 = vld [vmem:[#allocation2 + $0xb0] sm:$0xff] }
  0x57   :  { %v339_v9 = vld [vmem:[#allocation6 + $0x158] sm:$0xff]  ;;  %v92_v26 = vld [vmem:[#allocation2 + $0x1d0] sm:$0xff]  ;;  %v364_v52 = vld [vmem:[#allocation6 + $0x220] sm:$0xff] }
  0x58   :  { %v71_v10 = vld [vmem:[#allocation2 + $0x80] sm:$0xff]  ;;  %v76_v35 = vld [vmem:[#allocation2 + $0xd0] sm:$0xff] }
  0x59   :  { %848 = vmatpush3.bf16.xpose.msra.mxu0 %v847_v47  ;;  %v326_v47 = vld [vmem:[#allocation6 + $0xf0] sm:$0xff]  ;;  %v89_v12 = vld [vmem:[#allocation2 + $0x1a0] sm:$0xff]  ;;  %v879_v17 = vpack.c.bf16 %v72_v11, %v71_v10 }
  0x5a   :  { %850 = vmatprep.subr.bf16.mxu0 %v849_v48  ;;  %908 = vmatpush1.bf16.xpose.msra.mxu1 %v907_v5  ;;  %v329_v48 = vld [vmem:[#allocation6 + $0x108] sm:$0xff]  ;;  %v877_v5 = vpack.c.bf16 %v88_v1, %v87_v0  ;;  %v343_v22 = vld [vmem:[#allocation6 + $0x178] sm:$0xff]  ;;  %v366_v53 = vld [vmem:[#allocation6 + $0x230] sm:$0xff] }
  0x5b   :  { %910 = vmatprep.subr.bf16.mxu1 %v909_v6  ;;  %v925_v55 = vpack.c.bf16 %v331_v49, %v329_v48  ;;  %v332_v6 = vld [vmem:[#allocation6 + $0x120] sm:$0xff]  ;;  %v94_v37 = vld [vmem:[#allocation2 + $0x1f0] sm:$0xff]  ;;  %v367_v49 = vld [vmem:[#allocation6 + $0x238] sm:$0xff] }
  0x5c   :  { %v73_v23 = vld [vmem:[#allocation2 + $0xa0] sm:$0xff]  ;;  %v78_v42 = vld [vmem:[#allocation2 + $0xf0] sm:$0xff] }
  0x5d   :  { %v91_v25 = vld [vmem:[#allocation2 + $0x1c0] sm:$0xff]  ;;  %v883_v29 = vpack.c.bf16 %v74_v24, %v73_v23  ;;  %v365_v48 = vld [vmem:[#allocation6 + $0x228] sm:$0xff] }
  0x5e   :  { %v93_v36 = vld [vmem:[#allocation2 + $0x1e0] sm:$0xff]  ;;  %v961_v51 = vpack.c.bf16 %v367_v49, %v365_v48  ;;  %v377_v1 = vld [vmem:[#allocation6 + $0x288] sm:$0xff]  ;;  %v406_v49 = vld [vmem:[#allocation6 + $0x370] sm:$0xff] }
  0x5f   :  { %v889_v40 = vpack.c.bf16 %v94_v37, %v93_v36  ;;  %v77_v41 = vld [vmem:[#allocation2 + $0xe0] sm:$0xff] }
  0x60   :  { %v372_v0 = vld [vmem:[#allocation6 + $0x260] sm:$0xff] }
  0x61   :  { %852 = vmatpush3.bf16.xpose.msra.mxu0 %v851_v59  ;;  %v330_v59 = vld [vmem:[#allocation6 + $0x110] sm:$0xff]  ;;  %v380_v11 = vld [vmem:[#allocation6 + $0x2a0] sm:$0xff] }
  0x62   :  { %854 = vmatprep.subr.bf16.mxu0 %v853_v60  ;;  %912 = vmatpush1.bf16.xpose.msra.mxu1 %v911_v18  ;;  %v333_v60 = vld [vmem:[#allocation6 + $0x128] sm:$0xff]  ;;  %v927_v2 = vpack.c.bf16 %v330_v59, %v328_v58  ;;  %v881_v18 = vpack.c.bf16 %v90_v13, %v89_v12  ;;  %v368_v58 = vld [vmem:[#allocation6 + $0x240] sm:$0xff]  ;;  %v370_v59 = vld [vmem:[#allocation6 + $0x250] sm:$0xff] }
  0x63   :  { %914 = vmatprep.subr.bf16.mxu1 %v913_v19  ;;  %v929_v3 = vpack.c.bf16 %v335_v61, %v333_v60  ;;  %v336_v19 = vld [vmem:[#allocation6 + $0x140] sm:$0xff]  ;;  %v373_v60 = vld [vmem:[#allocation6 + $0x268] sm:$0xff]  ;;  %v375_v61 = vld [vmem:[#allocation6 + $0x278] sm:$0xff]  ;;  %v967_v62 = vpack.c.bf16 %v370_v59, %v368_v58 }
  0x64   :  { %v969_v63 = vpack.c.bf16 %v375_v61, %v373_v60  ;;  %v382_v12 = vld [vmem:[#allocation6 + $0x2b0] sm:$0xff]  ;;  %v385_v13 = vld [vmem:[#allocation6 + $0x2c8] sm:$0xff]  ;;  %v388_v24 = vld [vmem:[#allocation6 + $0x2e0] sm:$0xff] }
  0x65   :  { %v396_v37 = vld [vmem:[#allocation6 + $0x320] sm:$0xff]  ;;  %v410_v61 = vld [vmem:[#allocation6 + $0x390] sm:$0xff] }
  0x66   :  { %v404_v48 = vld [vmem:[#allocation6 + $0x360] sm:$0xff] }
  0x67   :  { %v1003_v58 = vpack.c.bf16 %v406_v49, %v404_v48  ;;  %v408_v60 = vld [vmem:[#allocation6 + $0x380] sm:$0xff] }
  0x69   :  { %856 = vmatpush3.bf16.xpose.msra.mxu0 %v855_v7  ;;  %v334_v7 = vld [vmem:[#allocation6 + $0x130] sm:$0xff] }
  0x6a   :  { %858 = vmatprep.subr.bf16.mxu0 %v857_v8  ;;  %916 = vmatpush1.bf16.xpose.msra.mxu1 %v915_v30  ;;  %v337_v8 = vld [vmem:[#allocation6 + $0x148] sm:$0xff]  ;;  %v931_v14 = vpack.c.bf16 %v334_v7, %v332_v6  ;;  %v885_v30 = vpack.c.bf16 %v92_v26, %v91_v25  ;;  %v378_v6 = vld [vmem:[#allocation6 + $0x290] sm:$0xff] }
  0x6b   :  { %918 = vmatprep.subr.bf16.mxu1 %v917_v31  ;;  %v933_v16 = vpack.c.bf16 %v339_v9, %v337_v8  ;;  %v340_v31 = vld [vmem:[#allocation6 + $0x160] sm:$0xff]  ;;  %v381_v7 = vld [vmem:[#allocation6 + $0x2a8] sm:$0xff]  ;;  %v383_v8 = vld [vmem:[#allocation6 + $0x2b8] sm:$0xff] }
  0x6c   :  { %v977_v10 = vpack.c.bf16 %v383_v8, %v381_v7  ;;  %v390_v25 = vld [vmem:[#allocation6 + $0x2f0] sm:$0xff]  ;;  %v393_v26 = vld [vmem:[#allocation6 + $0x308] sm:$0xff]  ;;  %v412_v7 = vld [vmem:[#allocation6 + $0x3a0] sm:$0xff] }
  0x6d   :  { %v414_v8 = vld [vmem:[#allocation6 + $0x3b0] sm:$0xff] }
  0x71   :  { %860 = vmatpush3.bf16.xpose.msra.mxu0 %v859_v20  ;;  %v338_v20 = vld [vmem:[#allocation6 + $0x150] sm:$0xff] }
  0x72   :  { %862 = vmatprep.subr.bf16.mxu0 %v861_v21  ;;  %920 = vmatpush1.bf16.xpose.msra.mxu1 %v919_v43  ;;  %v341_v21 = vld [vmem:[#allocation6 + $0x168] sm:$0xff]  ;;  %v935_v27 = vpack.c.bf16 %v338_v20, %v336_v19  ;;  %v386_v19 = vld [vmem:[#allocation6 + $0x2d0] sm:$0xff] }
  0x73   :  { %922 = vmatprep.subr.bf16.mxu1 %v921_v44  ;;  %v937_v28 = vpack.c.bf16 %v343_v22, %v341_v21  ;;  %v361_v43 = vld [vmem:[#allocation6 + $0x208] sm:$0xff]  ;;  %v363_v44 = vld [vmem:[#allocation6 + $0x218] sm:$0xff] }
  0x74   :  { %v389_v20 = vld [vmem:[#allocation6 + $0x2e8] sm:$0xff]  ;;  %v391_v21 = vld [vmem:[#allocation6 + $0x2f8] sm:$0xff] }
  0x75   :  { %v985_v23 = vpack.c.bf16 %v391_v21, %v389_v20  ;;  %v416_v20 = vld [vmem:[#allocation6 + $0x3c0] sm:$0xff]  ;;  %v418_v21 = vld [vmem:[#allocation6 + $0x3d0] sm:$0xff] }
  0x78   :  { %794 = vmatmul.mubr.f32.vlgmr.msra.gmra.mrb[0].mxu0 %v1242_v15  ;;  %v324_v15 = vld [vmem:[#allocation6 + $0xe0] sm:$0xff] }
  0x79   :  { %864 = vmatpush3.bf16.xpose.msra.mxu0 %v863_v32  ;;  %827 = vmatprep.mubr.f32.mxu0 %v1248_v34  ;;  %v923_v54 = vpack.c.bf16 %v326_v47, %v324_v15  ;;  %v342_v32 = vld [vmem:[#allocation6 + $0x170] sm:$0xff]  ;;  %v360_v15 = vld [vmem:[#allocation6 + $0x200] sm:$0xff] }
  0x7a   :  { %866 = vmatprep.subr.bf16.mxu0 %v865_v33  ;;  %v75_v33 = vld [vmem:[#allocation2 + $0xc0] sm:$0xff]  ;;  %v939_v38 = vpack.c.bf16 %v342_v32, %v340_v31  ;;  %v362_v47 = vld [vmem:[#allocation6 + $0x210] sm:$0xff]  ;;  %v397_v32 = vld [vmem:[#allocation6 + $0x328] sm:$0xff] }
  0x7b   :  { %924 = vmatpush1.bf16.xpose.msra.mxu1 %v923_v54  ;;  %v887_v39 = vpack.c.bf16 %v76_v35, %v75_v33  ;;  %v959_v50 = vpack.c.bf16 %v362_v47, %v360_v15  ;;  %v369_v54 = vld [vmem:[#allocation6 + $0x248] sm:$0xff]  ;;  %v394_v31 = vld [vmem:[#allocation6 + $0x310] sm:$0xff]  ;;  %v399_v33 = vld [vmem:[#allocation6 + $0x338] sm:$0xff] }
  0x7c   :  { %926 = vmatprep.subr.bf16.mxu1 %v925_v55  ;;  %v371_v55 = vld [vmem:[#allocation6 + $0x258] sm:$0xff]  ;;  %v993_v36 = vpack.c.bf16 %v399_v33, %v397_v32  ;;  %v420_v32 = vld [vmem:[#allocation6 + $0x3e0] sm:$0xff]  ;;  %v422_v33 = vld [vmem:[#allocation6 + $0x3f0] sm:$0xff] }
  0x81   :  { %868 = vmatpush3.bf16.xpose.msra.mxu0 %v867_v45  ;;  %v891_v45 = vpack.c.bf16 %v78_v42, %v77_v41 }
  0x82   :  { %870 = vmatprep.subr.bf16.mxu0 %v869_v46  ;;  %v957_v46 = vpack.c.bf16 %v363_v44, %v361_v43  ;;  %v400_v43 = vld [vmem:[#allocation6 + $0x340] sm:$0xff]  ;;  %v402_v44 = vld [vmem:[#allocation6 + $0x350] sm:$0xff] }
  0x83   :  { %928 = vmatpush1.bf16.xpose.msra.mxu1 %v927_v2  ;;  %v379_v2 = vld [vmem:[#allocation6 + $0x298] sm:$0xff]  ;;  %v999_v15 = vpack.c.bf16 %v402_v44, %v400_v43 }
  0x84   :  { %930 = vmatprep.subr.bf16.mxu1 %v929_v3 }
  0x89   :  { %872 = vmatpush3.bf16.xpose.msra.mxu0 %v871_v56  ;;  %v963_v56 = vpack.c.bf16 %v366_v53, %v364_v52  ;;  %v344_v53 = vld [vmem:[#allocation6 + $0x180] sm:$0xff] }
  0x8a   :  { %874 = vmatprep.subr.bf16.mxu0 %v873_v57  ;;  %v965_v57 = vpack.c.bf16 %v371_v55, %v369_v54  ;;  %v346_v54 = vld [vmem:[#allocation6 + $0x190] sm:$0xff]  ;;  %v409_v55 = vld [vmem:[#allocation6 + $0x388] sm:$0xff] }
  0x8b   :  { %932 = vmatpush1.bf16.xpose.msra.mxu1 %v931_v14  ;;  %v387_v14 = vld [vmem:[#allocation6 + $0x2d8] sm:$0xff] }
  0x8c   :  { %934 = vmatprep.subr.bf16.mxu1 %v933_v16  ;;  %v979_v16 = vpack.c.bf16 %v382_v12, %v380_v11  ;;  %v352_v12 = vld [vmem:[#allocation6 + $0x1c0] sm:$0xff] }
  0x91   :  { %876 = vmatpush3.bf16.xpose.msra.mxu0 %v875_v4  ;;  %v973_v4 = vpack.c.bf16 %v379_v2, %v377_v1  ;;  %v350_v1 = vld [vmem:[#allocation6 + $0x1b0] sm:$0xff]  ;;  %v413_v2 = vld [vmem:[#allocation6 + $0x3a8] sm:$0xff] }
  0x92   :  { %878 = vmatprep.subr.bf16.mxu0 %v877_v5  ;;  %v376_v5 = vld [vmem:[#allocation6 + $0x280] sm:$0xff] }
  0x93   :  { %936 = vmatpush1.bf16.xpose.msra.mxu1 %v935_v27  ;;  %v975_v9 = vpack.c.bf16 %v378_v6, %v376_v5  ;;  %v395_v27 = vld [vmem:[#allocation6 + $0x318] sm:$0xff]  ;;  %v1007_v5 = vpack.c.bf16 %v410_v61, %v408_v60  ;;  %v429_v60 = vld [vmem:[#allocation6 + $0x428] sm:$0xff] }
  0x94   :  { %938 = vmatprep.subr.bf16.mxu1 %v937_v28  ;;  %v987_v28 = vpack.c.bf16 %v390_v25, %v388_v24  ;;  %v356_v25 = vld [vmem:[#allocation6 + $0x1e0] sm:$0xff]  ;;  %v431_v61 = vld [vmem:[#allocation6 + $0x438] sm:$0xff] }
  0x99   :  { %880 = vmatpush3.bf16.xpose.msra.mxu0 %v879_v17  ;;  %v981_v17 = vpack.c.bf16 %v387_v14, %v385_v13  ;;  %v354_v13 = vld [vmem:[#allocation6 + $0x1d0] sm:$0xff]  ;;  %v417_v14 = vld [vmem:[#allocation6 + $0x3c8] sm:$0xff] }
  0x9a   :  { %882 = vmatprep.subr.bf16.mxu0 %v881_v18  ;;  %v384_v18 = vld [vmem:[#allocation6 + $0x2c0] sm:$0xff] }
  0x9b   :  { %940 = vmatpush1.bf16.xpose.msra.mxu1 %v939_v38  ;;  %v983_v22 = vpack.c.bf16 %v386_v19, %v384_v18  ;;  %v398_v38 = vld [vmem:[#allocation6 + $0x330] sm:$0xff]  ;;  %v1011_v18 = vpack.c.bf16 %v414_v8, %v412_v7  ;;  %v432_v8 = vld [vmem:[#allocation6 + $0x440] sm:$0xff] }
  0x9c   :  { %v995_v41 = vpack.c.bf16 %v398_v38, %v396_v37  ;;  %v1019_v38 = vpack.c.bf16 %v422_v33, %v420_v32  ;;  %v448_v33 = vld [vmem:[#allocation6 + $0x4c0] sm:$0xff] }
  0xa1   :  { %884 = vmatpush3.bf16.xpose.msra.mxu0 %v883_v29  ;;  %v989_v29 = vpack.c.bf16 %v395_v27, %v393_v26  ;;  %v358_v26 = vld [vmem:[#allocation6 + $0x1f0] sm:$0xff]  ;;  %v421_v27 = vld [vmem:[#allocation6 + $0x3e8] sm:$0xff] }
  0xa2   :  { %886 = vmatprep.subr.bf16.mxu0 %v885_v30  ;;  %v392_v30 = vld [vmem:[#allocation6 + $0x300] sm:$0xff] }
  0xa3   :  { %v991_v35 = vpack.c.bf16 %v394_v31, %v392_v30  ;;  %v1015_v30 = vpack.c.bf16 %v418_v21, %v416_v20  ;;  %v440_v21 = vld [vmem:[#allocation6 + $0x480] sm:$0xff] }
  0xa9   :  { %888 = vmatpush3.bf16.xpose.msra.mxu0 %v887_v39  ;;  %v401_v39 = vld [vmem:[#allocation6 + $0x348] sm:$0xff] }
  0xaa   :  { %890 = vmatprep.subr.bf16.mxu0 %v889_v40  ;;  %v403_v40 = vld [vmem:[#allocation6 + $0x358] sm:$0xff] }
  0xab   :  { %v997_v42 = vpack.c.bf16 %v403_v40, %v401_v39  ;;  %v272_v39 = vlaneseq }
  0xad   :  { %v1253_v40 = vshrl.u32 %v272_v39, 7 }
  0xaf   :  { %v278_v43 = vsub.s32 1, %v1253_v40 }
  0xb1   :  { %892 = vmatpush3.bf16.xpose.msra.mxu0 %v891_v45  ;;  %v405_v45 = vld [vmem:[#allocation6 + $0x368] sm:$0xff] }
  0xb2   :  { %958 = vmatprep.subr.bf16.mxu0 %v957_v46  ;;  %v407_v46 = vld [vmem:[#allocation6 + $0x378] sm:$0xff] }
  0xb3   :  { %v1001_v47 = vpack.c.bf16 %v407_v46, %v405_v45 }
  0xb8   :  { %828 = vmatmul.mubr.f32.vlgmr.msra.gmra.mrb[0].mxu0 %v1248_v34  ;;  %v374_v34 = vld [vmem:[#allocation6 + $0x270] sm:$0xff] }
  0xb9   :  { %960 = vmatpush1.bf16.xpose.msra.mxu0 %v959_v50  ;;  %v971_v3 = vpack.c.bf16 %v374_v34, %v372_v0  ;;  %v345_v50 = vld [vmem:[#allocation6 + $0x188] sm:$0xff]  ;;  %v348_v34 = vld [vmem:[#allocation6 + $0x1a0] sm:$0xff] }
  0xba   :  { %962 = vmatprep.subr.bf16.mxu0 %v961_v51  ;;  %v347_v51 = vld [vmem:[#allocation6 + $0x198] sm:$0xff] }
  0xbb   :  { %v941_v52 = vpack.c.bf16 %v347_v51, %v345_v50 }
  0xbd   :  { %942 = vmatprep.subr.bf16.mxu1 %v941_v52 }
  0xc1   :  { %964 = vmatpush1.bf16.xpose.msra.mxu0 %v963_v56  ;;  %v943_v56 = vpack.c.bf16 %v346_v54, %v344_v53 }
  0xc2   :  { %966 = vmatprep.subr.bf16.mxu0 %v965_v57  ;;  %v411_v57 = vld [vmem:[#allocation6 + $0x398] sm:$0xff] }
  0xc3   :  { %944 = vmatpush1.bf16.xpose.msra.mxu1 %v943_v56  ;;  %v1005_v59 = vpack.c.bf16 %v411_v57, %v409_v55  ;;  %v424_v57 = vld [vmem:[#allocation6 + $0x400] sm:$0xff] }
  0xc9   :  { %968 = vmatpush1.bf16.xpose.msra.mxu0 %v967_v62  ;;  %v349_v62 = vld [vmem:[#allocation6 + $0x1a8] sm:$0xff] }
  0xca   :  { %970 = vmatprep.subr.bf16.mxu0 %v969_v63  ;;  %v351_v63 = vld [vmem:[#allocation6 + $0x1b8] sm:$0xff] }
  0xcb   :  { %v945_v0 = vpack.c.bf16 %v351_v63, %v349_v62 }
  0xcd   :  { %946 = vmatprep.subr.bf16.mxu1 %v945_v0 }
  0xd1   :  { %972 = vmatpush1.bf16.xpose.msra.mxu0 %v971_v3  ;;  %v947_v3 = vpack.c.bf16 %v350_v1, %v348_v34  ;;  %v1025_v1 = vpack.c.bf16 %v431_v61, %v429_v60  ;;  %v464_v60 = vld [vmem:[#allocation6 + $0x540] sm:$0xff]  ;;  %v466_v61 = vld [vmem:[#allocation6 + $0x550] sm:$0xff] }
  0xd2   :  { %974 = vmatprep.subr.bf16.mxu0 %v973_v4  ;;  %v415_v4 = vld [vmem:[#allocation6 + $0x3b8] sm:$0xff] }
  0xd3   :  { %948 = vmatpush1.bf16.xpose.msra.mxu1 %v947_v3  ;;  %v1009_v6 = vpack.c.bf16 %v415_v4, %v413_v2  ;;  %v428_v2 = vld [vmem:[#allocation6 + $0x420] sm:$0xff]  ;;  %v430_v3 = vld [vmem:[#allocation6 + $0x430] sm:$0xff]  ;;  %v433_v4 = vld [vmem:[#allocation6 + $0x448] sm:$0xff] }
  0xd9   :  { %976 = vmatpush1.bf16.xpose.msra.mxu0 %v975_v9  ;;  %v353_v9 = vld [vmem:[#allocation6 + $0x1c8] sm:$0xff] }
  0xda   :  { %978 = vmatprep.subr.bf16.mxu0 %v977_v10  ;;  %v355_v10 = vld [vmem:[#allocation6 + $0x1d8] sm:$0xff] }
  0xdb   :  { %v949_v11 = vpack.c.bf16 %v355_v10, %v353_v9  ;;  %v434_v9 = vld [vmem:[#allocation6 + $0x450] sm:$0xff]  ;;  %v437_v10 = vld [vmem:[#allocation6 + $0x468] sm:$0xff] }
  0xdd   :  { %950 = vmatprep.subr.bf16.mxu1 %v949_v11  ;;  %v439_v11 = vld [vmem:[#allocation6 + $0x478] sm:$0xff] }
  0xe1   :  { %980 = vmatpush1.bf16.xpose.msra.mxu0 %v979_v16  ;;  %v951_v16 = vpack.c.bf16 %v354_v13, %v352_v12  ;;  %v1031_v12 = vpack.c.bf16 %v434_v9, %v432_v8  ;;  %v1033_v13 = vpack.c.bf16 %v439_v11, %v437_v10  ;;  %v488_v9 = vsub.s32 3, %v1253_v40 }
  0xe2   :  { %982 = vmatprep.subr.bf16.mxu0 %v981_v17  ;;  %v419_v17 = vld [vmem:[#allocation6 + $0x3d8] sm:$0xff] }
  0xe3   :  { %952 = vmatpush1.bf16.xpose.msra.mxu1 %v951_v16  ;;  %v1013_v19 = vpack.c.bf16 %v419_v17, %v417_v14  ;;  %v436_v14 = vld [vmem:[#allocation6 + $0x460] sm:$0xff]  ;;  %v438_v16 = vld [vmem:[#allocation6 + $0x470] sm:$0xff]  ;;  %v441_v17 = vld [vmem:[#allocation6 + $0x488] sm:$0xff] }
  0xe9   :  { %984 = vmatpush1.bf16.xpose.msra.mxu0 %v983_v22  ;;  %v357_v22 = vld [vmem:[#allocation6 + $0x1e8] sm:$0xff] }
  0xea   :  { %986 = vmatprep.subr.bf16.mxu0 %v985_v23  ;;  %v359_v23 = vld [vmem:[#allocation6 + $0x1f8] sm:$0xff] }
  0xeb   :  { %v953_v24 = vpack.c.bf16 %v359_v23, %v357_v22  ;;  %v442_v22 = vld [vmem:[#allocation6 + $0x490] sm:$0xff]  ;;  %v445_v23 = vld [vmem:[#allocation6 + $0x4a8] sm:$0xff] }
  0xed   :  { %954 = vmatprep.subr.bf16.mxu1 %v953_v24  ;;  %v447_v24 = vld [vmem:[#allocation6 + $0x4b8] sm:$0xff] }
  0xf1   :  { %988 = vmatpush1.bf16.xpose.msra.mxu0 %v987_v28  ;;  %v955_v28 = vpack.c.bf16 %v358_v26, %v356_v25  ;;  %v1039_v25 = vpack.c.bf16 %v442_v22, %v440_v21  ;;  %v1041_v26 = vpack.c.bf16 %v447_v24, %v445_v23 }
  0xf2   :  { %990 = vmatprep.subr.bf16.mxu0 %v989_v29  ;;  %v423_v29 = vld [vmem:[#allocation6 + $0x3f8] sm:$0xff] }
  0xf3   :  { %956 = vmatpush1.bf16.xpose.msra.mxu1 %v955_v28  ;;  %v1017_v31 = vpack.c.bf16 %v423_v29, %v421_v27  ;;  %v444_v27 = vld [vmem:[#allocation6 + $0x4a0] sm:$0xff]  ;;  %v446_v28 = vld [vmem:[#allocation6 + $0x4b0] sm:$0xff]  ;;  %v449_v29 = vld [vmem:[#allocation6 + $0x4c8] sm:$0xff] }
  0xf9   :  { %992 = vmatpush1.bf16.xpose.msra.mxu0 %v991_v35  ;;  %v425_v35 = vld [vmem:[#allocation6 + $0x408] sm:$0xff] }
  0xfa   :  { %994 = vmatprep.subr.bf16.mxu0 %v993_v36  ;;  %v427_v36 = vld [vmem:[#allocation6 + $0x418] sm:$0xff] }
  0xfb   :  { %v1021_v37 = vpack.c.bf16 %v427_v36, %v425_v35  ;;  %v450_v35 = vld [vmem:[#allocation6 + $0x4d0] sm:$0xff]  ;;  %v453_v36 = vld [vmem:[#allocation6 + $0x4e8] sm:$0xff] }
  0xfd   :  { %1022 = vmatprep.subr.bf16.mxu1 %v1021_v37  ;;  %v455_v37 = vld [vmem:[#allocation6 + $0x4f8] sm:$0xff] }
  0xfe   :  { %v1049_v39 = vpack.c.bf16 %v455_v37, %v453_v36 }
 0x101   :  { %996 = vmatpush1.bf16.xpose.msra.mxu0 %v995_v41  ;;  %v274_v41 = vsub.s32 0, %v1253_v40 }
 0x102   :  { %998 = vmatprep.subr.bf16.mxu0 %v997_v42  ;;  %v270_v42 = vld [vmem:[#allocation4] sm:$0x3] }
 0x103   :  { %v275_v44 = vrot.slane %v270_v42, %v274_v41  ;;  %v279_v45 = vrot.slane %v270_v42, %v278_v43  ;;  %v452_v42 = vld [vmem:[#allocation6 + $0x4e0] sm:$0xff] }
 0x109   :  { %1000 = vmatpush1.bf16.xpose.msra.mxu0 %v999_v15 }
 0x10a   :  { %1002 = vmatprep.subr.bf16.mxu0 %v1001_v47 }
 0x111   :  { %1004 = vmatpush1.bf16.xpose.msra.mxu0 %v1003_v58  ;;  %v426_v58 = vld [vmem:[#allocation6 + $0x410] sm:$0xff] }
 0x112   :  { %1006 = vmatprep.subr.bf16.mxu0 %v1005_v59  ;;  %v1023_v0 = vpack.c.bf16 %v426_v58, %v424_v57  ;;  %v467_v57 = vld [vmem:[#allocation6 + $0x558] sm:$0xff] }
 0x119   :  { %1008 = vmatpush1.bf16.xpose.msra.mxu0 %v1007_v5  ;;  %v435_v5 = vld [vmem:[#allocation6 + $0x458] sm:$0xff] }
 0x11a   :  { %1010 = vmatprep.subr.bf16.mxu0 %v1009_v6  ;;  %v1027_v6 = vpack.c.bf16 %v430_v3, %v428_v2  ;;  %v1029_v7 = vpack.c.bf16 %v435_v5, %v433_v4  ;;  %v468_v2 = vld [vmem:[#allocation6 + $0x560] sm:$0xff]  ;;  %v470_v3 = vld [vmem:[#allocation6 + $0x570] sm:$0xff]  ;;  %v484_v5 = vsub.s32 2, %v1253_v40 }
 0x11b   :  { %v1067_v4 = vpack.c.bf16 %v470_v3, %v468_v2 }
 0x121   :  { %1012 = vmatpush1.bf16.xpose.msra.mxu0 %v1011_v18  ;;  %v443_v18 = vld [vmem:[#allocation6 + $0x498] sm:$0xff] }
 0x122   :  { %1014 = vmatprep.subr.bf16.mxu0 %v1013_v19  ;;  %v1035_v19 = vpack.c.bf16 %v438_v16, %v436_v14  ;;  %v1037_v20 = vpack.c.bf16 %v443_v18, %v441_v17 }
 0x129   :  { %1016 = vmatpush1.bf16.xpose.msra.mxu0 %v1015_v30  ;;  %v451_v30 = vld [vmem:[#allocation6 + $0x4d8] sm:$0xff] }
 0x12a   :  { %1018 = vmatprep.subr.bf16.mxu0 %v1017_v31  ;;  %v1043_v31 = vpack.c.bf16 %v446_v28, %v444_v27  ;;  %v1045_v32 = vpack.c.bf16 %v451_v30, %v449_v29  ;;  %v496_v28 = vsub.s32 5, %v1253_v40 }
 0x131   :  { %1020 = vmatpush1.bf16.xpose.msra.mxu0 %v1019_v38  ;;  %v1047_v38 = vpack.c.bf16 %v450_v35, %v448_v33 }
 0x18b   :  { %v265_v46 = vpop.f32.mrb[0].mxu0 }
 0x18c   :  { %v282_v15 = vadd.f32 %v275_v44, %v265_v46  ;;  %v267_v47 = vpop.f32.mrb[1].mxu0  ;;  %v454_v44 = vld [vmem:[#allocation6 + $0x4f0] sm:$0xff]  ;;  %v459_v46 = vld [vmem:[#allocation6 + $0x518] sm:$0xff] }
 0x18d   :  { %v283_v48 = vadd.f32 %v279_v45, %v267_v47  ;;  %v457_v45 = vld [vmem:[#allocation6 + $0x508] sm:$0xff] }
 0x18e   :  { %v284_v49 = vsub.f32 0.0, %v282_v15  ;;  %v1053_v47 = vpack.c.bf16 %v459_v46, %v457_v45 }
 0x18f   :  { %v285_v50 = vsub.f32 0.0, %v283_v48 }
 0x190   :  { %v286_v51 = vmul.f32 1.442695, %v284_v49  ;;  %v458_v49 = vld [vmem:[#allocation6 + $0x510] sm:$0xff] }
 0x191   :  { %v288_v52 = vmul.f32 1.442695, %v285_v50  ;;  %v461_v50 = vld [vmem:[#allocation6 + $0x528] sm:$0xff] }
 0x192   :  { %1077 = vpow2.f32 %v286_v51  ;;  %v463_v51 = vld [vmem:[#allocation6 + $0x538] sm:$0xff] }
 0x193   :  { %1079 = vpow2.f32 %v288_v52 }
 0x19c   :  { %v1078_v53 = vpop.eup %1077 }
 0x19d   :  { %v1080_v54 = vpop.eup %1079  ;;  %v290_v55 = vadd.f32 1.0, %v1078_v53  ;;  %v1057_v53 = vpack.c.bf16 %v463_v51, %v461_v50 }
 0x19e   :  { %v291_v56 = vadd.f32 1.0, %v1080_v54  ;;  %v460_v54 = vld [vmem:[#allocation6 + $0x520] sm:$0xff] }
 0x19f   :  { %1081 = vrcp.f32 %v290_v55  ;;  %v462_v55 = vld [vmem:[#allocation6 + $0x530] sm:$0xff] }
 0x1a0   :  { %1083 = vrcp.f32 %v291_v56  ;;  %v465_v56 = vld [vmem:[#allocation6 + $0x548] sm:$0xff]  ;;  %v1059_v58 = vpack.c.bf16 %v462_v55, %v460_v54 }
 0x1a9   :  { %v1082_v59 = vpop.eup %1081 }
 0x1aa   :  { %v1084_v62 = vpop.eup %1083  ;;  %v1261_v34 = vmul.f32 %v1082_v59, %v282_v15  ;;  %v1051_v15 = vpack.c.bf16 %v454_v44, %v452_v42  ;;  %v1061_v59 = vpack.c.bf16 %v467_v57, %v465_v56 }
 0x1ab   :  { %v295_v63 = vmul.f32 %v1084_v62, %v283_v48  ;;  %v456_v48 = vld [vmem:[#allocation6 + $0x500] sm:$0xff]  ;;  %v469_v62 = vld [vmem:[#allocation6 + $0x568] sm:$0xff] }
 0x1ac   :  { %v1055_v52 = vpack.c.bf16 %v458_v49, %v456_v48 }
 0x1ad   :  { %568 = vmatprep.mubr.f32.mxu1 %v295_v63  ;;  %639 = vmatprep.mubr.f32.mxu0 %v295_v63 }
 0x1ae   :  { %569 = vmatmul.mubr.f32.vlgmr.msra.gmra.mrb[0].mxu1 %v1261_v34  ;;  %640 = vmatmul.mubr.f32.vlgmr.msra.gmra.mrb[2].mxu0 %v1261_v34 }
 0x1af   :  { %1024 = vmatpush1.bf16.xpose.msra.mxu1 %v1023_v0  ;;  %710 = vmatprep.mubr.f32.mxu1 %v295_v63  ;;  %v471_v63 = vld [vmem:[#allocation6 + $0x578] sm:$0xff]  ;;  %v1063_v0 = vpack.c.bf16 %v466_v61, %v464_v60 }
 0x1b0   :  { %1026 = vmatprep.subr.bf16.mxu1 %v1025_v1  ;;  %v1065_v1 = vpack.c.bf16 %v471_v63, %v469_v62 }
 0x1b7   :  { %1028 = vmatpush1.bf16.xpose.msra.mxu1 %v1027_v6  ;;  %v472_v6 = vld [vmem:[%s1289_s5] sm:$0x3f] }
 0x1b8   :  { %1030 = vmatprep.subr.bf16.mxu1 %v1029_v7  ;;  %v1160_v7 = vmov 1983009808   ;;  %v477_v10 = vrot.slane %v472_v6, %v274_v41  ;;  %v485_v11 = vrot.slane %v472_v6, %v484_v5  ;;  %v489_v14 = vrot.slane %v472_v6, %v488_v9 }
 0x1b9   :  { %v726_v8 = vunpack.c.l.s4 %v1160_v7  ;;  %v497_v30 = vrot.slane %v472_v6, %v496_v28 }
 0x1bf   :  { %1032 = vmatpush1.bf16.xpose.msra.mxu1 %v1031_v12  ;;  %v481_v12 = vrot.slane %v472_v6, %v278_v43  ;;  %v492_v43 = vsub.s32 4, %v1253_v40 }
 0x1c0   :  { %1034 = vmatprep.subr.bf16.mxu1 %v1033_v13  ;;  %v727_v13 = vunpack.c.0.s8 %v726_v8 }
 0x1c1   :  { %v493_v29 = vrot.slane %v472_v6, %v492_v43 }
 0x1c2   :  { %v730_v22 = vsub.s32 %v727_v13, %v1253_v40 }
 0x1c7   :  { %1036 = vmatpush1.bf16.xpose.msra.mxu1 %v1035_v19 }
 0x1c8   :  { %1038 = vmatprep.subr.bf16.mxu1 %v1037_v20 }
 0x1cf   :  { %1040 = vmatpush1.bf16.xpose.msra.mxu1 %v1039_v25 }
 0x1d0   :  { %1042 = vmatprep.subr.bf16.mxu1 %v1041_v26 }
 0x1d7   :  { %1044 = vmatpush1.bf16.xpose.msra.mxu1 %v1043_v31 }
 0x1d8   :  { %1046 = vmatprep.subr.bf16.mxu1 %v1045_v32 }
 0x1df   :  { %1048 = vmatpush1.bf16.xpose.msra.mxu1 %v1047_v38 }
 0x1e0   :  { %1050 = vmatprep.subr.bf16.mxu1 %v1049_v39 }
 0x1e7   :  { %1052 = vmatpush1.bf16.xpose.msra.mxu1 %v1051_v15 }
 0x1e8   :  { %1054 = vmatprep.subr.bf16.mxu1 %v1053_v47 }
 0x1ef   :  { %1056 = vmatpush1.bf16.xpose.msra.mxu1 %v1055_v52 }
 0x1f0   :  { %1058 = vmatprep.subr.bf16.mxu1 %v1057_v53 }
 0x1f7   :  { %1060 = vmatpush1.bf16.xpose.msra.mxu1 %v1059_v58 }
 0x1f8   :  { %1062 = vmatprep.subr.bf16.mxu1 %v1061_v59 }
 0x1ff   :  { %1064 = vmatpush1.bf16.xpose.msra.mxu1 %v1063_v0 }
 0x200   :  { %1066 = vmatprep.subr.bf16.mxu1 %v1065_v1 }
 0x207   :  { %1068 = vmatpush1.bf16.xpose.msra.mxu1 %v1067_v4 }
 0x20e   :  { %711 = vmatmul.mubr.f32.vlgmr.msra.gmra.mrb[2].mxu1 %v1261_v34 }
 0x281   :  { %v570_v34 = vpop.f32.mrb[0].mxu1  ;;  %v641_v16 = vpop.f32.mrb[2].mxu0 }
 0x282   :  { %v571_v17 = vadd.f32 %v570_v34, %v477_v10  ;;  %v642_v18 = vadd.f32 %v641_v16, %v485_v11  ;;  %v572_v19 = vpop.f32.mrb[1].mxu1  ;;  %v643_v20 = vpop.f32.mrb[3].mxu0 }
 0x283   :  { %v573_v21 = vadd.f32 %v572_v19, %v481_v12  ;;  %v644_v23 = vadd.f32 %v643_v20, %v489_v14 }
 0x285   :  { %v723_v24 = vcombine.low %v571_v17, %v573_v21  ;;  %v724_v25 = vcombine.low %v642_v18, %v644_v23 }
 0x287   :  { %v731_v26 = vrot.slane %v723_v24, %v730_v22  ;;  %v738_v41 = vrot.slane %v724_v25, %v730_v22 }
 0x289   :  { %v739_v27 = vcombine.low %v731_v26, %v738_v41 }
 0x28b   :  { %750 = vst [vmem:[%s1290_s6] sm:$0xff] %v739_v27 }
 0x2e1   :  { %v712_v31 = vpop.f32.mrb[2].mxu1 }
 0x2e2   :  { %v713_v32 = vadd.f32 %v712_v31, %v493_v29  ;;  %v714_v33 = vpop.f32.mrb[3].mxu1 }
 0x2e3   :  { %v715_v35 = vadd.f32 %v714_v33, %v497_v30 }
 0x2e5   :  { %v740_v36 = vcombine.low %v713_v32, %v715_v35 }
 0x2e7   :  { %v747_v37 = vrot.slane %v740_v36, %v730_v22 }
 0x2e9   :  { %754 = vst.msk [vmem:[%s1290_s6 + $0x8] sm:$0xf] %vm753_vm2, %v747_v37 }
 0x2ea   :  { %759 = vsyncpa [#allocation3], 1 }
 0x2eb   :  { %760 = vsyncpa [#allocation5], 1 }

// kernel: scorenet_forward.9
= control target key start
LH: loop header
LB: loop body
LE: loop exit
PB: predicated region body
PF: predicated region fallthrough
CT: control target
= control target key end

     0   :  { %s2522_s18 = smov 0   ;;  %s4680_s0 = inlined_call_operand.vmem [shape: f32[2,676,32], index: 0, kind: input, shape index: {}]   ;;  %s4681_s1 = inlined_call_operand.vmem [shape: f32[2,1,32], index: 1, kind: input, shape index: {}]   ;;  %s4682_s2 = inlined_call_operand.vmem [shape: f32[1,32], index: 2, kind: input, shape index: {}]   ;;  %s4683_s3 = inlined_call_operand.vmem [shape: f32[1,32], index: 3, kind: input, shape index: {}]   ;;  %s4684_s4 = inlined_call_operand.vmem [shape: f32[32,4], index: 4, kind: input, shape index: {}]   ;;  %s4685_s5 = inlined_call_operand.vmem [shape: f32[2,676,32], index: 5, kind: output, shape index: {}]  }
   0x1 LB: > { %s2013_s19 = sadd.s32 4294967295, %s2487_s18   ;;  %p2017_p0 = scmp.ge.s32.totalorder %s2487_s18, 1  ;;  %s2487_s18 = sphi %s2522_s18, %s15_s18  }
   0x2   : > { %p195_p1 = scmp.lt.s32.totalorder %s2487_s18, 3 }
   0x4   : > { %p196_p2 = pnand %p2017_p0, %p195_p1 }
   0x6   : > { %199 = sbr.rel (%p196_p2) target bundleno = 978 (0x3d2), region = 40 }
   0xd   : > { %v853_v0 = vld [vmem:[%s4684_s4] sm:$0xff]  ;;  %v854_v1 = vld [vmem:[%s4684_s4 + $0x8] sm:$0xff]  ;;  %v855_v2 = vld [vmem:[%s4684_s4 + $0x10] sm:$0xff]  ;;  %v4686_v3 = vmov 0.0|0.0   ;;  %p226_p3 = scmp.lt.s32.totalorder %s2013_s19, 1  ;;  %vm2490_vm0 = vmmov 0  }
   0xe   : > { %2099 = vmatprep.subr.bf16.mxu0 %v4686_v3  ;;  %v2540_v4 = vpack.c.bf16 %v854_v1, %v853_v0  ;;  %2105 = vmatprep.subr.bf16.mxu1 %v4686_v3  ;;  %v856_v5 = vld [vmem:[%s4684_s4 + $0x18] sm:$0xff]  ;;  %v4688_v6 = vmov 0.0   ;;  %vm416_vm1 = vcmask 261120   ;;  %vm584_vm2 = vcmask 257024  }
   0xf   : > { %2063 = vmatprep.mubr.msk.f32.mxu0 %vm2490_vm0, %v4688_v6  ;;  %2074 = vmatprep.mubr.msk.f32.mxu1 %vm2490_vm0, %v4688_v6  ;;  %v2552_v7 = vpack.c.bf16 %v856_v5, %v855_v2  ;;  %s5354_s19 = smov (!%p226_p3, %s2013_s19), 1  ;;  %vm1010_vm3 = vcmask 31744  }
  0x10   : > { %4861 = vst [vmem:[#allocation2_spill] sm:$0xff] %v2540_v4  ;;  %2101 = vmatpush3.bf16.msra.mxu0 %v2540_v4  ;;  %2107 = vmatpush3.bf16.msra.mxu1 %v2540_v4  ;;  %s2127_s28 = smul.u32 680, %s5354_s19  ;;  %s233_s6 = scalar_lea.vmem %s4681_s1, %s5354_s19  ;;  %vm3263_vm4 = vmpackc.low %vm1010_vm3, %vm1010_vm3 }
  0x11   : > { %4862 = vst [vmem:[#allocation3_spill] sm:$0xff] %v2552_v7  ;;  %2102 = vmatprep.subr.bf16.mxu0 %v4686_v3  ;;  %2108 = vmatprep.subr.bf16.mxu1 %v4686_v3  ;;  %v2563_v8 = vld [vmem:[%s233_s6] ss:$0 sm:$0xff] }
  0x12   : > { %s2572_s9 = scalar_lea.vmem %s4680_s0, %s2127_s28  ;;  %s4349_s16 = scalar_lea.vmem %s4685_s5, %s2127_s28 }
  0x13   : > { %v239_v9 = vld [vmem:[%s2572_s9] sm:$0xff]  ;;  %v240_v10 = vld [vmem:[%s2572_s9 + $0x8] sm:$0xff]  ;;  %v241_v11 = vld [vmem:[%s2572_s9 + $0x10] sm:$0xff] }
  0x14   : > { %2104 = vmatpush3.bf16.msra.mxu0 %v2552_v7  ;;  %2110 = vmatpush3.bf16.msra.mxu1 %v2552_v7  ;;  %v242_v12 = vld [vmem:[%s2572_s9 + $0x18] sm:$0xff]  ;;  %v2581_v13 = vadd.f32 %v2563_v8, %v239_v9  ;;  %v2584_v14 = vadd.f32 %v2563_v8, %v240_v10  ;;  %v2587_v15 = vadd.f32 %v2563_v8, %v241_v11  ;;  %v243_v16 = vld [vmem:[%s2572_s9 + $0x20] sm:$0xff]  ;;  %v244_v20 = vld [vmem:[%s2572_s9 + $0x28] sm:$0xff] }
  0x15   : > { %2111 = vmatprep.subr.bf16.mxu0 %v4686_v3  ;;  %2119 = vmatprep.subr.bf16.mxu1 %v4686_v3  ;;  %v2593_v18 = vadd.f32 %v2563_v8, %v242_v12  ;;  %v245_v21 = vld [vmem:[%s2572_s9 + $0x30] sm:$0xff]  ;;  %v246_v22 = vld [vmem:[%s2572_s9 + $0x38] sm:$0xff]  ;;  %v247_v24 = vld [vmem:[%s2572_s9 + $0x40] sm:$0xff]  ;;  %v2604_v27 = vadd.f32 %v2563_v8, %v243_v16  ;;  %v2615_v36 = vadd.f32 %v2563_v8, %v244_v20 }
  0x16   : > { %4863 = vst [vmem:[#allocation4_spill] sm:$0xff] %v2581_v13  ;;  %4864 = vst [vmem:[#allocation5_spill] sm:$0xff] %v2584_v14  ;;  %v417_v17 = vsel %vm416_vm1, %v2581_v13, 0.0  ;;  %v418_v19 = vsel %vm416_vm1, %v2584_v14, 0.0  ;;  %v248_v25 = vld [vmem:[%s2572_s9 + $0x48] sm:$0xff]  ;;  %v249_v26 = vld [vmem:[%s2572_s9 + $0x50] sm:$0xff]  ;;  %v2618_v37 = vadd.f32 %v2563_v8, %v245_v21  ;;  %v2621_v38 = vadd.f32 %v2563_v8, %v246_v22 }
  0x17   : > { %4865 = vst [vmem:[#allocation6_spill] sm:$0xff] %v2587_v15  ;;  %4866 = vst [vmem:[#allocation7_spill] sm:$0xff] %v2593_v18  ;;  %v419_v23 = vadd.f32 %v418_v19, %v417_v17  ;;  %v420_v28 = vsel %vm416_vm1, %v2587_v15, 0.0  ;;  %v250_v29 = vld [vmem:[%s2572_s9 + $0x58] sm:$0xff]  ;;  %v251_v30 = vld [vmem:[%s2572_s9 + $0x60] sm:$0xff]  ;;  %v422_v39 = vsel %vm416_vm1, %v2593_v18, 0.0  ;;  %v2626_v40 = vadd.f32 %v2563_v8, %v247_v24 }
  0x18   : > { %4867 = vst [vmem:[#allocation8_spill] sm:$0xff] %v2604_v27  ;;  %v252_v31 = vld [vmem:[%s2572_s9 + $0x68] sm:$0xff]  ;;  %v253_v33 = vld [vmem:[%s2572_s9 + $0x70] sm:$0xff]  ;;  %v254_v34 = vld [vmem:[%s2572_s9 + $0x78] sm:$0xff]  ;;  %v2629_v41 = vadd.f32 %v2563_v8, %v248_v25  ;;  %v2632_v42 = vadd.f32 %v2563_v8, %v249_v26  ;;  %v2635_v44 = vadd.f32 %v2563_v8, %v250_v29  ;;  %v2638_v45 = vadd.f32 %v2563_v8, %v251_v30 }
  0x19   : > { %v421_v32 = vadd.f32 %v420_v28, %v419_v23  ;;  %v255_v35 = vld [vmem:[%s2572_s9 + $0x80] sm:$0xff]  ;;  %v2641_v46 = vadd.f32 %v2563_v8, %v252_v31  ;;  %v424_v47 = vsel %vm416_vm1, %v2604_v27, 0.0  ;;  %v272_v48 = vld [vmem:[%s2572_s9 + $0x108] sm:$0xff]  ;;  %v273_v49 = vld [vmem:[%s2572_s9 + $0x110] sm:$0xff]  ;;  %v2649_v51 = vadd.f32 %v2563_v8, %v253_v33 }
  0x1a   : > { %v274_v50 = vld [vmem:[%s2572_s9 + $0x118] sm:$0xff]  ;;  %v2652_v52 = vadd.f32 %v2563_v8, %v254_v34  ;;  %v2655_v53 = vadd.f32 %v2563_v8, %v255_v35  ;;  %v275_v55 = vld [vmem:[%s2572_s9 + $0x120] sm:$0xff]  ;;  %v276_v56 = vld [vmem:[%s2572_s9 + $0x128] sm:$0xff]  ;;  %v2661_v58 = vadd.f32 %v2563_v8, %v272_v48  ;;  %v2664_v59 = vadd.f32 %v2563_v8, %v273_v49 }
  0x1b   : > { %v423_v43 = vadd.f32 %v422_v39, %v421_v32  ;;  %v277_v57 = vld [vmem:[%s2572_s9 + $0x130] sm:$0xff]  ;;  %v2667_v60 = vadd.f32 %v2563_v8, %v274_v50  ;;  %v426_v61 = vsel %vm416_vm1, %v2615_v36, 0.0  ;;  %v278_v62 = vld [vmem:[%s2572_s9 + $0x138] sm:$0xff]  ;;  %v279_v63 = vld [vmem:[%s2572_s9 + $0x140] sm:$0xff]  ;;  %v2675_v1 = vadd.f32 %v2563_v8, %v275_v55 }
  0x1c   : > { %4868 = vst [vmem:[#allocation9_spill] sm:$0xff] %v2652_v52  ;;  %4869 = vst [vmem:[#allocation10_spill] sm:$0xff] %v2655_v53  ;;  %v280_v0 = vld [vmem:[%s2572_s9 + $0x148] sm:$0xff]  ;;  %v2678_v2 = vadd.f32 %v2563_v8, %v276_v56  ;;  %v2681_v5 = vadd.f32 %v2563_v8, %v277_v57  ;;  %v281_v10 = vld [vmem:[%s2572_s9 + $0x150] sm:$0xff]  ;;  %v2687_v16 = vadd.f32 %v2563_v8, %v278_v62  ;;  %v428_v20 = vsel %vm416_vm1, %v2618_v37, 0.0 }
  0x1d   : > { %v425_v54 = vadd.f32 %v424_v47, %v423_v43  ;;  %4870 = vst [vmem:[#allocation11_spill] sm:$0xff] %v2661_v58  ;;  %4871 = vst [vmem:[#allocation12_spill] sm:$0xff] %v2664_v59  ;;  %v282_v11 = vld [vmem:[%s2572_s9 + $0x158] sm:$0xff]  ;;  %v283_v12 = vld [vmem:[%s2572_s9 + $0x160] sm:$0xff]  ;;  %v2690_v17 = vadd.f32 %v2563_v8, %v279_v63  ;;  %v2693_v19 = vadd.f32 %v2563_v8, %v280_v0  ;;  %v430_v35 = vsel %vm416_vm1, %v2621_v38, 0.0 }
  0x1e   : > { %4872 = vst [vmem:[#allocation13_spill] sm:$0xff] %v2667_v60  ;;  %4873 = vst [vmem:[#allocation14_spill] sm:$0xff] %v2675_v1  ;;  %v284_v21 = vld [vmem:[%s2572_s9 + $0x168] sm:$0xff]  ;;  %v285_v22 = vld [vmem:[%s2572_s9 + $0x170] sm:$0xff]  ;;  %v2701_v24 = vadd.f32 %v2563_v8, %v281_v10  ;;  %v2704_v25 = vadd.f32 %v2563_v8, %v282_v11  ;;  %v2707_v26 = vadd.f32 %v2563_v8, %v283_v12  ;;  %v432_v0 = vsel %vm416_vm1, %v2626_v40, 0.0 }
  0x1f   : > { %4874 = vst [vmem:[#allocation15_spill] sm:$0xff] %v2678_v2  ;;  %4875 = vst [vmem:[#allocation16_spill] sm:$0xff] %v2681_v5  ;;  %v427_v9 = vadd.f32 %v426_v61, %v425_v54  ;;  %v286_v23 = vld [vmem:[%s2572_s9 + $0x178] sm:$0xff]  ;;  %v287_v29 = vld [vmem:[%s2572_s9 + $0x180] sm:$0xff]  ;;  %v2713_v32 = vadd.f32 %v2563_v8, %v284_v21  ;;  %v2716_v33 = vadd.f32 %v2563_v8, %v285_v22 }
  0x20   : > { %4876 = vst [vmem:[#allocation17_spill] sm:$0xff] %v2687_v16  ;;  %4877 = vst [vmem:[#allocation18_spill] sm:$0xff] %v2690_v17  ;;  %v288_v30 = vld [vmem:[%s2572_s9 + $0x188] sm:$0xff]  ;;  %v289_v31 = vld [vmem:[%s2572_s9 + $0x190] sm:$0xff]  ;;  %v2719_v34 = vadd.f32 %v2563_v8, %v286_v23  ;;  %v2727_v48 = vadd.f32 %v2563_v8, %v287_v29 }
  0x21   : > { %4878 = vst [vmem:[#allocation19_spill] sm:$0xff] %v2693_v19  ;;  %4879 = vst [vmem:[#allocation20_spill] sm:$0xff] %v2701_v24  ;;  %v429_v28 = vadd.f32 %v428_v20, %v427_v9  ;;  %v290_v39 = vld [vmem:[%s2572_s9 + $0x198] sm:$0xff]  ;;  %v291_v43 = vld [vmem:[%s2572_s9 + $0x1a0] sm:$0xff]  ;;  %v2730_v49 = vadd.f32 %v2563_v8, %v288_v30  ;;  %v2733_v50 = vadd.f32 %v2563_v8, %v289_v31 }
  0x22   : > { %4880 = vst [vmem:[#allocation21_spill] sm:$0xff] %v2704_v25  ;;  %4881 = vst [vmem:[#allocation22_spill] sm:$0xff] %v2707_v26  ;;  %v292_v47 = vld [vmem:[%s2572_s9 + $0x1a8] sm:$0xff]  ;;  %v293_v55 = vld [vmem:[%s2572_s9 + $0x1b0] sm:$0xff]  ;;  %v2739_v61 = vadd.f32 %v2563_v8, %v290_v39  ;;  %v2742_v62 = vadd.f32 %v2563_v8, %v291_v43  ;;  %v434_v39 = vsel %vm416_vm1, %v2629_v41, 0.0 }
  0x23   : > { %4882 = vst [vmem:[#allocation23_spill] sm:$0xff] %v2713_v32  ;;  %4883 = vst [vmem:[#allocation24_spill] sm:$0xff] %v2716_v33  ;;  %v431_v54 = vadd.f32 %v430_v35, %v429_v28  ;;  %v294_v56 = vld [vmem:[%s2572_s9 + $0x1b8] sm:$0xff]  ;;  %v295_v57 = vld [vmem:[%s2572_s9 + $0x1c0] sm:$0xff]  ;;  %v2745_v63 = vadd.f32 %v2563_v8, %v292_v47  ;;  %v2753_v12 = vadd.f32 %v2563_v8, %v293_v55 }
  0x24   : > { %4884 = vst [vmem:[#allocation25_spill] sm:$0xff] %v2719_v34  ;;  %4885 = vst [vmem:[#allocation26_spill] sm:$0xff] %v2727_v48  ;;  %v296_v9 = vld [vmem:[%s2572_s9 + $0x1c8] sm:$0xff]  ;;  %v297_v10 = vld [vmem:[%s2572_s9 + $0x1d0] sm:$0xff]  ;;  %v2756_v20 = vadd.f32 %v2563_v8, %v294_v56  ;;  %v2759_v21 = vadd.f32 %v2563_v8, %v295_v57 }
  0x25   : > { %4886 = vst [vmem:[#allocation27_spill] sm:$0xff] %v2730_v49  ;;  %4887 = vst [vmem:[#allocation28_spill] sm:$0xff] %v2733_v50  ;;  %v298_v11 = vld [vmem:[%s2572_s9 + $0x1d8] sm:$0xff]  ;;  %v433_v22 = vadd.f32 %v432_v0, %v431_v54  ;;  %v299_v23 = vld [vmem:[%s2572_s9 + $0x1e0] sm:$0xff]  ;;  %v2765_v30 = vadd.f32 %v2563_v8, %v296_v9  ;;  %v2768_v31 = vadd.f32 %v2563_v8, %v297_v10 }
  0x26   : > { %4888 = vst [vmem:[#allocation29_spill] sm:$0xff] %v2759_v21  ;;  %v300_v28 = vld [vmem:[%s2572_s9 + $0x1e8] sm:$0xff]  ;;  %v301_v29 = vld [vmem:[%s2572_s9 + $0x1f0] sm:$0xff]  ;;  %v2771_v35 = vadd.f32 %v2563_v8, %v298_v11  ;;  %v302_v43 = vld [vmem:[%s2572_s9 + $0x1f8] sm:$0xff]  ;;  %v2779_v55 = vadd.f32 %v2563_v8, %v299_v23 }
  0x27   : > { %4889 = vst [vmem:[#allocation30_spill] sm:$0xff] %v2765_v30  ;;  %4890 = vst [vmem:[#allocation31_spill] sm:$0xff] %v2768_v31  ;;  %v303_v47 = vld [vmem:[%s2572_s9 + $0x200] sm:$0xff]  ;;  %v304_v54 = vld [vmem:[%s2572_s9 + $0x208] sm:$0xff]  ;;  %v2782_v56 = vadd.f32 %v2563_v8, %v300_v28  ;;  %v2785_v57 = vadd.f32 %v2563_v8, %v301_v29  ;;  %v435_v0 = vadd.f32 %v434_v39, %v433_v22  ;;  %v436_v28 = vsel %vm416_vm1, %v2632_v42, 0.0 }
  0x28   : > { %4891 = vst [vmem:[#allocation32_spill] sm:$0xff] %v2771_v35  ;;  %4892 = vst [vmem:[#allocation33_spill] sm:$0xff] %v2779_v55  ;;  %v305_v9 = vld [vmem:[%s2572_s9 + $0x210] sm:$0xff]  ;;  %v306_v10 = vld [vmem:[%s2572_s9 + $0x218] sm:$0xff]  ;;  %v2791_v3 = vadd.f32 %v2563_v8, %v302_v43  ;;  %v2794_v6 = vadd.f32 %v2563_v8, %v303_v47  ;;  %v2797_v23 = vadd.f32 %v2563_v8, %v304_v54 }
  0x29   : > { %4893 = vst [vmem:[#allocation34_spill] sm:$0xff] %v2782_v56  ;;  %4894 = vst [vmem:[#allocation35_spill] sm:$0xff] %v2785_v57  ;;  %v307_v11 = vld [vmem:[%s2572_s9 + $0x220] sm:$0xff]  ;;  %v308_v22 = vld [vmem:[%s2572_s9 + $0x228] sm:$0xff]  ;;  %v2805_v7 = vadd.f32 %v2563_v8, %v305_v9  ;;  %v2808_v43 = vadd.f32 %v2563_v8, %v306_v10  ;;  %v437_v54 = vadd.f32 %v436_v28, %v435_v0  ;;  %v438_v10 = vsel %vm416_vm1, %v2635_v44, 0.0 }
  0x2a   : > { %4895 = vst [vmem:[#allocation36_spill] sm:$0xff] %v2791_v3  ;;  %4896 = vst [vmem:[#allocation37_spill] sm:$0xff] %v2794_v6  ;;  %v309_v29 = vld [vmem:[%s2572_s9 + $0x230] sm:$0xff]  ;;  %v310_v39 = vld [vmem:[%s2572_s9 + $0x238] sm:$0xff]  ;;  %v2811_v47 = vadd.f32 %v2563_v8, %v307_v11  ;;  %v2817_v3 = vadd.f32 %v2563_v8, %v308_v22 }
  0x2b   : > { %4897 = vst [vmem:[#allocation38_spill] sm:$0xff] %v2797_v23  ;;  %4898 = vst [vmem:[#allocation39_spill] sm:$0xff] %v2805_v7  ;;  %v311_v4 = vld [vmem:[%s2572_s9 + $0x240] sm:$0xff]  ;;  %v312_v23 = vld [vmem:[%s2572_s9 + $0x248] sm:$0xff]  ;;  %v2820_v57 = vadd.f32 %v2563_v8, %v309_v29  ;;  %v2823_v9 = vadd.f32 %v2563_v8, %v310_v39  ;;  %v439_v39 = vadd.f32 %v438_v10, %v437_v54 }
  0x2c   : > { %4899 = vst [vmem:[#allocation40_spill] sm:$0xff] %v2808_v43  ;;  %4900 = vst [vmem:[#allocation41_spill] sm:$0xff] %v2811_v47  ;;  %v313_v6 = vld [vmem:[%s2572_s9 + $0x250] sm:$0xff]  ;;  %v256_v0 = vld [vmem:[%s2572_s9 + $0x88] sm:$0xff]  ;;  %v2832_v43 = vadd.f32 %v2563_v8, %v311_v4  ;;  %v2835_v22 = vadd.f32 %v2563_v8, %v312_v23  ;;  %v440_v23 = vsel %vm416_vm1, %v2638_v45, 0.0 }
  0x2d   : > { %4901 = vst [vmem:[#allocation42_spill] sm:$0xff] %v2817_v3  ;;  %4902 = vst [vmem:[#allocation43_spill] sm:$0xff] %v2820_v57  ;;  %v314_v11 = vld [vmem:[%s2572_s9 + $0x258] sm:$0xff]  ;;  %v315_v28 = vld [vmem:[%s2572_s9 + $0x260] sm:$0xff]  ;;  %v2838_v29 = vadd.f32 %v2563_v8, %v313_v6 }
  0x2e   : > { %4903 = vst [vmem:[#allocation44_spill] sm:$0xff] %v2823_v9  ;;  %v316_v47 = vld [vmem:[%s2572_s9 + $0x268] sm:$0xff]  ;;  %4904 = vst [vmem:[#allocation45_spill] sm:$0xff] %v2832_v43  ;;  %v317_v9 = vld [vmem:[%s2572_s9 + $0x270] sm:$0xff]  ;;  %v2844_v7 = vadd.f32 %v2563_v8, %v314_v11  ;;  %v2847_v56 = vadd.f32 %v2563_v8, %v315_v28  ;;  %v441_v28 = vadd.f32 %v440_v23, %v439_v39  ;;  %v444_v23 = vsel %vm416_vm1, %v2649_v51, 0.0 }
  0x2f   : > { %4905 = vst [vmem:[#allocation46_spill] sm:$0xff] %v2835_v22  ;;  %4906 = vst [vmem:[#allocation47_spill] sm:$0xff] %v2838_v29  ;;  %v318_v57 = vld [vmem:[%s2572_s9 + $0x278] sm:$0xff]  ;;  %v319_v3 = vld [vmem:[%s2572_s9 + $0x280] sm:$0xff]  ;;  %v2850_v4 = vadd.f32 %v2563_v8, %v316_v47  ;;  %v2858_v54 = vadd.f32 %v2563_v8, %v317_v9 }
  0x30   : > { %4907 = vst [vmem:[#allocation48_spill] sm:$0xff] %v2844_v7  ;;  %4908 = vst [vmem:[#allocation49_spill] sm:$0xff] %v2847_v56  ;;  %v320_v6 = vld [vmem:[%s2572_s9 + $0x288] sm:$0xff]  ;;  %v321_v29 = vld [vmem:[%s2572_s9 + $0x290] sm:$0xff]  ;;  %v2861_v10 = vadd.f32 %v2563_v8, %v318_v57  ;;  %v2864_v11 = vadd.f32 %v2563_v8, %v319_v3  ;;  %v442_v57 = vsel %vm416_vm1, %v2641_v46, 0.0 }
  0x31   : > { %4909 = vst [vmem:[#allocation50_spill] sm:$0xff] %v2850_v4  ;;  %v322_v22 = vld [vmem:[%s2572_s9 + $0x298] sm:$0xff]  ;;  %4910 = vst [vmem:[#allocation51_spill] sm:$0xff] %v2858_v54  ;;  %v323_v47 = vld [vmem:[%s2572_s9 + $0x2a0] sm:$0xf]  ;;  %v2868_v4 = vadd.f32 %v2563_v8, %v320_v6  ;;  %v2871_v56 = vadd.f32 %v2563_v8, %v321_v29  ;;  %v443_v39 = vadd.f32 %v442_v57, %v441_v28 }
  0x32   : > { %4911 = vst [vmem:[#allocation52_spill] sm:$0xff] %v2861_v10  ;;  %4912 = vst [vmem:[#allocation53_spill] sm:$0xff] %v2864_v11  ;;  %v2874_v7 = vadd.f32 %v2563_v8, %v322_v22  ;;  %v257_v9 = vld [vmem:[%s2572_s9 + $0x90] sm:$0xff]  ;;  %v2880_v3 = vadd.f32 %v2563_v8, %v323_v47  ;;  %v2885_v6 = vadd.f32 %v2563_v8, %v256_v0  ;;  %v446_v22 = vsel %vm416_vm1, %v2652_v52, 0.0  ;;  %v258_v29 = vld [vmem:[%s2572_s9 + $0x98] sm:$0xff] }
  0x33   : > { %4913 = vst [vmem:[#allocation54_spill] sm:$0xff] %v2868_v4  ;;  %4914 = vst [vmem:[#allocation55_spill] sm:$0xff] %v2871_v56  ;;  %v2891_v56 = vadd.f32 %v2563_v8, %v257_v9  ;;  %v448_v47 = vsel %vm416_vm1, %v2655_v53, 0.0  ;;  %v259_v28 = vld [vmem:[%s2572_s9 + $0xa0] sm:$0xff]  ;;  %v260_v4 = vld [vmem:[%s2572_s9 + $0xa8] sm:$0xff] }
  0x34   : > { %4915 = vst [vmem:[#allocation56_spill] sm:$0xff] %v2874_v7  ;;  %4916 = vst [vmem:[#allocation57_spill] sm:$0xff] %v2880_v3  ;;  %v445_v7 = vadd.f32 %v444_v23, %v443_v39  ;;  %v2897_v3 = vadd.f32 %v2563_v8, %v258_v29  ;;  %v450_v0 = vsel %vm416_vm1, %v2885_v6, 0.0  ;;  %v2903_v39 = vadd.f32 %v2563_v8, %v259_v28  ;;  %v261_v23 = vld [vmem:[%s2572_s9 + $0xb0] sm:$0xff]  ;;  %v262_v29 = vld [vmem:[%s2572_s9 + $0xb8] sm:$0xff] }
  0x35   : > { %4917 = vst [vmem:[#allocation58_spill] sm:$0xff] %v2885_v6  ;;  %4918 = vst [vmem:[#allocation59_spill] sm:$0xff] %v2891_v56  ;;  %v452_v9 = vsel %vm416_vm1, %v2891_v56, 0.0 }
  0x36   : > { %v447_v57 = vadd.f32 %v446_v22, %v445_v7  ;;  %4919 = vst [vmem:[#allocation60_spill] sm:$0xff] %v2897_v3  ;;  %4920 = vst [vmem:[#allocation61_spill] sm:$0xff] %v2903_v39  ;;  %v2909_v7 = vadd.f32 %v2563_v8, %v260_v4  ;;  %v454_v22 = vsel %vm416_vm1, %v2897_v3, 0.0  ;;  %v456_v28 = vsel %vm416_vm1, %v2903_v39, 0.0 }
  0x38   : > { %v449_v11 = vadd.f32 %v448_v47, %v447_v57  ;;  %4921 = vst [vmem:[#allocation62_spill] sm:$0xff] %v2909_v7  ;;  %v2915_v47 = vadd.f32 %v2563_v8, %v261_v23  ;;  %v263_v57 = vld [vmem:[%s2572_s9 + $0xc0] sm:$0xff]  ;;  %v458_v4 = vsel %vm416_vm1, %v2909_v7, 0.0  ;;  %v265_v23 = vld [vmem:[%s2572_s9 + $0xd0] sm:$0xff] }
  0x3a   : > { %v451_v10 = vadd.f32 %v450_v0, %v449_v11  ;;  %4922 = vst [vmem:[#allocation63_spill] sm:$0xff] %v2915_v47  ;;  %v2921_v11 = vadd.f32 %v2563_v8, %v262_v29  ;;  %v264_v0 = vld [vmem:[%s2572_s9 + $0xc8] sm:$0xff]  ;;  %v266_v29 = vld [vmem:[%s2572_s9 + $0xd8] sm:$0xff] }
  0x3c   : > { %v453_v54 = vadd.f32 %v452_v9, %v451_v10  ;;  %4923 = vst [vmem:[#allocation64_spill] sm:$0xff] %v2921_v11  ;;  %v2927_v10 = vadd.f32 %v2563_v8, %v263_v57  ;;  %v460_v9 = vsel %vm416_vm1, %v2915_v47, 0.0  ;;  %v267_v57 = vld [vmem:[%s2572_s9 + $0xe0] sm:$0xff] }
  0x3d   : > { %v2951_v21 = vadd.f32 %v2563_v8, %v267_v57 }
  0x3e   : > { %v455_v43 = vadd.f32 %v454_v22, %v453_v54  ;;  %4924 = vst [vmem:[#allocation65_spill] sm:$0xff] %v2927_v10  ;;  %v2933_v54 = vadd.f32 %v2563_v8, %v264_v0  ;;  %v462_v22 = vsel %vm416_vm1, %v2921_v11, 0.0  ;;  %v268_v0 = vld [vmem:[%s2572_s9 + $0xe8] sm:$0xff] }
  0x3f   : > { %4928 = vst [vmem:[#allocation69_spill] sm:$0xff] %v2951_v21 }
  0x40   : > { %v457_v55 = vadd.f32 %v456_v28, %v455_v43  ;;  %4925 = vst [vmem:[#allocation66_spill] sm:$0xff] %v2933_v54  ;;  %v2939_v43 = vadd.f32 %v2563_v8, %v265_v23  ;;  %v464_v28 = vsel %vm416_vm1, %v2927_v10, 0.0  ;;  %v2957_v10 = vadd.f32 %v2563_v8, %v268_v0 }
  0x42   : > { %v459_v35 = vadd.f32 %v458_v4, %v457_v55  ;;  %4926 = vst [vmem:[#allocation67_spill] sm:$0xff] %v2939_v43  ;;  %v2945_v55 = vadd.f32 %v2563_v8, %v266_v29  ;;  %v466_v4 = vsel %vm416_vm1, %v2933_v54, 0.0  ;;  %4929 = vst [vmem:[#allocation70_spill] sm:$0xff] %v2957_v10 }
  0x44   : > { %v461_v31 = vadd.f32 %v460_v9, %v459_v35  ;;  %4927 = vst [vmem:[#allocation68_spill] sm:$0xff] %v2945_v55  ;;  %v468_v35 = vsel %vm416_vm1, %v2939_v43, 0.0  ;;  %v269_v9 = vld [vmem:[%s2572_s9 + $0xf0] sm:$0xff] }
  0x45   : > { %v2963_v54 = vadd.f32 %v2563_v8, %v269_v9 }
  0x46   : > { %v463_v30 = vadd.f32 %v462_v22, %v461_v31  ;;  %v470_v31 = vsel %vm416_vm1, %v2945_v55, 0.0  ;;  %v270_v22 = vld [vmem:[%s2572_s9 + $0xf8] sm:$0xff] }
  0x47   : > { %4930 = vst [vmem:[#allocation71_spill] sm:$0xff] %v2963_v54  ;;  %v2969_v43 = vadd.f32 %v2563_v8, %v270_v22 }
  0x48   : > { %v465_v11 = vadd.f32 %v464_v28, %v463_v30  ;;  %v472_v30 = vsel %vm416_vm1, %v2951_v21, 0.0  ;;  %v271_v28 = vld [vmem:[%s2572_s9 + $0x100] sm:$0xff] }
  0x49   : > { %4931 = vst [vmem:[#allocation72_spill] sm:$0xff] %v2969_v43  ;;  %v2974_v0 = vadd.f32 %v2563_v8, %v271_v28  ;;  %v484_v8 = vsel %vm416_vm1, %v2664_v59, 0.0  ;;  %v486_v28 = vsel %vm416_vm1, %v2667_v60, 0.0 }
  0x4a   : > { %v467_v23 = vadd.f32 %v466_v4, %v465_v11  ;;  %v474_v11 = vsel %vm416_vm1, %v2957_v10, 0.0 }
  0x4b   : > { %4932 = vst [vmem:[#allocation73_spill] sm:$0xff] %v2974_v0 }
  0x4c   : > { %v469_v29 = vadd.f32 %v468_v35, %v467_v23  ;;  %v476_v35 = vsel %vm416_vm1, %v2963_v54, 0.0  ;;  %v478_v23 = vsel %vm416_vm1, %v2969_v43, 0.0 }
  0x4e   : > { %v471_v57 = vadd.f32 %v470_v31, %v469_v29  ;;  %v480_v31 = vsel %vm416_vm1, %v2974_v0, 0.0  ;;  %v482_v29 = vsel %vm416_vm1, %v2661_v58, 0.0 }
  0x50   : > { %v473_v4 = vadd.f32 %v472_v30, %v471_v57  ;;  %v593_v57 = vmul.f32 %v2581_v13, %v2581_v13 }
  0x52   : > { %v475_v9 = vadd.f32 %v474_v11, %v473_v4  ;;  %v594_v11 = vmul.f32 %v2584_v14, %v2584_v14  ;;  %v492_v14 = vsel %vm416_vm1, %v2681_v5, 0.0 }
  0x54   : > { %v477_v21 = vadd.f32 %v476_v35, %v475_v9  ;;  %v488_v35 = vsel %vm416_vm1, %v2675_v1, 0.0  ;;  %v596_v9 = vmul.f32 %v2593_v18, %v2593_v18 }
  0x56   : > { %v479_v22 = vadd.f32 %v478_v23, %v477_v21  ;;  %v595_v21 = vmul.f32 %v2587_v15, %v2587_v15  ;;  %v490_v23 = vsel %vm416_vm1, %v2678_v2, 0.0 }
  0x58   : > { %v481_v10 = vadd.f32 %v480_v31, %v479_v22  ;;  %v597_v31 = vmul.f32 %v2604_v27, %v2604_v27  ;;  %v678_v22 = vsel %vm416_vm1, %v593_v57, 0.0  ;;  %v681_v15 = vsel %vm416_vm1, %v595_v21, 0.0 }
  0x59   : > { %v494_v27 = vsel %vm416_vm1, %v2687_v16, 0.0  ;;  %v599_v57 = vmul.f32 %v2618_v37, %v2618_v37 }
  0x5a   : > { %v483_v30 = vadd.f32 %v482_v29, %v481_v10  ;;  %v679_v29 = vsel %vm416_vm1, %v594_v11, 0.0  ;;  %v685_v11 = vsel %vm416_vm1, %v597_v31, 0.0 }
  0x5b   : > { %v689_v31 = vsel %vm416_vm1, %v599_v57, 0.0 }
  0x5c   : > { %v485_v4 = vadd.f32 %v484_v8, %v483_v30  ;;  %v680_v30 = vadd.f32 %v679_v29, %v678_v22  ;;  %v600_v22 = vmul.f32 %v2621_v38, %v2621_v38  ;;  %v498_v29 = vsel %vm416_vm1, %v2693_v19, 0.0 }
  0x5e   : > { %v487_v10 = vadd.f32 %v486_v28, %v485_v4  ;;  %v598_v28 = vmul.f32 %v2615_v36, %v2615_v36  ;;  %v683_v4 = vsel %vm416_vm1, %v596_v9, 0.0  ;;  %v682_v13 = vadd.f32 %v681_v15, %v680_v30 }
  0x5f   : > { %v602_v30 = vmul.f32 %v2629_v41, %v2629_v41 }
  0x60   : > { %v489_v8 = vadd.f32 %v488_v35, %v487_v10  ;;  %v684_v35 = vadd.f32 %v683_v4, %v682_v13  ;;  %v496_v10 = vsel %vm416_vm1, %v2690_v17, 0.0  ;;  %v687_v9 = vsel %vm416_vm1, %v598_v28, 0.0 }
  0x61   : > { %v691_v28 = vsel %vm416_vm1, %v600_v22, 0.0  ;;  %v695_v22 = vsel %vm416_vm1, %v602_v30, 0.0 }
  0x62   : > { %v491_v18 = vadd.f32 %v490_v23, %v489_v8  ;;  %v686_v15 = vadd.f32 %v685_v11, %v684_v35  ;;  %v601_v8 = vmul.f32 %v2626_v40, %v2626_v40  ;;  %v502_v11 = vsel %vm416_vm1, %v2704_v25, 0.0 }
  0x64   : > { %v493_v21 = vadd.f32 %v492_v14, %v491_v18  ;;  %v688_v13 = vadd.f32 %v687_v9, %v686_v15  ;;  %v500_v18 = vsel %vm416_vm1, %v2701_v24, 0.0  ;;  %v693_v57 = vsel %vm416_vm1, %v601_v8, 0.0 }
  0x65   : > { %v504_v9 = vsel %vm416_vm1, %v2707_v26, 0.0 }
  0x66   : > { %v495_v23 = vadd.f32 %v494_v27, %v493_v21  ;;  %v690_v4 = vadd.f32 %v689_v31, %v688_v13  ;;  %v603_v21 = vmul.f32 %v2632_v42, %v2632_v42  ;;  %v506_v31 = vsel %vm416_vm1, %v2713_v32, 0.0 }
  0x68   : > { %v497_v14 = vadd.f32 %v496_v10, %v495_v23  ;;  %v692_v10 = vadd.f32 %v691_v28, %v690_v4  ;;  %v604_v23 = vmul.f32 %v2635_v44, %v2635_v44  ;;  %v697_v8 = vsel %vm416_vm1, %v603_v21, 0.0 }
  0x69   : > { %v508_v28 = vsel %vm416_vm1, %v2716_v33, 0.0 }
  0x6a   : > { %v499_v27 = vadd.f32 %v498_v29, %v497_v14  ;;  %v694_v29 = vadd.f32 %v693_v57, %v692_v10  ;;  %v605_v14 = vmul.f32 %v2638_v45, %v2638_v45  ;;  %v699_v30 = vsel %vm416_vm1, %v604_v23, 0.0 }
  0x6b   : > { %v510_v57 = vsel %vm416_vm1, %v2719_v34, 0.0 }
  0x6c   : > { %v501_v35 = vadd.f32 %v500_v18, %v499_v27  ;;  %v696_v18 = vadd.f32 %v695_v22, %v694_v29  ;;  %v606_v27 = vmul.f32 %v2641_v46, %v2641_v46  ;;  %v701_v21 = vsel %vm416_vm1, %v605_v14, 0.0 }
  0x6d   : > { %v512_v22 = vsel %vm416_vm1, %v2727_v48, 0.0 }
  0x6e   : > { %v503_v15 = vadd.f32 %v502_v11, %v501_v35  ;;  %v698_v11 = vadd.f32 %v697_v8, %v696_v18  ;;  %v607_v35 = vmul.f32 %v2649_v51, %v2649_v51  ;;  %v703_v23 = vsel %vm416_vm1, %v606_v27, 0.0 }
  0x6f   : > { %v514_v8 = vsel %vm416_vm1, %v2730_v49, 0.0 }
  0x70   : > { %v505_v13 = vadd.f32 %v504_v9, %v503_v15  ;;  %v700_v9 = vadd.f32 %v699_v30, %v698_v11  ;;  %v608_v15 = vmul.f32 %v2652_v52, %v2652_v52  ;;  %v705_v14 = vsel %vm416_vm1, %v607_v35, 0.0 }
  0x71   : > { %v516_v30 = vsel %vm416_vm1, %v2733_v50, 0.0 }
  0x72   : > { %v507_v4 = vadd.f32 %v506_v31, %v505_v13  ;;  %v702_v31 = vadd.f32 %v701_v21, %v700_v9  ;;  %v609_v13 = vmul.f32 %v2655_v53, %v2655_v53  ;;  %v707_v27 = vsel %vm416_vm1, %v608_v15, 0.0  ;;  %v4945_v53 = vld [vmem:[#allocation70_spill] sm:$0xff] }
  0x73   : > { %v518_v21 = vsel %vm416_vm1, %v2739_v61, 0.0 }
  0x74   : > { %v509_v10 = vadd.f32 %v508_v28, %v507_v4  ;;  %v704_v28 = vadd.f32 %v703_v23, %v702_v31  ;;  %v610_v4 = vmul.f32 %v2885_v6, %v2885_v6  ;;  %v709_v35 = vsel %vm416_vm1, %v609_v13, 0.0  ;;  %v4943_v6 = vld [vmem:[#allocation69_spill] sm:$0xff] }
  0x75   : > { %v520_v23 = vsel %vm416_vm1, %v2742_v62, 0.0 }
  0x76   : > { %v511_v29 = vadd.f32 %v510_v57, %v509_v10  ;;  %v706_v57 = vadd.f32 %v705_v14, %v704_v28  ;;  %v611_v10 = vmul.f32 %v2891_v56, %v2891_v56  ;;  %v711_v15 = vsel %vm416_vm1, %v610_v4, 0.0  ;;  %v4940_v56 = vld [vmem:[#allocation67_spill] sm:$0xff] }
  0x77   : > { %v522_v14 = vsel %vm416_vm1, %v2745_v63, 0.0 }
  0x78   : > { %v513_v18 = vadd.f32 %v512_v22, %v511_v29  ;;  %v708_v22 = vadd.f32 %v707_v27, %v706_v57  ;;  %v612_v29 = vmul.f32 %v2897_v3, %v2897_v3  ;;  %v713_v13 = vsel %vm416_vm1, %v611_v10, 0.0  ;;  %v4938_v3 = vld [vmem:[#allocation66_spill] sm:$0xff] }
  0x79   : > { %v524_v27 = vsel %vm416_vm1, %v2753_v12, 0.0 }
  0x7a   : > { %v515_v11 = vadd.f32 %v514_v8, %v513_v18  ;;  %v710_v8 = vadd.f32 %v709_v35, %v708_v22  ;;  %v613_v18 = vmul.f32 %v2903_v39, %v2903_v39  ;;  %v715_v4 = vsel %vm416_vm1, %v612_v29, 0.0  ;;  %v4936_v39 = vld [vmem:[#allocation65_spill] sm:$0xff] }
  0x7b   : > { %v526_v35 = vsel %vm416_vm1, %v2756_v20, 0.0 }
  0x7c   : > { %v517_v9 = vadd.f32 %v516_v30, %v515_v11  ;;  %v712_v30 = vadd.f32 %v711_v15, %v710_v8  ;;  %v614_v11 = vmul.f32 %v2909_v7, %v2909_v7  ;;  %v717_v10 = vsel %vm416_vm1, %v613_v18, 0.0  ;;  %v4933_v15 = vld [vmem:[#allocation29_spill] sm:$0xff]  ;;  %v4934_v8 = vld [vmem:[#allocation64_spill] sm:$0xff] }
  0x7d   : > { %v616_v7 = vmul.f32 %v4934_v8, %v4934_v8  ;;  %v618_v8 = vmul.f32 %v4938_v3, %v4938_v3  ;;  %v620_v3 = vmul.f32 %v2945_v55, %v2945_v55  ;;  %v622_v55 = vmul.f32 %v4945_v53, %v4945_v53 }
  0x7e   : > { %v519_v31 = vadd.f32 %v518_v21, %v517_v9  ;;  %v714_v21 = vadd.f32 %v713_v13, %v712_v30  ;;  %v615_v9 = vmul.f32 %v2915_v47, %v2915_v47  ;;  %v719_v29 = vsel %vm416_vm1, %v614_v11, 0.0 }
  0x7f   : > { %v617_v47 = vmul.f32 %v4936_v39, %v4936_v39  ;;  %v723_v11 = vsel %vm416_vm1, %v616_v7, 0.0  ;;  %v619_v39 = vmul.f32 %v4940_v56, %v4940_v56  ;;  %v727_v7 = vsel %vm416_vm1, %v618_v8, 0.0 }
  0x80   : > { %v521_v28 = vadd.f32 %v520_v23, %v519_v31  ;;  %v716_v23 = vadd.f32 %v715_v4, %v714_v21  ;;  %v528_v31 = vsel %vm416_vm1, %v4933_v15, 0.0  ;;  %v721_v18 = vsel %vm416_vm1, %v615_v9, 0.0 }
  0x81   : > { %v725_v9 = vsel %vm416_vm1, %v617_v47, 0.0  ;;  %v621_v56 = vmul.f32 %v4943_v6, %v4943_v6  ;;  %v729_v47 = vsel %vm416_vm1, %v619_v39, 0.0  ;;  %v731_v8 = vsel %vm416_vm1, %v620_v3, 0.0 }
  0x82   : > { %v523_v57 = vadd.f32 %v522_v14, %v521_v28  ;;  %v718_v13 = vadd.f32 %v717_v10, %v716_v23  ;;  %v4935_v28 = vld [vmem:[#allocation30_spill] sm:$0xff]  ;;  %v623_v6 = vmul.f32 %v2963_v54, %v2963_v54  ;;  %v624_v53 = vmul.f32 %v2969_v43, %v2969_v43 }
  0x83   : > { %v530_v30 = vsel %vm416_vm1, %v4935_v28, 0.0  ;;  %v733_v39 = vsel %vm416_vm1, %v621_v56, 0.0  ;;  %v735_v3 = vsel %vm416_vm1, %v622_v55, 0.0  ;;  %v625_v54 = vmul.f32 %v2974_v0, %v2974_v0 }
  0x84   : > { %v525_v22 = vadd.f32 %v524_v27, %v523_v57  ;;  %v720_v4 = vadd.f32 %v719_v29, %v718_v13  ;;  %v4937_v57 = vld [vmem:[#allocation31_spill] sm:$0xff]  ;;  %v737_v56 = vsel %vm416_vm1, %v623_v6, 0.0  ;;  %v626_v43 = vmul.f32 %v2661_v58, %v2661_v58 }
  0x85   : > { %v532_v21 = vsel %vm416_vm1, %v4937_v57, 0.0  ;;  %v739_v55 = vsel %vm416_vm1, %v624_v53, 0.0  ;;  %v627_v0 = vmul.f32 %v2664_v59, %v2664_v59  ;;  %v741_v6 = vsel %vm416_vm1, %v625_v54, 0.0 }
  0x86   : > { %v527_v14 = vadd.f32 %v526_v35, %v525_v22  ;;  %v722_v10 = vadd.f32 %v721_v18, %v720_v4  ;;  %v4939_v22 = vld [vmem:[#allocation32_spill] sm:$0xff]  ;;  %v628_v58 = vmul.f32 %v2667_v60, %v2667_v60  ;;  %v743_v53 = vsel %vm416_vm1, %v626_v43, 0.0 }
  0x87   : > { %v534_v23 = vsel %vm416_vm1, %v4939_v22, 0.0  ;;  %v629_v59 = vmul.f32 %v2675_v1, %v2675_v1  ;;  %v745_v54 = vsel %vm416_vm1, %v627_v0, 0.0  ;;  %v630_v60 = vmul.f32 %v2678_v2, %v2678_v2 }
  0x88   : > { %v529_v27 = vadd.f32 %v528_v31, %v527_v14  ;;  %v724_v29 = vadd.f32 %v723_v11, %v722_v10  ;;  %v4941_v14 = vld [vmem:[#allocation33_spill] sm:$0xff]  ;;  %v747_v43 = vsel %vm416_vm1, %v628_v58, 0.0  ;;  %v631_v1 = vmul.f32 %v2681_v5, %v2681_v5 }
  0x89   : > { %v536_v13 = vsel %vm416_vm1, %v4941_v14, 0.0  ;;  %v749_v0 = vsel %vm416_vm1, %v629_v59, 0.0  ;;  %v632_v2 = vmul.f32 %v2687_v16, %v2687_v16  ;;  %v751_v58 = vsel %vm416_vm1, %v630_v60, 0.0 }
  0x8a   : > { %v531_v35 = vadd.f32 %v530_v30, %v529_v27  ;;  %v726_v18 = vadd.f32 %v725_v9, %v724_v29  ;;  %v4942_v27 = vld [vmem:[#allocation34_spill] sm:$0xff]  ;;  %v633_v5 = vmul.f32 %v2690_v17, %v2690_v17  ;;  %v753_v59 = vsel %vm416_vm1, %v631_v1, 0.0 }
  0x8b   : > { %v538_v4 = vsel %vm416_vm1, %v4942_v27, 0.0  ;;  %v634_v16 = vmul.f32 %v2693_v19, %v2693_v19  ;;  %v755_v60 = vsel %vm416_vm1, %v632_v2, 0.0  ;;  %v635_v17 = vmul.f32 %v2701_v24, %v2701_v24 }
  0x8c   : > { %v533_v31 = vadd.f32 %v532_v21, %v531_v35  ;;  %v728_v11 = vadd.f32 %v727_v7, %v726_v18  ;;  %v4944_v35 = vld [vmem:[#allocation35_spill] sm:$0xff]  ;;  %v757_v1 = vsel %vm416_vm1, %v633_v5, 0.0  ;;  %v636_v19 = vmul.f32 %v2704_v25, %v2704_v25 }
  0x8d   : > { %v540_v10 = vsel %vm416_vm1, %v4944_v35, 0.0  ;;  %v759_v2 = vsel %vm416_vm1, %v634_v16, 0.0  ;;  %v637_v24 = vmul.f32 %v2707_v26, %v2707_v26  ;;  %v761_v5 = vsel %vm416_vm1, %v635_v17, 0.0 }
  0x8e   : > { %v535_v30 = vadd.f32 %v534_v23, %v533_v31  ;;  %v730_v9 = vadd.f32 %v729_v47, %v728_v11  ;;  %v4946_v31 = vld [vmem:[#allocation36_spill] sm:$0xff]  ;;  %v638_v25 = vmul.f32 %v2713_v32, %v2713_v32  ;;  %v763_v16 = vsel %vm416_vm1, %v636_v19, 0.0 }
  0x8f   : > { %v542_v29 = vsel %vm416_vm1, %v4946_v31, 0.0  ;;  %v639_v26 = vmul.f32 %v2716_v33, %v2716_v33  ;;  %v765_v17 = vsel %vm416_vm1, %v637_v24, 0.0  ;;  %v640_v32 = vmul.f32 %v2719_v34, %v2719_v34 }
  0x90   : > { %v537_v21 = vadd.f32 %v536_v13, %v535_v30  ;;  %v732_v7 = vadd.f32 %v731_v8, %v730_v9  ;;  %v4947_v30 = vld [vmem:[#allocation37_spill] sm:$0xff]  ;;  %v767_v19 = vsel %vm416_vm1, %v638_v25, 0.0  ;;  %v641_v33 = vmul.f32 %v2727_v48, %v2727_v48 }
  0x91   : > { %v544_v18 = vsel %vm416_vm1, %v4947_v30, 0.0  ;;  %v769_v24 = vsel %vm416_vm1, %v639_v26, 0.0  ;;  %v642_v34 = vmul.f32 %v2730_v49, %v2730_v49  ;;  %v771_v25 = vsel %vm416_vm1, %v640_v32, 0.0 }
  0x92   : > { %v539_v23 = vadd.f32 %v538_v4, %v537_v21  ;;  %v734_v47 = vadd.f32 %v733_v39, %v732_v7  ;;  %v4948_v21 = vld [vmem:[#allocation38_spill] sm:$0xff]  ;;  %v643_v48 = vmul.f32 %v2733_v50, %v2733_v50  ;;  %v773_v26 = vsel %vm416_vm1, %v641_v33, 0.0 }
  0x93   : > { %v546_v11 = vsel %vm416_vm1, %v4948_v21, 0.0  ;;  %v644_v49 = vmul.f32 %v2739_v61, %v2739_v61  ;;  %v775_v32 = vsel %vm416_vm1, %v642_v34, 0.0  ;;  %v646_v33 = vmul.f32 %v2745_v63, %v2745_v63 }
  0x94   : > { %v541_v13 = vadd.f32 %v540_v10, %v539_v23  ;;  %v736_v8 = vadd.f32 %v735_v3, %v734_v47  ;;  %v4949_v23 = vld [vmem:[#allocation39_spill] sm:$0xff] }
  0x95   : > { %v548_v9 = vsel %vm416_vm1, %v4949_v23, 0.0 }
  0x96   : > { %v543_v4 = vadd.f32 %v542_v29, %v541_v13  ;;  %v738_v39 = vadd.f32 %v737_v56, %v736_v8  ;;  %v4950_v13 = vld [vmem:[#allocation40_spill] sm:$0xff] }
  0x97   : > { %v550_v7 = vsel %vm416_vm1, %v4950_v13, 0.0 }
  0x98   : > { %v545_v10 = vadd.f32 %v544_v18, %v543_v4  ;;  %v740_v3 = vadd.f32 %v739_v55, %v738_v39  ;;  %v4951_v4 = vld [vmem:[#allocation41_spill] sm:$0xff] }
  0x99   : > { %v552_v47 = vsel %vm416_vm1, %v4951_v4, 0.0 }
  0x9a   : > { %v547_v29 = vadd.f32 %v546_v11, %v545_v10  ;;  %v742_v56 = vadd.f32 %v741_v6, %v740_v3  ;;  %v4952_v10 = vld [vmem:[#allocation42_spill] sm:$0xff] }
  0x9b   : > { %v554_v8 = vsel %vm416_vm1, %v4952_v10, 0.0 }
  0x9c   : > { %v549_v18 = vadd.f32 %v548_v9, %v547_v29  ;;  %v744_v55 = vadd.f32 %v743_v53, %v742_v56  ;;  %v4953_v29 = vld [vmem:[#allocation43_spill] sm:$0xff] }
  0x9d   : > { %v556_v39 = vsel %vm416_vm1, %v4953_v29, 0.0 }
  0x9e   : > { %v551_v11 = vadd.f32 %v550_v7, %v549_v18  ;;  %v746_v6 = vadd.f32 %v745_v54, %v744_v55  ;;  %v4954_v18 = vld [vmem:[#allocation44_spill] sm:$0xff] }
  0x9f   : > { %v558_v3 = vsel %vm416_vm1, %v4954_v18, 0.0 }
  0xa0   : > { %v553_v9 = vadd.f32 %v552_v47, %v551_v11  ;;  %v748_v53 = vadd.f32 %v747_v43, %v746_v6  ;;  %v4955_v11 = vld [vmem:[#allocation45_spill] sm:$0xff] }
  0xa1   : > { %v560_v56 = vsel %vm416_vm1, %v4955_v11, 0.0 }
  0xa2   : > { %v555_v7 = vadd.f32 %v554_v8, %v553_v9  ;;  %v750_v54 = vadd.f32 %v749_v0, %v748_v53  ;;  %v4956_v9 = vld [vmem:[#allocation46_spill] sm:$0xff] }
  0xa3   : > { %v562_v55 = vsel %vm416_vm1, %v4956_v9, 0.0 }
  0xa4   : > { %v557_v47 = vadd.f32 %v556_v39, %v555_v7  ;;  %v752_v43 = vadd.f32 %v751_v58, %v750_v54  ;;  %v4957_v7 = vld [vmem:[#allocation47_spill] sm:$0xff] }
  0xa5   : > { %v564_v6 = vsel %vm416_vm1, %v4957_v7, 0.0 }
  0xa6   : > { %v559_v8 = vadd.f32 %v558_v3, %v557_v47  ;;  %v754_v0 = vadd.f32 %v753_v59, %v752_v43  ;;  %v4958_v47 = vld [vmem:[#allocation48_spill] sm:$0xff] }
  0xa7   : > { %v566_v53 = vsel %vm416_vm1, %v4958_v47, 0.0 }
  0xa8   : > { %v561_v39 = vadd.f32 %v560_v56, %v559_v8  ;;  %v756_v58 = vadd.f32 %v755_v60, %v754_v0  ;;  %v4959_v8 = vld [vmem:[#allocation49_spill] sm:$0xff] }
  0xa9   : > { %v568_v54 = vsel %vm416_vm1, %v4959_v8, 0.0 }
  0xaa   : > { %v563_v3 = vadd.f32 %v562_v55, %v561_v39  ;;  %v758_v59 = vadd.f32 %v757_v1, %v756_v58  ;;  %v4960_v39 = vld [vmem:[#allocation50_spill] sm:$0xff] }
  0xab   : > { %v570_v43 = vsel %vm416_vm1, %v4960_v39, 0.0 }
  0xac   : > { %v565_v56 = vadd.f32 %v564_v6, %v563_v3  ;;  %v760_v60 = vadd.f32 %v759_v2, %v758_v59  ;;  %v4961_v3 = vld [vmem:[#allocation51_spill] sm:$0xff] }
  0xad   : > { %v572_v0 = vsel %vm416_vm1, %v4961_v3, 0.0 }
  0xae   : > { %v567_v55 = vadd.f32 %v566_v53, %v565_v56  ;;  %v762_v1 = vadd.f32 %v761_v5, %v760_v60  ;;  %v4962_v56 = vld [vmem:[#allocation52_spill] sm:$0xff] }
  0xaf   : > { %v574_v58 = vsel %vm416_vm1, %v4962_v56, 0.0 }
  0xb0   : > { %v569_v6 = vadd.f32 %v568_v54, %v567_v55  ;;  %v764_v2 = vadd.f32 %v763_v16, %v762_v1  ;;  %v4963_v55 = vld [vmem:[#allocation53_spill] sm:$0xff] }
  0xb1   : > { %v576_v59 = vsel %vm416_vm1, %v4963_v55, 0.0 }
  0xb2   : > { %v571_v53 = vadd.f32 %v570_v43, %v569_v6  ;;  %v766_v5 = vadd.f32 %v765_v17, %v764_v2  ;;  %v4964_v6 = vld [vmem:[#allocation54_spill] sm:$0xff] }
  0xb3   : > { %v578_v60 = vsel %vm416_vm1, %v4964_v6, 0.0 }
  0xb4   : > { %v573_v54 = vadd.f32 %v572_v0, %v571_v53  ;;  %v768_v16 = vadd.f32 %v767_v19, %v766_v5  ;;  %v4965_v53 = vld [vmem:[#allocation55_spill] sm:$0xff] }
  0xb5   : > { %v580_v1 = vsel %vm416_vm1, %v4965_v53, 0.0 }
  0xb6   : > { %v575_v43 = vadd.f32 %v574_v58, %v573_v54  ;;  %v770_v17 = vadd.f32 %v769_v24, %v768_v16  ;;  %v4966_v54 = vld [vmem:[#allocation56_spill] sm:$0xff]  ;;  %v777_v16 = vsel %vm416_vm1, %v643_v48, 0.0  ;;  %v783_v48 = vsel %vm416_vm1, %v646_v33, 0.0 }
  0xb7   : > { %v582_v2 = vsel %vm416_vm1, %v4966_v54, 0.0  ;;  %v651_v33 = vmul.f32 %v4937_v57, %v4937_v57 }
  0xb8   : > { %v577_v0 = vadd.f32 %v576_v59, %v575_v43  ;;  %v772_v19 = vadd.f32 %v771_v25, %v770_v17  ;;  %v4967_v43 = vld [vmem:[#allocation57_spill] sm:$0xff]  ;;  %v647_v17 = vmul.f32 %v2753_v12, %v2753_v12 }
  0xb9   : > { %v585_v5 = vsel %vm584_vm2, %v4967_v43, 0.0 }
  0xba   : > { %v579_v58 = vadd.f32 %v578_v60, %v577_v0  ;;  %v774_v24 = vadd.f32 %v773_v26, %v772_v19  ;;  %v645_v0 = vmul.f32 %v2742_v62, %v2742_v62 }
  0xbc   : > { %v581_v59 = vadd.f32 %v580_v1, %v579_v58  ;;  %v776_v52 = vadd.f32 %v775_v32, %v774_v24  ;;  %v779_v1 = vsel %vm416_vm1, %v644_v49, 0.0  ;;  %v781_v34 = vsel %vm416_vm1, %v645_v0, 0.0 }
  0xbd   : > { %v649_v32 = vmul.f32 %v4933_v15, %v4933_v15  ;;  %v785_v49 = vsel %vm416_vm1, %v647_v17, 0.0  ;;  %v650_v24 = vmul.f32 %v4935_v28, %v4935_v28  ;;  %v1174_v17 = vlaneseq }
  0xbe   : > { %v583_v60 = vadd.f32 %v582_v2, %v581_v59  ;;  %v778_v58 = vadd.f32 %v777_v16, %v776_v52  ;;  %v648_v59 = vmul.f32 %v2756_v20, %v2756_v20 }
  0xc0   : > { %v586_v50 = vadd.f32 %v585_v5, %v583_v60  ;;  %v780_v26 = vadd.f32 %v779_v1, %v778_v58  ;;  %v789_v1 = vsel %vm416_vm1, %v649_v32, 0.0 }
  0xc2   : > { %v587_v25 = vrot.slane %v586_v50, 4  ;;  %v782_v5 = vadd.f32 %v781_v34, %v780_v26  ;;  %v652_v34 = vmul.f32 %v4939_v22, %v4939_v22 }
  0xc4   : > { %v588_v2 = vadd.f32 %v587_v25, %v586_v50  ;;  %v784_v60 = vadd.f32 %v783_v48, %v782_v5  ;;  %v787_v50 = vsel %vm416_vm1, %v648_v59, 0.0  ;;  %v653_v59 = vmul.f32 %v4941_v14, %v4941_v14 }
  0xc5   : > { %v793_v48 = vsel %vm416_vm1, %v651_v33, 0.0  ;;  %v4971_v5 = vmov 0.0   ;;  %v656_v33 = vmul.f32 %v4946_v31, %v4946_v31 }
  0xc6   : > { %v589_v19 = vrot.slane %v588_v2, 2  ;;  %v786_v16 = vadd.f32 %v785_v49, %v784_v60  ;;  %v4972_v49 = vmov 0.0|0.0   ;;  %v795_v60 = vsel %vm416_vm1, %v652_v34, 0.0 }
  0xc8   : > { %v590_v52 = vadd.f32 %v589_v19, %v588_v2  ;;  %v788_v58 = vadd.f32 %v787_v50, %v786_v16  ;;  %v791_v2 = vsel %vm416_vm1, %v650_v24, 0.0  ;;  %v4970_v19 = vld [vmem:[#allocation2_spill] sm:$0xff]  ;;  %v655_v50 = vmul.f32 %v4944_v35, %v4944_v35 }
  0xca   : > { %v591_v0 = vrot.slane %v590_v52, 1  ;;  %v790_v26 = vadd.f32 %v789_v1, %v788_v58  ;;  %v657_v58 = vmul.f32 %v4947_v30, %v4947_v30 }
  0xcc   : > { %v592_v25 = vadd.f32 %v591_v0, %v590_v52  ;;  %v792_v32 = vadd.f32 %v791_v2, %v790_v26  ;;  %v654_v52 = vmul.f32 %v4942_v27, %v4942_v27  ;;  %v797_v0 = vsel %vm416_vm1, %v653_v59, 0.0  ;;  %v4973_v26 = vld [vmem:[#allocation3_spill] sm:$0xff] }
  0xcd   : > { %v801_v2 = vsel %vm416_vm1, %v655_v50, 0.0  ;;  %v658_v59 = vmul.f32 %v4948_v21, %v4948_v21  ;;  %v660_v50 = vmul.f32 %v4950_v13, %v4950_v13 }
  0xce   : > { %2064 = vmatmul.mubr.msk.f32.vlgmr.msra.gmra.mrb[0].mxu0 %vm416_vm1, %v592_v25  ;;  %v794_v24 = vadd.f32 %v793_v48, %v792_v32  ;;  %v799_v1 = vsel %vm416_vm1, %v654_v52, 0.0  ;;  %v803_v48 = vsel %vm416_vm1, %v656_v33, 0.0  ;;  %v659_v52 = vmul.f32 %v4949_v23, %v4949_v23 }
  0xcf   : > { %2114 = vmatpush3.bf16.xpose.msk.msra.mxu0 %vm3263_vm4, %v4970_v19  ;;  %2085 = vmatprep.mubr.msk.f32.mxu0 %vm2490_vm0, %v4971_v5  ;;  %v662_v33 = vmul.f32 %v4952_v10, %v4952_v10 }
  0xd0   : > { %2115 = vmatprep.subr.bf16.mxu0 %v4972_v49  ;;  %v796_v16 = vadd.f32 %v795_v60, %v794_v24  ;;  %v805_v60 = vsel %vm416_vm1, %v657_v58, 0.0  ;;  %v663_v58 = vmul.f32 %v4953_v29, %v4953_v29 }
  0xd2   : > { %v798_v25 = vadd.f32 %v797_v0, %v796_v16  ;;  %v807_v0 = vsel %vm416_vm1, %v658_v59, 0.0  ;;  %v664_v59 = vmul.f32 %v4954_v18, %v4954_v18 }
  0xd4   : > { %v800_v34 = vadd.f32 %v799_v1, %v798_v25  ;;  %v661_v1 = vmul.f32 %v4951_v4, %v4951_v4  ;;  %v809_v25 = vsel %vm416_vm1, %v659_v52, 0.0  ;;  %v665_v52 = vmul.f32 %v4955_v11, %v4955_v11 }
  0xd6   : > { %v802_v32 = vadd.f32 %v801_v2, %v800_v34  ;;  %v811_v2 = vsel %vm416_vm1, %v660_v50, 0.0  ;;  %v819_v50 = vsel %vm416_vm1, %v664_v59, 0.0  ;;  %v670_v59 = vmul.f32 %v4960_v39, %v4960_v39 }
  0xd7   : > { %2118 = vmatpush3.bf16.xpose.msk.msra.mxu0 %vm3263_vm4, %v4973_v26 }
  0xd8   : > { %v804_v24 = vadd.f32 %v803_v48, %v802_v32  ;;  %v813_v48 = vsel %vm416_vm1, %v661_v1, 0.0  ;;  %v667_v1 = vmul.f32 %v4957_v7, %v4957_v7 }
  0xda   : > { %v806_v16 = vadd.f32 %v805_v60, %v804_v24  ;;  %v815_v60 = vsel %vm416_vm1, %v662_v33, 0.0  ;;  %v668_v33 = vmul.f32 %v4958_v47, %v4958_v47 }
  0xdc   : > { %v808_v21 = vadd.f32 %v807_v0, %v806_v16  ;;  %v817_v0 = vsel %vm416_vm1, %v663_v58, 0.0  ;;  %v669_v58 = vmul.f32 %v4959_v8, %v4959_v8 }
  0xde   : > { %v810_v34 = vadd.f32 %v809_v25, %v808_v21  ;;  %v666_v21 = vmul.f32 %v4956_v9, %v4956_v9 }
  0xe0   : > { %v812_v32 = vadd.f32 %v811_v2, %v810_v34  ;;  %v821_v2 = vsel %vm416_vm1, %v665_v52, 0.0  ;;  %v671_v52 = vmul.f32 %v4961_v3, %v4961_v3 }
  0xe2   : > { %v814_v24 = vadd.f32 %v813_v48, %v812_v32  ;;  %v823_v48 = vsel %vm416_vm1, %v666_v21, 0.0  ;;  %v672_v21 = vmul.f32 %v4962_v56, %v4962_v56 }
  0xe4   : > { %v816_v16 = vadd.f32 %v815_v60, %v814_v24  ;;  %v825_v60 = vsel %vm416_vm1, %v667_v1, 0.0  ;;  %v673_v1 = vmul.f32 %v4963_v55, %v4963_v55 }
  0xe6   : > { %v818_v25 = vadd.f32 %v817_v0, %v816_v16  ;;  %v827_v0 = vsel %vm416_vm1, %v668_v33, 0.0  ;;  %v674_v33 = vmul.f32 %v4964_v6, %v4964_v6 }
  0xe8   : > { %v820_v34 = vadd.f32 %v819_v50, %v818_v25  ;;  %v829_v50 = vsel %vm416_vm1, %v669_v58, 0.0  ;;  %v675_v58 = vmul.f32 %v4965_v53, %v4965_v53 }
  0xea   : > { %v822_v32 = vadd.f32 %v821_v2, %v820_v34  ;;  %v831_v2 = vsel %vm416_vm1, %v670_v59, 0.0  ;;  %v676_v59 = vmul.f32 %v4966_v54, %v4966_v54 }
  0xec   : > { %v824_v24 = vadd.f32 %v823_v48, %v822_v32  ;;  %v833_v48 = vsel %vm416_vm1, %v671_v52, 0.0  ;;  %v677_v52 = vmul.f32 %v4967_v43, %v4967_v43 }
  0xee   : > { %v826_v16 = vadd.f32 %v825_v60, %v824_v24  ;;  %v835_v60 = vsel %vm416_vm1, %v672_v21, 0.0  ;;  %v843_v21 = vsel %vm416_vm1, %v676_v59, 0.0 }
  0xf0   : > { %v828_v25 = vadd.f32 %v827_v0, %v826_v16  ;;  %v837_v0 = vsel %vm416_vm1, %v673_v1, 0.0 }
  0xf2   : > { %v830_v34 = vadd.f32 %v829_v50, %v828_v25  ;;  %v839_v50 = vsel %vm416_vm1, %v674_v33, 0.0 }
  0xf4   : > { %v832_v32 = vadd.f32 %v831_v2, %v830_v34  ;;  %v841_v2 = vsel %vm416_vm1, %v675_v58, 0.0 }
  0xf6   : > { %v834_v24 = vadd.f32 %v833_v48, %v832_v32  ;;  %v845_v32 = vsel %vm584_vm2, %v677_v52, 0.0  ;;  %v1169_v52 = vld [vmem:[%s4682_s2] sm:$0x1] }
  0xf8   : > { %v836_v16 = vadd.f32 %v835_v60, %v834_v24 }
  0xfa   : > { %v838_v25 = vadd.f32 %v837_v0, %v836_v16 }
  0xfc   : > { %v840_v34 = vadd.f32 %v839_v50, %v838_v25 }
  0xfe   : > { %v842_v48 = vadd.f32 %v841_v2, %v840_v34 }
 0x100   : > { %v844_v53 = vadd.f32 %v843_v21, %v842_v48 }
 0x102   : > { %v846_v1 = vadd.f32 %v845_v32, %v844_v53  ;;  %v3378_v32 = vld [vmem:[%s4683_s3] sm:$0x1] }
 0x104   : > { %v847_v60 = vrot.slane %v846_v1, 4 }
 0x106   : > { %v848_v24 = vadd.f32 %v847_v60, %v846_v1 }
 0x108   : > { %v849_v6 = vrot.slane %v848_v24, 2 }
 0x10a   : > { %v850_v54 = vadd.f32 %v849_v6, %v848_v24  ;;  %v4992_v24 = vld [vmem:[#allocation65_spill] sm:$0xff] }
 0x10c   : > { %v851_v55 = vrot.slane %v850_v54, 1 }
 0x10e   : > { %v852_v33 = vadd.f32 %v851_v55, %v850_v54 }
 0x110   : > { %2075 = vmatmul.mubr.msk.f32.vlgmr.msra.gmra.mrb[0].mxu1 %vm416_vm1, %v852_v33  ;;  %v4974_v33 = vld [vmem:[#allocation4_spill] sm:$0xff] }
 0x111   : > { %2122 = vmatpush3.bf16.xpose.msk.msra.mxu1 %vm3263_vm4, %v4970_v19  ;;  %2096 = vmatprep.mubr.msk.f32.mxu1 %vm2490_vm0, %v4971_v5 }
 0x112   : > { %2123 = vmatprep.subr.bf16.mxu1 %v4972_v49 }
 0x119   : > { %2126 = vmatpush3.bf16.xpose.msk.msra.mxu1 %vm3263_vm4, %v4973_v26  ;;  %v3369_v26 = vshrl.u32 %v1174_v17, 7 }
 0x11b   : > { %v4775_v2 = vsub.s32 0, %v3369_v26 }
 0x1a1   : > { %v926_v53 = vpop.f32.mrb[0].mxu0 }
 0x1a2   : > { %v930_v58 = vmul.f32 0.00018491125, %v926_v53  ;;  %v2065_v6 = vpop.f32.mrb[1].mxu0 }
 0x1a4   : > { %2086 = vmatmul.mubr.msk.f32.vlgmr.msra.gmra.mrb[2].mxu0 %vm1010_vm3, %v930_v58  ;;  %v1005_v55 = vmul.f32 %v930_v58, %v930_v58  ;;  %v4975_v58 = vld [vmem:[#allocation5_spill] sm:$0xff] }
 0x1e3   : > { %v1000_v54 = vpop.f32.mrb[0].mxu1 }
 0x1e4   : > { %v1004_v0 = vmul.f32 0.00018491125, %v1000_v54  ;;  %v2076_v16 = vpop.f32.mrb[1].mxu1 }
 0x1e6   : > { %v1006_v59 = vsub.f32 %v1004_v0, %v1005_v55  ;;  %v4976_v55 = vld [vmem:[#allocation6_spill] sm:$0xff]  ;;  %v4977_v0 = vld [vmem:[#allocation7_spill] sm:$0xff] }
 0x1e8   : > { %v1007_v19 = vmax.f32 %v1006_v59, 0.0  ;;  %v4978_v59 = vld [vmem:[#allocation8_spill] sm:$0xff] }
 0x1ea   : > { %v1008_v50 = vadd.f32 1e-05, %v1007_v19 }
 0x1ec   : > { %2139 = vrsqrt.f32 %v1008_v50 }
 0x1f6   : > { %v2140_v5 = vpop.eup %2139 }
 0x1f7   : > { %2097 = vmatmul.mubr.msk.f32.vlgmr.msra.gmra.mrb[2].mxu1 %vm1010_vm3, %v2140_v5 }
 0x277   : > { %v1092_v49 = vpop.f32.mrb[2].mxu0 }
 0x278   : > { %v2087_v25 = vpop.f32.mrb[3].mxu0 }
 0x2ca   : > { %v1165_v34 = vpop.f32.mrb[2].mxu1 }
 0x2cb   : > { %v1170_v21 = vmul.f32 %v1169_v52, %v1165_v34  ;;  %v2098_v48 = vpop.f32.mrb[3].mxu1  ;;  %v4979_v52 = vld [vmem:[#allocation9_spill] sm:$0xff]  ;;  %v4980_v34 = vld [vmem:[#allocation10_spill] sm:$0xff] }
 0x2cc   : > { %v4982_v48 = vld [vmem:[#allocation59_spill] sm:$0xff] }
 0x2cd   : > { %v3380_v1 = vmul.f32 %v1170_v21, %v1092_v49  ;;  %v3384_v60 = vrot.slane %v1170_v21, %v4775_v2  ;;  %v4981_v21 = vld [vmem:[#allocation58_spill] sm:$0xff] }
 0x2ce   : > { %v4994_v2 = vld [vmem:[#allocation66_spill] sm:$0xff] }
 0x2cf   : > { %v3390_v53 = vmul.f32 %v3384_v60, %v4974_v33  ;;  %v3394_v6 = vmul.f32 %v3384_v60, %v4975_v58  ;;  %v3398_v54 = vmul.f32 %v3384_v60, %v4976_v55  ;;  %v3402_v16 = vmul.f32 %v3384_v60, %v4977_v0  ;;  %v4983_v33 = vld [vmem:[#allocation60_spill] sm:$0xff]  ;;  %v4984_v58 = vld [vmem:[#allocation61_spill] sm:$0xff]  ;;  %v4986_v0 = vld [vmem:[#allocation62_spill] sm:$0xff] }
 0x2d0   : > { %v3406_v19 = vmul.f32 %v3384_v60, %v4978_v59  ;;  %v3410_v50 = vmul.f32 %v3384_v60, %v2615_v36  ;;  %v3414_v5 = vmul.f32 %v3384_v60, %v2618_v37  ;;  %v3418_v49 = vmul.f32 %v3384_v60, %v2621_v38 }
 0x2d1   : > { %v3422_v25 = vmul.f32 %v3384_v60, %v2626_v40  ;;  %v3426_v17 = vmul.f32 %v3384_v60, %v2629_v41  ;;  %v3430_v36 = vmul.f32 %v3384_v60, %v2632_v42  ;;  %v3434_v37 = vmul.f32 %v3384_v60, %v2635_v44 }
 0x2d2   : > { %v3438_v38 = vmul.f32 %v3384_v60, %v2638_v45  ;;  %v3442_v40 = vmul.f32 %v3384_v60, %v2641_v46  ;;  %v3446_v41 = vmul.f32 %v3384_v60, %v2649_v51  ;;  %v3450_v42 = vmul.f32 %v3384_v60, %v4979_v52  ;;  %v4988_v52 = vld [vmem:[#allocation63_spill] sm:$0xff] }
 0x2d3   : > { %v3454_v44 = vmul.f32 %v3384_v60, %v4980_v34  ;;  %v3458_v45 = vmul.f32 %v3384_v60, %v4981_v21  ;;  %v3462_v46 = vmul.f32 %v3384_v60, %v4982_v48  ;;  %v3466_v51 = vmul.f32 %v3384_v60, %v4983_v33  ;;  %v4990_v21 = vld [vmem:[#allocation64_spill] sm:$0xff] }
 0x2d4   : > { %v3470_v55 = vmul.f32 %v3384_v60, %v4984_v58  ;;  %v3474_v59 = vmul.f32 %v3384_v60, %v4986_v0  ;;  %v3478_v34 = vmul.f32 %v3384_v60, %v4988_v52  ;;  %v3482_v48 = vmul.f32 %v3384_v60, %v4990_v21 }
 0x2d5   : > { %v3486_v33 = vmul.f32 %v3384_v60, %v4992_v24  ;;  %v3490_v58 = vmul.f32 %v3384_v60, %v4994_v2 }
 0x2d6   : > { %4985 = vst [vmem:[#allocation29_spill] sm:$0xff] %v3470_v55  ;;  %4987 = vst [vmem:[#allocation30_spill] sm:$0xff] %v3474_v59  ;;  %v4996_v55 = vld [vmem:[#allocation67_spill] sm:$0xff]  ;;  %v4998_v59 = vld [vmem:[#allocation68_spill] sm:$0xff] }
 0x2d7   : > { %4989 = vst [vmem:[#allocation31_spill] sm:$0xff] %v3478_v34  ;;  %4991 = vst [vmem:[#allocation32_spill] sm:$0xff] %v3482_v48  ;;  %v3494_v0 = vmul.f32 %v3384_v60, %v4996_v55  ;;  %v3498_v52 = vmul.f32 %v3384_v60, %v4998_v59  ;;  %v5000_v34 = vld [vmem:[#allocation69_spill] sm:$0xff]  ;;  %v5002_v48 = vld [vmem:[#allocation70_spill] sm:$0xff] }
 0x2d8   : > { %4993 = vst [vmem:[#allocation33_spill] sm:$0xff] %v3486_v33  ;;  %4995 = vst [vmem:[#allocation34_spill] sm:$0xff] %v3490_v58  ;;  %v3502_v21 = vmul.f32 %v3384_v60, %v5000_v34  ;;  %v3506_v24 = vmul.f32 %v3384_v60, %v5002_v48  ;;  %v5004_v33 = vld [vmem:[#allocation71_spill] sm:$0xff]  ;;  %v5006_v58 = vld [vmem:[#allocation72_spill] sm:$0xff] }
 0x2d9   : > { %4997 = vst [vmem:[#allocation35_spill] sm:$0xff] %v3494_v0  ;;  %4999 = vst [vmem:[#allocation36_spill] sm:$0xff] %v3498_v52  ;;  %v3510_v2 = vmul.f32 %v3384_v60, %v5004_v33  ;;  %v3514_v55 = vmul.f32 %v3384_v60, %v5006_v58  ;;  %v5008_v0 = vld [vmem:[#allocation73_spill] sm:$0xff]  ;;  %v5010_v52 = vld [vmem:[#allocation11_spill] sm:$0xff] }
 0x2da   : > { %5001 = vst [vmem:[#allocation37_spill] sm:$0xff] %v3502_v21  ;;  %5003 = vst [vmem:[#allocation39_spill] sm:$0xff] %v3506_v24  ;;  %v3518_v59 = vmul.f32 %v3384_v60, %v5008_v0  ;;  %v3522_v34 = vmul.f32 %v3384_v60, %v5010_v52  ;;  %v5012_v21 = vld [vmem:[#allocation12_spill] sm:$0xff]  ;;  %v5014_v24 = vld [vmem:[#allocation13_spill] sm:$0xff] }
 0x2db   : > { %5005 = vst [vmem:[#allocation40_spill] sm:$0xff] %v3510_v2  ;;  %5007 = vst [vmem:[#allocation41_spill] sm:$0xff] %v3514_v55  ;;  %v3526_v48 = vmul.f32 %v3384_v60, %v5012_v21  ;;  %v3530_v33 = vmul.f32 %v3384_v60, %v5014_v24  ;;  %v5016_v2 = vld [vmem:[#allocation14_spill] sm:$0xff]  ;;  %v5018_v55 = vld [vmem:[#allocation15_spill] sm:$0xff] }
 0x2dc   : > { %5009 = vst [vmem:[#allocation42_spill] sm:$0xff] %v3518_v59  ;;  %5011 = vst [vmem:[#allocation43_spill] sm:$0xff] %v3522_v34  ;;  %v3534_v58 = vmul.f32 %v3384_v60, %v5016_v2  ;;  %v3538_v0 = vmul.f32 %v3384_v60, %v5018_v55  ;;  %v5020_v59 = vld [vmem:[#allocation16_spill] sm:$0xff]  ;;  %v5022_v34 = vld [vmem:[#allocation17_spill] sm:$0xff] }
 0x2dd   : > { %5013 = vst [vmem:[#allocation44_spill] sm:$0xff] %v3526_v48  ;;  %5015 = vst [vmem:[#allocation45_spill] sm:$0xff] %v3530_v33  ;;  %v3542_v52 = vmul.f32 %v3384_v60, %v5020_v59  ;;  %v3546_v21 = vmul.f32 %v3384_v60, %v5022_v34  ;;  %v5024_v48 = vld [vmem:[#allocation18_spill] sm:$0xff]  ;;  %v5026_v33 = vld [vmem:[#allocation19_spill] sm:$0xff] }
 0x2de   : > { %5017 = vst [vmem:[#allocation46_spill] sm:$0xff] %v3534_v58  ;;  %5019 = vst [vmem:[#allocation47_spill] sm:$0xff] %v3538_v0  ;;  %v3550_v24 = vmul.f32 %v3384_v60, %v5024_v48  ;;  %v3554_v2 = vmul.f32 %v3384_v60, %v5026_v33  ;;  %v5028_v58 = vld [vmem:[#allocation20_spill] sm:$0xff]  ;;  %v5030_v0 = vld [vmem:[#allocation21_spill] sm:$0xff] }
 0x2df   : > { %5021 = vst [vmem:[#allocation48_spill] sm:$0xff] %v3542_v52  ;;  %5023 = vst [vmem:[#allocation49_spill] sm:$0xff] %v3546_v21  ;;  %v3558_v55 = vmul.f32 %v3384_v60, %v5028_v58  ;;  %v3562_v59 = vmul.f32 %v3384_v60, %v5030_v0  ;;  %v5032_v52 = vld [vmem:[#allocation22_spill] sm:$0xff]  ;;  %v5034_v21 = vld [vmem:[#allocation23_spill] sm:$0xff] }
 0x2e0   : > { %5025 = vst [vmem:[#allocation50_spill] sm:$0xff] %v3550_v24  ;;  %5027 = vst [vmem:[#allocation51_spill] sm:$0xff] %v3554_v2  ;;  %v3566_v34 = vmul.f32 %v3384_v60, %v5032_v52  ;;  %v3570_v48 = vmul.f32 %v3384_v60, %v5034_v21  ;;  %v5035_v24 = vld [vmem:[#allocation24_spill] sm:$0xff]  ;;  %v5036_v2 = vld [vmem:[#allocation25_spill] sm:$0xff] }
 0x2e1   : > { %5029 = vst [vmem:[#allocation52_spill] sm:$0xff] %v3558_v55  ;;  %5031 = vst [vmem:[#allocation57_spill] sm:$0xff] %v3562_v59  ;;  %v3574_v33 = vmul.f32 %v3384_v60, %v5035_v24  ;;  %v3578_v58 = vmul.f32 %v3384_v60, %v5036_v2  ;;  %v5037_v55 = vld [vmem:[#allocation26_spill] sm:$0xff]  ;;  %v5038_v59 = vld [vmem:[#allocation27_spill] sm:$0xff]  ;;  %v3594_v24 = vmul.f32 %v3384_v60, %v2739_v61 }
 0x2e2   : > { %5033 = vst [vmem:[#allocation2_spill] sm:$0xff] %v3566_v34  ;;  %v3582_v0 = vmul.f32 %v3384_v60, %v5037_v55  ;;  %v3586_v52 = vmul.f32 %v3384_v60, %v5038_v59  ;;  %v5039_v34 = vld [vmem:[#allocation28_spill] sm:$0xff]  ;;  %v3598_v2 = vmul.f32 %v3384_v60, %v2742_v62  ;;  %v3602_v55 = vmul.f32 %v3384_v60, %v2745_v63 }
 0x2e3   : > { %v3590_v21 = vmul.f32 %v3384_v60, %v5039_v34  ;;  %v3606_v59 = vmul.f32 %v3384_v60, %v2753_v12  ;;  %v3610_v34 = vmul.f32 %v3384_v60, %v2756_v20  ;;  %v3614_v61 = vmul.f32 %v3384_v60, %v4933_v15 }
 0x2e4   : > { %v3618_v62 = vmul.f32 %v3384_v60, %v4935_v28  ;;  %v3622_v63 = vmul.f32 %v3384_v60, %v4937_v57  ;;  %v3626_v12 = vmul.f32 %v3384_v60, %v4939_v22  ;;  %v3630_v20 = vmul.f32 %v3384_v60, %v4941_v14 }
 0x2e5   : > { %v3634_v15 = vmul.f32 %v3384_v60, %v4942_v27  ;;  %v3638_v28 = vmul.f32 %v3384_v60, %v4944_v35  ;;  %v3642_v57 = vmul.f32 %v3384_v60, %v4946_v31  ;;  %v3646_v22 = vmul.f32 %v3384_v60, %v4947_v30 }
 0x2e6   : > { %5040 = vst [vmem:[#allocation3_spill] sm:$0xff] %v3626_v12  ;;  %v5041_v12 = vld [vmem:[#allocation38_spill] sm:$0xff]  ;;  %v3654_v27 = vmul.f32 %v3384_v60, %v4949_v23  ;;  %v3658_v35 = vmul.f32 %v3384_v60, %v4950_v13  ;;  %v3662_v31 = vmul.f32 %v3384_v60, %v4951_v4  ;;  %v3666_v30 = vmul.f32 %v3384_v60, %v4952_v10 }
 0x2e7   : > { %v3650_v14 = vmul.f32 %v3384_v60, %v5041_v12  ;;  %v3670_v12 = vmul.f32 %v3384_v60, %v4953_v29  ;;  %v3674_v23 = vmul.f32 %v3384_v60, %v4954_v18  ;;  %v3678_v13 = vmul.f32 %v3384_v60, %v4955_v11 }
 0x2e8   : > { %v3682_v4 = vmul.f32 %v3384_v60, %v4956_v9  ;;  %v3686_v10 = vmul.f32 %v3384_v60, %v4957_v7  ;;  %v3690_v29 = vmul.f32 %v3384_v60, %v4958_v47  ;;  %v3694_v18 = vmul.f32 %v3384_v60, %v4959_v8 }
 0x2e9   : > { %v3698_v11 = vmul.f32 %v3384_v60, %v4960_v39  ;;  %v3702_v9 = vmul.f32 %v3384_v60, %v4961_v3  ;;  %v3706_v7 = vmul.f32 %v3384_v60, %v4962_v56  ;;  %v5050_v8 = vsub.f32 %v3378_v32, %v3380_v1  ;;  %v5051_v39 = vld [vmem:[#allocation54_spill] sm:$0xff]  ;;  %v5052_v3 = vld [vmem:[#allocation55_spill] sm:$0xff]  ;;  %v5053_v56 = vld [vmem:[#allocation56_spill] sm:$0xff] }
 0x2ea   : > { %5042 = vst [vmem:[#allocation4_spill] sm:$0xff] %v3686_v10  ;;  %5043 = vst [vmem:[#allocation5_spill] sm:$0xff] %v3690_v29  ;;  %v5048_v10 = vld [vmem:[#allocation53_spill] sm:$0xff]  ;;  %v5049_v29 = vsub.s32 0, %v3369_v26  ;;  %v3733_v26 = vmul.f32 %v3384_v60, %v4967_v43 }
 0x2eb   : > { %5044 = vst [vmem:[#allocation6_spill] sm:$0xff] %v3694_v18  ;;  %5045 = vst [vmem:[#allocation7_spill] sm:$0xff] %v3698_v11  ;;  %v3710_v47 = vmul.f32 %v3384_v60, %v5048_v10  ;;  %v3721_v11 = vmul.f32 %v3384_v60, %v5051_v39  ;;  %v5078_v39 = vld [vmem:[#allocation31_spill] sm:$0xff] }
 0x2ec   : > { %5046 = vst [vmem:[#allocation8_spill] sm:$0xff] %v3702_v9  ;;  %5047 = vst [vmem:[#allocation9_spill] sm:$0xff] %v3706_v7  ;;  %v3717_v18 = vrot.slane %v5050_v8, %v5049_v29  ;;  %v3725_v9 = vmul.f32 %v3384_v60, %v5052_v3  ;;  %v3729_v7 = vmul.f32 %v3384_v60, %v5053_v56  ;;  %v5076_v8 = vld [vmem:[#allocation30_spill] sm:$0xff]  ;;  %v5080_v3 = vld [vmem:[#allocation32_spill] sm:$0xff] }
 0x2ed   : > { %v5082_v56 = vld [vmem:[#allocation33_spill] sm:$0xff] }
 0x2ee   : > { %v3737_v32 = vadd.f32 %v3717_v18, %v3390_v53  ;;  %v3741_v1 = vadd.f32 %v3717_v18, %v3394_v6  ;;  %v3745_v10 = vadd.f32 %v3717_v18, %v3398_v54  ;;  %v3749_v29 = vadd.f32 %v3717_v18, %v3402_v16 }
 0x2ef   : > { %v3753_v43 = vadd.f32 %v3717_v18, %v3406_v19  ;;  %v3757_v60 = vadd.f32 %v3717_v18, %v3410_v50  ;;  %v3761_v53 = vadd.f32 %v3717_v18, %v3414_v5  ;;  %v3765_v6 = vadd.f32 %v3717_v18, %v3418_v49 }
 0x2f0   : > { %5054 = vst [vmem:[#allocation10_spill] sm:$0xff] %v3737_v32  ;;  %5055 = vst [vmem:[#allocation58_spill] sm:$0xff] %v3741_v1  ;;  %v3769_v54 = vadd.f32 %v3717_v18, %v3422_v25  ;;  %v3773_v16 = vadd.f32 %v3717_v18, %v3426_v17  ;;  %v3777_v19 = vadd.f32 %v3717_v18, %v3430_v36 }
 0x2f1   : > { %5056 = vst [vmem:[#allocation59_spill] sm:$0xff] %v3745_v10  ;;  %5057 = vst [vmem:[#allocation60_spill] sm:$0xff] %v3749_v29  ;;  %v3781_v50 = vadd.f32 %v3717_v18, %v3434_v37  ;;  %v3785_v5 = vadd.f32 %v3717_v18, %v3438_v38  ;;  %v3789_v49 = vadd.f32 %v3717_v18, %v3442_v40 }
 0x2f2   : > { %5058 = vst [vmem:[#allocation61_spill] sm:$0xff] %v3753_v43  ;;  %5059 = vst [vmem:[#allocation62_spill] sm:$0xff] %v3757_v60  ;;  %v3793_v25 = vadd.f32 %v3717_v18, %v3446_v41  ;;  %v3797_v17 = vadd.f32 %v3717_v18, %v3450_v42  ;;  %v3801_v36 = vadd.f32 %v3717_v18, %v3454_v44  ;;  %v5074_v41 = vld [vmem:[#allocation29_spill] sm:$0xff] }
 0x2f3   : > { %5060 = vst [vmem:[#allocation63_spill] sm:$0xff] %v3761_v53  ;;  %5061 = vst [vmem:[#allocation64_spill] sm:$0xff] %v3765_v6  ;;  %v3805_v37 = vadd.f32 %v3717_v18, %v3458_v45  ;;  %v3809_v38 = vadd.f32 %v3717_v18, %v3462_v46  ;;  %v3813_v40 = vadd.f32 %v3717_v18, %v3466_v51 }
 0x2f4   : > { %5062 = vst [vmem:[#allocation65_spill] sm:$0xff] %v3769_v54  ;;  %5063 = vst [vmem:[#allocation66_spill] sm:$0xff] %v3773_v16  ;;  %v3817_v42 = vadd.f32 %v3717_v18, %v5074_v41  ;;  %v3821_v44 = vadd.f32 %v3717_v18, %v5076_v8  ;;  %v3825_v45 = vadd.f32 %v3717_v18, %v5078_v39 }
 0x2f5   : > { %5064 = vst [vmem:[#allocation67_spill] sm:$0xff] %v3777_v19  ;;  %5065 = vst [vmem:[#allocation68_spill] sm:$0xff] %v3781_v50  ;;  %v3829_v46 = vadd.f32 %v3717_v18, %v5080_v3  ;;  %v3833_v51 = vadd.f32 %v3717_v18, %v5082_v56 }
 0x2f6   : > { %5066 = vst [vmem:[#allocation69_spill] sm:$0xff] %v3785_v5  ;;  %5067 = vst [vmem:[#allocation70_spill] sm:$0xff] %v3789_v49 }
 0x2f7   : > { %5068 = vst [vmem:[#allocation71_spill] sm:$0xff] %v3793_v25  ;;  %5069 = vst [vmem:[#allocation72_spill] sm:$0xff] %v3797_v17 }
 0x2f8   : > { %5070 = vst [vmem:[#allocation73_spill] sm:$0xff] %v3801_v36  ;;  %5071 = vst [vmem:[#allocation11_spill] sm:$0xff] %v3805_v37 }
 0x2f9   : > { %5072 = vst [vmem:[#allocation12_spill] sm:$0xff] %v3809_v38  ;;  %5073 = vst [vmem:[#allocation13_spill] sm:$0xff] %v3813_v40  ;;  %v5084_v40 = vld [vmem:[#allocation34_spill] sm:$0xff] }
 0x2fa   : > { %5075 = vst [vmem:[#allocation14_spill] sm:$0xff] %v3817_v42  ;;  %5077 = vst [vmem:[#allocation15_spill] sm:$0xff] %v3821_v44  ;;  %v3837_v41 = vadd.f32 %v3717_v18, %v5084_v40  ;;  %v5086_v42 = vld [vmem:[#allocation35_spill] sm:$0xff]  ;;  %v5088_v44 = vld [vmem:[#allocation36_spill] sm:$0xff] }
 0x2fb   : > { %5079 = vst [vmem:[#allocation16_spill] sm:$0xff] %v3825_v45  ;;  %5081 = vst [vmem:[#allocation17_spill] sm:$0xff] %v3829_v46  ;;  %v3841_v8 = vadd.f32 %v3717_v18, %v5086_v42  ;;  %v3845_v39 = vadd.f32 %v3717_v18, %v5088_v44  ;;  %v5090_v45 = vld [vmem:[#allocation37_spill] sm:$0xff]  ;;  %v5092_v46 = vld [vmem:[#allocation39_spill] sm:$0xff] }
 0x2fc   : > { %5083 = vst [vmem:[#allocation18_spill] sm:$0xff] %v3833_v51  ;;  %5085 = vst [vmem:[#allocation19_spill] sm:$0xff] %v3837_v41  ;;  %v3849_v3 = vadd.f32 %v3717_v18, %v5090_v45  ;;  %v3853_v56 = vadd.f32 %v3717_v18, %v5092_v46  ;;  %v5094_v51 = vld [vmem:[#allocation40_spill] sm:$0xff]  ;;  %v5096_v41 = vld [vmem:[#allocation41_spill] sm:$0xff] }
 0x2fd   : > { %5087 = vst [vmem:[#allocation20_spill] sm:$0xff] %v3841_v8  ;;  %5089 = vst [vmem:[#allocation21_spill] sm:$0xff] %v3845_v39  ;;  %v3857_v40 = vadd.f32 %v3717_v18, %v5094_v51  ;;  %v3861_v42 = vadd.f32 %v3717_v18, %v5096_v41  ;;  %v5098_v8 = vld [vmem:[#allocation42_spill] sm:$0xff]  ;;  %v5100_v39 = vld [vmem:[#allocation43_spill] sm:$0xff] }
 0x2fe   : > { %5091 = vst [vmem:[#allocation22_spill] sm:$0xff] %v3849_v3  ;;  %5093 = vst [vmem:[#allocation23_spill] sm:$0xff] %v3853_v56  ;;  %v3865_v44 = vadd.f32 %v3717_v18, %v5098_v8  ;;  %v3869_v45 = vadd.f32 %v3717_v18, %v5100_v39  ;;  %v5102_v3 = vld [vmem:[#allocation44_spill] sm:$0xff]  ;;  %v5104_v56 = vld [vmem:[#allocation45_spill] sm:$0xff] }
 0x2ff   : > { %5095 = vst [vmem:[#allocation24_spill] sm:$0xff] %v3857_v40  ;;  %5097 = vst [vmem:[#allocation25_spill] sm:$0xff] %v3861_v42  ;;  %v3873_v46 = vadd.f32 %v3717_v18, %v5102_v3  ;;  %v3877_v51 = vadd.f32 %v3717_v18, %v5104_v56  ;;  %v5106_v40 = vld [vmem:[#allocation46_spill] sm:$0xff]  ;;  %v5108_v42 = vld [vmem:[#allocation47_spill] sm:$0xff] }
 0x300   : > { %5099 = vst [vmem:[#allocation26_spill] sm:$0xff] %v3865_v44  ;;  %5101 = vst [vmem:[#allocation27_spill] sm:$0xff] %v3869_v45  ;;  %v3881_v41 = vadd.f32 %v3717_v18, %v5106_v40  ;;  %v3885_v8 = vadd.f32 %v3717_v18, %v5108_v42  ;;  %v5110_v44 = vld [vmem:[#allocation48_spill] sm:$0xff]  ;;  %v5112_v45 = vld [vmem:[#allocation49_spill] sm:$0xff] }
 0x301   : > { %5103 = vst [vmem:[#allocation28_spill] sm:$0xff] %v3873_v46  ;;  %5105 = vst [vmem:[#allocation38_spill] sm:$0xff] %v3877_v51  ;;  %v3889_v39 = vadd.f32 %v3717_v18, %v5110_v44  ;;  %v3893_v3 = vadd.f32 %v3717_v18, %v5112_v45  ;;  %v5114_v46 = vld [vmem:[#allocation50_spill] sm:$0xff]  ;;  %v5116_v51 = vld [vmem:[#allocation51_spill] sm:$0xff] }
 0x302   : > { %5107 = vst [vmem:[#allocation53_spill] sm:$0xff] %v3881_v41  ;;  %5109 = vst [vmem:[#allocation54_spill] sm:$0xff] %v3885_v8  ;;  %v3897_v56 = vadd.f32 %v3717_v18, %v5114_v46  ;;  %v3901_v40 = vadd.f32 %v3717_v18, %v5116_v51  ;;  %v5118_v41 = vld [vmem:[#allocation52_spill] sm:$0xff]  ;;  %v5120_v8 = vld [vmem:[#allocation57_spill] sm:$0xff]  ;;  %v3917_v46 = vadd.f32 %v3717_v18, %v3570_v48 }
 0x303   : > { %5111 = vst [vmem:[#allocation55_spill] sm:$0xff] %v3889_v39  ;;  %5113 = vst [vmem:[#allocation56_spill] sm:$0xff] %v3893_v3  ;;  %v3905_v42 = vadd.f32 %v3717_v18, %v5118_v41  ;;  %v3909_v44 = vadd.f32 %v3717_v18, %v5120_v8  ;;  %v5122_v39 = vld [vmem:[#allocation2_spill] sm:$0xff]  ;;  %v3921_v51 = vadd.f32 %v3717_v18, %v3574_v33 }
 0x304   : > { %5115 = vst [vmem:[#allocation29_spill] sm:$0xff] %v3897_v56  ;;  %5117 = vst [vmem:[#allocation30_spill] sm:$0xff] %v3901_v40  ;;  %v3913_v45 = vadd.f32 %v3717_v18, %v5122_v39  ;;  %v3925_v41 = vadd.f32 %v3717_v18, %v3578_v58  ;;  %v3929_v8 = vadd.f32 %v3717_v18, %v3582_v0 }
 0x305   : > { %5119 = vst [vmem:[#allocation31_spill] sm:$0xff] %v3905_v42  ;;  %5121 = vst [vmem:[#allocation32_spill] sm:$0xff] %v3909_v44  ;;  %v3933_v39 = vadd.f32 %v3717_v18, %v3586_v52  ;;  %v3937_v48 = vadd.f32 %v3717_v18, %v3590_v21  ;;  %v3941_v33 = vadd.f32 %v3717_v18, %v3594_v24 }
 0x306   : > { %5123 = vst [vmem:[#allocation33_spill] sm:$0xff] %v3913_v45  ;;  %5124 = vst [vmem:[#allocation34_spill] sm:$0xff] %v3917_v46  ;;  %v3945_v58 = vadd.f32 %v3717_v18, %v3598_v2  ;;  %v3949_v0 = vadd.f32 %v3717_v18, %v3602_v55  ;;  %v3953_v52 = vadd.f32 %v3717_v18, %v3606_v59 }
 0x307   : > { %5125 = vst [vmem:[#allocation35_spill] sm:$0xff] %v3921_v51  ;;  %5126 = vst [vmem:[#allocation36_spill] sm:$0xff] %v3925_v41  ;;  %v3957_v21 = vadd.f32 %v3717_v18, %v3610_v34  ;;  %v3961_v24 = vadd.f32 %v3717_v18, %v3614_v61  ;;  %v3965_v2 = vadd.f32 %v3717_v18, %v3618_v62 }
 0x308   : > { %5127 = vst [vmem:[#allocation37_spill] sm:$0xff] %v3929_v8  ;;  %5128 = vst [vmem:[#allocation39_spill] sm:$0xff] %v3933_v39  ;;  %v3969_v55 = vadd.f32 %v3717_v18, %v3622_v63  ;;  %v3977_v34 = vadd.f32 %v3717_v18, %v3630_v20  ;;  %v3981_v61 = vadd.f32 %v3717_v18, %v3634_v15 }
 0x309   : > { %5129 = vst [vmem:[#allocation40_spill] sm:$0xff] %v3937_v48  ;;  %5130 = vst [vmem:[#allocation41_spill] sm:$0xff] %v3941_v33  ;;  %v3985_v62 = vadd.f32 %v3717_v18, %v3638_v28  ;;  %v3989_v63 = vadd.f32 %v3717_v18, %v3642_v57  ;;  %v3997_v20 = vadd.f32 %v3717_v18, %v3650_v14 }
 0x30a   : > { %5131 = vst [vmem:[#allocation42_spill] sm:$0xff] %v3945_v58  ;;  %5132 = vst [vmem:[#allocation43_spill] sm:$0xff] %v3949_v0  ;;  %v5138_v0 = vld [vmem:[#allocation3_spill] sm:$0xff]  ;;  %v4001_v15 = vadd.f32 %v3717_v18, %v3654_v27  ;;  %v4005_v28 = vadd.f32 %v3717_v18, %v3658_v35  ;;  %v4009_v57 = vadd.f32 %v3717_v18, %v3662_v31 }
 0x30b   : > { %5133 = vst [vmem:[#allocation44_spill] sm:$0xff] %v3953_v52  ;;  %5134 = vst [vmem:[#allocation45_spill] sm:$0xff] %v3957_v21  ;;  %v3973_v59 = vadd.f32 %v3717_v18, %v5138_v0  ;;  %v3993_v0 = vadd.f32 %v3717_v18, %v3646_v22  ;;  %v4013_v22 = vadd.f32 %v3717_v18, %v3666_v30 }
 0x30c   : > { %5135 = vst [vmem:[#allocation46_spill] sm:$0xff] %v3961_v24  ;;  %5136 = vst [vmem:[#allocation47_spill] sm:$0xff] %v3965_v2  ;;  %v4017_v14 = vadd.f32 %v3717_v18, %v3670_v12  ;;  %v4021_v27 = vadd.f32 %v3717_v18, %v3674_v23  ;;  %v4025_v35 = vadd.f32 %v3717_v18, %v3678_v13 }
 0x30d   : > { %5137 = vst [vmem:[#allocation48_spill] sm:$0xff] %v3969_v55  ;;  %5139 = vst [vmem:[#allocation49_spill] sm:$0xff] %v3973_v59  ;;  %v4029_v31 = vadd.f32 %v3717_v18, %v3682_v4 }
 0x30e   : > { %5140 = vst [vmem:[#allocation50_spill] sm:$0xff] %v3977_v34  ;;  %5141 = vst [vmem:[#allocation51_spill] sm:$0xff] %v3981_v61 }
 0x30f   : > { %5142 = vst [vmem:[#allocation52_spill] sm:$0xff] %v3985_v62  ;;  %5143 = vst [vmem:[#allocation57_spill] sm:$0xff] %v3989_v63 }
 0x310   : > { %5144 = vst [vmem:[#allocation2_spill] sm:$0xff] %v3993_v0  ;;  %5145 = vst [vmem:[#allocation3_spill] sm:$0xff] %v3997_v20 }
 0x311   : > { %5146 = vst [vmem:[#allocation74_spill] sm:$0xff] %v4001_v15  ;;  %5147 = vst [vmem:[#allocation75_spill] sm:$0xff] %v4005_v28 }
 0x312   : > { %5148 = vst [vmem:[#allocation76_spill] sm:$0xff] %v4009_v57  ;;  %5149 = vst [vmem:[#allocation77_spill] sm:$0xff] %v4013_v22  ;;  %v5154_v57 = vld [vmem:[#allocation4_spill] sm:$0xff]  ;;  %v5156_v22 = vld [vmem:[#allocation5_spill] sm:$0xff] }
 0x313   : > { %5150 = vst [vmem:[#allocation78_spill] sm:$0xff] %v4017_v14  ;;  %5151 = vst [vmem:[#allocation79_spill] sm:$0xff] %v4021_v27  ;;  %v4033_v30 = vadd.f32 %v3717_v18, %v5154_v57  ;;  %v4037_v12 = vadd.f32 %v3717_v18, %v5156_v22  ;;  %v5158_v14 = vld [vmem:[#allocation6_spill] sm:$0xff]  ;;  %v5160_v27 = vld [vmem:[#allocation7_spill] sm:$0xff]  ;;  %v4057_v22 = vadd.f32 %v3717_v18, %v3710_v47  ;;  %v1355_v47 = vsub.f32 0.0, %v3741_v1 }
 0x314   : > { %5152 = vst [vmem:[#allocation80_spill] sm:$0xff] %v4025_v35  ;;  %5153 = vst [vmem:[#allocation81_spill] sm:$0xff] %v4029_v31  ;;  %v4041_v23 = vadd.f32 %v3717_v18, %v5158_v14  ;;  %v4045_v13 = vadd.f32 %v3717_v18, %v5160_v27  ;;  %v5162_v35 = vld [vmem:[#allocation8_spill] sm:$0xff]  ;;  %v5164_v31 = vld [vmem:[#allocation9_spill] sm:$0xff]  ;;  %v4061_v14 = vadd.f32 %v3717_v18, %v3721_v11  ;;  %v1357_v11 = vsub.f32 0.0, %v3749_v29 }
 0x315   : > { %5155 = vst [vmem:[#allocation4_spill] sm:$0xff] %v4033_v30  ;;  %5157 = vst [vmem:[#allocation5_spill] sm:$0xff] %v4037_v12  ;;  %v4049_v4 = vadd.f32 %v3717_v18, %v5162_v35  ;;  %v4053_v57 = vadd.f32 %v3717_v18, %v5164_v31  ;;  %v4065_v27 = vadd.f32 %v3717_v18, %v3725_v9  ;;  %v1359_v9 = vsub.f32 0.0, %v3757_v60 }
 0x316   : > { %5159 = vst [vmem:[#allocation6_spill] sm:$0xff] %v4041_v23  ;;  %5161 = vst [vmem:[#allocation7_spill] sm:$0xff] %v4045_v13  ;;  %v4069_v35 = vadd.f32 %v3717_v18, %v3729_v7  ;;  %v4073_v31 = vadd.f32 %v3717_v18, %v3733_v26  ;;  %v1445_v26 = vmul.f32 1.442695, %v1357_v11  ;;  %v1367_v11 = vsub.f32 0.0, %v3789_v49 }
 0x317   : > { %5163 = vst [vmem:[#allocation8_spill] sm:$0xff] %v4049_v4  ;;  %5165 = vst [vmem:[#allocation9_spill] sm:$0xff] %v4053_v57  ;;  %v1354_v57 = vsub.f32 0.0, %v3737_v32  ;;  %v1361_v4 = vsub.f32 0.0, %v3765_v6  ;;  %v1362_v32 = vsub.f32 0.0, %v3769_v54 }
 0x318   : > { %5166 = vst [vmem:[#allocation82_spill] sm:$0xff] %v4057_v22  ;;  %5167 = vst [vmem:[#allocation83_spill] sm:$0xff] %v4061_v14  ;;  %v1356_v22 = vsub.f32 0.0, %v3745_v10  ;;  %v1358_v14 = vsub.f32 0.0, %v3753_v43  ;;  %v1363_v10 = vsub.f32 0.0, %v3773_v16  ;;  %v1364_v43 = vsub.f32 0.0, %v3777_v19 }
 0x319   : > { %5168 = vst [vmem:[#allocation84_spill] sm:$0xff] %v4065_v27  ;;  %5169 = vst [vmem:[#allocation85_spill] sm:$0xff] %v4069_v35  ;;  %v1360_v27 = vsub.f32 0.0, %v3761_v53  ;;  %v1439_v7 = vmul.f32 1.442695, %v1354_v57  ;;  %v1365_v53 = vsub.f32 0.0, %v3781_v50 }
 0x31a   : > { %5170 = vst [vmem:[#allocation86_spill] sm:$0xff] %v4073_v31  ;;  %v1441_v35 = vmul.f32 1.442695, %v1355_v47  ;;  %v1443_v18 = vmul.f32 1.442695, %v1356_v22  ;;  %v1366_v47 = vsub.f32 0.0, %v3785_v5 }
 0x31b   : > { %2141 = vpow2.f32 %v1439_v7  ;;  %v1447_v1 = vmul.f32 1.442695, %v1358_v14  ;;  %v1449_v29 = vmul.f32 1.442695, %v1359_v9  ;;  %v1451_v60 = vmul.f32 1.442695, %v1360_v27 }
 0x31c   : > { %2143 = vpow2.f32 %v1441_v35  ;;  %v1453_v57 = vmul.f32 1.442695, %v1361_v4  ;;  %v1455_v22 = vmul.f32 1.442695, %v1362_v32  ;;  %v1457_v14 = vmul.f32 1.442695, %v1363_v10 }
 0x31d   : > { %2145 = vpow2.f32 %v1443_v18  ;;  %v1368_v7 = vsub.f32 0.0, %v3793_v25  ;;  %v1459_v35 = vmul.f32 1.442695, %v1364_v43  ;;  %v1369_v9 = vsub.f32 0.0, %v3797_v17  ;;  %v5171_v43 = vld [vmem:[#allocation13_spill] sm:$0xff] }
 0x31e   : > { %2147 = vpow2.f32 %v1445_v26  ;;  %v1461_v27 = vmul.f32 1.442695, %v1365_v53  ;;  %v1370_v18 = vsub.f32 0.0, %v3801_v36  ;;  %v1463_v4 = vmul.f32 1.442695, %v1366_v47 }
 0x31f   : > { %2149 = vpow2.f32 %v1447_v1  ;;  %v1371_v26 = vsub.f32 0.0, %v3805_v37  ;;  %v1465_v32 = vmul.f32 1.442695, %v1367_v11  ;;  %v1372_v10 = vsub.f32 0.0, %v3809_v38  ;;  %v5173_v11 = vld [vmem:[#allocation15_spill] sm:$0xff] }
 0x320   : > { %2151 = vpow2.f32 %v1449_v29  ;;  %v1467_v29 = vmul.f32 1.442695, %v1368_v7  ;;  %v1373_v17 = vsub.f32 0.0, %v5171_v43  ;;  %v1469_v53 = vmul.f32 1.442695, %v1369_v9  ;;  %v5174_v7 = vld [vmem:[#allocation16_spill] sm:$0xff] }
 0x321   : > { %2153 = vpow2.f32 %v1451_v60  ;;  %v1471_v37 = vmul.f32 1.442695, %v1370_v18  ;;  %v1375_v36 = vsub.f32 0.0, %v5173_v11  ;;  %v1473_v38 = vmul.f32 1.442695, %v1371_v26  ;;  %v5175_v9 = vld [vmem:[#allocation17_spill] sm:$0xff] }
 0x322   : > { %2155 = vpow2.f32 %v1453_v57  ;;  %v1376_v25 = vsub.f32 0.0, %v5174_v7  ;;  %v1475_v43 = vmul.f32 1.442695, %v1372_v10  ;;  %v1377_v49 = vsub.f32 0.0, %v5175_v9  ;;  %v5176_v18 = vld [vmem:[#allocation18_spill] sm:$0xff]  ;;  %v5177_v26 = vld [vmem:[#allocation19_spill] sm:$0xff] }
 0x323   : > { %2157 = vpow2.f32 %v1455_v22  ;;  %v5172_v22 = vld [vmem:[#allocation14_spill] sm:$0xff]  ;;  %v1378_v5 = vsub.f32 0.0, %v5176_v18  ;;  %v1379_v50 = vsub.f32 0.0, %v5177_v26  ;;  %v1481_v7 = vmul.f32 1.442695, %v1375_v36  ;;  %v5178_v10 = vld [vmem:[#allocation20_spill] sm:$0xff] }
 0x324   : > { %2159 = vpow2.f32 %v1457_v14  ;;  %v1374_v47 = vsub.f32 0.0, %v5172_v22  ;;  %v1477_v22 = vmul.f32 1.442695, %v1373_v17  ;;  %v1380_v19 = vsub.f32 0.0, %v5178_v10  ;;  %v5180_v17 = vld [vmem:[#allocation21_spill] sm:$0xff]  ;;  %v5184_v36 = vld [vmem:[#allocation23_spill] sm:$0xff] }
 0x325   : > { %v4093_v1 = vpop.eup %2141  ;;  %2161 = vpow2.f32 %v1459_v35  ;;  %v1483_v9 = vmul.f32 1.442695, %v1376_v25  ;;  %v1381_v16 = vsub.f32 0.0, %v5180_v17  ;;  %v1485_v18 = vmul.f32 1.442695, %v1377_v49  ;;  %v5186_v25 = vld [vmem:[#allocation24_spill] sm:$0xff] }
 0x326   : > { %v4096_v60 = vpop.eup %2143  ;;  %2163 = vpow2.f32 %v1461_v27  ;;  %v1479_v11 = vmul.f32 1.442695, %v1374_v47  ;;  %v5182_v47 = vld [vmem:[#allocation22_spill] sm:$0xff]  ;;  %v1487_v26 = vmul.f32 1.442695, %v1378_v5  ;;  %v1383_v6 = vsub.f32 0.0, %v5184_v36 }
 0x327   : > { %v4099_v57 = vpop.eup %2145  ;;  %2165 = vpow2.f32 %v1463_v4  ;;  %v1382_v54 = vsub.f32 0.0, %v5182_v47  ;;  %v1489_v10 = vmul.f32 1.442695, %v1379_v50  ;;  %v1491_v17 = vmul.f32 1.442695, %v1380_v19  ;;  %v5188_v49 = vld [vmem:[#allocation25_spill] sm:$0xff] }
 0x328   : > { %v4102_v14 = vpop.eup %2147  ;;  %2167 = vpow2.f32 %v1465_v32  ;;  %v1493_v47 = vmul.f32 1.442695, %v1381_v16  ;;  %v5190_v5 = vld [vmem:[#allocation26_spill] sm:$0xff]  ;;  %v5192_v50 = vld [vmem:[#allocation27_spill] sm:$0xff]  ;;  %v5194_v19 = vld [vmem:[#allocation28_spill] sm:$0xff] }
 0x329   : > { %v4105_v35 = vpop.eup %2149  ;;  %2169 = vpow2.f32 %v1467_v29  ;;  %v1495_v36 = vmul.f32 1.442695, %v1382_v54  ;;  %v5196_v16 = vld [vmem:[#allocation38_spill] sm:$0xff]  ;;  %v5197_v54 = vld [vmem:[#allocation53_spill] sm:$0xff] }
 0x32a   : > { %v4108_v27 = vpop.eup %2151  ;;  %2171 = vpow2.f32 %v1469_v53 }
 0x32b   : > { %v4111_v4 = vpop.eup %2153  ;;  %2173 = vpow2.f32 %v1471_v37 }
 0x32c   : > { %v4114_v32 = vpop.eup %2155  ;;  %2175 = vpow2.f32 %v1473_v38 }
 0x32d   : > { %v4117_v29 = vpop.eup %2157  ;;  %2177 = vpow2.f32 %v1475_v43 }
 0x32e   : > { %v4120_v53 = vpop.eup %2159  ;;  %2179 = vpow2.f32 %v1477_v22 }
 0x32f   : > { %5179 = vst [vmem:[#allocation87_spill] sm:$0xff] %v4120_v53  ;;  %v4123_v37 = vpop.eup %2161  ;;  %2181 = vpow2.f32 %v1479_v11  ;;  %v1384_v53 = vsub.f32 0.0, %v5186_v25  ;;  %v1497_v25 = vmul.f32 1.442695, %v1383_v6  ;;  %v5198_v6 = vld [vmem:[#allocation54_spill] sm:$0xff] }
 0x330   : > { %5181 = vst [vmem:[#allocation88_spill] sm:$0xff] %v4123_v37  ;;  %v4126_v38 = vpop.eup %2163  ;;  %2183 = vpow2.f32 %v1481_v7  ;;  %v1385_v37 = vsub.f32 0.0, %v5188_v49 }
 0x331   : > { %5183 = vst [vmem:[#allocation89_spill] sm:$0xff] %v4126_v38  ;;  %v4129_v43 = vpop.eup %2165  ;;  %2185 = vpow2.f32 %v1483_v9  ;;  %v1386_v38 = vsub.f32 0.0, %v5190_v5  ;;  %v1499_v49 = vmul.f32 1.442695, %v1384_v53  ;;  %v5199_v53 = vld [vmem:[#allocation55_spill] sm:$0xff] }
 0x332   : > { %5185 = vst [vmem:[#allocation90_spill] sm:$0xff] %v4129_v43  ;;  %v4132_v22 = vpop.eup %2167  ;;  %2187 = vpow2.f32 %v1485_v18  ;;  %v1387_v43 = vsub.f32 0.0, %v5192_v50  ;;  %v1501_v5 = vmul.f32 1.442695, %v1385_v37  ;;  %v1393_v37 = vsub.f32 0.0, %v3893_v3 }
 0x333   : > { %5187 = vst [vmem:[#allocation91_spill] sm:$0xff] %v4132_v22  ;;  %v4135_v11 = vpop.eup %2169  ;;  %2189 = vpow2.f32 %v1487_v26  ;;  %v1388_v22 = vsub.f32 0.0, %v5194_v19  ;;  %v1503_v50 = vmul.f32 1.442695, %v1386_v38  ;;  %v1394_v38 = vsub.f32 0.0, %v3897_v56 }
 0x334   : > { %5189 = vst [vmem:[#allocation92_spill] sm:$0xff] %v4135_v11  ;;  %v4138_v7 = vpop.eup %2171  ;;  %2191 = vpow2.f32 %v1489_v10  ;;  %v1389_v11 = vsub.f32 0.0, %v5196_v16  ;;  %v1505_v19 = vmul.f32 1.442695, %v1387_v43  ;;  %v1395_v43 = vsub.f32 0.0, %v3901_v40 }
 0x335   : > { %5191 = vst [vmem:[#allocation93_spill] sm:$0xff] %v4138_v7  ;;  %v4141_v9 = vpop.eup %2173  ;;  %2193 = vpow2.f32 %v1491_v17  ;;  %v1390_v7 = vsub.f32 0.0, %v5197_v54  ;;  %v1507_v16 = vmul.f32 1.442695, %v1388_v22  ;;  %v1396_v22 = vsub.f32 0.0, %v3905_v42 }
 0x336   : > { %5193 = vst [vmem:[#allocation94_spill] sm:$0xff] %v4141_v9  ;;  %v4144_v18 = vpop.eup %2175  ;;  %2195 = vpow2.f32 %v1493_v47  ;;  %v1391_v9 = vsub.f32 0.0, %v5198_v6  ;;  %v1509_v54 = vmul.f32 1.442695, %v1389_v11  ;;  %v1397_v11 = vsub.f32 0.0, %v3909_v44 }
 0x337   : > { %5195 = vst [vmem:[#allocation95_spill] sm:$0xff] %v4144_v18  ;;  %v4147_v26 = vpop.eup %2177  ;;  %2197 = vpow2.f32 %v1495_v36  ;;  %v1392_v18 = vsub.f32 0.0, %v5199_v53  ;;  %v1511_v6 = vmul.f32 1.442695, %v1390_v7  ;;  %v1517_v56 = vmul.f32 1.442695, %v1393_v37 }
 0x338   : > { %v4150_v10 = vpop.eup %2179  ;;  %2199 = vpow2.f32 %v1497_v25  ;;  %v1513_v53 = vmul.f32 1.442695, %v1391_v9  ;;  %v1398_v7 = vsub.f32 0.0, %v3913_v45  ;;  %v1519_v40 = vmul.f32 1.442695, %v1394_v38 }
 0x339   : > { %v4153_v17 = vpop.eup %2181  ;;  %2201 = vpow2.f32 %v1499_v49  ;;  %v1515_v3 = vmul.f32 1.442695, %v1392_v18  ;;  %v1399_v9 = vsub.f32 0.0, %v3917_v46  ;;  %v1521_v42 = vmul.f32 1.442695, %v1395_v43 }
 0x33a   : > { %v4156_v47 = vpop.eup %2183  ;;  %2203 = vpow2.f32 %v1501_v5  ;;  %v1400_v18 = vsub.f32 0.0, %v3921_v51  ;;  %v1523_v44 = vmul.f32 1.442695, %v1396_v22  ;;  %v1401_v37 = vsub.f32 0.0, %v3925_v41 }
 0x33b   : > { %v4159_v36 = vpop.eup %2185  ;;  %2205 = vpow2.f32 %v1503_v50  ;;  %v1525_v45 = vmul.f32 1.442695, %v1397_v11  ;;  %v1402_v38 = vsub.f32 0.0, %v3929_v8  ;;  %v1527_v46 = vmul.f32 1.442695, %v1398_v7 }
 0x33c   : > { %v4162_v25 = vpop.eup %2187  ;;  %2207 = vpow2.f32 %v1505_v19  ;;  %v1403_v43 = vsub.f32 0.0, %v3933_v39  ;;  %v1529_v51 = vmul.f32 1.442695, %v1399_v9  ;;  %v1404_v22 = vsub.f32 0.0, %v3937_v48  ;;  %v5201_v9 = vld [vmem:[#allocation43_spill] sm:$0xff] }
 0x33d   : > { %v4165_v49 = vpop.eup %2189  ;;  %2209 = vpow2.f32 %v1507_v16  ;;  %v1531_v41 = vmul.f32 1.442695, %v1400_v18  ;;  %v1405_v11 = vsub.f32 0.0, %v3941_v33  ;;  %v1533_v8 = vmul.f32 1.442695, %v1401_v37 }
 0x33e   : > { %v4168_v5 = vpop.eup %2191  ;;  %2211 = vpow2.f32 %v1509_v54  ;;  %v1406_v7 = vsub.f32 0.0, %v3945_v58  ;;  %v1535_v39 = vmul.f32 1.442695, %v1402_v38  ;;  %v1537_v48 = vmul.f32 1.442695, %v1403_v43 }
 0x33f   : > { %v4171_v50 = vpop.eup %2193  ;;  %2213 = vpow2.f32 %v1511_v6  ;;  %v1408_v18 = vsub.f32 0.0, %v3953_v52  ;;  %v1539_v33 = vmul.f32 1.442695, %v1404_v22  ;;  %v1409_v37 = vsub.f32 0.0, %v3957_v21 }
 0x340   : > { %v4174_v19 = vpop.eup %2195  ;;  %2215 = vpow2.f32 %v1513_v53  ;;  %v1541_v58 = vmul.f32 1.442695, %v1405_v11  ;;  %v1410_v38 = vsub.f32 0.0, %v3961_v24  ;;  %v1411_v43 = vsub.f32 0.0, %v3965_v2 }
 0x341   : > { %v4177_v16 = vpop.eup %2197  ;;  %2217 = vpow2.f32 %v1515_v3  ;;  %v1412_v22 = vsub.f32 0.0, %v3969_v55  ;;  %v1547_v21 = vmul.f32 1.442695, %v1408_v18  ;;  %v1413_v11 = vsub.f32 0.0, %v3973_v59 }
 0x342   : > { %v4180_v54 = vpop.eup %2199  ;;  %2219 = vpow2.f32 %v1517_v56  ;;  %v1549_v24 = vmul.f32 1.442695, %v1409_v37  ;;  %v1551_v2 = vmul.f32 1.442695, %v1410_v38  ;;  %v1553_v55 = vmul.f32 1.442695, %v1411_v43 }
 0x343   : > { %v4183_v6 = vpop.eup %2201  ;;  %2221 = vpow2.f32 %v1519_v40  ;;  %v1416_v18 = vsub.f32 0.0, %v3985_v62  ;;  %v1555_v59 = vmul.f32 1.442695, %v1412_v22  ;;  %v1417_v37 = vsub.f32 0.0, %v3989_v63 }
 0x344   : > { %v4186_v53 = vpop.eup %2203  ;;  %2223 = vpow2.f32 %v1521_v42  ;;  %v1418_v38 = vsub.f32 0.0, %v3993_v0  ;;  %v1419_v43 = vsub.f32 0.0, %v3997_v20  ;;  %v1420_v22 = vsub.f32 0.0, %v4001_v15 }
 0x345   : > { %v4189_v3 = vpop.eup %2205  ;;  %2225 = vpow2.f32 %v1523_v44  ;;  %v1563_v63 = vmul.f32 1.442695, %v1416_v18  ;;  %v1565_v0 = vmul.f32 1.442695, %v1417_v37  ;;  %v5210_v18 = vld [vmem:[#allocation78_spill] sm:$0xff]  ;;  %v5211_v37 = vld [vmem:[#allocation79_spill] sm:$0xff] }
 0x346   : > { %5200 = vst [vmem:[#allocation96_spill] sm:$0xff] %v4189_v3  ;;  %v4192_v56 = vpop.eup %2207  ;;  %2227 = vpow2.f32 %v1525_v45  ;;  %v1407_v3 = vsub.f32 0.0, %v5201_v9  ;;  %v1543_v9 = vmul.f32 1.442695, %v1406_v7  ;;  %v1414_v7 = vsub.f32 0.0, %v3977_v34 }
 0x347   : > { %v4195_v40 = vpop.eup %2209  ;;  %2229 = vpow2.f32 %v1527_v46  ;;  %v1557_v34 = vmul.f32 1.442695, %v1413_v11  ;;  %v1421_v11 = vsub.f32 0.0, %v4005_v28  ;;  %v1567_v20 = vmul.f32 1.442695, %v1418_v38  ;;  %v5212_v38 = vld [vmem:[#allocation80_spill] sm:$0xff] }
 0x348   : > { %v4198_v42 = vpop.eup %2211  ;;  %2231 = vpow2.f32 %v1529_v51  ;;  %v1545_v52 = vmul.f32 1.442695, %v1407_v3  ;;  %v1415_v3 = vsub.f32 0.0, %v3981_v61  ;;  %v1559_v61 = vmul.f32 1.442695, %v1414_v7  ;;  %v5206_v7 = vld [vmem:[#allocation76_spill] sm:$0xff] }
 0x349   : > { %v4201_v44 = vpop.eup %2213  ;;  %2233 = vpow2.f32 %v1531_v41  ;;  %v1569_v15 = vmul.f32 1.442695, %v1419_v43  ;;  %v1571_v28 = vmul.f32 1.442695, %v1420_v22  ;;  %v5213_v43 = vld [vmem:[#allocation81_spill] sm:$0xff]  ;;  %v1428_v22 = vsub.f32 0.0, %v4033_v30 }
 0x34a   : > { %v4204_v45 = vpop.eup %2215  ;;  %2235 = vpow2.f32 %v1533_v8  ;;  %v1561_v62 = vmul.f32 1.442695, %v1415_v3  ;;  %v5208_v3 = vld [vmem:[#allocation77_spill] sm:$0xff] }
 0x34b   : > { %v4207_v46 = vpop.eup %2217  ;;  %2237 = vpow2.f32 %v1535_v39 }
 0x34c   : > { %v4210_v51 = vpop.eup %2219  ;;  %2239 = vpow2.f32 %v1537_v48 }
 0x34d   : > { %v4213_v41 = vpop.eup %2221  ;;  %2241 = vpow2.f32 %v1539_v33 }
 0x34e   : > { %v4216_v8 = vpop.eup %2223  ;;  %2243 = vpow2.f32 %v1541_v58 }
 0x34f   : > { %v4219_v39 = vpop.eup %2225  ;;  %2245 = vpow2.f32 %v1543_v9 }
 0x350   : > { %v4222_v48 = vpop.eup %2227  ;;  %2247 = vpow2.f32 %v1545_v52 }
 0x351   : > { %v4225_v33 = vpop.eup %2229  ;;  %2249 = vpow2.f32 %v1547_v21 }
 0x352   : > { %v4228_v58 = vpop.eup %2231  ;;  %2251 = vpow2.f32 %v1549_v24 }
 0x353   : > { %v4231_v9 = vpop.eup %2233  ;;  %2253 = vpow2.f32 %v1551_v2 }
 0x354   : > { %v4234_v52 = vpop.eup %2235  ;;  %2255 = vpow2.f32 %v1553_v55 }
 0x355   : > { %5202 = vst [vmem:[#allocation97_spill] sm:$0xff] %v4234_v52  ;;  %v4237_v21 = vpop.eup %2237  ;;  %2257 = vpow2.f32 %v1555_v59  ;;  %v1422_v52 = vsub.f32 0.0, %v5206_v7  ;;  %v1573_v7 = vmul.f32 1.442695, %v1421_v11  ;;  %v1429_v11 = vsub.f32 0.0, %v4037_v12 }
 0x356   : > { %5203 = vst [vmem:[#allocation98_spill] sm:$0xff] %v4237_v21  ;;  %v4240_v24 = vpop.eup %2239  ;;  %2259 = vpow2.f32 %v1557_v34  ;;  %v1423_v21 = vsub.f32 0.0, %v5208_v3  ;;  %v1587_v12 = vmul.f32 1.442695, %v1428_v22  ;;  %v5225_v22 = vld [vmem:[#allocation84_spill] sm:$0xff] }
 0x357   : > { %5204 = vst [vmem:[#allocation99_spill] sm:$0xff] %v4240_v24  ;;  %v4243_v2 = vpop.eup %2241  ;;  %2261 = vpow2.f32 %v1559_v61  ;;  %v1424_v24 = vsub.f32 0.0, %v5210_v18  ;;  %v1575_v3 = vmul.f32 1.442695, %v1422_v52  ;;  %v1430_v52 = vsub.f32 0.0, %v4041_v23 }
 0x358   : > { %5205 = vst [vmem:[#allocation100_spill] sm:$0xff] %v4243_v2  ;;  %v4246_v55 = vpop.eup %2243  ;;  %2263 = vpow2.f32 %v1561_v62  ;;  %v1425_v2 = vsub.f32 0.0, %v5211_v37  ;;  %v1577_v18 = vmul.f32 1.442695, %v1423_v21  ;;  %v1431_v21 = vsub.f32 0.0, %v4045_v13 }
 0x359   : > { %5207 = vst [vmem:[#allocation101_spill] sm:$0xff] %v4246_v55  ;;  %v4249_v59 = vpop.eup %2245  ;;  %2265 = vpow2.f32 %v1563_v63  ;;  %v1426_v55 = vsub.f32 0.0, %v5212_v38  ;;  %v1579_v37 = vmul.f32 1.442695, %v1424_v24  ;;  %v5218_v24 = vld [vmem:[#allocation8_spill] sm:$0xff] }
 0x35a   : > { %5209 = vst [vmem:[#allocation102_spill] sm:$0xff] %v4249_v59  ;;  %v4252_v34 = vpop.eup %2247  ;;  %2267 = vpow2.f32 %v1565_v0  ;;  %v1427_v59 = vsub.f32 0.0, %v5213_v43  ;;  %v1581_v38 = vmul.f32 1.442695, %v1425_v2  ;;  %v5220_v2 = vld [vmem:[#allocation9_spill] sm:$0xff] }
 0x35b   : > { %v4255_v61 = vpop.eup %2249  ;;  %2269 = vpow2.f32 %v1567_v20  ;;  %v1583_v43 = vmul.f32 1.442695, %v1426_v55  ;;  %v1589_v23 = vmul.f32 1.442695, %v1429_v11  ;;  %v5222_v55 = vld [vmem:[#allocation82_spill] sm:$0xff]  ;;  %v5226_v11 = vld [vmem:[#allocation85_spill] sm:$0xff] }
 0x35c   : > { %v4258_v62 = vpop.eup %2251  ;;  %2271 = vpow2.f32 %v1569_v15  ;;  %v1585_v30 = vmul.f32 1.442695, %v1427_v59  ;;  %v1591_v13 = vmul.f32 1.442695, %v1430_v52  ;;  %v5223_v59 = vld [vmem:[#allocation83_spill] sm:$0xff]  ;;  %v1438_v52 = vsub.f32 0.0, %v4073_v31 }
 0x35d   : > { %v4261_v63 = vpop.eup %2253  ;;  %2273 = vpow2.f32 %v1571_v28 }
 0x35e   : > { %v4264_v0 = vpop.eup %2255  ;;  %2275 = vpow2.f32 %v1573_v7 }
 0x35f   : > { %5214 = vst [vmem:[#allocation103_spill] sm:$0xff] %v4264_v0  ;;  %v4267_v20 = vpop.eup %2257  ;;  %2277 = vpow2.f32 %v1575_v3  ;;  %v1432_v0 = vsub.f32 0.0, %v5218_v24  ;;  %v1593_v24 = vmul.f32 1.442695, %v1431_v21 }
 0x360   : > { %5215 = vst [vmem:[#allocation104_spill] sm:$0xff] %v4267_v20  ;;  %v4270_v15 = vpop.eup %2259  ;;  %2279 = vpow2.f32 %v1577_v18  ;;  %v1433_v20 = vsub.f32 0.0, %v5220_v2 }
 0x361   : > { %5216 = vst [vmem:[#allocation105_spill] sm:$0xff] %v4270_v15  ;;  %v4273_v28 = vpop.eup %2261  ;;  %2281 = vpow2.f32 %v1579_v37  ;;  %v1434_v15 = vsub.f32 0.0, %v5222_v55  ;;  %v1595_v2 = vmul.f32 1.442695, %v1432_v0 }
 0x362   : > { %5217 = vst [vmem:[#allocation106_spill] sm:$0xff] %v4273_v28  ;;  %v4276_v7 = vpop.eup %2263  ;;  %2283 = vpow2.f32 %v1581_v38  ;;  %v1435_v28 = vsub.f32 0.0, %v5223_v59  ;;  %v1597_v55 = vmul.f32 1.442695, %v1433_v20  ;;  %v1607_v20 = vmul.f32 1.442695, %v1438_v52 }
 0x363   : > { %5219 = vst [vmem:[#allocation107_spill] sm:$0xff] %v4276_v7  ;;  %v4279_v3 = vpop.eup %2265  ;;  %2285 = vpow2.f32 %v1583_v43  ;;  %v1436_v7 = vsub.f32 0.0, %v5225_v22  ;;  %v1599_v59 = vmul.f32 1.442695, %v1434_v15  ;;  %v1614_v52 = vadd.f32 1.0, %v4108_v27 }
 0x364   : > { %5221 = vst [vmem:[#allocation108_spill] sm:$0xff] %v4279_v3  ;;  %v4282_v18 = vpop.eup %2267  ;;  %2287 = vpow2.f32 %v1585_v30  ;;  %v1437_v3 = vsub.f32 0.0, %v5226_v11  ;;  %v1601_v21 = vmul.f32 1.442695, %v1435_v28  ;;  %v1610_v28 = vadd.f32 1.0, %v4096_v60 }
 0x365   : > { %v4285_v37 = vpop.eup %2269  ;;  %2289 = vpow2.f32 %v1587_v12  ;;  %v1603_v12 = vmul.f32 1.442695, %v1436_v7  ;;  %v1611_v7 = vadd.f32 1.0, %v4099_v57 }
 0x366   : > { %5224 = vst [vmem:[#allocation109_spill] sm:$0xff] %v4285_v37  ;;  %v4288_v38 = vpop.eup %2271  ;;  %2291 = vpow2.f32 %v1589_v23  ;;  %v1605_v11 = vmul.f32 1.442695, %v1437_v3  ;;  %v1612_v3 = vadd.f32 1.0, %v4102_v14 }
 0x367   : > { %v4291_v43 = vpop.eup %2273  ;;  %2293 = vpow2.f32 %v1591_v13  ;;  %v1609_v13 = vadd.f32 1.0, %v4093_v1 }
 0x368   : > { %v4294_v30 = vpop.eup %2275  ;;  %2295 = vpow2.f32 %v1593_v24 }
 0x369   : > { %v4296_v37 = vpop.eup %2277  ;;  %2297 = vpow2.f32 %v1595_v2 }
 0x36a   : > { %v4298_v0 = vpop.eup %2279  ;;  %2299 = vpow2.f32 %v1597_v55 }
 0x36b   : > { %v4300_v23 = vpop.eup %2281  ;;  %2301 = vpow2.f32 %v1599_v59  ;;  %v1613_v59 = vadd.f32 1.0, %v4105_v35  ;;  %v1617_v35 = vadd.f32 1.0, %v4117_v29  ;;  %v5238_v29 = vld [vmem:[#allocation90_spill] sm:$0xff] }
 0x36c   : > { %v4302_v22 = vpop.eup %2283  ;;  %2303 = vpow2.f32 %v1601_v21  ;;  %v1616_v21 = vadd.f32 1.0, %v4114_v32  ;;  %v5236_v32 = vld [vmem:[#allocation89_spill] sm:$0xff] }
 0x36d   : > { %v4305_v15 = vpop.eup %2285  ;;  %2305 = vpow2.f32 %v1603_v12 }
 0x36e   : > { %v4308_v24 = vpop.eup %2287  ;;  %2307 = vpow2.f32 %v1605_v11  ;;  %v1615_v11 = vadd.f32 1.0, %v4111_v4  ;;  %v5234_v4 = vld [vmem:[#allocation88_spill] sm:$0xff] }
 0x36f   : > { %v4311_v2 = vpop.eup %2289  ;;  %2309 = vpow2.f32 %v1607_v20  ;;  %v5232_v20 = vld [vmem:[#allocation87_spill] sm:$0xff] }
 0x370   : > { %v4314_v55 = vpop.eup %2291  ;;  %2311 = vrcp.f32 %v1609_v13  ;;  %v1618_v27 = vadd.f32 1.0, %v5232_v20 }
 0x371   : > { %v4317_v1 = vpop.eup %2293  ;;  %2313 = vrcp.f32 %v1610_v28  ;;  %v1619_v28 = vadd.f32 1.0, %v5234_v4 }
 0x372   : > { %5227 = vst [vmem:[#allocation110_spill] sm:$0xff] %v4317_v1  ;;  %v4320_v60 = vpop.eup %2295  ;;  %2315 = vrcp.f32 %v1611_v7 }
 0x373   : > { %5228 = vst [vmem:[#allocation111_spill] sm:$0xff] %v4320_v60  ;;  %v4323_v57 = vpop.eup %2297  ;;  %2317 = vrcp.f32 %v1612_v3  ;;  %v1620_v3 = vadd.f32 1.0, %v5236_v32  ;;  %v5242_v32 = vld [vmem:[#allocation93_spill] sm:$0xff]  ;;  %v5246_v60 = vld [vmem:[#allocation95_spill] sm:$0xff] }
 0x374   : > { %5229 = vst [vmem:[#allocation112_spill] sm:$0xff] %v4323_v57  ;;  %v4326_v14 = vpop.eup %2299  ;;  %2319 = vrcp.f32 %v1613_v59  ;;  %v1621_v59 = vadd.f32 1.0, %v5238_v29  ;;  %v1624_v29 = vadd.f32 1.0, %v5242_v32  ;;  %v1626_v1 = vadd.f32 1.0, %v5246_v60  ;;  %v5249_v60 = vld [vmem:[#allocation61_spill] sm:$0xff] }
 0x375   : > { %5230 = vst [vmem:[#allocation113_spill] sm:$0xff] %v4326_v14  ;;  %v4329_v12 = vpop.eup %2301  ;;  %2321 = vrcp.f32 %v1614_v52  ;;  %v5240_v14 = vld [vmem:[#allocation91_spill] sm:$0xff] }
 0x376   : > { %5231 = vst [vmem:[#allocation114_spill] sm:$0xff] %v4329_v12  ;;  %v4332_v13 = vpop.eup %2303  ;;  %2323 = vrcp.f32 %v1615_v11  ;;  %v1622_v20 = vadd.f32 1.0, %v5240_v14  ;;  %v5241_v11 = vld [vmem:[#allocation92_spill] sm:$0xff] }
 0x377   : > { %5233 = vst [vmem:[#allocation87_spill] sm:$0xff] %v4332_v13  ;;  %v4335_v7 = vpop.eup %2305  ;;  %2325 = vrcp.f32 %v1616_v21  ;;  %v1623_v21 = vadd.f32 1.0, %v5241_v11  ;;  %v5247_v11 = vld [vmem:[#allocation59_spill] sm:$0xff] }
 0x378   : > { %5235 = vst [vmem:[#allocation88_spill] sm:$0xff] %v4335_v7  ;;  %v4338_v31 = vpop.eup %2307  ;;  %2327 = vrcp.f32 %v1617_v35  ;;  %v5243_v35 = vld [vmem:[#allocation10_spill] sm:$0xff] }
 0x379   : > { %5237 = vst [vmem:[#allocation89_spill] sm:$0xff] %v4338_v31  ;;  %v4341_v12 = vpop.eup %2309  ;;  %2329 = vrcp.f32 %v1618_v27  ;;  %v5244_v27 = vld [vmem:[#allocation94_spill] sm:$0xff] }
 0x37a   : > { %5239 = vst [vmem:[#allocation90_spill] sm:$0xff] %v4341_v12  ;;  %v2312_v52 = vpop.eup %2311  ;;  %2331 = vrcp.f32 %v1619_v28  ;;  %v1625_v31 = vadd.f32 1.0, %v5244_v27  ;;  %v5245_v7 = vld [vmem:[#allocation58_spill] sm:$0xff]  ;;  %v1631_v27 = vadd.f32 1.0, %v4159_v36 }
 0x37b   : > { %v2314_v4 = vpop.eup %2313  ;;  %2333 = vrcp.f32 %v1620_v3  ;;  %v1779_v12 = vmul.f32 %v2312_v52, %v5243_v35  ;;  %v1627_v3 = vadd.f32 1.0, %v4147_v26  ;;  %v5248_v52 = vld [vmem:[#allocation60_spill] sm:$0xff]  ;;  %v5250_v26 = vld [vmem:[#allocation62_spill] sm:$0xff] }
 0x37c   : > { %v2316_v14 = vpop.eup %2315  ;;  %2335 = vrcp.f32 %v1621_v59  ;;  %v1780_v13 = vmul.f32 %v2314_v4, %v5245_v7  ;;  %v1628_v7 = vadd.f32 1.0, %v4150_v10  ;;  %v5251_v10 = vld [vmem:[#allocation63_spill] sm:$0xff]  ;;  %v5254_v36 = vld [vmem:[#allocation66_spill] sm:$0xff] }
 0x37d   : > { %v2318_v57 = vpop.eup %2317  ;;  %2337 = vrcp.f32 %v1622_v20  ;;  %v1781_v28 = vmul.f32 %v2316_v14, %v5247_v11  ;;  %1864 = vst.msk [vmem:[%s4349_s16] sm:$0xff] %vm416_vm1, %v1779_v12  ;;  %v1629_v12 = vadd.f32 1.0, %v4153_v17  ;;  %v5252_v17 = vld [vmem:[#allocation64_spill] sm:$0xff] }
 0x37e   : > { %v2320_v32 = vpop.eup %2319  ;;  %2339 = vrcp.f32 %v1623_v21  ;;  %v1782_v35 = vmul.f32 %v2318_v57, %v5248_v52  ;;  %1865 = vst.msk [vmem:[%s4349_s16 + $0x8] sm:$0xff] %vm416_vm1, %v1780_v13  ;;  %v1630_v13 = vadd.f32 1.0, %v4156_v47  ;;  %v5253_v47 = vld [vmem:[#allocation65_spill] sm:$0xff]  ;;  %v1633_v52 = vadd.f32 1.0, %v4165_v49  ;;  %v5256_v49 = vld [vmem:[#allocation68_spill] sm:$0xff] }
 0x37f   : > { %v2322_v59 = vpop.eup %2321  ;;  %2341 = vrcp.f32 %v1624_v29  ;;  %v1783_v20 = vmul.f32 %v2320_v32, %v5249_v60  ;;  %1866 = vst.msk [vmem:[%s4349_s16 + $0x10] sm:$0xff] %vm416_vm1, %v1781_v28  ;;  %v1632_v28 = vadd.f32 1.0, %v4162_v25  ;;  %v5255_v25 = vld [vmem:[#allocation67_spill] sm:$0xff] }
 0x380   : > { %v2324_v4 = vpop.eup %2323  ;;  %2343 = vrcp.f32 %v1625_v31  ;;  %v1784_v21 = vmul.f32 %v2322_v59, %v5250_v26  ;;  %1867 = vst.msk [vmem:[%s4349_s16 + $0x18] sm:$0xff] %vm416_vm1, %v1782_v35  ;;  %v1634_v59 = vadd.f32 1.0, %v4168_v5  ;;  %v1636_v26 = vadd.f32 1.0, %v4174_v19  ;;  %v5257_v5 = vld [vmem:[#allocation69_spill] sm:$0xff]  ;;  %v5259_v19 = vld [vmem:[#allocation71_spill] sm:$0xff] }
 0x381   : > { %v2326_v57 = vpop.eup %2325  ;;  %2345 = vrcp.f32 %v1626_v1  ;;  %v1785_v29 = vmul.f32 %v2324_v4, %v5251_v10  ;;  %1868 = vst.msk [vmem:[%s4349_s16 + $0x20] sm:$0xff] %vm416_vm1, %v1783_v20  ;;  %v1635_v20 = vadd.f32 1.0, %v4171_v50  ;;  %v5258_v50 = vld [vmem:[#allocation70_spill] sm:$0xff] }
 0x382   : > { %v2328_v14 = vpop.eup %2327  ;;  %2347 = vrcp.f32 %v1627_v3  ;;  %v1786_v31 = vmul.f32 %v2326_v57, %v5252_v17  ;;  %1869 = vst.msk [vmem:[%s4349_s16 + $0x28] sm:$0xff] %vm416_vm1, %v1784_v21 }
 0x383   : > { %v2330_v11 = vpop.eup %2329  ;;  %2349 = vrcp.f32 %v1628_v7  ;;  %v1787_v1 = vmul.f32 %v2328_v14, %v5253_v47  ;;  %1870 = vst.msk [vmem:[%s4349_s16 + $0x30] sm:$0xff] %vm416_vm1, %v1785_v29  ;;  %v1638_v14 = vadd.f32 1.0, %v4180_v54  ;;  %v1640_v47 = vadd.f32 1.0, %v4186_v53  ;;  %v5261_v54 = vld [vmem:[#allocation73_spill] sm:$0xff]  ;;  %v5264_v53 = vld [vmem:[#allocation12_spill] sm:$0xff] }
 0x384   : > { %v2332_v32 = vpop.eup %2331  ;;  %2351 = vrcp.f32 %v1629_v12  ;;  %v1788_v3 = vmul.f32 %v2330_v11, %v5254_v36  ;;  %1871 = vst.msk [vmem:[%s4349_s16 + $0x38] sm:$0xff] %vm416_vm1, %v1786_v31  ;;  %v1639_v31 = vadd.f32 1.0, %v4183_v6  ;;  %v5263_v6 = vld [vmem:[#allocation11_spill] sm:$0xff] }
 0x385   : > { %v2334_v35 = vpop.eup %2333  ;;  %2353 = vrcp.f32 %v1630_v13  ;;  %v1789_v7 = vmul.f32 %v2332_v32, %v5255_v25  ;;  %1872 = vst.msk [vmem:[%s4349_s16 + $0x40] sm:$0xff] %vm416_vm1, %v1787_v1  ;;  %v1637_v13 = vadd.f32 1.0, %v4177_v16  ;;  %v5260_v16 = vld [vmem:[#allocation72_spill] sm:$0xff] }
 0x386   : > { %v2336_v60 = vpop.eup %2335  ;;  %2355 = vrcp.f32 %v1631_v27  ;;  %v1790_v4 = vmul.f32 %v2334_v35, %v5256_v49  ;;  %1873 = vst.msk [vmem:[%s4349_s16 + $0x48] sm:$0xff] %vm416_vm1, %v1788_v3 }
 0x387   : > { %v2338_v12 = vpop.eup %2337  ;;  %2357 = vrcp.f32 %v1632_v28  ;;  %v1791_v21 = vmul.f32 %v2336_v60, %v5257_v5  ;;  %1874 = vst.msk [vmem:[%s4349_s16 + $0x50] sm:$0xff] %vm416_vm1, %v1789_v7  ;;  %v1643_v60 = vadd.f32 1.0, %v4195_v40  ;;  %v5267_v40 = vld [vmem:[#allocation15_spill] sm:$0xff] }
 0x388   : > { %v2340_v57 = vpop.eup %2339  ;;  %2359 = vrcp.f32 %v1633_v52  ;;  %v1792_v10 = vmul.f32 %v2338_v12, %v5258_v50  ;;  %1875 = vst.msk [vmem:[%s4349_s16 + $0x58] sm:$0xff] %vm416_vm1, %v1790_v4  ;;  %v5262_v52 = vld [vmem:[#allocation96_spill] sm:$0xff]  ;;  %v1644_v12 = vadd.f32 1.0, %v4198_v42  ;;  %v1646_v50 = vadd.f32 1.0, %v4204_v45  ;;  %v5270_v45 = vld [vmem:[#allocation18_spill] sm:$0xff] }
 0x389   : > { %v2342_v29 = vpop.eup %2341  ;;  %2361 = vrcp.f32 %v1634_v59  ;;  %v1793_v27 = vmul.f32 %v2340_v57, %v5259_v19  ;;  %1876 = vst.msk [vmem:[%s4349_s16 + $0x60] sm:$0xff] %vm416_vm1, %v1791_v21  ;;  %v1641_v36 = vadd.f32 1.0, %v5262_v52  ;;  %v1642_v59 = vadd.f32 1.0, %v4192_v56  ;;  %v5266_v56 = vld [vmem:[#allocation14_spill] sm:$0xff]  ;;  %v5268_v42 = vld [vmem:[#allocation16_spill] sm:$0xff] }
 0x38a   : > { %v2344_v17 = vpop.eup %2343  ;;  %2363 = vrcp.f32 %v1635_v20  ;;  %v1794_v11 = vmul.f32 %v2342_v29, %v5260_v16  ;;  %1877 = vst.msk [vmem:[%s4349_s16 + $0x68] sm:$0xff] %vm416_vm1, %v1792_v10  ;;  %v5265_v20 = vld [vmem:[#allocation13_spill] sm:$0xff]  ;;  %v1645_v21 = vadd.f32 1.0, %v4201_v44  ;;  %v1651_v52 = vadd.f32 1.0, %v4219_v39  ;;  %v5275_v39 = vld [vmem:[#allocation23_spill] sm:$0xff] }
 0x38b   : > { %v2346_v28 = vpop.eup %2345  ;;  %2365 = vrcp.f32 %v1636_v26  ;;  %v1795_v1 = vmul.f32 %v2344_v17, %v5261_v54  ;;  %1878 = vst.msk [vmem:[%s4349_s16 + $0x70] sm:$0xff] %vm416_vm1, %v1793_v27  ;;  %v5269_v44 = vld [vmem:[#allocation17_spill] sm:$0xff]  ;;  %v1648_v17 = vadd.f32 1.0, %v4210_v51  ;;  %v1650_v54 = vadd.f32 1.0, %v4216_v8  ;;  %v5272_v51 = vld [vmem:[#allocation20_spill] sm:$0xff]  ;;  %v5274_v8 = vld [vmem:[#allocation22_spill] sm:$0xff] }
 0x38c   : > { %v2348_v32 = vpop.eup %2347  ;;  %2367 = vrcp.f32 %v1637_v13  ;;  %v1796_v3 = vmul.f32 %v2346_v28, %v5263_v6  ;;  %1879 = vst.msk [vmem:[%s4349_s16 + $0x78] sm:$0xff] %vm416_vm1, %v1794_v11  ;;  %v1649_v11 = vadd.f32 1.0, %v4213_v41  ;;  %v5273_v41 = vld [vmem:[#allocation21_spill] sm:$0xff] }
 0x38d   : > { %v2350_v35 = vpop.eup %2349  ;;  %2369 = vrcp.f32 %v1638_v14  ;;  %v1797_v25 = vmul.f32 %v2348_v32, %v5264_v53  ;;  %1880 = vst.msk [vmem:[%s4349_s16 + $0x80] sm:$0xff] %vm416_vm1, %v1795_v1  ;;  %v1647_v14 = vadd.f32 1.0, %v4207_v46  ;;  %v5271_v46 = vld [vmem:[#allocation19_spill] sm:$0xff]  ;;  %v1653_v53 = vadd.f32 1.0, %v4225_v33  ;;  %v5277_v33 = vld [vmem:[#allocation25_spill] sm:$0xff] }
 0x38e   : > { %v2352_v7 = vpop.eup %2351  ;;  %2371 = vrcp.f32 %v1639_v31  ;;  %v1798_v49 = vmul.f32 %v2350_v35, %v5265_v20  ;;  %1881 = vst.msk [vmem:[%s4349_s16 + $0x88] sm:$0xff] %vm416_vm1, %v1796_v3  ;;  %v1652_v3 = vadd.f32 1.0, %v4222_v48  ;;  %v5276_v48 = vld [vmem:[#allocation24_spill] sm:$0xff] }
 0x38f   : > { %v2354_v4 = vpop.eup %2353  ;;  %2373 = vrcp.f32 %v1640_v47  ;;  %v1799_v26 = vmul.f32 %v2352_v7, %v5266_v56  ;;  %1882 = vst.msk [vmem:[%s4349_s16 + $0x90] sm:$0xff] %vm416_vm1, %v1797_v25 }
 0x390   : > { %v2356_v5 = vpop.eup %2355  ;;  %2375 = vrcp.f32 %v1641_v36  ;;  %v1800_v57 = vmul.f32 %v2354_v4, %v5267_v40  ;;  %1883 = vst.msk [vmem:[%s4349_s16 + $0x98] sm:$0xff] %vm416_vm1, %v1798_v49  ;;  %v1655_v4 = vadd.f32 1.0, %v4231_v9  ;;  %v5281_v9 = vld [vmem:[#allocation27_spill] sm:$0xff] }
 0x391   : > { %v2358_v13 = vpop.eup %2357  ;;  %2377 = vrcp.f32 %v1642_v59  ;;  %v1801_v10 = vmul.f32 %v2356_v5, %v5268_v42  ;;  %1884 = vst.msk [vmem:[%s4349_s16 + $0xa0] sm:$0xff] %vm416_vm1, %v1799_v26  ;;  %v5278_v26 = vld [vmem:[#allocation97_spill] sm:$0xff] }
 0x392   : > { %v2360_v29 = vpop.eup %2359  ;;  %2379 = vrcp.f32 %v1643_v60  ;;  %v1802_v19 = vmul.f32 %v2358_v13, %v5269_v44  ;;  %1885 = vst.msk [vmem:[%s4349_s16 + $0xa8] sm:$0xff] %vm416_vm1, %v1800_v57  ;;  %v1654_v60 = vadd.f32 1.0, %v4228_v58  ;;  %v1656_v5 = vadd.f32 1.0, %v5278_v26  ;;  %v5279_v58 = vld [vmem:[#allocation26_spill] sm:$0xff]  ;;  %v5296_v26 = vld [vmem:[#allocation104_spill] sm:$0xff] }
 0x393   : > { %v2362_v27 = vpop.eup %2361  ;;  %2381 = vrcp.f32 %v1644_v12  ;;  %v1803_v31 = vmul.f32 %v2360_v29, %v5270_v45  ;;  %1886 = vst.msk [vmem:[%s4349_s16 + $0xb0] sm:$0xff] %vm416_vm1, %v1801_v10  ;;  %v5280_v57 = vld [vmem:[#allocation98_spill] sm:$0xff]  ;;  %v5282_v10 = vld [vmem:[#allocation99_spill] sm:$0xff] }
 0x394   : > { %v2364_v16 = vpop.eup %2363  ;;  %2383 = vrcp.f32 %v1645_v21  ;;  %v1804_v28 = vmul.f32 %v2362_v27, %v5271_v46  ;;  %1887 = vst.msk [vmem:[%s4349_s16 + $0xb8] sm:$0xff] %vm416_vm1, %v1802_v19  ;;  %v1657_v13 = vadd.f32 1.0, %v5280_v57  ;;  %v1658_v29 = vadd.f32 1.0, %v5282_v10  ;;  %v5284_v27 = vld [vmem:[#allocation100_spill] sm:$0xff]  ;;  %v5285_v45 = vld [vmem:[#allocation38_spill] sm:$0xff] }
 0x395   : > { %v2366_v47 = vpop.eup %2365  ;;  %2385 = vrcp.f32 %v1646_v50  ;;  %v1805_v1 = vmul.f32 %v2364_v16, %v5272_v51  ;;  %1888 = vst.msk [vmem:[%s4349_s16 + $0xc0] sm:$0xff] %vm416_vm1, %v1803_v31  ;;  %v5288_v51 = vld [vmem:[#allocation102_spill] sm:$0xff] }
 0x396   : > { %v2368_v32 = vpop.eup %2367  ;;  %2387 = vrcp.f32 %v1647_v14  ;;  %v1806_v36 = vmul.f32 %v2366_v47, %v5273_v41  ;;  %1889 = vst.msk [vmem:[%s4349_s16 + $0xc8] sm:$0xff] %vm416_vm1, %v1804_v28  ;;  %v5283_v14 = vld [vmem:[#allocation28_spill] sm:$0xff]  ;;  %v5287_v28 = vld [vmem:[#allocation53_spill] sm:$0xff] }
 0x397   : > { %v2370_v6 = vpop.eup %2369  ;;  %2389 = vrcp.f32 %v1648_v17  ;;  %v1807_v35 = vmul.f32 %v2368_v32, %v5274_v8  ;;  %1890 = vst.msk [vmem:[%s4349_s16 + $0xd0] sm:$0xff] %vm416_vm1, %v1805_v1  ;;  %v1659_v17 = vadd.f32 1.0, %v5284_v27  ;;  %v1661_v1 = vadd.f32 1.0, %v5288_v51  ;;  %v5289_v32 = vld [vmem:[#allocation54_spill] sm:$0xff]  ;;  %v5306_v51 = vld [vmem:[#allocation37_spill] sm:$0xff] }
 0x398   : > { %v2372_v59 = vpop.eup %2371  ;;  %2391 = vrcp.f32 %v1649_v11  ;;  %v1808_v25 = vmul.f32 %v2370_v6, %v5275_v39  ;;  %1891 = vst.msk [vmem:[%s4349_s16 + $0xd8] sm:$0xff] %vm416_vm1, %v1806_v36  ;;  %v5286_v11 = vld [vmem:[#allocation101_spill] sm:$0xff]  ;;  %v1662_v36 = vadd.f32 1.0, %v4252_v34  ;;  %v5290_v6 = vld [vmem:[#allocation55_spill] sm:$0xff] }
 0x399   : > { %v2374_v7 = vpop.eup %2373  ;;  %2393 = vrcp.f32 %v1650_v54  ;;  %v1809_v20 = vmul.f32 %v2372_v59, %v5276_v48  ;;  %1892 = vst.msk [vmem:[%s4349_s16 + $0xe0] sm:$0xff] %vm416_vm1, %v1807_v35  ;;  %v1660_v46 = vadd.f32 1.0, %v5286_v11  ;;  %v1663_v35 = vadd.f32 1.0, %v4255_v61  ;;  %v5291_v59 = vld [vmem:[#allocation56_spill] sm:$0xff]  ;;  %v5292_v34 = vld [vmem:[#allocation29_spill] sm:$0xff]  ;;  %v5293_v61 = vld [vmem:[#allocation30_spill] sm:$0xff] }
 0x39a   : > { %v2376_v49 = vpop.eup %2375  ;;  %2395 = vrcp.f32 %v1651_v52  ;;  %v1810_v12 = vmul.f32 %v2374_v7, %v5277_v33  ;;  %1893 = vst.msk [vmem:[%s4349_s16 + $0xe8] sm:$0xff] %vm416_vm1, %v1808_v25  ;;  %v1664_v25 = vadd.f32 1.0, %v4258_v62  ;;  %v1665_v48 = vadd.f32 1.0, %v4261_v63  ;;  %v5295_v62 = vld [vmem:[#allocation31_spill] sm:$0xff]  ;;  %v5297_v63 = vld [vmem:[#allocation32_spill] sm:$0xff] }
 0x39b   : > { %v2378_v56 = vpop.eup %2377  ;;  %2397 = vrcp.f32 %v1652_v3  ;;  %v1811_v21 = vmul.f32 %v2376_v49, %v5279_v58  ;;  %1894 = vst.msk [vmem:[%s4349_s16 + $0xf0] sm:$0xff] %vm416_vm1, %v1809_v20 }
 0x39c   : > { %v2380_v40 = vpop.eup %2379  ;;  %2399 = vrcp.f32 %v1653_v53  ;;  %v1812_v50 = vmul.f32 %v2378_v56, %v5281_v9  ;;  %1895 = vst.msk [vmem:[%s4349_s16 + $0xf8] sm:$0xff] %vm416_vm1, %v1810_v12 }
 0x39d   : > { %v2382_v42 = vpop.eup %2381  ;;  %2401 = vrcp.f32 %v1654_v60  ;;  %v1813_v44 = vmul.f32 %v2380_v40, %v5283_v14  ;;  %1896 = vst.msk [vmem:[%s4349_s16 + $0x100] sm:$0xff] %vm416_vm1, %v1811_v21  ;;  %v5298_v40 = vld [vmem:[#allocation105_spill] sm:$0xff] }
 0x39e   : > { %v2384_v19 = vpop.eup %2383  ;;  %2403 = vrcp.f32 %v1655_v4  ;;  %v1814_v31 = vmul.f32 %v2382_v42, %v5285_v45  ;;  %1897 = vst.msk [vmem:[%s4349_s16 + $0x108] sm:$0xff] %vm416_vm1, %v1812_v50  ;;  %v5294_v4 = vld [vmem:[#allocation103_spill] sm:$0xff]  ;;  %v1668_v57 = vadd.f32 1.0, %v5298_v40  ;;  %v5300_v42 = vld [vmem:[#allocation106_spill] sm:$0xff] }
 0x39f   : > { %v2386_v16 = vpop.eup %2385  ;;  %2405 = vrcp.f32 %v1656_v5  ;;  %v1815_v47 = vmul.f32 %v2384_v19, %v5287_v28  ;;  %1898 = vst.msk [vmem:[%s4349_s16 + $0x110] sm:$0xff] %vm416_vm1, %v1813_v44  ;;  %v1666_v33 = vadd.f32 1.0, %v5294_v4  ;;  %v1667_v5 = vadd.f32 1.0, %v5296_v26  ;;  %v5302_v19 = vld [vmem:[#allocation107_spill] sm:$0xff] }
 0x3a0   : > { %v2388_v54 = vpop.eup %2387  ;;  %2407 = vrcp.f32 %v1657_v13  ;;  %v1816_v52 = vmul.f32 %v2386_v16, %v5289_v32  ;;  %1899 = vst.msk [vmem:[%s4349_s16 + $0x118] sm:$0xff] %vm416_vm1, %v1814_v31  ;;  %v5299_v13 = vld [vmem:[#allocation33_spill] sm:$0xff]  ;;  %v1669_v10 = vadd.f32 1.0, %v5300_v42  ;;  %v1670_v27 = vadd.f32 1.0, %v5302_v19  ;;  %v5304_v16 = vld [vmem:[#allocation108_spill] sm:$0xff] }
 0x3a1   : > { %v2390_v41 = vpop.eup %2389  ;;  %2409 = vrcp.f32 %v1658_v29  ;;  %v1817_v3 = vmul.f32 %v2388_v54, %v5290_v6  ;;  %1900 = vst.msk [vmem:[%s4349_s16 + $0x120] sm:$0xff] %vm416_vm1, %v1815_v47  ;;  %v5301_v29 = vld [vmem:[#allocation34_spill] sm:$0xff]  ;;  %v1671_v11 = vadd.f32 1.0, %v5304_v16  ;;  %v1672_v54 = vadd.f32 1.0, %v4282_v18  ;;  %v5309_v18 = vld [vmem:[#allocation40_spill] sm:$0xff]  ;;  %v5322_v16 = vld [vmem:[#allocation111_spill] sm:$0xff] }
 0x3a2   : > { %v2392_v8 = vpop.eup %2391  ;;  %2411 = vrcp.f32 %v1659_v17  ;;  %v1818_v53 = vmul.f32 %v2390_v41, %v5291_v59  ;;  %1901 = vst.msk [vmem:[%s4349_s16 + $0x128] sm:$0xff] %vm416_vm1, %v1816_v52  ;;  %v5303_v17 = vld [vmem:[#allocation35_spill] sm:$0xff]  ;;  %v5307_v52 = vld [vmem:[#allocation109_spill] sm:$0xff]  ;;  %v1678_v4 = vadd.f32 1.0, %v4298_v0  ;;  %v5315_v0 = vld [vmem:[#allocation46_spill] sm:$0xff]  ;;  %v1683_v42 = vadd.f32 1.0, %v4311_v2 }
 0x3a3   : > { %v2394_v39 = vpop.eup %2393  ;;  %2413 = vrcp.f32 %v1660_v46  ;;  %v1819_v7 = vmul.f32 %v2392_v8, %v5292_v34  ;;  %1902 = vst.msk [vmem:[%s4349_s16 + $0x130] sm:$0xff] %vm416_vm1, %v1817_v3  ;;  %v5305_v46 = vld [vmem:[#allocation36_spill] sm:$0xff]  ;;  %v1673_v41 = vadd.f32 1.0, %v5307_v52  ;;  %v1674_v8 = vadd.f32 1.0, %v4288_v38  ;;  %v5311_v38 = vld [vmem:[#allocation42_spill] sm:$0xff]  ;;  %v5321_v2 = vld [vmem:[#allocation51_spill] sm:$0xff] }
 0x3a4   : > { %v2396_v60 = vpop.eup %2395  ;;  %2415 = vrcp.f32 %v1661_v1  ;;  %v1820_v20 = vmul.f32 %v2394_v39, %v5293_v61  ;;  %1903 = vst.msk [vmem:[%s4349_s16 + $0x138] sm:$0xff] %vm416_vm1, %v1818_v53  ;;  %v1675_v53 = vadd.f32 1.0, %v4291_v43  ;;  %v5310_v39 = vld [vmem:[#allocation41_spill] sm:$0xff]  ;;  %v1677_v61 = vadd.f32 1.0, %v4296_v37  ;;  %v5312_v43 = vld [vmem:[#allocation43_spill] sm:$0xff] }
 0x3a5   : > { %v2398_v49 = vpop.eup %2397  ;;  %2417 = vrcp.f32 %v1662_v36  ;;  %v1821_v12 = vmul.f32 %v2396_v60, %v5295_v62  ;;  %1904 = vst.msk [vmem:[%s4349_s16 + $0x140] sm:$0xff] %vm416_vm1, %v1819_v7  ;;  %v5308_v36 = vld [vmem:[#allocation39_spill] sm:$0xff]  ;;  %v1676_v7 = vadd.f32 1.0, %v4294_v30  ;;  %v5313_v30 = vld [vmem:[#allocation44_spill] sm:$0xff]  ;;  %v5314_v37 = vld [vmem:[#allocation45_spill] sm:$0xff] }
 0x3a6   : > { %v2400_v56 = vpop.eup %2399  ;;  %2419 = vrcp.f32 %v1663_v35  ;;  %v1822_v58 = vmul.f32 %v2398_v49, %v5297_v63  ;;  %1905 = vst.msk [vmem:[%s4349_s16 + $0x148] sm:$0xff] %vm416_vm1, %v1820_v20  ;;  %v5326_v52 = vld [vmem:[#allocation113_spill] sm:$0xff] }
 0x3a7   : > { %v2402_v21 = vpop.eup %2401  ;;  %2421 = vrcp.f32 %v1664_v25  ;;  %v1823_v9 = vmul.f32 %v2400_v56, %v5299_v13  ;;  %1906 = vst.msk [vmem:[%s4349_s16 + $0x150] sm:$0xff] %vm416_vm1, %v1821_v12  ;;  %v1679_v12 = vadd.f32 1.0, %v4300_v23  ;;  %v5316_v23 = vld [vmem:[#allocation47_spill] sm:$0xff]  ;;  %v1682_v13 = vadd.f32 1.0, %v4308_v24  ;;  %v5319_v24 = vld [vmem:[#allocation50_spill] sm:$0xff] }
 0x3a8   : > { %v2404_v50 = vpop.eup %2403  ;;  %2423 = vrcp.f32 %v1665_v48  ;;  %v1824_v14 = vmul.f32 %v2402_v21, %v5301_v29  ;;  %1907 = vst.msk [vmem:[%s4349_s16 + $0x158] sm:$0xff] %vm416_vm1, %v1822_v58  ;;  %v1681_v21 = vadd.f32 1.0, %v4305_v15  ;;  %v5318_v15 = vld [vmem:[#allocation49_spill] sm:$0xff] }
 0x3a9   : > { %v2406_v44 = vpop.eup %2405  ;;  %2425 = vrcp.f32 %v1666_v33  ;;  %v1825_v45 = vmul.f32 %v2404_v50, %v5303_v17  ;;  %1908 = vst.msk [vmem:[%s4349_s16 + $0x160] sm:$0xff] %vm416_vm1, %v1823_v9 }
 0x3aa   : > { %v2408_v31 = vpop.eup %2407  ;;  %2427 = vrcp.f32 %v1667_v5  ;;  %v1826_v28 = vmul.f32 %v2406_v44, %v5305_v46  ;;  %1909 = vst.msk [vmem:[%s4349_s16 + $0x168] sm:$0xff] %vm416_vm1, %v1824_v14  ;;  %v1680_v5 = vadd.f32 1.0, %v4302_v22  ;;  %v5317_v22 = vld [vmem:[#allocation48_spill] sm:$0xff]  ;;  %v1684_v14 = vadd.f32 1.0, %v4314_v55 }
 0x3ab   : > { %v2410_v47 = vpop.eup %2409  ;;  %2429 = vrcp.f32 %v1668_v57  ;;  %v1827_v1 = vmul.f32 %v2408_v31, %v5306_v51  ;;  %1910 = vst.msk [vmem:[%s4349_s16 + $0x170] sm:$0xff] %vm416_vm1, %v1825_v45  ;;  %v5323_v55 = vld [vmem:[#allocation52_spill] sm:$0xff]  ;;  %v5325_v51 = vld [vmem:[#allocation57_spill] sm:$0xff] }
 0x3ac   : > { %v2412_v32 = vpop.eup %2411  ;;  %2431 = vrcp.f32 %v1669_v10  ;;  %v1828_v6 = vmul.f32 %v2410_v47, %v5308_v36  ;;  %1911 = vst.msk [vmem:[%s4349_s16 + $0x178] sm:$0xff] %vm416_vm1, %v1826_v28  ;;  %v5324_v47 = vld [vmem:[#allocation112_spill] sm:$0xff]  ;;  %v5327_v36 = vld [vmem:[#allocation2_spill] sm:$0xff] }
 0x3ad   : > { %v2414_v3 = vpop.eup %2413  ;;  %2433 = vrcp.f32 %v1670_v27  ;;  %v1829_v35 = vmul.f32 %v2412_v32, %v5309_v18  ;;  %1912 = vst.msk [vmem:[%s4349_s16 + $0x180] sm:$0xff] %vm416_vm1, %v1827_v1  ;;  %v5320_v27 = vld [vmem:[#allocation110_spill] sm:$0xff] }
 0x3ae   : > { %v2416_v59 = vpop.eup %2415  ;;  %2435 = vrcp.f32 %v1671_v11  ;;  %v1830_v25 = vmul.f32 %v2414_v3, %v5310_v39  ;;  %1913 = vst.msk [vmem:[%s4349_s16 + $0x188] sm:$0xff] %vm416_vm1, %v1828_v6  ;;  %v1685_v17 = vadd.f32 1.0, %v5320_v27  ;;  %v1686_v11 = vadd.f32 1.0, %v5322_v16  ;;  %v5330_v39 = vld [vmem:[#allocation87_spill] sm:$0xff]  ;;  %v5346_v16 = vld [vmem:[#allocation8_spill] sm:$0xff] }
 0x3af   : > { %v2418_v34 = vpop.eup %2417  ;;  %2437 = vrcp.f32 %v1672_v54  ;;  %v1831_v60 = vmul.f32 %v2416_v59, %v5311_v38  ;;  %1914 = vst.msk [vmem:[%s4349_s16 + $0x190] sm:$0xff] %vm416_vm1, %v1829_v35  ;;  %v1687_v54 = vadd.f32 1.0, %v5324_v47  ;;  %v5329_v35 = vld [vmem:[#allocation3_spill] sm:$0xff] }
 0x3b0   : > { %v2420_v48 = vpop.eup %2419  ;;  %2439 = vrcp.f32 %v1673_v41  ;;  %v1832_v20 = vmul.f32 %v2418_v34, %v5312_v43  ;;  %1915 = vst.msk [vmem:[%s4349_s16 + $0x198] sm:$0xff] %vm416_vm1, %v1830_v25  ;;  %v1688_v41 = vadd.f32 1.0, %v5326_v52  ;;  %v1690_v25 = vadd.f32 1.0, %v5330_v39  ;;  %v5331_v34 = vld [vmem:[#allocation74_spill] sm:$0xff] }
 0x3b1   : > { %v2422_v49 = vpop.eup %2421  ;;  %2441 = vrcp.f32 %v1674_v8  ;;  %v1833_v33 = vmul.f32 %v2420_v48, %v5313_v30  ;;  %1916 = vst.msk [vmem:[%s4349_s16 + $0x1a0] sm:$0xff] %vm416_vm1, %v1831_v60  ;;  %v5328_v8 = vld [vmem:[#allocation114_spill] sm:$0xff]  ;;  %v5332_v60 = vld [vmem:[#allocation88_spill] sm:$0xff] }
 0x3b2   : > { %v2424_v62 = vpop.eup %2423  ;;  %2443 = vrcp.f32 %v1675_v53  ;;  %v1834_v56 = vmul.f32 %v2422_v49, %v5314_v37  ;;  %1917 = vst.msk [vmem:[%s4349_s16 + $0x1a8] sm:$0xff] %vm416_vm1, %v1832_v20  ;;  %v1689_v18 = vadd.f32 1.0, %v5328_v8  ;;  %v1691_v48 = vadd.f32 1.0, %v5332_v60  ;;  %v5334_v49 = vld [vmem:[#allocation89_spill] sm:$0xff]  ;;  %v5335_v30 = vld [vmem:[#allocation76_spill] sm:$0xff] }
 0x3b3   : > { %v2426_v26 = vpop.eup %2425  ;;  %2445 = vrcp.f32 %v1676_v7  ;;  %v1835_v63 = vmul.f32 %v2424_v62, %v5315_v0  ;;  %1918 = vst.msk [vmem:[%s4349_s16 + $0x1b0] sm:$0xff] %vm416_vm1, %v1833_v33  ;;  %v5338_v0 = vld [vmem:[#allocation78_spill] sm:$0xff]  ;;  %v5351_v8 = vld [vmem:[#allocation85_spill] sm:$0xff] }
 0x3b4   : > { %v2428_v58 = vpop.eup %2427  ;;  %2447 = vrcp.f32 %v1677_v61  ;;  %v1836_v40 = vmul.f32 %v2426_v26, %v5316_v23  ;;  %1919 = vst.msk [vmem:[%s4349_s16 + $0x1b8] sm:$0xff] %vm416_vm1, %v1834_v56  ;;  %v5333_v61 = vld [vmem:[#allocation75_spill] sm:$0xff]  ;;  %v5337_v56 = vld [vmem:[#allocation77_spill] sm:$0xff] }
 0x3b5   : > { %v2430_v57 = vpop.eup %2429  ;;  %2449 = vrcp.f32 %v1678_v4  ;;  %v1837_v9 = vmul.f32 %v2428_v58, %v5317_v22  ;;  %1920 = vst.msk [vmem:[%s4349_s16 + $0x1c0] sm:$0xff] %vm416_vm1, %v1835_v63  ;;  %v1692_v4 = vadd.f32 1.0, %v5334_v49 }
 0x3b6   : > { %v2432_v50 = vpop.eup %2431  ;;  %2451 = vrcp.f32 %v1679_v12  ;;  %v1838_v10 = vmul.f32 %v2430_v57, %v5318_v15  ;;  %1921 = vst.msk [vmem:[%s4349_s16 + $0x1c8] sm:$0xff] %vm416_vm1, %v1836_v40  ;;  %v5336_v12 = vld [vmem:[#allocation90_spill] sm:$0xff]  ;;  %v5340_v57 = vld [vmem:[#allocation80_spill] sm:$0xff] }
 0x3b7   : > { %v2434_v29 = vpop.eup %2433  ;;  %2453 = vrcp.f32 %v1680_v5  ;;  %v1839_v44 = vmul.f32 %v2432_v50, %v5319_v24  ;;  %1922 = vst.msk [vmem:[%s4349_s16 + $0x1d0] sm:$0xff] %vm416_vm1, %v1837_v9  ;;  %v1693_v37 = vadd.f32 1.0, %v5336_v12  ;;  %v5341_v9 = vld [vmem:[#allocation81_spill] sm:$0xff]  ;;  %v5342_v15 = vld [vmem:[#allocation4_spill] sm:$0xff] }
 0x3b8   : > { %v2436_v19 = vpop.eup %2435  ;;  %2455 = vrcp.f32 %v1681_v21  ;;  %v1840_v45 = vmul.f32 %v2434_v29, %v5321_v2  ;;  %1923 = vst.msk [vmem:[%s4349_s16 + $0x1d8] sm:$0xff] %vm416_vm1, %v1838_v10  ;;  %v5339_v21 = vld [vmem:[#allocation79_spill] sm:$0xff] }
 0x3b9   : > { %v2438_v31 = vpop.eup %2437  ;;  %2457 = vrcp.f32 %v1682_v13  ;;  %v1841_v46 = vmul.f32 %v2436_v19, %v5323_v55  ;;  %1924 = vst.msk [vmem:[%s4349_s16 + $0x1e0] sm:$0xff] %vm416_vm1, %v1839_v44  ;;  %v5344_v19 = vld [vmem:[#allocation6_spill] sm:$0xff]  ;;  %v5345_v2 = vld [vmem:[#allocation7_spill] sm:$0xff] }
 0x3ba   : > { %v2440_v28 = vpop.eup %2439  ;;  %2459 = vrcp.f32 %v1683_v42  ;;  %v1842_v1 = vmul.f32 %v2438_v31, %v5325_v51  ;;  %1925 = vst.msk [vmem:[%s4349_s16 + $0x1e8] sm:$0xff] %vm416_vm1, %v1840_v45 }
 0x3bb   : > { %v2442_v32 = vpop.eup %2441  ;;  %2461 = vrcp.f32 %v1684_v14  ;;  %v1843_v6 = vmul.f32 %v2440_v28, %v5327_v36  ;;  %1926 = vst.msk [vmem:[%s4349_s16 + $0x1f0] sm:$0xff] %vm416_vm1, %v1841_v46  ;;  %v5343_v14 = vld [vmem:[#allocation5_spill] sm:$0xff]  ;;  %v5350_v36 = vld [vmem:[#allocation84_spill] sm:$0xff] }
 0x3bc   : > { %v2444_v3 = vpop.eup %2443  ;;  %2463 = vrcp.f32 %v1685_v17  ;;  %v1844_v59 = vmul.f32 %v2442_v32, %v5329_v35  ;;  %1927 = vst.msk [vmem:[%s4349_s16 + $0x1f8] sm:$0xff] %vm416_vm1, %v1842_v1  ;;  %v5347_v46 = vld [vmem:[#allocation9_spill] sm:$0xff]  ;;  %v5349_v32 = vld [vmem:[#allocation83_spill] sm:$0xff]  ;;  %v5352_v35 = vld [vmem:[#allocation86_spill] sm:$0xff] }
 0x3bd   : > { %v2446_v53 = vpop.eup %2445  ;;  %2465 = vrcp.f32 %v1686_v11  ;;  %v1845_v7 = vmul.f32 %v2444_v3, %v5331_v34  ;;  %1928 = vst.msk [vmem:[%s4349_s16 + $0x200] sm:$0xff] %vm416_vm1, %v1843_v6 }
 0x3be   : > { %v2448_v38 = vpop.eup %2447  ;;  %2467 = vrcp.f32 %v1687_v54  ;;  %v1846_v43 = vmul.f32 %v2446_v53, %v5333_v61  ;;  %1929 = vst.msk [vmem:[%s4349_s16 + $0x208] sm:$0xff] %vm416_vm1, %v1844_v59  ;;  %v5348_v54 = vld [vmem:[#allocation82_spill] sm:$0xff] }
 0x3bf   : > { %v2450_v20 = vpop.eup %2449  ;;  %2469 = vrcp.f32 %v1688_v41  ;;  %v1847_v33 = vmul.f32 %v2448_v38, %v5335_v30  ;;  %1930 = vst.msk [vmem:[%s4349_s16 + $0x210] sm:$0xff] %vm416_vm1, %v1845_v7 }
 0x3c0   : > { %v2452_v62 = vpop.eup %2451  ;;  %2471 = vrcp.f32 %v1689_v18  ;;  %v1848_v26 = vmul.f32 %v2450_v20, %v5337_v56  ;;  %1931 = vst.msk [vmem:[%s4349_s16 + $0x218] sm:$0xff] %vm416_vm1, %v1846_v43 }
 0x3c1   : > { %v2454_v5 = vpop.eup %2453  ;;  %2473 = vrcp.f32 %v1690_v25  ;;  %v1849_v63 = vmul.f32 %v2452_v62, %v5338_v0  ;;  %1932 = vst.msk [vmem:[%s4349_s16 + $0x220] sm:$0xff] %vm416_vm1, %v1847_v33 }
 0x3c2   : > { %v2456_v58 = vpop.eup %2455  ;;  %2475 = vrcp.f32 %v1691_v48  ;;  %v1850_v23 = vmul.f32 %v2454_v5, %v5339_v21  ;;  %1933 = vst.msk [vmem:[%s4349_s16 + $0x228] sm:$0xff] %vm416_vm1, %v1848_v26 }
 0x3c3   : > { %v2458_v40 = vpop.eup %2457  ;;  %2477 = vrcp.f32 %v1692_v4  ;;  %v1851_v13 = vmul.f32 %v2456_v58, %v5340_v57  ;;  %1934 = vst.msk [vmem:[%s4349_s16 + $0x230] sm:$0xff] %vm416_vm1, %v1849_v63 }
 0x3c4   : > { %v2460_v22 = vpop.eup %2459  ;;  %2479 = vrcp.f32 %v1693_v37  ;;  %v1852_v50 = vmul.f32 %v2458_v40, %v5341_v9  ;;  %1935 = vst.msk [vmem:[%s4349_s16 + $0x238] sm:$0xff] %vm416_vm1, %v1850_v23 }
 0x3c5   : > { %v2462_v42 = vpop.eup %2461  ;;  %v1853_v10 = vmul.f32 %v2460_v22, %v5342_v15  ;;  %1936 = vst.msk [vmem:[%s4349_s16 + $0x240] sm:$0xff] %vm416_vm1, %v1851_v13 }
 0x3c6   : > { %v2464_v29 = vpop.eup %2463  ;;  %v1854_v24 = vmul.f32 %v2462_v42, %v5343_v14  ;;  %1937 = vst.msk [vmem:[%s4349_s16 + $0x248] sm:$0xff] %vm416_vm1, %v1852_v50 }
 0x3c7   : > { %v2466_v44 = vpop.eup %2465  ;;  %v1855_v27 = vmul.f32 %v2464_v29, %v5344_v19  ;;  %1938 = vst.msk [vmem:[%s4349_s16 + $0x250] sm:$0xff] %vm416_vm1, %v1853_v10 }
 0x3c8   : > { %v2468_v17 = vpop.eup %2467  ;;  %v1856_v45 = vmul.f32 %v2466_v44, %v5345_v2  ;;  %1939 = vst.msk [vmem:[%s4349_s16 + $0x258] sm:$0xff] %vm416_vm1, %v1854_v24 }
 0x3c9   : > { %v2470_v31 = vpop.eup %2469  ;;  %v1857_v11 = vmul.f32 %v2468_v17, %v5346_v16  ;;  %1940 = vst.msk [vmem:[%s4349_s16 + $0x260] sm:$0xff] %vm416_vm1, %v1855_v27 }
 0x3ca   : > { %v2472_v55 = vpop.eup %2471  ;;  %v1858_v28 = vmul.f32 %v2470_v31, %v5347_v46  ;;  %1941 = vst.msk [vmem:[%s4349_s16 + $0x268] sm:$0xff] %vm416_vm1, %v1856_v45 }
 0x3cb   : > { %v2474_v47 = vpop.eup %2473  ;;  %v1859_v51 = vmul.f32 %v2472_v55, %v5348_v54  ;;  %1942 = vst.msk [vmem:[%s4349_s16 + $0x270] sm:$0xff] %vm416_vm1, %v1857_v11 }
 0x3cc   : > { %v2476_v1 = vpop.eup %2475  ;;  %v1860_v52 = vmul.f32 %v2474_v47, %v5349_v32  ;;  %1943 = vst.msk [vmem:[%s4349_s16 + $0x278] sm:$0xff] %vm416_vm1, %v1858_v28 }
 0x3cd   : > { %v2478_v41 = vpop.eup %2477  ;;  %v1861_v6 = vmul.f32 %v2476_v1, %v5350_v36  ;;  %1944 = vst.msk [vmem:[%s4349_s16 + $0x280] sm:$0xff] %vm416_vm1, %v1859_v51 }
 0x3ce   : > { %v2480_v3 = vpop.eup %2479  ;;  %v1862_v18 = vmul.f32 %v2478_v41, %v5351_v8  ;;  %1945 = vst.msk [vmem:[%s4349_s16 + $0x288] sm:$0xff] %vm416_vm1, %v1860_v52 }
 0x3cf   : > { %v1863_v59 = vmul.f32 %v2480_v3, %v5352_v35  ;;  %1946 = vst.msk [vmem:[%s4349_s16 + $0x290] sm:$0xff] %vm416_vm1, %v1861_v6 }
 0x3d0   : > { %1947 = vst.msk [vmem:[%s4349_s16 + $0x298] sm:$0xff] %vm416_vm1, %v1862_v18 }
 0x3d1   : > { %1948 = vst.msk [vmem:[%s4349_s16 + $0x2a0] sm:$0xf] %vm584_vm2, %v1863_v59 }
 0x3d2 PF: > { %s15_s18 = sadd.s32 1, %s2487_s18  }
 0x3d3   : > { %p12_p4 = scmp.ge.s32.totalorder %s15_s18, 4  }
 0x3d5   :  { %14 = sbr.rel (!%p12_p4) target bundleno = 1 (0x1), region = 73 }

// kernel: scorenet_forward.10
= control target key start
LH: loop header
LB: loop body
LE: loop exit
PB: predicated region body
PF: predicated region fallthrough
CT: control target
= control target key end

     0   :  { %s1281_s18 = smov 0   ;;  %s1707_s0 = inlined_call_operand.vmem [shape: f32[2,144,64], index: 0, kind: input, shape index: {}]   ;;  %s1708_s1 = inlined_call_operand.vmem [shape: f32[2,1,64], index: 1, kind: input, shape index: {}]   ;;  %s1709_s2 = inlined_call_operand.vmem [shape: f32[1,64], index: 2, kind: input, shape index: {}]   ;;  %s1710_s3 = inlined_call_operand.vmem [shape: f32[1,64], index: 3, kind: input, shape index: {}]   ;;  %s1711_s4 = inlined_call_operand.vmem [shape: f32[64,32], index: 4, kind: input, shape index: {}]   ;;  %s1712_s5 = inlined_call_operand.vmem [shape: f32[2,144,64], index: 5, kind: output, shape index: {}]  }
   0x1 LB: > { %s956_s19 = sadd.s32 4294967295, %s1246_s18   ;;  %p960_p0 = scmp.ge.s32.totalorder %s1246_s18, 1  ;;  %s1246_s18 = sphi %s1281_s18, %s15_s18  }
   0x2   : > { %p195_p1 = scmp.lt.s32.totalorder %s1246_s18, 3 }
   0x4   : > { %p196_p2 = pnand %p960_p0, %p195_p1 }
   0x5   : > { %v383_v0 = vld [vmem:[%s1711_s4] sm:$0xff] (!%p196_p2)  ;;  %v384_v1 = vld [vmem:[%s1711_s4 + $0x8] sm:$0xff] (!%p196_p2)  ;;  %v385_v2 = vld [vmem:[%s1711_s4 + $0x10] sm:$0xff] (!%p196_p2)  ;;  %v1248_v3 = vmov (!%p196_p2), 0.0|0.0   ;;  %p226_p3 = scmp.lt.s32.totalorder (!%p196_p2), %s956_s19, 1  ;;  %vm1249_vm0 = vmmov (!%p196_p2), 0  }
   0x6   : > { %199 = sbr.rel (%p196_p2) target bundleno = 581 (0x245), region = 40  ;;  %1098 = vmatprep.subr.bf16.mxu0 (!%p196_p2), %v1248_v3  ;;  %v1299_v4 = vpack.c.bf16 (!%p196_p2), %v384_v1, %v383_v0  ;;  %1110 = vmatprep.subr.bf16.mxu1 (!%p196_p2), %v1248_v3  ;;  %v386_v5 = vld [vmem:[%s1711_s4 + $0x18] sm:$0xff] (!%p196_p2)  ;;  %v1250_v6 = vmov (!%p196_p2), 0.0   ;;  %v387_v8 = vld [vmem:[%s1711_s4 + $0x20] sm:$0xff] (!%p196_p2)  ;;  %v388_v9 = vld [vmem:[%s1711_s4 + $0x28] sm:$0xff] (!%p196_p2)  ;;  %vm282_vm1 = vcmask (!%p196_p2), 523264  }
   0x7   : > { %1038 = vmatprep.mubr.msk.f32.mxu0 (!%p196_p2), %vm1249_vm0, %v1250_v6  ;;  %1057 = vmatprep.mubr.msk.f32.mxu1 (!%p196_p2), %vm1249_vm0, %v1250_v6  ;;  %v1311_v7 = vpack.c.bf16 (!%p196_p2), %v386_v5, %v385_v2  ;;  %v1332_v11 = vpack.c.bf16 (!%p196_p2), %v388_v9, %v387_v8  ;;  %v389_v12 = vld [vmem:[%s1711_s4 + $0x30] sm:$0xff] (!%p196_p2)  ;;  %v390_v13 = vld [vmem:[%s1711_s4 + $0x38] sm:$0xff] (!%p196_p2)  ;;  %vm544_vm2 = vcmask (!%p196_p2), 261120  }
   0x8   : > { %1100 = vmatpush3.bf16.msra.mxu0 (!%p196_p2), %v1299_v4  ;;  %1112 = vmatpush3.bf16.msra.mxu1 (!%p196_p2), %v1299_v4  ;;  %v1365_v22 = vpack.c.bf16 (!%p196_p2), %v390_v13, %v389_v12  ;;  %vm1523_vm3 = vmpackc.low (!%p196_p2), %vm544_vm2, %vm544_vm2 }
   0x9   : > { %1101 = vmatprep.subr.bf16.mxu0 (!%p196_p2), %v1248_v3  ;;  %1113 = vmatprep.subr.bf16.mxu1 (!%p196_p2), %v1248_v3 }
   0xc   : > { %1103 = vmatpush3.bf16.msra.mxu0 (!%p196_p2), %v1311_v7  ;;  %1115 = vmatpush3.bf16.msra.mxu1 (!%p196_p2), %v1311_v7 }
   0xd   : > { %s1716_s19 = smov (!%p226_p3, %s956_s19), 1  ;;  %1104 = vmatprep.subr.bf16.mxu0 %v1248_v3  ;;  %1116 = vmatprep.subr.bf16.mxu1 %v1248_v3 }
   0xe   : > { %s1154_s7 = smul.u32 144, %s1716_s19  ;;  %s233_s10 = scalar_lea.vmem %s1708_s1, %s1716_s19 }
   0xf   : > { %v1328_v10 = vld [vmem:[%s233_s10] ss:$0 sm:$0xff] }
  0x10   : > { %s1345_s17 = scalar_lea.vmem %s1707_s0, %s1154_s7  ;;  %1106 = vmatpush3.bf16.msra.mxu0 %v1332_v11  ;;  %1118 = vmatpush3.bf16.msra.mxu1 %v1332_v11  ;;  %s1648_s26 = scalar_lea.vmem %s1712_s5, %s1154_s7 }
  0x11   : > { %v239_v14 = vld [vmem:[%s1345_s17] sm:$0xff]  ;;  %v240_v15 = vld [vmem:[%s1345_s17 + $0x8] sm:$0xff]  ;;  %v241_v16 = vld [vmem:[%s1345_s17 + $0x10] sm:$0xff]  ;;  %1107 = vmatprep.subr.bf16.mxu0 %v1248_v3  ;;  %1119 = vmatprep.subr.bf16.mxu1 %v1248_v3 }
  0x12   : > { %v242_v17 = vld [vmem:[%s1345_s17 + $0x18] sm:$0xff]  ;;  %v243_v18 = vld [vmem:[%s1345_s17 + $0x20] sm:$0xff]  ;;  %v1355_v19 = vadd.f32 %v1328_v10, %v239_v14  ;;  %v1358_v20 = vadd.f32 %v1328_v10, %v240_v15  ;;  %v1361_v21 = vadd.f32 %v1328_v10, %v241_v16  ;;  %v244_v23 = vld [vmem:[%s1345_s17 + $0x28] sm:$0xff] }
  0x13   : > { %v1369_v24 = vadd.f32 %v1328_v10, %v242_v17  ;;  %v1376_v26 = vadd.f32 %v1328_v10, %v243_v18  ;;  %v245_v28 = vld [vmem:[%s1345_s17 + $0x30] sm:$0xff]  ;;  %v1382_v30 = vadd.f32 %v1328_v10, %v244_v23  ;;  %v246_v32 = vld [vmem:[%s1345_s17 + $0x38] sm:$0xff]  ;;  %v247_v37 = vld [vmem:[%s1345_s17 + $0x40] sm:$0xff] }
  0x14   : > { %v283_v25 = vsel %vm282_vm1, %v1355_v19, 0.0  ;;  %v284_v27 = vsel %vm282_vm1, %v1358_v20, 0.0  ;;  %v286_v31 = vsel %vm282_vm1, %v1361_v21, 0.0  ;;  %1109 = vmatpush3.bf16.msra.mxu0 %v1365_v22  ;;  %1121 = vmatpush3.bf16.msra.mxu1 %v1365_v22  ;;  %v1392_v35 = vadd.f32 %v1328_v10, %v245_v28  ;;  %v248_v41 = vld [vmem:[%s1345_s17 + $0x48] sm:$0xff]  ;;  %v249_v43 = vld [vmem:[%s1345_s17 + $0x50] sm:$0xff]  ;;  %v250_v53 = vld [vmem:[%s1345_s17 + $0x58] sm:$0xff] }
  0x15   : > { %v285_v29 = vadd.f32 %v284_v27, %v283_v25  ;;  %v288_v34 = vsel %vm282_vm1, %v1369_v24, 0.0  ;;  %v290_v36 = vsel %vm282_vm1, %v1376_v26, 0.0  ;;  %1122 = vmatprep.subr.bf16.mxu0 %v1248_v3  ;;  %1138 = vmatprep.subr.bf16.mxu1 %v1248_v3  ;;  %v1400_v39 = vadd.f32 %v1328_v10, %v246_v32  ;;  %v251_v60 = vld [vmem:[%s1345_s17 + $0x60] sm:$0xff]  ;;  %v252_v8 = vld [vmem:[%s1345_s17 + $0x68] sm:$0xff]  ;;  %v253_v17 = vld [vmem:[%s1345_s17 + $0x70] sm:$0xff] }
  0x16   : > { %v292_v40 = vsel %vm282_vm1, %v1382_v30, 0.0  ;;  %v1407_v44 = vadd.f32 %v1328_v10, %v247_v37  ;;  %v294_v45 = vsel %vm282_vm1, %v1392_v35, 0.0  ;;  %v324_v46 = vmul.f32 %v1355_v19, %v1355_v19 }
  0x17   : > { %v287_v33 = vadd.f32 %v286_v31, %v285_v29  ;;  %v325_v47 = vmul.f32 %v1358_v20, %v1358_v20  ;;  %v326_v49 = vmul.f32 %v1361_v21, %v1361_v21  ;;  %v1418_v50 = vadd.f32 %v1328_v10, %v248_v41  ;;  %v254_v31 = vld [vmem:[%s1345_s17 + $0x78] sm:$0xff] }
  0x18   : > { %v296_v51 = vsel %vm282_vm1, %v1400_v39, 0.0  ;;  %v327_v52 = vmul.f32 %v1369_v24, %v1369_v24  ;;  %v1426_v54 = vadd.f32 %v1328_v10, %v249_v43  ;;  %v298_v56 = vsel %vm282_vm1, %v1407_v44, 0.0 }
  0x19   : > { %v289_v38 = vadd.f32 %v288_v34, %v287_v33  ;;  %v328_v57 = vmul.f32 %v1376_v26, %v1376_v26  ;;  %v342_v58 = vsel %vm282_vm1, %v324_v46, 0.0  ;;  %v343_v59 = vsel %vm282_vm1, %v325_v47, 0.0 }
  0x1a   : > { %v344_v62 = vadd.f32 %v343_v59, %v342_v58  ;;  %v345_v63 = vsel %vm282_vm1, %v326_v49, 0.0  ;;  %v1437_v0 = vadd.f32 %v1328_v10, %v250_v53  ;;  %v300_v1 = vsel %vm282_vm1, %v1418_v50, 0.0 }
  0x1b   : > { %v291_v42 = vadd.f32 %v290_v36, %v289_v38  ;;  %v329_v2 = vmul.f32 %v1382_v30, %v1382_v30  ;;  %v347_v5 = vsel %vm282_vm1, %v327_v52, 0.0  ;;  %v1446_v13 = vadd.f32 %v1328_v10, %v251_v60 }
  0x1c   : > { %v346_v12 = vadd.f32 %v345_v63, %v344_v62  ;;  %v302_v14 = vsel %vm282_vm1, %v1426_v54, 0.0  ;;  %v330_v15 = vmul.f32 %v1392_v35, %v1392_v35  ;;  %v349_v16 = vsel %vm282_vm1, %v328_v57, 0.0 }
  0x1d   : > { %v293_v48 = vadd.f32 %v292_v40, %v291_v42  ;;  %v1455_v25 = vadd.f32 %v1328_v10, %v252_v8  ;;  %v304_v27 = vsel %vm282_vm1, %v1437_v0, 0.0  ;;  %v331_v28 = vmul.f32 %v1400_v39, %v1400_v39  ;;  %v255_v40 = vld [vmem:[%s1345_s17 + $0x80] sm:$0xff] }
  0x1e   : > { %v348_v23 = vadd.f32 %v347_v5, %v346_v12  ;;  %v351_v29 = vsel %vm282_vm1, %v329_v2, 0.0  ;;  %v1464_v34 = vadd.f32 %v1328_v10, %v253_v17  ;;  %v306_v36 = vsel %vm282_vm1, %v1446_v13, 0.0 }
  0x1f   : > { %v295_v55 = vadd.f32 %v294_v45, %v293_v48  ;;  %v332_v37 = vmul.f32 %v1407_v44, %v1407_v44  ;;  %v353_v38 = vsel %vm282_vm1, %v330_v15, 0.0  ;;  %v1473_v43 = vadd.f32 %v1328_v10, %v254_v31  ;;  %v256_v48 = vld [vmem:[%s1345_s17 + $0x88] sm:$0xff] }
  0x20   : > { %v350_v33 = vadd.f32 %v349_v16, %v348_v23  ;;  %v308_v45 = vsel %vm282_vm1, %v1455_v25, 0.0  ;;  %v333_v46 = vmul.f32 %v1418_v50, %v1418_v50  ;;  %v355_v47 = vsel %vm282_vm1, %v331_v28, 0.0 }
  0x21   : > { %v297_v61 = vadd.f32 %v296_v51, %v295_v55  ;;  %v1482_v52 = vadd.f32 %v1328_v10, %v255_v40  ;;  %v310_v53 = vsel %vm282_vm1, %v1464_v34, 0.0  ;;  %v334_v55 = vmul.f32 %v1426_v54, %v1426_v54 }
  0x22   : > { %v352_v42 = vadd.f32 %v351_v29, %v350_v33  ;;  %v1490_v59 = vadd.f32 %v1328_v10, %v256_v48  ;;  %v312_v60 = vsel %vm282_vm1, %v1473_v43, 0.0  ;;  %v359_v62 = vsel %vm282_vm1, %v333_v46, 0.0 }
  0x23   : > { %v299_v9 = vadd.f32 %v298_v56, %v297_v61  ;;  %v357_v56 = vsel %vm282_vm1, %v332_v37, 0.0  ;;  %v335_v61 = vmul.f32 %v1437_v0, %v1437_v0  ;;  %v314_v2 = vsel %vm282_vm1, %v1482_v52, 0.0 }
  0x24   : > { %v354_v51 = vadd.f32 %v353_v38, %v352_v42  ;;  %v336_v5 = vmul.f32 %v1446_v13, %v1446_v13  ;;  %v361_v8 = vsel %vm282_vm1, %v334_v55, 0.0  ;;  %v316_v12 = vsel %vm282_vm1, %v1490_v59, 0.0 }
  0x25   : > { %v301_v18 = vadd.f32 %v300_v1, %v299_v9  ;;  %v363_v15 = vsel %vm282_vm1, %v335_v61, 0.0  ;;  %v339_v29 = vmul.f32 %v1473_v43, %v1473_v43 }
  0x26   : > { %v356_v58 = vadd.f32 %v355_v47, %v354_v51  ;;  %v365_v23 = vsel %vm282_vm1, %v336_v5, 0.0 }
  0x27   : > { %v303_v32 = vadd.f32 %v302_v14, %v301_v18  ;;  %v337_v14 = vmul.f32 %v1455_v25, %v1455_v25  ;;  %v338_v18 = vmul.f32 %v1464_v34, %v1464_v34  ;;  %v371_v42 = vsel %vm282_vm1, %v339_v29, 0.0 }
  0x28   : > { %v358_v1 = vadd.f32 %v357_v56, %v356_v58 }
  0x29   : > { %v305_v41 = vadd.f32 %v304_v27, %v303_v32  ;;  %v367_v31 = vsel %vm282_vm1, %v337_v14, 0.0  ;;  %v369_v37 = vsel %vm282_vm1, %v338_v18, 0.0  ;;  %v715_v18 = vld [vmem:[%s1709_s2] sm:$0x1] }
  0x2a   : > { %v360_v9 = vadd.f32 %v359_v62, %v358_v1 }
  0x2b   : > { %v307_v49 = vadd.f32 %v306_v36, %v305_v41  ;;  %v340_v36 = vmul.f32 %v1482_v52, %v1482_v52  ;;  %v341_v41 = vmul.f32 %v1490_v59, %v1490_v59 }
  0x2c   : > { %v362_v17 = vadd.f32 %v361_v8, %v360_v9 }
  0x2d   : > { %v309_v57 = vadd.f32 %v308_v45, %v307_v49  ;;  %v373_v47 = vsel %vm282_vm1, %v340_v36, 0.0  ;;  %v375_v51 = vsel %vm282_vm1, %v341_v41, 0.0 }
  0x2e   : > { %v364_v28 = vadd.f32 %v363_v15, %v362_v17  ;;  %v720_v17 = vlaneseq }
  0x2f   : > { %v311_v63 = vadd.f32 %v310_v53, %v309_v57 }
  0x30   : > { %v366_v33 = vadd.f32 %v365_v23, %v364_v28 }
  0x31   : > { %v313_v10 = vadd.f32 %v312_v60, %v311_v63 }
  0x32   : > { %v368_v40 = vadd.f32 %v367_v31, %v366_v33  ;;  %v717_v31 = vld [vmem:[%s1710_s3] sm:$0x1] }
  0x33   : > { %v315_v16 = vadd.f32 %v314_v2, %v313_v10 }
  0x34   : > { %v370_v46 = vadd.f32 %v369_v37, %v368_v40 }
  0x35   : > { %v317_v27 = vadd.f32 %v316_v12, %v315_v16 }
  0x36   : > { %v372_v49 = vadd.f32 %v371_v42, %v370_v46 }
  0x37   : > { %v318_v32 = vrot.slane %v317_v27, 4 }
  0x38   : > { %v374_v55 = vadd.f32 %v373_v47, %v372_v49 }
  0x39   : > { %v319_v38 = vadd.f32 %v318_v32, %v317_v27 }
  0x3a   : > { %v376_v57 = vadd.f32 %v375_v51, %v374_v55 }
  0x3b   : > { %v320_v45 = vrot.slane %v319_v38, 2 }
  0x3c   : > { %v377_v60 = vrot.slane %v376_v57, 4 }
  0x3d   : > { %v321_v48 = vadd.f32 %v320_v45, %v319_v38 }
  0x3e   : > { %v378_v61 = vadd.f32 %v377_v60, %v376_v57 }
  0x3f   : > { %v322_v53 = vrot.slane %v321_v48, 1 }
  0x40   : > { %v379_v62 = vrot.slane %v378_v61, 2 }
  0x41   : > { %v323_v56 = vadd.f32 %v322_v53, %v321_v48 }
  0x42   : > { %v380_v63 = vadd.f32 %v379_v62, %v378_v61 }
  0x43   : > { %1039 = vmatmul.mubr.msk.f32.vlgmr.msra.gmra.mrb[0].mxu0 %vm282_vm1, %v323_v56 }
  0x44   : > { %1125 = vmatpush3.bf16.xpose.msk.msra.mxu0 %vm1523_vm3, %v1299_v4  ;;  %1076 = vmatprep.mubr.msk.f32.mxu0 %vm1249_vm0, %v1250_v6  ;;  %v381_v1 = vrot.slane %v380_v63, 1 }
  0x45   : > { %1126 = vmatprep.subr.bf16.mxu0 %v1248_v3 }
  0x46   : > { %v382_v2 = vadd.f32 %v381_v1, %v380_v63 }
  0x48   : > { %1058 = vmatmul.mubr.msk.f32.vlgmr.msra.gmra.mrb[0].mxu1 %vm282_vm1, %v382_v2 }
  0x49   : > { %1141 = vmatpush3.bf16.xpose.msk.msra.mxu1 %vm1523_vm3, %v1299_v4  ;;  %1095 = vmatprep.mubr.msk.f32.mxu1 %vm1249_vm0, %v1250_v6 }
  0x4a   : > { %1142 = vmatprep.subr.bf16.mxu1 %v1248_v3 }
  0x4c   : > { %1129 = vmatpush3.bf16.xpose.msk.msra.mxu0 %vm1523_vm3, %v1311_v7 }
  0x4d   : > { %1130 = vmatprep.subr.bf16.mxu0 %v1248_v3 }
  0x51   : > { %1145 = vmatpush3.bf16.xpose.msk.msra.mxu1 %vm1523_vm3, %v1311_v7 }
  0x52   : > { %1146 = vmatprep.subr.bf16.mxu1 %v1248_v3 }
  0x54   : > { %1133 = vmatpush3.bf16.xpose.msk.msra.mxu0 %vm1523_vm3, %v1332_v11 }
  0x55   : > { %1134 = vmatprep.subr.bf16.mxu0 %v1248_v3 }
  0x59   : > { %1149 = vmatpush3.bf16.xpose.msk.msra.mxu1 %vm1523_vm3, %v1332_v11 }
  0x5a   : > { %1150 = vmatprep.subr.bf16.mxu1 %v1248_v3 }
  0x5c   : > { %1137 = vmatpush3.bf16.xpose.msk.msra.mxu0 %vm1523_vm3, %v1365_v22 }
  0x61   : > { %1153 = vmatpush3.bf16.xpose.msk.msra.mxu1 %vm1523_vm3, %v1365_v22  ;;  %v721_v22 = vshrl.u32 %v720_v17, 7 }
  0x63   : > { %v722_v23 = vsub.s32 0, %v721_v22 }
 0x116   : > { %v460_v4 = vpop.f32.mrb[0].mxu0 }
 0x117   : > { %v464_v6 = vmul.f32 0.0034722222, %v460_v4  ;;  %v1040_v5 = vpop.f32.mrb[1].mxu0 }
 0x119   : > { %1077 = vmatmul.mubr.msk.f32.vlgmr.msra.gmra.mrb[2].mxu0 %vm544_vm2, %v464_v6  ;;  %v539_v7 = vmul.f32 %v464_v6, %v464_v6 }
 0x11b   : > { %v534_v8 = vpop.f32.mrb[0].mxu1 }
 0x11c   : > { %v538_v10 = vmul.f32 0.0034722222, %v534_v8  ;;  %v1059_v9 = vpop.f32.mrb[1].mxu1 }
 0x11e   : > { %v540_v12 = vsub.f32 %v538_v10, %v539_v7 }
 0x120   : > { %v541_v14 = vmax.f32 %v540_v12, 0.0 }
 0x122   : > { %v542_v15 = vadd.f32 1e-05, %v541_v14 }
 0x124   : > { %1166 = vrsqrt.f32 %v542_v15 }
 0x12e   : > { %v1167_v11 = vpop.eup %1166 }
 0x12f   : > { %1096 = vmatmul.mubr.msk.f32.vlgmr.msra.gmra.mrb[2].mxu1 %vm544_vm2, %v1167_v11 }
 0x1ec   : > { %v638_v3 = vpop.f32.mrb[2].mxu0 }
 0x1ed   : > { %v1078_v16 = vpop.f32.mrb[3].mxu0 }
 0x202   : > { %v711_v27 = vpop.f32.mrb[2].mxu1 }
 0x203   : > { %v716_v28 = vmul.f32 %v715_v18, %v711_v27  ;;  %v1097_v29 = vpop.f32.mrb[3].mxu1 }
 0x205   : > { %v718_v32 = vmul.f32 %v716_v28, %v638_v3  ;;  %v723_v33 = vrot.slane %v716_v28, %v722_v23 }
 0x207   : > { %v719_v36 = vsub.f32 %v717_v31, %v718_v32  ;;  %v724_v37 = vmul.f32 %v723_v33, %v1355_v19  ;;  %v725_v38 = vmul.f32 %v723_v33, %v1358_v20  ;;  %v726_v40 = vmul.f32 %v723_v33, %v1361_v21 }
 0x208   : > { %v727_v41 = vmul.f32 %v723_v33, %v1369_v24  ;;  %v728_v42 = vmul.f32 %v723_v33, %v1376_v26  ;;  %v729_v45 = vmul.f32 %v723_v33, %v1382_v30  ;;  %v730_v46 = vmul.f32 %v723_v33, %v1392_v35 }
 0x209   : > { %v731_v47 = vmul.f32 %v723_v33, %v1400_v39  ;;  %v732_v48 = vmul.f32 %v723_v33, %v1407_v44  ;;  %v733_v49 = vmul.f32 %v723_v33, %v1418_v50  ;;  %v734_v19 = vmul.f32 %v723_v33, %v1426_v54 }
 0x20a   : > { %v735_v20 = vmul.f32 %v723_v33, %v1437_v0  ;;  %v736_v21 = vmul.f32 %v723_v33, %v1446_v13  ;;  %v737_v24 = vmul.f32 %v723_v33, %v1455_v25  ;;  %v746_v51 = vrot.slane %v719_v36, %v722_v23 }
 0x20b   : > { %v738_v26 = vmul.f32 %v723_v33, %v1464_v34  ;;  %v739_v30 = vmul.f32 %v723_v33, %v1473_v43  ;;  %v740_v35 = vmul.f32 %v723_v33, %v1482_v52  ;;  %v741_v39 = vmul.f32 %v723_v33, %v1490_v59 }
 0x20c   : > { %v1589_v44 = vadd.f32 %v746_v51, %v724_v37  ;;  %v1591_v50 = vadd.f32 %v746_v51, %v725_v38  ;;  %v1593_v54 = vadd.f32 %v746_v51, %v726_v40  ;;  %v1595_v0 = vadd.f32 %v746_v51, %v727_v41 }
 0x20d   : > { %v1597_v13 = vadd.f32 %v746_v51, %v728_v42  ;;  %v1599_v25 = vadd.f32 %v746_v51, %v729_v45  ;;  %v1601_v53 = vadd.f32 %v746_v51, %v730_v46  ;;  %v1603_v34 = vadd.f32 %v746_v51, %v731_v47 }
 0x20e   : > { %v1605_v43 = vadd.f32 %v746_v51, %v732_v48  ;;  %v1607_v52 = vadd.f32 %v746_v51, %v733_v49  ;;  %v1609_v59 = vadd.f32 %v746_v51, %v734_v19  ;;  %v1611_v55 = vadd.f32 %v746_v51, %v735_v20 }
 0x20f   : > { %v1613_v56 = vadd.f32 %v746_v51, %v736_v21  ;;  %v1615_v57 = vadd.f32 %v746_v51, %v737_v24  ;;  %v1617_v58 = vadd.f32 %v746_v51, %v738_v26  ;;  %v1619_v60 = vadd.f32 %v746_v51, %v739_v30 }
 0x210   : > { %v1621_v61 = vadd.f32 %v746_v51, %v740_v35  ;;  %v1623_v62 = vadd.f32 %v746_v51, %v741_v39  ;;  %v766_v63 = vsub.f32 0.0, %v1589_v44  ;;  %v767_v1 = vsub.f32 0.0, %v1591_v50 }
 0x211   : > { %v768_v2 = vsub.f32 0.0, %v1593_v54  ;;  %v769_v4 = vsub.f32 0.0, %v1595_v0  ;;  %v770_v6 = vsub.f32 0.0, %v1597_v13  ;;  %v771_v5 = vsub.f32 0.0, %v1599_v25 }
 0x212   : > { %v772_v7 = vsub.f32 0.0, %v1601_v53  ;;  %v784_v8 = vmul.f32 1.442695, %v766_v63  ;;  %v786_v10 = vmul.f32 1.442695, %v767_v1  ;;  %v773_v12 = vsub.f32 0.0, %v1603_v34 }
 0x213   : > { %v788_v9 = vmul.f32 1.442695, %v768_v2  ;;  %v790_v14 = vmul.f32 1.442695, %v769_v4  ;;  %v774_v15 = vsub.f32 0.0, %v1605_v43  ;;  %v775_v3 = vsub.f32 0.0, %v1607_v52 }
 0x214   : > { %1168 = vpow2.f32 %v784_v8  ;;  %v792_v11 = vmul.f32 1.442695, %v770_v6  ;;  %v794_v16 = vmul.f32 1.442695, %v771_v5  ;;  %v776_v17 = vsub.f32 0.0, %v1609_v59 }
 0x215   : > { %1170 = vpow2.f32 %v786_v10  ;;  %v796_v22 = vmul.f32 1.442695, %v772_v7  ;;  %v777_v18 = vsub.f32 0.0, %v1611_v55  ;;  %v798_v23 = vmul.f32 1.442695, %v773_v12 }
 0x216   : > { %1172 = vpow2.f32 %v788_v9  ;;  %v778_v27 = vsub.f32 0.0, %v1613_v56  ;;  %v800_v28 = vmul.f32 1.442695, %v774_v15  ;;  %v779_v29 = vsub.f32 0.0, %v1615_v57 }
 0x217   : > { %1174 = vpow2.f32 %v790_v14  ;;  %v802_v31 = vmul.f32 1.442695, %v775_v3  ;;  %v780_v32 = vsub.f32 0.0, %v1617_v58  ;;  %v804_v33 = vmul.f32 1.442695, %v776_v17 }
 0x218   : > { %1176 = vpow2.f32 %v792_v11  ;;  %v781_v36 = vsub.f32 0.0, %v1619_v60  ;;  %v806_v37 = vmul.f32 1.442695, %v777_v18  ;;  %v782_v38 = vsub.f32 0.0, %v1621_v61 }
 0x219   : > { %1178 = vpow2.f32 %v794_v16  ;;  %v808_v40 = vmul.f32 1.442695, %v778_v27  ;;  %v783_v41 = vsub.f32 0.0, %v1623_v62  ;;  %v810_v42 = vmul.f32 1.442695, %v779_v29 }
 0x21a   : > { %1180 = vpow2.f32 %v796_v22  ;;  %v812_v46 = vmul.f32 1.442695, %v780_v32  ;;  %v814_v48 = vmul.f32 1.442695, %v781_v36  ;;  %v816_v19 = vmul.f32 1.442695, %v782_v38 }
 0x21b   : > { %1182 = vpow2.f32 %v798_v23  ;;  %v818_v21 = vmul.f32 1.442695, %v783_v41 }
 0x21c   : > { %1184 = vpow2.f32 %v800_v28 }
 0x21d   : > { %1186 = vpow2.f32 %v802_v31 }
 0x21e   : > { %v1169_v45 = vpop.eup %1168  ;;  %1188 = vpow2.f32 %v804_v33 }
 0x21f   : > { %v1171_v47 = vpop.eup %1170  ;;  %1190 = vpow2.f32 %v806_v37  ;;  %v820_v51 = vadd.f32 1.0, %v1169_v45 }
 0x220   : > { %v1173_v49 = vpop.eup %1172  ;;  %1192 = vpow2.f32 %v808_v40  ;;  %v821_v30 = vadd.f32 1.0, %v1171_v47 }
 0x221   : > { %v1175_v20 = vpop.eup %1174  ;;  %1194 = vpow2.f32 %v810_v42  ;;  %v822_v39 = vadd.f32 1.0, %v1173_v49 }
 0x222   : > { %v1177_v24 = vpop.eup %1176  ;;  %1196 = vpow2.f32 %v812_v46  ;;  %v823_v1 = vadd.f32 1.0, %v1175_v20 }
 0x223   : > { %v1179_v26 = vpop.eup %1178  ;;  %1198 = vpow2.f32 %v814_v48  ;;  %v824_v4 = vadd.f32 1.0, %v1177_v24 }
 0x224   : > { %v1181_v35 = vpop.eup %1180  ;;  %1200 = vpow2.f32 %v816_v19  ;;  %v825_v5 = vadd.f32 1.0, %v1179_v26 }
 0x225   : > { %v1183_v63 = vpop.eup %1182  ;;  %1202 = vpow2.f32 %v818_v21  ;;  %v826_v8 = vadd.f32 1.0, %v1181_v35 }
 0x226   : > { %v1185_v2 = vpop.eup %1184  ;;  %1204 = vrcp.f32 %v820_v51  ;;  %v827_v9 = vadd.f32 1.0, %v1183_v63 }
 0x227   : > { %v1187_v6 = vpop.eup %1186  ;;  %1206 = vrcp.f32 %v821_v30  ;;  %v828_v14 = vadd.f32 1.0, %v1185_v2 }
 0x228   : > { %v1189_v7 = vpop.eup %1188  ;;  %1208 = vrcp.f32 %v822_v39  ;;  %v829_v11 = vadd.f32 1.0, %v1187_v6 }
 0x229   : > { %v1191_v10 = vpop.eup %1190  ;;  %1210 = vrcp.f32 %v823_v1  ;;  %v830_v16 = vadd.f32 1.0, %v1189_v7 }
 0x22a   : > { %v1193_v12 = vpop.eup %1192  ;;  %1212 = vrcp.f32 %v824_v4  ;;  %v831_v22 = vadd.f32 1.0, %v1191_v10 }
 0x22b   : > { %v1195_v15 = vpop.eup %1194  ;;  %1214 = vrcp.f32 %v825_v5  ;;  %v832_v23 = vadd.f32 1.0, %v1193_v12 }
 0x22c   : > { %v1197_v3 = vpop.eup %1196  ;;  %1216 = vrcp.f32 %v826_v8  ;;  %v833_v28 = vadd.f32 1.0, %v1195_v15 }
 0x22d   : > { %v1199_v17 = vpop.eup %1198  ;;  %1218 = vrcp.f32 %v827_v9  ;;  %v834_v31 = vadd.f32 1.0, %v1197_v3 }
 0x22e   : > { %v1201_v18 = vpop.eup %1200  ;;  %1220 = vrcp.f32 %v828_v14  ;;  %v835_v33 = vadd.f32 1.0, %v1199_v17 }
 0x22f   : > { %v1203_v27 = vpop.eup %1202  ;;  %1222 = vrcp.f32 %v829_v11  ;;  %v836_v38 = vadd.f32 1.0, %v1201_v18 }
 0x230   : > { %v1205_v29 = vpop.eup %1204  ;;  %1224 = vrcp.f32 %v830_v16  ;;  %v837_v42 = vadd.f32 1.0, %v1203_v27 }
 0x231   : > { %v1207_v32 = vpop.eup %1206  ;;  %1226 = vrcp.f32 %v831_v22  ;;  %v856_v36 = vmul.f32 %v1205_v29, %v1589_v44 }
 0x232   : > { %v1209_v37 = vpop.eup %1208  ;;  %1228 = vrcp.f32 %v832_v23  ;;  %v857_v40 = vmul.f32 %v1207_v32, %v1591_v50 }
 0x233   : > { %v1211_v41 = vpop.eup %1210  ;;  %1230 = vrcp.f32 %v833_v28  ;;  %v858_v45 = vmul.f32 %v1209_v37, %v1593_v54  ;;  %874 = vst.msk [vmem:[%s1648_s26] sm:$0xff] %vm282_vm1, %v856_v36 }
 0x234   : > { %v1213_v46 = vpop.eup %1212  ;;  %1232 = vrcp.f32 %v834_v31  ;;  %v859_v47 = vmul.f32 %v1211_v41, %v1595_v0  ;;  %875 = vst.msk [vmem:[%s1648_s26 + $0x8] sm:$0xff] %vm282_vm1, %v857_v40 }
 0x235   : > { %v1215_v44 = vpop.eup %1214  ;;  %1234 = vrcp.f32 %v835_v33  ;;  %v860_v50 = vmul.f32 %v1213_v46, %v1597_v13  ;;  %876 = vst.msk [vmem:[%s1648_s26 + $0x10] sm:$0xff] %vm282_vm1, %v858_v45 }
 0x236   : > { %v1217_v48 = vpop.eup %1216  ;;  %1236 = vrcp.f32 %v836_v38  ;;  %v861_v54 = vmul.f32 %v1215_v44, %v1599_v25  ;;  %877 = vst.msk [vmem:[%s1648_s26 + $0x18] sm:$0xff] %vm282_vm1, %v859_v47 }
 0x237   : > { %v1219_v49 = vpop.eup %1218  ;;  %1238 = vrcp.f32 %v837_v42  ;;  %v862_v0 = vmul.f32 %v1217_v48, %v1601_v53  ;;  %878 = vst.msk [vmem:[%s1648_s26 + $0x20] sm:$0xff] %vm282_vm1, %v860_v50 }
 0x238   : > { %v1221_v19 = vpop.eup %1220  ;;  %v863_v13 = vmul.f32 %v1219_v49, %v1603_v34  ;;  %879 = vst.msk [vmem:[%s1648_s26 + $0x28] sm:$0xff] %vm282_vm1, %v861_v54 }
 0x239   : > { %v1223_v20 = vpop.eup %1222  ;;  %v864_v21 = vmul.f32 %v1221_v19, %v1605_v43  ;;  %880 = vst.msk [vmem:[%s1648_s26 + $0x30] sm:$0xff] %vm282_vm1, %v862_v0 }
 0x23a   : > { %v1225_v25 = vpop.eup %1224  ;;  %v865_v24 = vmul.f32 %v1223_v20, %v1607_v52  ;;  %881 = vst.msk [vmem:[%s1648_s26 + $0x38] sm:$0xff] %vm282_vm1, %v863_v13 }
 0x23b   : > { %v1227_v53 = vpop.eup %1226  ;;  %v866_v51 = vmul.f32 %v1225_v25, %v1609_v59  ;;  %882 = vst.msk [vmem:[%s1648_s26 + $0x40] sm:$0xff] %vm282_vm1, %v864_v21 }
 0x23c   : > { %v1229_v34 = vpop.eup %1228  ;;  %v867_v26 = vmul.f32 %v1227_v53, %v1611_v55  ;;  %883 = vst.msk [vmem:[%s1648_s26 + $0x48] sm:$0xff] %vm282_vm1, %v865_v24 }
 0x23d   : > { %v1231_v43 = vpop.eup %1230  ;;  %v868_v30 = vmul.f32 %v1229_v34, %v1613_v56  ;;  %884 = vst.msk [vmem:[%s1648_s26 + $0x50] sm:$0xff] %vm282_vm1, %v866_v51 }
 0x23e   : > { %v1233_v52 = vpop.eup %1232  ;;  %v869_v59 = vmul.f32 %v1231_v43, %v1615_v57  ;;  %885 = vst.msk [vmem:[%s1648_s26 + $0x58] sm:$0xff] %vm282_vm1, %v867_v26 }
 0x23f   : > { %v1235_v35 = vpop.eup %1234  ;;  %v870_v39 = vmul.f32 %v1233_v52, %v1617_v58  ;;  %886 = vst.msk [vmem:[%s1648_s26 + $0x60] sm:$0xff] %vm282_vm1, %v868_v30 }
 0x240   : > { %v1237_v55 = vpop.eup %1236  ;;  %v871_v63 = vmul.f32 %v1235_v35, %v1619_v60  ;;  %887 = vst.msk [vmem:[%s1648_s26 + $0x68] sm:$0xff] %vm282_vm1, %v869_v59 }
 0x241   : > { %v1239_v56 = vpop.eup %1238  ;;  %v872_v1 = vmul.f32 %v1237_v55, %v1621_v61  ;;  %888 = vst.msk [vmem:[%s1648_s26 + $0x70] sm:$0xff] %vm282_vm1, %v870_v39 }
 0x242   : > { %v873_v2 = vmul.f32 %v1239_v56, %v1623_v62  ;;  %889 = vst.msk [vmem:[%s1648_s26 + $0x78] sm:$0xff] %vm282_vm1, %v871_v63 }
 0x243   : > { %890 = vst.msk [vmem:[%s1648_s26 + $0x80] sm:$0xff] %vm282_vm1, %v872_v1 }
 0x244   : > { %891 = vst.msk [vmem:[%s1648_s26 + $0x88] sm:$0xff] %vm282_vm1, %v873_v2 }
 0x245 PF: > { %s15_s18 = sadd.s32 1, %s1246_s18  }
 0x246   : > { %p12_p4 = scmp.ge.s32.totalorder %s15_s18, 4  }
 0x248   :  { %14 = sbr.rel (!%p12_p4) target bundleno = 1 (0x1), region = 73 }

// kernel: scorenet_forward.11
= control target key start
LH: loop header
LB: loop body
LE: loop exit
PB: predicated region body
PF: predicated region fallthrough
CT: control target
= control target key end

     0   :  { %s1190_s18 = smov 0   ;;  %s1408_s0 = inlined_call_operand.vmem [shape: f32[2,25,128], index: 0, kind: input, shape index: {}]   ;;  %s1409_s1 = inlined_call_operand.vmem [shape: f32[2,1,128], index: 1, kind: input, shape index: {}]   ;;  %s1410_s2 = inlined_call_operand.vmem [shape: f32[1,128], index: 2, kind: input, shape index: {}]   ;;  %s1411_s3 = inlined_call_operand.vmem [shape: f32[1,128], index: 3, kind: input, shape index: {}]   ;;  %s1412_s4 = inlined_call_operand.vmem [shape: f32[128,32], index: 4, kind: input, shape index: {}]   ;;  %s1413_s5 = inlined_call_operand.vmem [shape: f32[2,25,128], index: 5, kind: output, shape index: {}]  }
   0x1 LB: > { %s752_s19 = sadd.s32 4294967295, %s1155_s18   ;;  %p756_p0 = scmp.ge.s32.totalorder %s1155_s18, 1  ;;  %s1155_s18 = sphi %s1190_s18, %s15_s18  }
   0x2   : > { %p195_p1 = scmp.lt.s32.totalorder %s1155_s18, 3 }
   0x4   : > { %p196_p2 = pnand %p756_p0, %p195_p1 }
   0x5   : > { %v279_v0 = vld [vmem:[%s1412_s4] sm:$0xff] (!%p196_p2)  ;;  %v280_v1 = vld [vmem:[%s1412_s4 + $0x8] sm:$0xff] (!%p196_p2)  ;;  %v281_v2 = vld [vmem:[%s1412_s4 + $0x10] sm:$0xff] (!%p196_p2)  ;;  %v1157_v3 = vmov (!%p196_p2), 0.0|0.0   ;;  %p226_p3 = scmp.lt.s32.totalorder (!%p196_p2), %s752_s19, 1  ;;  %vm1158_vm0 = vmmov (!%p196_p2), 0  }
   0x6   : > { %199 = sbr.rel (%p196_p2) target bundleno = 528 (0x210), region = 40  ;;  %1008 = vmatprep.subr.bf16.mxu0 (!%p196_p2), %v1157_v3  ;;  %v1208_v4 = vpack.c.bf16 (!%p196_p2), %v280_v1, %v279_v0  ;;  %1032 = vmatprep.subr.bf16.mxu1 (!%p196_p2), %v1157_v3  ;;  %v282_v5 = vld [vmem:[%s1412_s4 + $0x18] sm:$0xff] (!%p196_p2)  ;;  %v1159_v6 = vmov (!%p196_p2), 0.0   ;;  %v283_v8 = vld [vmem:[%s1412_s4 + $0x20] sm:$0xff] (!%p196_p2)  ;;  %v284_v9 = vld [vmem:[%s1412_s4 + $0x28] sm:$0xff] (!%p196_p2)  ;;  %vm256_vm1 = vcmask (!%p196_p2), 1040384  }
   0x7   : > { %900 = vmatprep.mubr.msk.f32.mxu0 (!%p196_p2), %vm1158_vm0, %v1159_v6  ;;  %935 = vmatprep.mubr.msk.f32.mxu1 (!%p196_p2), %vm1158_vm0, %v1159_v6  ;;  %v1220_v7 = vpack.c.bf16 (!%p196_p2), %v282_v5, %v281_v2  ;;  %v1244_v11 = vpack.c.bf16 (!%p196_p2), %v284_v9, %v283_v8  ;;  %v285_v15 = vld [vmem:[%s1412_s4 + $0x30] sm:$0xff] (!%p196_p2)  ;;  %v286_v16 = vld [vmem:[%s1412_s4 + $0x38] sm:$0xff] (!%p196_p2)  ;;  %v287_v29 = vld [vmem:[%s1412_s4 + $0x40] sm:$0xff] (!%p196_p2)  ;;  %vm442_vm2 = vcmask (!%p196_p2), 261120   ;;  %v642_v9 = vlaneseq (!%p196_p2) }
   0x8   : > { %1010 = vmatpush3.bf16.msra.mxu0 (!%p196_p2), %v1208_v4  ;;  %1034 = vmatpush3.bf16.msra.mxu1 (!%p196_p2), %v1208_v4  ;;  %v1272_v26 = vpack.c.bf16 (!%p196_p2), %v286_v16, %v285_v15  ;;  %v288_v30 = vld [vmem:[%s1412_s4 + $0x48] sm:$0xff] (!%p196_p2)  ;;  %v289_v37 = vld [vmem:[%s1412_s4 + $0x50] sm:$0xff] (!%p196_p2)  ;;  %v290_v38 = vld [vmem:[%s1412_s4 + $0x58] sm:$0xff] (!%p196_p2) }
   0x9   : > { %1011 = vmatprep.subr.bf16.mxu0 (!%p196_p2), %v1157_v3  ;;  %1035 = vmatprep.subr.bf16.mxu1 (!%p196_p2), %v1157_v3  ;;  %v1290_v36 = vpack.c.bf16 (!%p196_p2), %v288_v30, %v287_v29  ;;  %v1024_v43 = vpack.c.bf16 (!%p196_p2), %v290_v38, %v289_v37  ;;  %v291_v44 = vld [vmem:[%s1412_s4 + $0x60] sm:$0xff] (!%p196_p2)  ;;  %v292_v45 = vld [vmem:[%s1412_s4 + $0x68] sm:$0xff] (!%p196_p2)  ;;  %v293_v51 = vld [vmem:[%s1412_s4 + $0x70] sm:$0xff] (!%p196_p2) }
   0xa   : > { %v1027_v50 = vpack.c.bf16 (!%p196_p2), %v292_v45, %v291_v44  ;;  %v294_v52 = vld [vmem:[%s1412_s4 + $0x78] sm:$0xff] (!%p196_p2)  ;;  %vm1328_vm3 = vmpackc.low (!%p196_p2), %vm442_vm2, %vm442_vm2  ;;  %v639_v16 = vld [vmem:[%s1411_s3] sm:$0x1] (!%p196_p2) }
   0xb   : > { %v1030_v56 = vpack.c.bf16 (!%p196_p2), %v294_v52, %v293_v51 }
   0xc   : > { %1013 = vmatpush3.bf16.msra.mxu0 (!%p196_p2), %v1220_v7  ;;  %1037 = vmatpush3.bf16.msra.mxu1 (!%p196_p2), %v1220_v7 }
   0xd   : > { %s1417_s19 = smov (!%p226_p3, %s752_s19), 1  ;;  %1014 = vmatprep.subr.bf16.mxu0 %v1157_v3  ;;  %1038 = vmatprep.subr.bf16.mxu1 %v1157_v3 }
   0xe   : > { %s798_s7 = sshll.u32 %s1417_s19, 5  ;;  %s233_s10 = scalar_lea.vmem %s1409_s1, %s1417_s19 }
   0xf   : > { %s230_s13 = scalar_lea.vmem %s1408_s0, %s798_s7  ;;  %v761_v10 = vld [vmem:[%s233_s10] ss:$0 sm:$0xff]  ;;  %s238_s20 = scalar_lea.vmem %s1413_s5, %s798_s7 }
  0x10   : > { %v239_v12 = vld [vmem:[%s230_s13] sm:$0xff]  ;;  %v240_v13 = vld [vmem:[%s230_s13 + $0x8] sm:$0xff]  ;;  %v241_v14 = vld [vmem:[%s230_s13 + $0x10] sm:$0xff]  ;;  %1016 = vmatpush3.bf16.msra.mxu0 %v1244_v11  ;;  %1040 = vmatpush3.bf16.msra.mxu1 %v1244_v11 }
  0x11   : > { %v242_v17 = vld [vmem:[%s230_s13 + $0x18] sm:$0x1]  ;;  %v1254_v18 = vadd.f32 %v761_v10, %v239_v12  ;;  %v1256_v19 = vadd.f32 %v761_v10, %v240_v13  ;;  %v1258_v20 = vadd.f32 %v761_v10, %v241_v14  ;;  %1017 = vmatprep.subr.bf16.mxu0 %v1157_v3  ;;  %1041 = vmatprep.subr.bf16.mxu1 %v1157_v3 }
  0x12   : > { %v1260_v21 = vadd.f32 %v761_v10, %v242_v17  ;;  %v643_v10 = vshrl.u32 %v642_v9, 7 }
  0x13   : > { %v254_v22 = vadd.f32 %v1256_v19, %v1254_v18  ;;  %v265_v23 = vmul.f32 %v1254_v18, %v1254_v18  ;;  %v266_v24 = vmul.f32 %v1256_v19, %v1256_v19  ;;  %v267_v25 = vmul.f32 %v1258_v20, %v1258_v20 }
  0x14   : > { %v257_v27 = vsel %vm256_vm1, %v1260_v21, 0.0  ;;  %v268_v28 = vmul.f32 %v1260_v21, %v1260_v21  ;;  %1019 = vmatpush3.bf16.msra.mxu0 %v1272_v26  ;;  %1043 = vmatpush3.bf16.msra.mxu1 %v1272_v26  ;;  %v644_v12 = vsub.s32 0, %v643_v10 }
  0x15   : > { %v255_v31 = vadd.f32 %v254_v22, %v1258_v20  ;;  %v269_v32 = vadd.f32 %v266_v24, %v265_v23  ;;  %1020 = vmatprep.subr.bf16.mxu0 %v1157_v3  ;;  %1044 = vmatprep.subr.bf16.mxu1 %v1157_v3 }
  0x16   : > { %v271_v33 = vsel %vm256_vm1, %v268_v28, 0.0 }
  0x17   : > { %v258_v34 = vadd.f32 %v257_v27, %v255_v31  ;;  %v270_v35 = vadd.f32 %v269_v32, %v267_v25 }
  0x18   : > { %1022 = vmatpush3.bf16.msra.mxu0 %v1290_v36  ;;  %1046 = vmatpush3.bf16.msra.mxu1 %v1290_v36 }
  0x19   : > { %v259_v39 = vrot.slane %v258_v34, 4  ;;  %v272_v40 = vadd.f32 %v271_v33, %v270_v35  ;;  %1023 = vmatprep.subr.bf16.mxu0 %v1157_v3  ;;  %1047 = vmatprep.subr.bf16.mxu1 %v1157_v3 }
  0x1b   : > { %v260_v41 = vadd.f32 %v259_v39, %v258_v34  ;;  %v273_v42 = vrot.slane %v272_v40, 4 }
  0x1c   : > { %1025 = vmatpush3.bf16.msra.mxu0 %v1024_v43  ;;  %1049 = vmatpush3.bf16.msra.mxu1 %v1024_v43 }
  0x1d   : > { %v261_v46 = vrot.slane %v260_v41, 2  ;;  %v274_v47 = vadd.f32 %v273_v42, %v272_v40  ;;  %1026 = vmatprep.subr.bf16.mxu0 %v1157_v3  ;;  %1050 = vmatprep.subr.bf16.mxu1 %v1157_v3 }
  0x1f   : > { %v262_v48 = vadd.f32 %v261_v46, %v260_v41  ;;  %v275_v49 = vrot.slane %v274_v47, 2 }
  0x20   : > { %1028 = vmatpush3.bf16.msra.mxu0 %v1027_v50  ;;  %1052 = vmatpush3.bf16.msra.mxu1 %v1027_v50 }
  0x21   : > { %v276_v53 = vadd.f32 %v275_v49, %v274_v47  ;;  %v263_v54 = vrot.slane %v262_v48, 1  ;;  %1029 = vmatprep.subr.bf16.mxu0 %v1157_v3  ;;  %1053 = vmatprep.subr.bf16.mxu1 %v1157_v3 }
  0x23   : > { %v277_v55 = vrot.slane %v276_v53, 1  ;;  %v264_v57 = vadd.f32 %v263_v54, %v262_v48 }
  0x24   : > { %1031 = vmatpush3.bf16.msra.mxu0 %v1030_v56  ;;  %1055 = vmatpush3.bf16.msra.mxu1 %v1030_v56 }
  0x25   : > { %v278_v58 = vadd.f32 %v277_v55, %v276_v53  ;;  %1056 = vmatprep.subr.bf16.mxu0 %v1157_v3  ;;  %1088 = vmatprep.subr.bf16.mxu1 %v1157_v3 }
  0x27   : > { %901 = vmatmul.mubr.f32.vlgmr.msra.gmra.mrb[0].mxu0 %v264_v57  ;;  %936 = vmatmul.mubr.f32.vlgmr.msra.gmra.mrb[0].mxu1 %v278_v58 }
  0x28   : > { %970 = vmatprep.mubr.msk.f32.mxu0 %vm1158_vm0, %v1159_v6  ;;  %1005 = vmatprep.mubr.msk.f32.mxu1 %vm1158_vm0, %v1159_v6 }
  0x2d   : > { %1059 = vmatpush3.bf16.xpose.msk.msra.mxu0 %vm1328_vm3, %v1208_v4  ;;  %1091 = vmatpush3.bf16.xpose.msk.msra.mxu1 %vm1328_vm3, %v1208_v4 }
  0x2e   : > { %1060 = vmatprep.subr.bf16.mxu0 %v1157_v3  ;;  %1092 = vmatprep.subr.bf16.mxu1 %v1157_v3 }
  0x35   : > { %1063 = vmatpush3.bf16.xpose.msk.msra.mxu0 %vm1328_vm3, %v1220_v7  ;;  %1095 = vmatpush3.bf16.xpose.msk.msra.mxu1 %vm1328_vm3, %v1220_v7 }
  0x36   : > { %1064 = vmatprep.subr.bf16.mxu0 %v1157_v3  ;;  %1096 = vmatprep.subr.bf16.mxu1 %v1157_v3 }
  0x3d   : > { %1067 = vmatpush3.bf16.xpose.msk.msra.mxu0 %vm1328_vm3, %v1244_v11  ;;  %1099 = vmatpush3.bf16.xpose.msk.msra.mxu1 %vm1328_vm3, %v1244_v11  ;;  %v637_v11 = vld [vmem:[%s1410_s2] sm:$0x1] }
  0x3e   : > { %1068 = vmatprep.subr.bf16.mxu0 %v1157_v3  ;;  %1100 = vmatprep.subr.bf16.mxu1 %v1157_v3 }
  0x45   : > { %1071 = vmatpush3.bf16.xpose.msk.msra.mxu0 %vm1328_vm3, %v1272_v26  ;;  %1103 = vmatpush3.bf16.xpose.msk.msra.mxu1 %vm1328_vm3, %v1272_v26 }
  0x46   : > { %1072 = vmatprep.subr.bf16.mxu0 %v1157_v3  ;;  %1104 = vmatprep.subr.bf16.mxu1 %v1157_v3 }
  0x4d   : > { %1075 = vmatpush3.bf16.xpose.msk.msra.mxu0 %vm1328_vm3, %v1290_v36  ;;  %1107 = vmatpush3.bf16.xpose.msk.msra.mxu1 %vm1328_vm3, %v1290_v36 }
  0x4e   : > { %1076 = vmatprep.subr.bf16.mxu0 %v1157_v3  ;;  %1108 = vmatprep.subr.bf16.mxu1 %v1157_v3 }
  0x55   : > { %1079 = vmatpush3.bf16.xpose.msk.msra.mxu0 %vm1328_vm3, %v1024_v43  ;;  %1111 = vmatpush3.bf16.xpose.msk.msra.mxu1 %vm1328_vm3, %v1024_v43 }
  0x56   : > { %1080 = vmatprep.subr.bf16.mxu0 %v1157_v3  ;;  %1112 = vmatprep.subr.bf16.mxu1 %v1157_v3 }
  0x5d   : > { %1083 = vmatpush3.bf16.xpose.msk.msra.mxu0 %vm1328_vm3, %v1027_v50  ;;  %1115 = vmatpush3.bf16.xpose.msk.msra.mxu1 %vm1328_vm3, %v1027_v50 }
  0x5e   : > { %1084 = vmatprep.subr.bf16.mxu0 %v1157_v3  ;;  %1116 = vmatprep.subr.bf16.mxu1 %v1157_v3 }
  0x65   : > { %1087 = vmatpush3.bf16.xpose.msk.msra.mxu0 %vm1328_vm3, %v1030_v56  ;;  %1119 = vmatpush3.bf16.xpose.msk.msra.mxu1 %vm1328_vm3, %v1030_v56 }
  0xfa   : > { %v361_v60 = vpop.f32.mrb[0].mxu0  ;;  %v432_v61 = vpop.f32.mrb[0].mxu1 }
  0xfb   : > { %v365_v62 = vmul.f32 0.01, %v361_v60  ;;  %v902_v63 = vpop.f32.mrb[1].mxu0  ;;  %v436_v0 = vmul.f32 0.01, %v432_v61  ;;  %v937_v1 = vpop.f32.mrb[1].mxu1 }
  0xfd   : > { %v437_v2 = vmul.f32 %v365_v62, %v365_v62  ;;  %971 = vmatmul.mubr.msk.f32.vlgmr.msra.gmra.mrb[2].mxu0 %vm442_vm2, %v365_v62 }
  0xff   : > { %v438_v4 = vsub.f32 %v436_v0, %v437_v2 }
 0x101   : > { %v439_v5 = vmax.f32 %v438_v4, 0.0 }
 0x103   : > { %v440_v6 = vadd.f32 1e-05, %v439_v5 }
 0x105   : > { %1131 = vrsqrt.f32 %v440_v6 }
 0x10f   : > { %v1132_v3 = vpop.eup %1131 }
 0x110   : > { %1006 = vmatmul.mubr.msk.f32.vlgmr.msra.gmra.mrb[2].mxu1 %vm442_vm2, %v1132_v3 }
 0x1d0   : > { %v560_v7 = vpop.f32.mrb[2].mxu0 }
 0x1d1   : > { %v972_v8 = vpop.f32.mrb[3].mxu0 }
 0x1e3   : > { %v633_v13 = vpop.f32.mrb[2].mxu1 }
 0x1e4   : > { %v638_v14 = vmul.f32 %v637_v11, %v633_v13  ;;  %v1007_v15 = vpop.f32.mrb[3].mxu1 }
 0x1e6   : > { %v640_v17 = vmul.f32 %v638_v14, %v560_v7  ;;  %v645_v22 = vrot.slane %v638_v14, %v644_v12 }
 0x1e8   : > { %v641_v23 = vsub.f32 %v639_v16, %v640_v17  ;;  %v646_v24 = vmul.f32 %v645_v22, %v1254_v18  ;;  %v647_v25 = vmul.f32 %v645_v22, %v1256_v19  ;;  %v648_v26 = vmul.f32 %v645_v22, %v1258_v20 }
 0x1e9   : > { %v649_v27 = vmul.f32 %v645_v22, %v1260_v21 }
 0x1ea   : > { %v654_v28 = vrot.slane %v641_v23, %v644_v12 }
 0x1ec   : > { %v656_v29 = vadd.f32 %v654_v28, %v646_v24  ;;  %v657_v30 = vadd.f32 %v654_v28, %v647_v25  ;;  %v658_v31 = vadd.f32 %v654_v28, %v648_v26  ;;  %v659_v32 = vadd.f32 %v654_v28, %v649_v27 }
 0x1ee   : > { %v660_v33 = vsub.f32 0.0, %v656_v29  ;;  %v661_v34 = vsub.f32 0.0, %v657_v30  ;;  %v662_v35 = vsub.f32 0.0, %v658_v31  ;;  %v663_v36 = vsub.f32 0.0, %v659_v32 }
 0x1f0   : > { %v664_v37 = vmul.f32 1.442695, %v660_v33  ;;  %v666_v38 = vmul.f32 1.442695, %v661_v34  ;;  %v668_v39 = vmul.f32 1.442695, %v662_v35 }
 0x1f1   : > { %v670_v40 = vmul.f32 1.442695, %v663_v36 }
 0x1f2   : > { %1133 = vpow2.f32 %v664_v37 }
 0x1f3   : > { %1135 = vpow2.f32 %v666_v38 }
 0x1f4   : > { %1137 = vpow2.f32 %v668_v39 }
 0x1f5   : > { %1139 = vpow2.f32 %v670_v40 }
 0x1fc   : > { %v1134_v18 = vpop.eup %1133 }
 0x1fd   : > { %v1136_v19 = vpop.eup %1135  ;;  %v672_v20 = vadd.f32 1.0, %v1134_v18 }
 0x1fe   : > { %v1138_v21 = vpop.eup %1137  ;;  %v673_v41 = vadd.f32 1.0, %v1136_v19 }
 0x1ff   : > { %v1140_v42 = vpop.eup %1139  ;;  %v674_v43 = vadd.f32 1.0, %v1138_v21  ;;  %1141 = vrcp.f32 %v672_v20 }
 0x200   : > { %v675_v44 = vadd.f32 1.0, %v1140_v42  ;;  %1143 = vrcp.f32 %v673_v41 }
 0x201   : > { %1145 = vrcp.f32 %v674_v43 }
 0x202   : > { %1147 = vrcp.f32 %v675_v44 }
 0x209   : > { %v1142_v45 = vpop.eup %1141 }
 0x20a   : > { %v1144_v46 = vpop.eup %1143  ;;  %v680_v47 = vmul.f32 %v1142_v45, %v656_v29 }
 0x20b   : > { %v1146_v48 = vpop.eup %1145  ;;  %v681_v49 = vmul.f32 %v1144_v46, %v657_v30 }
 0x20c   : > { %v1148_v50 = vpop.eup %1147  ;;  %v682_v51 = vmul.f32 %v1146_v48, %v658_v31  ;;  %684 = vst [vmem:[%s238_s20] sm:$0xff] %v680_v47 }
 0x20d   : > { %v683_v52 = vmul.f32 %v1148_v50, %v659_v32  ;;  %685 = vst [vmem:[%s238_s20 + $0x8] sm:$0xff] %v681_v49 }
 0x20e   : > { %686 = vst [vmem:[%s238_s20 + $0x10] sm:$0xff] %v682_v51 }
 0x20f   : > { %687 = vst [vmem:[%s238_s20 + $0x18] sm:$0x1] %v683_v52 }
 0x210 PF: > { %s15_s18 = sadd.s32 1, %s1155_s18  }
 0x211   : > { %p12_p4 = scmp.ge.s32.totalorder %s15_s18, 4  }
 0x213   :  { %14 = sbr.rel (!%p12_p4) target bundleno = 1 (0x1), region = 73 }

// kernel: scorenet_forward.12
= control target key start
LH: loop header
LB: loop body
LE: loop exit
PB: predicated region body
PF: predicated region fallthrough
CT: control target
= control target key end

     0   :  { %s1283_s18 = smov 0   ;;  %s1600_s0 = inlined_call_operand.vmem [shape: f32[2,4,256], index: 0, kind: input, shape index: {}]   ;;  %s1601_s1 = inlined_call_operand.vmem [shape: f32[2,1,256], index: 1, kind: input, shape index: {}]   ;;  %s1602_s2 = inlined_call_operand.vmem [shape: f32[1,256], index: 2, kind: input, shape index: {}]   ;;  %s1603_s3 = inlined_call_operand.vmem [shape: f32[1,256], index: 3, kind: input, shape index: {}]   ;;  %s1604_s4 = inlined_call_operand.vmem [shape: f32[256,32], index: 4, kind: input, shape index: {}]   ;;  %s1605_s5 = inlined_call_operand.vmem [shape: f32[2,4,256], index: 5, kind: output, shape index: {}]  }
   0x1 LB: > { %s851_s19 = sadd.s32 4294967295, %s1250_s18   ;;  %p855_p0 = scmp.ge.s32.totalorder %s1250_s18, 1  ;;  %s1250_s18 = sphi %s1283_s18, %s15_s18  }
   0x2   : > { %p196_p1 = scmp.lt.s32.totalorder %s1250_s18, 3 }
   0x4   : > { %p197_p2 = pnand %p855_p0, %p196_p1 }
   0x5   : > { %v308_v0 = vld [vmem:[%s1604_s4 + $0x80] sm:$0xff] (!%p197_p2)  ;;  %v309_v1 = vld [vmem:[%s1604_s4 + $0x88] sm:$0xff] (!%p197_p2)  ;;  %p228_p3 = scmp.lt.s32.totalorder (!%p197_p2), %s851_s19, 1  ;;  %v245_v3 = vlaneseq (!%p197_p2)  ;;  %v310_v6 = vld [vmem:[%s1604_s4 + $0x90] sm:$0xff] (!%p197_p2)  ;;  %vm259_vm0 = vcmask (!%p197_p2), 1043456   ;;  %vm471_vm1 = vcmask (!%p197_p2), 261120  }
   0x6   : > { %200 = sbr.rel (%p197_p2) target bundleno = 539 (0x21b), region = 40  ;;  %v292_v2 = vld [vmem:[%s1604_s4] sm:$0xff] (!%p197_p2)  ;;  %v1300_v4 = vpack.c.bf16 (!%p197_p2), %v309_v1, %v308_v0  ;;  %v293_v5 = vld [vmem:[%s1604_s4 + $0x8] sm:$0xff] (!%p197_p2)  ;;  %v311_v7 = vld [vmem:[%s1604_s4 + $0x98] sm:$0xff] (!%p197_p2) }
   0x7   : > { %v1311_v8 = vpack.c.bf16 (!%p197_p2), %v293_v5, %v292_v2  ;;  %v1313_v9 = vpack.c.bf16 (!%p197_p2), %v311_v7, %v310_v6  ;;  %v294_v10 = vld [vmem:[%s1604_s4 + $0x10] sm:$0xff] (!%p197_p2)  ;;  %v295_v11 = vld [vmem:[%s1604_s4 + $0x18] sm:$0xff] (!%p197_p2)  ;;  %v312_v12 = vld [vmem:[%s1604_s4 + $0xa0] sm:$0xff] (!%p197_p2)  ;;  %v1335_v15 = vshrl.u32 (!%p197_p2), %v245_v3, 7 }
   0x8   : > { %1070 = vmatprep.subr.bf16.mxu0 (!%p197_p2), %v1300_v4  ;;  %1102 = vmatprep.subr.bf16.mxu1 (!%p197_p2), %v1300_v4  ;;  %v313_v13 = vld [vmem:[%s1604_s4 + $0xa8] sm:$0xff] (!%p197_p2)  ;;  %v1333_v14 = vpack.c.bf16 (!%p197_p2), %v295_v11, %v294_v10  ;;  %v296_v17 = vld [vmem:[%s1604_s4 + $0x20] sm:$0xff] (!%p197_p2)  ;;  %v314_v19 = vld [vmem:[%s1604_s4 + $0xb0] sm:$0xff] (!%p197_p2) }
   0x9   : > { %1072 = vmatpush3.bf16.msra.mxu0 (!%p197_p2), %v1311_v8  ;;  %1104 = vmatpush3.bf16.msra.mxu1 (!%p197_p2), %v1311_v8  ;;  %v1339_v16 = vpack.c.bf16 (!%p197_p2), %v313_v13, %v312_v12  ;;  %v297_v18 = vld [vmem:[%s1604_s4 + $0x28] sm:$0xff] (!%p197_p2)  ;;  %v315_v20 = vld [vmem:[%s1604_s4 + $0xb8] sm:$0xff] (!%p197_p2)  ;;  %v1363_v22 = vsub.s32 (!%p197_p2), 0, %v1335_v15  ;;  %v1366_v23 = vsub.s32 (!%p197_p2), 1, %v1335_v15  ;;  %v298_v25 = vld [vmem:[%s1604_s4 + $0x30] sm:$0xff] (!%p197_p2) }
   0xa   : > { %1074 = vmatprep.subr.bf16.mxu0 (!%p197_p2), %v1313_v9  ;;  %1106 = vmatprep.subr.bf16.mxu1 (!%p197_p2), %v1313_v9  ;;  %v1357_v21 = vpack.c.bf16 (!%p197_p2), %v297_v18, %v296_v17  ;;  %v1370_v24 = vpack.c.bf16 (!%p197_p2), %v315_v20, %v314_v19  ;;  %v299_v26 = vld [vmem:[%s1604_s4 + $0x38] sm:$0xff] (!%p197_p2)  ;;  %v316_v27 = vld [vmem:[%s1604_s4 + $0xc0] sm:$0xff] (!%p197_p2)  ;;  %v317_v28 = vld [vmem:[%s1604_s4 + $0xc8] sm:$0xff] (!%p197_p2) }
   0xb   : > { %v1391_v30 = vpack.c.bf16 (!%p197_p2), %v299_v26, %v298_v25  ;;  %v1397_v33 = vpack.c.bf16 (!%p197_p2), %v317_v28, %v316_v27  ;;  %v300_v34 = vld [vmem:[%s1604_s4 + $0x40] sm:$0xff] (!%p197_p2)  ;;  %v301_v35 = vld [vmem:[%s1604_s4 + $0x48] sm:$0xff] (!%p197_p2)  ;;  %v318_v37 = vld [vmem:[%s1604_s4 + $0xd0] sm:$0xff] (!%p197_p2) }
   0xc   : > { %v319_v38 = vld [vmem:[%s1604_s4 + $0xd8] sm:$0xff] (!%p197_p2)  ;;  %v1413_v40 = vpack.c.bf16 (!%p197_p2), %v301_v35, %v300_v34  ;;  %v302_v43 = vld [vmem:[%s1604_s4 + $0x50] sm:$0xff] (!%p197_p2)  ;;  %v320_v45 = vld [vmem:[%s1604_s4 + $0xe0] sm:$0xff] (!%p197_p2) }
   0xd   : > { %s1609_s19 = smov (!%p228_p3, %s851_s19), 1  ;;  %1076 = vmatpush3.bf16.msra.mxu0 %v1333_v14  ;;  %1108 = vmatpush3.bf16.msra.mxu1 %v1333_v14  ;;  %v1419_v42 = vpack.c.bf16 %v319_v38, %v318_v37  ;;  %v303_v44 = vld [vmem:[%s1604_s4 + $0x58] sm:$0xff]  ;;  %v321_v46 = vld [vmem:[%s1604_s4 + $0xe8] sm:$0xff]  ;;  %v304_v52 = vld [vmem:[%s1604_s4 + $0x60] sm:$0xff] }
   0xe   : > { %s858_s21 = sshll.u32 %s1609_s19, 1  ;;  %s929_s26 = sshll.u32 %s1609_s19, 3  ;;  %1078 = vmatprep.subr.bf16.mxu0 %v1339_v16  ;;  %1110 = vmatprep.subr.bf16.mxu1 %v1339_v16  ;;  %v1441_v51 = vpack.c.bf16 %v303_v44, %v302_v43  ;;  %v1450_v56 = vpack.c.bf16 %v321_v46, %v320_v45  ;;  %v305_v57 = vld [vmem:[%s1604_s4 + $0x68] sm:$0xff]  ;;  %v322_v58 = vld [vmem:[%s1604_s4 + $0xf0] sm:$0xff]  ;;  %v323_v59 = vld [vmem:[%s1604_s4 + $0xf8] sm:$0xff] }
   0xf   : > { %s236_s29 = scalar_lea.vmem %s1601_s1, %s858_s21  ;;  %s232_s15 = scalar_lea.vmem %s1600_s0, %s929_s26  ;;  %v1095_v5 = vpack.c.bf16 %v305_v57, %v304_v52  ;;  %v1464_v6 = vpack.c.bf16 %v323_v59, %v322_v58  ;;  %v306_v7 = vld [vmem:[%s1604_s4 + $0x70] sm:$0xff]  ;;  %v307_v10 = vld [vmem:[%s1604_s4 + $0x78] sm:$0xff]  ;;  %vm1478_vm2 = vmpackc.low %vm471_vm1, %vm471_vm1  ;;  %v1252_v46 = vmov 1966171168  }
  0x10   : > { %v243_v29 = vld [vmem:[%s236_s29] sm:$0x3]  ;;  %v1099_v26 = vpack.c.bf16 %v307_v10, %v306_v7  ;;  %s241_s6 = scalar_lea.vmem %s1605_s5, %s929_s26 }
  0x11   : > { %1080 = vmatpush3.bf16.msra.mxu0 %v1357_v21  ;;  %1112 = vmatpush3.bf16.msra.mxu1 %v1357_v21  ;;  %v248_v31 = vrot.slane %v243_v29, %v1363_v22  ;;  %v252_v32 = vrot.slane %v243_v29, %v1366_v23  ;;  %v242_v36 = vld [vmem:[%s232_s15] sm:$0xff] }
  0x12   : > { %1082 = vmatprep.subr.bf16.mxu0 %v1370_v24  ;;  %1114 = vmatprep.subr.bf16.mxu1 %v1370_v24  ;;  %v716_v45 = vld [vmem:[%s1602_s2] sm:$0x3] }
  0x13   : > { %v253_v39 = vcombine.low %v248_v31, %v252_v32 }
  0x15   : > { %1084 = vmatpush3.bf16.msra.mxu0 %v1391_v30  ;;  %1116 = vmatpush3.bf16.msra.mxu1 %v1391_v30  ;;  %v1415_v41 = vadd.f32 %v253_v39, %v242_v36 }
  0x16   : > { %1086 = vmatprep.subr.bf16.mxu0 %v1397_v33  ;;  %1118 = vmatprep.subr.bf16.mxu1 %v1397_v33 }
  0x17   : > { %v257_v47 = vcombine.high %v1415_v41, %v1415_v41  ;;  %v260_v48 = vsel %vm259_vm0, %v1415_v41, 0.0  ;;  %v274_v49 = vmul.f32 %v1415_v41, %v1415_v41 }
  0x18   : > { %v261_v50 = vrot.slane %v260_v48, 4 }
  0x19   : > { %1088 = vmatpush3.bf16.msra.mxu0 %v1413_v40  ;;  %1120 = vmatpush3.bf16.msra.mxu1 %v1413_v40  ;;  %v267_v53 = vsel %vm259_vm0, %v257_v47, 0.0  ;;  %v276_v54 = vcombine.high %v274_v49, %v274_v49  ;;  %v278_v55 = vsel %vm259_vm0, %v274_v49, 0.0  ;;  %v737_v47 = vunpack.c.l.s4 %v1252_v46 }
  0x1a   : > { %1090 = vmatprep.subr.bf16.mxu0 %v1419_v42  ;;  %1122 = vmatprep.subr.bf16.mxu1 %v1419_v42  ;;  %v268_v60 = vrot.slane %v267_v53, 4  ;;  %v262_v61 = vadd.f32 %v261_v50, %v260_v48  ;;  %v279_v62 = vrot.slane %v278_v55, 4  ;;  %v721_v48 = vrot.slane %v716_v45, %v1363_v22 }
  0x1b   : > { %v285_v63 = vsel %vm259_vm0, %v276_v54, 0.0  ;;  %v725_v49 = vrot.slane %v716_v45, %v1366_v23 }
  0x1c   : > { %v269_v0 = vadd.f32 %v268_v60, %v267_v53  ;;  %v263_v1 = vrot.slane %v262_v61, 2  ;;  %v286_v2 = vrot.slane %v285_v63, 4  ;;  %v280_v3 = vadd.f32 %v279_v62, %v278_v55 }
  0x1d   : > { %1092 = vmatpush3.bf16.msra.mxu0 %v1441_v51  ;;  %1124 = vmatpush3.bf16.msra.mxu1 %v1441_v51 }
  0x1e   : > { %1094 = vmatprep.subr.bf16.mxu0 %v1450_v56  ;;  %1126 = vmatprep.subr.bf16.mxu1 %v1450_v56  ;;  %v270_v11 = vrot.slane %v269_v0, 2  ;;  %v264_v12 = vadd.f32 %v263_v1, %v262_v61  ;;  %v287_v13 = vadd.f32 %v286_v2, %v285_v63  ;;  %v281_v17 = vrot.slane %v280_v3, 2  ;;  %v730_v63 = vld [vmem:[%s1603_s3] sm:$0x3] }
  0x20   : > { %v271_v18 = vadd.f32 %v270_v11, %v269_v0  ;;  %v265_v19 = vrot.slane %v264_v12, 1  ;;  %v288_v20 = vrot.slane %v287_v13, 2  ;;  %v282_v25 = vadd.f32 %v281_v17, %v280_v3 }
  0x21   : > { %1096 = vmatpush3.bf16.msra.mxu0 %v1095_v5  ;;  %1128 = vmatpush3.bf16.msra.mxu1 %v1095_v5 }
  0x22   : > { %1098 = vmatprep.subr.bf16.mxu0 %v1464_v6  ;;  %1130 = vmatprep.subr.bf16.mxu1 %v1464_v6  ;;  %v272_v27 = vrot.slane %v271_v18, 1  ;;  %v289_v28 = vadd.f32 %v288_v20, %v287_v13  ;;  %v283_v29 = vrot.slane %v282_v25, 1  ;;  %v266_v34 = vadd.f32 %v265_v19, %v264_v12 }
  0x24   : > { %v273_v32 = vadd.f32 %v272_v27, %v271_v18  ;;  %v290_v35 = vrot.slane %v289_v28, 1  ;;  %v284_v36 = vadd.f32 %v283_v29, %v282_v25 }
  0x25   : > { %1100 = vmatpush3.bf16.msra.mxu0 %v1099_v26  ;;  %1132 = vmatpush3.bf16.msra.mxu1 %v1099_v26 }
  0x26   : > { %388 = vmatprep.mubr.f32.mxu0 %v273_v32  ;;  %v291_v37 = vadd.f32 %v290_v35, %v289_v28  ;;  %1135 = vmatprep.subr.msk.bf16.mxu0 %vm1478_vm2, %v1300_v4 }
  0x27   : > { %1183 = vmatprep.subr.msk.bf16.mxu1 %vm1478_vm2, %v1300_v4 }
  0x28   : > { %389 = vmatmul.mubr.f32.vlgmr.msra.gmra.mrb[0].mxu0 %v266_v34  ;;  %459 = vmatprep.mubr.f32.mxu1 %v291_v37 }
  0x29   : > { %460 = vmatmul.mubr.f32.vlgmr.msra.gmra.mrb[0].mxu1 %v284_v36 }
  0x2e   : > { %1138 = vmatpush3.bf16.xpose.msk.msra.mxu0 %vm1478_vm2, %v1311_v8  ;;  %1186 = vmatpush3.bf16.xpose.msk.msra.mxu1 %vm1478_vm2, %v1311_v8 }
  0x2f   : > { %1141 = vmatprep.subr.msk.bf16.mxu0 %vm1478_vm2, %v1313_v9  ;;  %1189 = vmatprep.subr.msk.bf16.mxu1 %vm1478_vm2, %v1313_v9 }
  0x36   : > { %1144 = vmatpush3.bf16.xpose.msk.msra.mxu0 %vm1478_vm2, %v1333_v14  ;;  %1192 = vmatpush3.bf16.xpose.msk.msra.mxu1 %vm1478_vm2, %v1333_v14 }
  0x37   : > { %1147 = vmatprep.subr.msk.bf16.mxu0 %vm1478_vm2, %v1339_v16  ;;  %1195 = vmatprep.subr.msk.bf16.mxu1 %vm1478_vm2, %v1339_v16 }
  0x3e   : > { %1150 = vmatpush3.bf16.xpose.msk.msra.mxu0 %vm1478_vm2, %v1357_v21  ;;  %1198 = vmatpush3.bf16.xpose.msk.msra.mxu1 %vm1478_vm2, %v1357_v21 }
  0x3f   : > { %1153 = vmatprep.subr.msk.bf16.mxu0 %vm1478_vm2, %v1370_v24  ;;  %1201 = vmatprep.subr.msk.bf16.mxu1 %vm1478_vm2, %v1370_v24 }
  0x46   : > { %1156 = vmatpush3.bf16.xpose.msk.msra.mxu0 %vm1478_vm2, %v1391_v30  ;;  %1204 = vmatpush3.bf16.xpose.msk.msra.mxu1 %vm1478_vm2, %v1391_v30 }
  0x47   : > { %1159 = vmatprep.subr.msk.bf16.mxu0 %vm1478_vm2, %v1397_v33  ;;  %1207 = vmatprep.subr.msk.bf16.mxu1 %vm1478_vm2, %v1397_v33 }
  0x4e   : > { %1162 = vmatpush3.bf16.xpose.msk.msra.mxu0 %vm1478_vm2, %v1413_v40  ;;  %1210 = vmatpush3.bf16.xpose.msk.msra.mxu1 %vm1478_vm2, %v1413_v40 }
  0x4f   : > { %1165 = vmatprep.subr.msk.bf16.mxu0 %vm1478_vm2, %v1419_v42  ;;  %1213 = vmatprep.subr.msk.bf16.mxu1 %vm1478_vm2, %v1419_v42 }
  0x56   : > { %1168 = vmatpush3.bf16.xpose.msk.msra.mxu0 %vm1478_vm2, %v1441_v51  ;;  %1216 = vmatpush3.bf16.xpose.msk.msra.mxu1 %vm1478_vm2, %v1441_v51  ;;  %v738_v51 = vunpack.c.0.s8 %v737_v47 }
  0x57   : > { %1171 = vmatprep.subr.msk.bf16.mxu0 %vm1478_vm2, %v1450_v56  ;;  %1219 = vmatprep.subr.msk.bf16.mxu1 %vm1478_vm2, %v1450_v56 }
  0x58   : > { %v741_v58 = vsub.s32 %v738_v51, %v1335_v15 }
  0x5e   : > { %1174 = vmatpush3.bf16.xpose.msk.msra.mxu0 %vm1478_vm2, %v1095_v5  ;;  %1222 = vmatpush3.bf16.xpose.msk.msra.mxu1 %vm1478_vm2, %v1095_v5 }
  0x5f   : > { %1177 = vmatprep.subr.msk.bf16.mxu0 %vm1478_vm2, %v1464_v6  ;;  %1225 = vmatprep.subr.msk.bf16.mxu1 %vm1478_vm2, %v1464_v6 }
  0x66   : > { %1180 = vmatpush3.bf16.xpose.msk.msra.mxu0 %vm1478_vm2, %v1099_v26  ;;  %1228 = vmatpush3.bf16.xpose.msk.msra.mxu1 %vm1478_vm2, %v1099_v26 }
  0xfb   : > { %v963_v4 = vpop.f32.mrb[0].mxu0 }
  0xfc   : > { %v964_v8 = vpop.f32.mrb[1].mxu0  ;;  %v998_v9 = vpop.f32.mrb[0].mxu1 }
  0xfd   : > { %v965_v14 = vadd.f32 %v964_v8, %v963_v4  ;;  %v999_v16 = vpop.f32.mrb[1].mxu1 }
  0xfe   : > { %v1000_v21 = vadd.f32 %v999_v16, %v998_v9 }
  0xff   : > { %v394_v24 = vmul.f32 0.03125, %v965_v14 }
 0x100   : > { %v465_v30 = vmul.f32 0.03125, %v1000_v21 }
 0x101   : > { %v466_v33 = vmul.f32 %v394_v24, %v394_v24  ;;  %1033 = vmatprep.mubr.msk.f32.mxu0 %vm471_vm1, %v394_v24 }
 0x102   : > { %1034 = vmatmul.mubr.msk.f32.vlgmr.msra.gmra.mrb[2].mxu0 %vm471_vm1, %v394_v24 }
 0x103   : > { %v467_v38 = vsub.f32 %v465_v30, %v466_v33 }
 0x105   : > { %v468_v39 = vmax.f32 %v467_v38, 0.0 }
 0x107   : > { %v469_v40 = vadd.f32 1e-05, %v468_v39 }
 0x109   : > { %1238 = vrsqrt.f32 %v469_v40 }
 0x113   : > { %v1239_v42 = vpop.eup %1238 }
 0x114   : > { %1067 = vmatprep.mubr.msk.f32.mxu1 %vm471_vm1, %v1239_v42 }
 0x115   : > { %1068 = vmatmul.mubr.msk.f32.vlgmr.msra.gmra.mrb[2].mxu1 %vm471_vm1, %v1239_v42 }
 0x1d5   : > { %v637_v43 = vpop.f32.mrb[2].mxu0 }
 0x1d6   : > { %v639_v44 = vpop.f32.mrb[3].mxu0 }
 0x1e8   : > { %v711_v50 = vpop.f32.mrb[2].mxu1 }
 0x1e9   : > { %v728_v52 = vmul.f32 %v721_v48, %v711_v50  ;;  %v713_v53 = vpop.f32.mrb[3].mxu1 }
 0x1ea   : > { %v729_v54 = vmul.f32 %v725_v49, %v713_v53 }
 0x1eb   : > { %v731_v55 = vmul.f32 %v728_v52, %v637_v43  ;;  %v755_v56 = vrot.slane %v728_v52, %v1363_v22 }
 0x1ec   : > { %v732_v57 = vmul.f32 %v729_v54, %v639_v44  ;;  %v759_v59 = vrot.slane %v729_v54, %v1363_v22 }
 0x1ee   : > { %v735_v60 = vcombine.low %v731_v55, %v732_v57  ;;  %v762_v61 = vcombine.low %v755_v56, %v759_v59 }
 0x1f0   : > { %v742_v62 = vrot.slane %v735_v60, %v741_v58  ;;  %v764_v5 = vmul.f32 %v762_v61, %v1415_v41 }
 0x1f2   : > { %v749_v0 = vrot.slane %v742_v62, %v741_v58 }
 0x1f4   : > { %v751_v1 = vsub.f32 %v730_v63, %v749_v0 }
 0x1f6   : > { %v769_v2 = vrot.slane %v751_v1, %v1363_v22  ;;  %v773_v3 = vrot.slane %v751_v1, %v1366_v23 }
 0x1f8   : > { %v774_v6 = vcombine.low %v769_v2, %v773_v3 }
 0x1fa   : > { %v776_v15 = vadd.f32 %v774_v6, %v764_v5 }
 0x1fc   : > { %v777_v7 = vsub.f32 0.0, %v776_v15 }
 0x1fe   : > { %v778_v10 = vmul.f32 1.442695, %v777_v7 }
 0x200   : > { %1240 = vpow2.f32 %v778_v10 }
 0x20a   : > { %v1241_v11 = vpop.eup %1240 }
 0x20b   : > { %v780_v12 = vadd.f32 1.0, %v1241_v11 }
 0x20d   : > { %1242 = vrcp.f32 %v780_v12 }
 0x217   : > { %v1243_v13 = vpop.eup %1242 }
 0x218   : > { %v782_v17 = vmul.f32 %v1243_v13, %v776_v15 }
 0x21a   : > { %783 = vst [vmem:[%s241_s6] sm:$0xff] %v782_v17 }
 0x21b PF: > { %s15_s18 = sadd.s32 1, %s1250_s18  }
 0x21c   : > { %p12_p4 = scmp.ge.s32.totalorder %s15_s18, 4  }
 0x21e   :  { %14 = sbr.rel (!%p12_p4) target bundleno = 1 (0x1), region = 73 }

// kernel: reverse
= control target key start
LH: loop header
LB: loop body
LE: loop exit
PB: predicated region body
PF: predicated region fallthrough
CT: control target
= control target key end

     0   :  { %v2015_v3 = vmov 0.0   ;;  %s4042_s0 = inlined_call_operand.vmem [shape: f32[3,3,256,128], index: 0, kind: input, shape index: {}]   ;;  %s4043_s1 = inlined_call_operand.vmem [shape: bf16[3,3,256,128], index: 1, kind: output, shape index: {}]  }
   0x1   :  { %v1440_v0 = vld [vmem:[%s4042_s0 + $0x800] sm:$0xff]  ;;  %v1456_v19 = vld [vmem:[%s4042_s0 + $0x808] sm:$0xff]  ;;  %v1474_v37 = vld [vmem:[%s4042_s0 + $0x810] sm:$0xff] }
   0x2   :  { %v1441_v1 = vld [vmem:[%s4042_s0 + $0x500] sm:$0xff]  ;;  %v4_v4 = vpack.c.bf16 %v2015_v3, %v1440_v0  ;;  %v1458_v20 = vld [vmem:[%s4042_s0 + $0x508] sm:$0xff]  ;;  %v48_v22 = vpack.c.bf16 %v2015_v3, %v1456_v19  ;;  %v1476_v38 = vld [vmem:[%s4042_s0 + $0x510] sm:$0xff]  ;;  %v93_v40 = vpack.c.bf16 %v2015_v3, %v1474_v37 }
   0x3   :  { %v1443_v2 = vld [vmem:[%s4042_s0 + $0x200] sm:$0xff]  ;;  %v9_v5 = vpack.c.bf16 %v2015_v3, %v1441_v1  ;;  %v1460_v21 = vld [vmem:[%s4042_s0 + $0x208] sm:$0xff]  ;;  %v53_v23 = vpack.c.bf16 %v2015_v3, %v1458_v20  ;;  %v1478_v39 = vld [vmem:[%s4042_s0 + $0x210] sm:$0xff]  ;;  %v98_v41 = vpack.c.bf16 %v2015_v3, %v1476_v38 }
   0x4   :  { %v14_v6 = vpack.c.bf16 %v2015_v3, %v1443_v2  ;;  %v1445_v7 = vld [vmem:[%s4042_s0 + $0x700] sm:$0xff]  ;;  %5 = vst [vmem:[%s4043_s1] sm:$0xf] %v4_v4  ;;  %v58_v24 = vpack.c.bf16 %v2015_v3, %v1460_v21  ;;  %v1462_v25 = vld [vmem:[%s4042_s0 + $0x708] sm:$0xff]  ;;  %1457 = vst [vmem:[%s4043_s1 + $0x4] sm:$0xf] %v48_v22  ;;  %v103_v42 = vpack.c.bf16 %v2015_v3, %v1478_v39 }
   0x5   :  { %v1447_v8 = vld [vmem:[%s4042_s0 + $0x400] sm:$0xff]  ;;  %v19_v10 = vpack.c.bf16 %v2015_v3, %v1445_v7  ;;  %1442 = vst [vmem:[%s4043_s1 + $0x180] sm:$0xf] %v9_v5  ;;  %v1464_v26 = vld [vmem:[%s4042_s0 + $0x408] sm:$0xff]  ;;  %v63_v28 = vpack.c.bf16 %v2015_v3, %v1462_v25  ;;  %1459 = vst [vmem:[%s4043_s1 + $0x184] sm:$0xf] %v53_v23 }
   0x6   :  { %v1449_v9 = vld [vmem:[%s4042_s0 + $0x100] sm:$0xff]  ;;  %v24_v11 = vpack.c.bf16 %v2015_v3, %v1447_v8  ;;  %1444 = vst [vmem:[%s4043_s1 + $0x300] sm:$0xf] %v14_v6  ;;  %v1466_v27 = vld [vmem:[%s4042_s0 + $0x108] sm:$0xff]  ;;  %v68_v29 = vpack.c.bf16 %v2015_v3, %v1464_v26  ;;  %1461 = vst [vmem:[%s4043_s1 + $0x304] sm:$0xf] %v58_v24 }
   0x7   :  { %v29_v12 = vpack.c.bf16 %v2015_v3, %v1449_v9  ;;  %v1451_v13 = vld [vmem:[%s4042_s0 + $0x600] sm:$0xff]  ;;  %1446 = vst [vmem:[%s4043_s1 + $0x80] sm:$0xf] %v19_v10  ;;  %v73_v30 = vpack.c.bf16 %v2015_v3, %v1466_v27  ;;  %v1468_v31 = vld [vmem:[%s4042_s0 + $0x608] sm:$0xff]  ;;  %1463 = vst [vmem:[%s4043_s1 + $0x84] sm:$0xf] %v63_v28 }
   0x8   :  { %v1453_v14 = vld [vmem:[%s4042_s0 + $0x300] sm:$0xff]  ;;  %v34_v16 = vpack.c.bf16 %v2015_v3, %v1451_v13  ;;  %1448 = vst [vmem:[%s4043_s1 + $0x200] sm:$0xf] %v24_v11  ;;  %v1470_v32 = vld [vmem:[%s4042_s0 + $0x308] sm:$0xff]  ;;  %v78_v34 = vpack.c.bf16 %v2015_v3, %v1468_v31  ;;  %1465 = vst [vmem:[%s4043_s1 + $0x204] sm:$0xf] %v68_v29 }
   0x9   :  { %v41_v15 = vld [vmem:[%s4042_s0] sm:$0xff]  ;;  %v39_v17 = vpack.c.bf16 %v2015_v3, %v1453_v14  ;;  %1450 = vst [vmem:[%s4043_s1 + $0x380] sm:$0xf] %v29_v12  ;;  %v1472_v33 = vld [vmem:[%s4042_s0 + $0x8] sm:$0xff]  ;;  %v83_v35 = vpack.c.bf16 %v2015_v3, %v1470_v32  ;;  %1467 = vst [vmem:[%s4043_s1 + $0x384] sm:$0xf] %v73_v30 }
   0xa   :  { %v43_v18 = vpack.c.bf16 %v2015_v3, %v41_v15  ;;  %1452 = vst [vmem:[%s4043_s1 + $0x100] sm:$0xf] %v34_v16  ;;  %v88_v36 = vpack.c.bf16 %v2015_v3, %v1472_v33  ;;  %v1480_v43 = vld [vmem:[%s4042_s0 + $0x710] sm:$0xff]  ;;  %1469 = vst [vmem:[%s4043_s1 + $0x104] sm:$0xf] %v78_v34  ;;  %v1492_v55 = vld [vmem:[%s4042_s0 + $0x818] sm:$0xff] }
   0xb   :  { %1454 = vst [vmem:[%s4043_s1 + $0x280] sm:$0xf] %v39_v17  ;;  %v1482_v44 = vld [vmem:[%s4042_s0 + $0x410] sm:$0xff]  ;;  %1471 = vst [vmem:[%s4043_s1 + $0x284] sm:$0xf] %v83_v35  ;;  %v108_v46 = vpack.c.bf16 %v2015_v3, %v1480_v43  ;;  %v1494_v56 = vld [vmem:[%s4042_s0 + $0x518] sm:$0xff]  ;;  %v138_v58 = vpack.c.bf16 %v2015_v3, %v1492_v55 }
   0xc   :  { %1455 = vst [vmem:[%s4043_s1 + $0x400] sm:$0xf] %v43_v18  ;;  %v1484_v45 = vld [vmem:[%s4042_s0 + $0x110] sm:$0xff]  ;;  %1473 = vst [vmem:[%s4043_s1 + $0x404] sm:$0xf] %v88_v36  ;;  %v113_v47 = vpack.c.bf16 %v2015_v3, %v1482_v44  ;;  %v1496_v57 = vld [vmem:[%s4042_s0 + $0x218] sm:$0xff]  ;;  %v143_v59 = vpack.c.bf16 %v2015_v3, %v1494_v56 }
   0xd   :  { %v118_v48 = vpack.c.bf16 %v2015_v3, %v1484_v45  ;;  %v1486_v49 = vld [vmem:[%s4042_s0 + $0x610] sm:$0xff]  ;;  %1475 = vst [vmem:[%s4043_s1 + $0x8] sm:$0xf] %v93_v40  ;;  %1477 = vst [vmem:[%s4043_s1 + $0x188] sm:$0xf] %v98_v41  ;;  %v148_v60 = vpack.c.bf16 %v2015_v3, %v1496_v57  ;;  %v1498_v61 = vld [vmem:[%s4042_s0 + $0x718] sm:$0xff] }
   0xe   :  { %v1488_v50 = vld [vmem:[%s4042_s0 + $0x310] sm:$0xff]  ;;  %1479 = vst [vmem:[%s4043_s1 + $0x308] sm:$0xf] %v103_v42  ;;  %v123_v52 = vpack.c.bf16 %v2015_v3, %v1486_v49  ;;  %1481 = vst [vmem:[%s4043_s1 + $0x88] sm:$0xf] %v108_v46  ;;  %v1500_v62 = vld [vmem:[%s4042_s0 + $0x418] sm:$0xff]  ;;  %v153_v0 = vpack.c.bf16 %v2015_v3, %v1498_v61 }
   0xf   :  { %v1490_v51 = vld [vmem:[%s4042_s0 + $0x10] sm:$0xff]  ;;  %v128_v53 = vpack.c.bf16 %v2015_v3, %v1488_v50  ;;  %1483 = vst [vmem:[%s4043_s1 + $0x208] sm:$0xf] %v113_v47  ;;  %1485 = vst [vmem:[%s4043_s1 + $0x388] sm:$0xf] %v118_v48  ;;  %v1502_v63 = vld [vmem:[%s4042_s0 + $0x118] sm:$0xff]  ;;  %v158_v1 = vpack.c.bf16 %v2015_v3, %v1500_v62 }
  0x10   :  { %v133_v54 = vpack.c.bf16 %v2015_v3, %v1490_v51  ;;  %1487 = vst [vmem:[%s4043_s1 + $0x108] sm:$0xf] %v123_v52  ;;  %v163_v2 = vpack.c.bf16 %v2015_v3, %v1502_v63  ;;  %v1504_v4 = vld [vmem:[%s4042_s0 + $0x618] sm:$0xff]  ;;  %1493 = vst [vmem:[%s4043_s1 + $0xc] sm:$0xf] %v138_v58  ;;  %v1510_v10 = vld [vmem:[%s4042_s0 + $0x820] sm:$0xff] }
  0x11   :  { %1489 = vst [vmem:[%s4043_s1 + $0x288] sm:$0xf] %v128_v53  ;;  %v1506_v5 = vld [vmem:[%s4042_s0 + $0x318] sm:$0xff]  ;;  %1495 = vst [vmem:[%s4043_s1 + $0x18c] sm:$0xf] %v143_v59  ;;  %v168_v7 = vpack.c.bf16 %v2015_v3, %v1504_v4  ;;  %v1512_v11 = vld [vmem:[%s4042_s0 + $0x520] sm:$0xff]  ;;  %v183_v13 = vpack.c.bf16 %v2015_v3, %v1510_v10 }
  0x12   :  { %1491 = vst [vmem:[%s4043_s1 + $0x408] sm:$0xf] %v133_v54  ;;  %v1508_v6 = vld [vmem:[%s4042_s0 + $0x18] sm:$0xff]  ;;  %1497 = vst [vmem:[%s4043_s1 + $0x30c] sm:$0xf] %v148_v60  ;;  %v173_v8 = vpack.c.bf16 %v2015_v3, %v1506_v5  ;;  %v1514_v12 = vld [vmem:[%s4042_s0 + $0x220] sm:$0xff]  ;;  %v188_v14 = vpack.c.bf16 %v2015_v3, %v1512_v11 }
  0x13   :  { %v178_v9 = vpack.c.bf16 %v2015_v3, %v1508_v6  ;;  %1499 = vst [vmem:[%s4043_s1 + $0x8c] sm:$0xf] %v153_v0  ;;  %1501 = vst [vmem:[%s4043_s1 + $0x20c] sm:$0xf] %v158_v1  ;;  %v193_v15 = vpack.c.bf16 %v2015_v3, %v1514_v12  ;;  %v1516_v16 = vld [vmem:[%s4042_s0 + $0x720] sm:$0xff]  ;;  %v1528_v28 = vld [vmem:[%s4042_s0 + $0x828] sm:$0xff] }
  0x14   :  { %1503 = vst [vmem:[%s4043_s1 + $0x38c] sm:$0xf] %v163_v2  ;;  %v1518_v17 = vld [vmem:[%s4042_s0 + $0x420] sm:$0xff]  ;;  %1505 = vst [vmem:[%s4043_s1 + $0x10c] sm:$0xf] %v168_v7  ;;  %v198_v19 = vpack.c.bf16 %v2015_v3, %v1516_v16  ;;  %v1530_v29 = vld [vmem:[%s4042_s0 + $0x528] sm:$0xff]  ;;  %v228_v31 = vpack.c.bf16 %v2015_v3, %v1528_v28 }
  0x15   :  { %v1520_v18 = vld [vmem:[%s4042_s0 + $0x120] sm:$0xff]  ;;  %1507 = vst [vmem:[%s4043_s1 + $0x28c] sm:$0xf] %v173_v8  ;;  %1509 = vst [vmem:[%s4043_s1 + $0x40c] sm:$0xf] %v178_v9  ;;  %v203_v20 = vpack.c.bf16 %v2015_v3, %v1518_v17  ;;  %v1532_v30 = vld [vmem:[%s4042_s0 + $0x228] sm:$0xff]  ;;  %v233_v32 = vpack.c.bf16 %v2015_v3, %v1530_v29 }
  0x16   :  { %v208_v21 = vpack.c.bf16 %v2015_v3, %v1520_v18  ;;  %v1522_v22 = vld [vmem:[%s4042_s0 + $0x620] sm:$0xff]  ;;  %1511 = vst [vmem:[%s4043_s1 + $0x10] sm:$0xf] %v183_v13  ;;  %1513 = vst [vmem:[%s4043_s1 + $0x190] sm:$0xf] %v188_v14  ;;  %v238_v33 = vpack.c.bf16 %v2015_v3, %v1532_v30  ;;  %v1534_v34 = vld [vmem:[%s4042_s0 + $0x728] sm:$0xff] }
  0x17   :  { %v1524_v23 = vld [vmem:[%s4042_s0 + $0x320] sm:$0xff]  ;;  %1515 = vst [vmem:[%s4043_s1 + $0x310] sm:$0xf] %v193_v15  ;;  %v213_v25 = vpack.c.bf16 %v2015_v3, %v1522_v22  ;;  %1517 = vst [vmem:[%s4043_s1 + $0x90] sm:$0xf] %v198_v19  ;;  %v1536_v35 = vld [vmem:[%s4042_s0 + $0x428] sm:$0xff]  ;;  %v243_v37 = vpack.c.bf16 %v2015_v3, %v1534_v34 }
  0x18   :  { %v1526_v24 = vld [vmem:[%s4042_s0 + $0x20] sm:$0xff]  ;;  %v218_v26 = vpack.c.bf16 %v2015_v3, %v1524_v23  ;;  %1519 = vst [vmem:[%s4043_s1 + $0x210] sm:$0xf] %v203_v20  ;;  %1521 = vst [vmem:[%s4043_s1 + $0x390] sm:$0xf] %v208_v21  ;;  %v1538_v36 = vld [vmem:[%s4042_s0 + $0x128] sm:$0xff]  ;;  %v248_v38 = vpack.c.bf16 %v2015_v3, %v1536_v35 }
  0x19   :  { %v223_v27 = vpack.c.bf16 %v2015_v3, %v1526_v24  ;;  %1523 = vst [vmem:[%s4043_s1 + $0x110] sm:$0xf] %v213_v25  ;;  %v253_v39 = vpack.c.bf16 %v2015_v3, %v1538_v36  ;;  %v1540_v40 = vld [vmem:[%s4042_s0 + $0x628] sm:$0xff]  ;;  %1529 = vst [vmem:[%s4043_s1 + $0x14] sm:$0xf] %v228_v31  ;;  %v1546_v46 = vld [vmem:[%s4042_s0 + $0x830] sm:$0xff] }
  0x1a   :  { %1525 = vst [vmem:[%s4043_s1 + $0x290] sm:$0xf] %v218_v26  ;;  %v1542_v41 = vld [vmem:[%s4042_s0 + $0x328] sm:$0xff]  ;;  %1531 = vst [vmem:[%s4043_s1 + $0x194] sm:$0xf] %v233_v32  ;;  %v258_v43 = vpack.c.bf16 %v2015_v3, %v1540_v40  ;;  %v1548_v47 = vld [vmem:[%s4042_s0 + $0x530] sm:$0xff]  ;;  %v273_v49 = vpack.c.bf16 %v2015_v3, %v1546_v46 }
  0x1b   :  { %1527 = vst [vmem:[%s4043_s1 + $0x410] sm:$0xf] %v223_v27  ;;  %v1544_v42 = vld [vmem:[%s4042_s0 + $0x28] sm:$0xff]  ;;  %1533 = vst [vmem:[%s4043_s1 + $0x314] sm:$0xf] %v238_v33  ;;  %v263_v44 = vpack.c.bf16 %v2015_v3, %v1542_v41  ;;  %v1550_v48 = vld [vmem:[%s4042_s0 + $0x230] sm:$0xff]  ;;  %v278_v50 = vpack.c.bf16 %v2015_v3, %v1548_v47 }
  0x1c   :  { %v268_v45 = vpack.c.bf16 %v2015_v3, %v1544_v42  ;;  %1535 = vst [vmem:[%s4043_s1 + $0x94] sm:$0xf] %v243_v37  ;;  %1537 = vst [vmem:[%s4043_s1 + $0x214] sm:$0xf] %v248_v38  ;;  %v283_v51 = vpack.c.bf16 %v2015_v3, %v1550_v48  ;;  %v1552_v52 = vld [vmem:[%s4042_s0 + $0x730] sm:$0xff]  ;;  %v1564_v0 = vld [vmem:[%s4042_s0 + $0x838] sm:$0xff] }
  0x1d   :  { %1539 = vst [vmem:[%s4043_s1 + $0x394] sm:$0xf] %v253_v39  ;;  %v1554_v53 = vld [vmem:[%s4042_s0 + $0x430] sm:$0xff]  ;;  %1541 = vst [vmem:[%s4043_s1 + $0x114] sm:$0xf] %v258_v43  ;;  %v288_v55 = vpack.c.bf16 %v2015_v3, %v1552_v52  ;;  %v1566_v1 = vld [vmem:[%s4042_s0 + $0x538] sm:$0xff]  ;;  %v318_v4 = vpack.c.bf16 %v2015_v3, %v1564_v0 }
  0x1e   :  { %v1556_v54 = vld [vmem:[%s4042_s0 + $0x130] sm:$0xff]  ;;  %1543 = vst [vmem:[%s4043_s1 + $0x294] sm:$0xf] %v263_v44  ;;  %1545 = vst [vmem:[%s4043_s1 + $0x414] sm:$0xf] %v268_v45  ;;  %v293_v56 = vpack.c.bf16 %v2015_v3, %v1554_v53  ;;  %v1568_v2 = vld [vmem:[%s4042_s0 + $0x238] sm:$0xff]  ;;  %v323_v5 = vpack.c.bf16 %v2015_v3, %v1566_v1 }
  0x1f   :  { %v298_v57 = vpack.c.bf16 %v2015_v3, %v1556_v54  ;;  %v1558_v58 = vld [vmem:[%s4042_s0 + $0x630] sm:$0xff]  ;;  %1547 = vst [vmem:[%s4043_s1 + $0x18] sm:$0xf] %v273_v49  ;;  %1549 = vst [vmem:[%s4043_s1 + $0x198] sm:$0xf] %v278_v50  ;;  %v328_v6 = vpack.c.bf16 %v2015_v3, %v1568_v2  ;;  %v1570_v7 = vld [vmem:[%s4042_s0 + $0x738] sm:$0xff] }
  0x20   :  { %v1560_v59 = vld [vmem:[%s4042_s0 + $0x330] sm:$0xff]  ;;  %1551 = vst [vmem:[%s4043_s1 + $0x318] sm:$0xf] %v283_v51  ;;  %v303_v61 = vpack.c.bf16 %v2015_v3, %v1558_v58  ;;  %1553 = vst [vmem:[%s4043_s1 + $0x98] sm:$0xf] %v288_v55  ;;  %v1572_v8 = vld [vmem:[%s4042_s0 + $0x438] sm:$0xff]  ;;  %v333_v10 = vpack.c.bf16 %v2015_v3, %v1570_v7 }
  0x21   :  { %v1562_v60 = vld [vmem:[%s4042_s0 + $0x30] sm:$0xff]  ;;  %v308_v62 = vpack.c.bf16 %v2015_v3, %v1560_v59  ;;  %1555 = vst [vmem:[%s4043_s1 + $0x218] sm:$0xf] %v293_v56  ;;  %1557 = vst [vmem:[%s4043_s1 + $0x398] sm:$0xf] %v298_v57  ;;  %v1574_v9 = vld [vmem:[%s4042_s0 + $0x138] sm:$0xff]  ;;  %v338_v11 = vpack.c.bf16 %v2015_v3, %v1572_v8 }
  0x22   :  { %v313_v63 = vpack.c.bf16 %v2015_v3, %v1562_v60  ;;  %1559 = vst [vmem:[%s4043_s1 + $0x118] sm:$0xf] %v303_v61  ;;  %v343_v12 = vpack.c.bf16 %v2015_v3, %v1574_v9  ;;  %v1576_v13 = vld [vmem:[%s4042_s0 + $0x638] sm:$0xff]  ;;  %1565 = vst [vmem:[%s4043_s1 + $0x1c] sm:$0xf] %v318_v4  ;;  %v1582_v19 = vld [vmem:[%s4042_s0 + $0x840] sm:$0xff] }
  0x23   :  { %1561 = vst [vmem:[%s4043_s1 + $0x298] sm:$0xf] %v308_v62  ;;  %v1578_v14 = vld [vmem:[%s4042_s0 + $0x338] sm:$0xff]  ;;  %1567 = vst [vmem:[%s4043_s1 + $0x19c] sm:$0xf] %v323_v5  ;;  %v348_v16 = vpack.c.bf16 %v2015_v3, %v1576_v13  ;;  %v1584_v20 = vld [vmem:[%s4042_s0 + $0x540] sm:$0xff]  ;;  %v363_v22 = vpack.c.bf16 %v2015_v3, %v1582_v19 }
  0x24   :  { %1563 = vst [vmem:[%s4043_s1 + $0x418] sm:$0xf] %v313_v63  ;;  %v1580_v15 = vld [vmem:[%s4042_s0 + $0x38] sm:$0xff]  ;;  %1569 = vst [vmem:[%s4043_s1 + $0x31c] sm:$0xf] %v328_v6  ;;  %v353_v17 = vpack.c.bf16 %v2015_v3, %v1578_v14  ;;  %v1586_v21 = vld [vmem:[%s4042_s0 + $0x240] sm:$0xff]  ;;  %v368_v23 = vpack.c.bf16 %v2015_v3, %v1584_v20 }
  0x25   :  { %v358_v18 = vpack.c.bf16 %v2015_v3, %v1580_v15  ;;  %1571 = vst [vmem:[%s4043_s1 + $0x9c] sm:$0xf] %v333_v10  ;;  %1573 = vst [vmem:[%s4043_s1 + $0x21c] sm:$0xf] %v338_v11  ;;  %v373_v24 = vpack.c.bf16 %v2015_v3, %v1586_v21  ;;  %v1588_v25 = vld [vmem:[%s4042_s0 + $0x740] sm:$0xff]  ;;  %v1600_v37 = vld [vmem:[%s4042_s0 + $0x848] sm:$0xff] }
  0x26   :  { %1575 = vst [vmem:[%s4043_s1 + $0x39c] sm:$0xf] %v343_v12  ;;  %v1590_v26 = vld [vmem:[%s4042_s0 + $0x440] sm:$0xff]  ;;  %1577 = vst [vmem:[%s4043_s1 + $0x11c] sm:$0xf] %v348_v16  ;;  %v378_v28 = vpack.c.bf16 %v2015_v3, %v1588_v25  ;;  %v1602_v38 = vld [vmem:[%s4042_s0 + $0x548] sm:$0xff]  ;;  %v408_v40 = vpack.c.bf16 %v2015_v3, %v1600_v37 }
  0x27   :  { %v1592_v27 = vld [vmem:[%s4042_s0 + $0x140] sm:$0xff]  ;;  %1579 = vst [vmem:[%s4043_s1 + $0x29c] sm:$0xf] %v353_v17  ;;  %1581 = vst [vmem:[%s4043_s1 + $0x41c] sm:$0xf] %v358_v18  ;;  %v383_v29 = vpack.c.bf16 %v2015_v3, %v1590_v26  ;;  %v1604_v39 = vld [vmem:[%s4042_s0 + $0x248] sm:$0xff]  ;;  %v413_v41 = vpack.c.bf16 %v2015_v3, %v1602_v38 }
  0x28   :  { %v388_v30 = vpack.c.bf16 %v2015_v3, %v1592_v27  ;;  %v1594_v31 = vld [vmem:[%s4042_s0 + $0x640] sm:$0xff]  ;;  %1583 = vst [vmem:[%s4043_s1 + $0x20] sm:$0xf] %v363_v22  ;;  %1585 = vst [vmem:[%s4043_s1 + $0x1a0] sm:$0xf] %v368_v23  ;;  %v418_v42 = vpack.c.bf16 %v2015_v3, %v1604_v39  ;;  %v1606_v43 = vld [vmem:[%s4042_s0 + $0x748] sm:$0xff] }
  0x29   :  { %v1596_v32 = vld [vmem:[%s4042_s0 + $0x340] sm:$0xff]  ;;  %1587 = vst [vmem:[%s4043_s1 + $0x320] sm:$0xf] %v373_v24  ;;  %v393_v34 = vpack.c.bf16 %v2015_v3, %v1594_v31  ;;  %1589 = vst [vmem:[%s4043_s1 + $0xa0] sm:$0xf] %v378_v28  ;;  %v1608_v44 = vld [vmem:[%s4042_s0 + $0x448] sm:$0xff]  ;;  %v423_v46 = vpack.c.bf16 %v2015_v3, %v1606_v43 }
  0x2a   :  { %v1598_v33 = vld [vmem:[%s4042_s0 + $0x40] sm:$0xff]  ;;  %v398_v35 = vpack.c.bf16 %v2015_v3, %v1596_v32  ;;  %1591 = vst [vmem:[%s4043_s1 + $0x220] sm:$0xf] %v383_v29  ;;  %1593 = vst [vmem:[%s4043_s1 + $0x3a0] sm:$0xf] %v388_v30  ;;  %v1610_v45 = vld [vmem:[%s4042_s0 + $0x148] sm:$0xff]  ;;  %v428_v47 = vpack.c.bf16 %v2015_v3, %v1608_v44 }
  0x2b   :  { %v403_v36 = vpack.c.bf16 %v2015_v3, %v1598_v33  ;;  %1595 = vst [vmem:[%s4043_s1 + $0x120] sm:$0xf] %v393_v34  ;;  %v433_v48 = vpack.c.bf16 %v2015_v3, %v1610_v45  ;;  %v1612_v49 = vld [vmem:[%s4042_s0 + $0x648] sm:$0xff]  ;;  %1601 = vst [vmem:[%s4043_s1 + $0x24] sm:$0xf] %v408_v40  ;;  %v1618_v55 = vld [vmem:[%s4042_s0 + $0x850] sm:$0xff] }
  0x2c   :  { %1597 = vst [vmem:[%s4043_s1 + $0x2a0] sm:$0xf] %v398_v35  ;;  %v1614_v50 = vld [vmem:[%s4042_s0 + $0x348] sm:$0xff]  ;;  %1603 = vst [vmem:[%s4043_s1 + $0x1a4] sm:$0xf] %v413_v41  ;;  %v438_v52 = vpack.c.bf16 %v2015_v3, %v1612_v49  ;;  %v1620_v56 = vld [vmem:[%s4042_s0 + $0x550] sm:$0xff]  ;;  %v453_v58 = vpack.c.bf16 %v2015_v3, %v1618_v55 }
  0x2d   :  { %1599 = vst [vmem:[%s4043_s1 + $0x420] sm:$0xf] %v403_v36  ;;  %v1616_v51 = vld [vmem:[%s4042_s0 + $0x48] sm:$0xff]  ;;  %1605 = vst [vmem:[%s4043_s1 + $0x324] sm:$0xf] %v418_v42  ;;  %v443_v53 = vpack.c.bf16 %v2015_v3, %v1614_v50  ;;  %v1622_v57 = vld [vmem:[%s4042_s0 + $0x250] sm:$0xff]  ;;  %v458_v59 = vpack.c.bf16 %v2015_v3, %v1620_v56 }
  0x2e   :  { %v448_v54 = vpack.c.bf16 %v2015_v3, %v1616_v51  ;;  %1607 = vst [vmem:[%s4043_s1 + $0xa4] sm:$0xf] %v423_v46  ;;  %1609 = vst [vmem:[%s4043_s1 + $0x224] sm:$0xf] %v428_v47  ;;  %v463_v60 = vpack.c.bf16 %v2015_v3, %v1622_v57  ;;  %v1624_v61 = vld [vmem:[%s4042_s0 + $0x750] sm:$0xff]  ;;  %v1636_v10 = vld [vmem:[%s4042_s0 + $0x858] sm:$0xff] }
  0x2f   :  { %1611 = vst [vmem:[%s4043_s1 + $0x3a4] sm:$0xf] %v433_v48  ;;  %v1626_v62 = vld [vmem:[%s4042_s0 + $0x450] sm:$0xff]  ;;  %1613 = vst [vmem:[%s4043_s1 + $0x124] sm:$0xf] %v438_v52  ;;  %v468_v0 = vpack.c.bf16 %v2015_v3, %v1624_v61  ;;  %v1638_v11 = vld [vmem:[%s4042_s0 + $0x558] sm:$0xff]  ;;  %v498_v13 = vpack.c.bf16 %v2015_v3, %v1636_v10 }
  0x30   :  { %v1628_v63 = vld [vmem:[%s4042_s0 + $0x150] sm:$0xff]  ;;  %1615 = vst [vmem:[%s4043_s1 + $0x2a4] sm:$0xf] %v443_v53  ;;  %1617 = vst [vmem:[%s4043_s1 + $0x424] sm:$0xf] %v448_v54  ;;  %v473_v1 = vpack.c.bf16 %v2015_v3, %v1626_v62  ;;  %v1640_v12 = vld [vmem:[%s4042_s0 + $0x258] sm:$0xff]  ;;  %v503_v14 = vpack.c.bf16 %v2015_v3, %v1638_v11 }
  0x31   :  { %v478_v2 = vpack.c.bf16 %v2015_v3, %v1628_v63  ;;  %v1630_v4 = vld [vmem:[%s4042_s0 + $0x650] sm:$0xff]  ;;  %1619 = vst [vmem:[%s4043_s1 + $0x28] sm:$0xf] %v453_v58  ;;  %1621 = vst [vmem:[%s4043_s1 + $0x1a8] sm:$0xf] %v458_v59  ;;  %v508_v15 = vpack.c.bf16 %v2015_v3, %v1640_v12  ;;  %v1642_v16 = vld [vmem:[%s4042_s0 + $0x758] sm:$0xff] }
  0x32   :  { %v1632_v5 = vld [vmem:[%s4042_s0 + $0x350] sm:$0xff]  ;;  %1623 = vst [vmem:[%s4043_s1 + $0x328] sm:$0xf] %v463_v60  ;;  %v483_v7 = vpack.c.bf16 %v2015_v3, %v1630_v4  ;;  %1625 = vst [vmem:[%s4043_s1 + $0xa8] sm:$0xf] %v468_v0  ;;  %v1644_v17 = vld [vmem:[%s4042_s0 + $0x458] sm:$0xff]  ;;  %v513_v19 = vpack.c.bf16 %v2015_v3, %v1642_v16 }
  0x33   :  { %v1634_v6 = vld [vmem:[%s4042_s0 + $0x50] sm:$0xff]  ;;  %v488_v8 = vpack.c.bf16 %v2015_v3, %v1632_v5  ;;  %1627 = vst [vmem:[%s4043_s1 + $0x228] sm:$0xf] %v473_v1  ;;  %1629 = vst [vmem:[%s4043_s1 + $0x3a8] sm:$0xf] %v478_v2  ;;  %v1646_v18 = vld [vmem:[%s4042_s0 + $0x158] sm:$0xff]  ;;  %v518_v20 = vpack.c.bf16 %v2015_v3, %v1644_v17 }
  0x34   :  { %v493_v9 = vpack.c.bf16 %v2015_v3, %v1634_v6  ;;  %1631 = vst [vmem:[%s4043_s1 + $0x128] sm:$0xf] %v483_v7  ;;  %v523_v21 = vpack.c.bf16 %v2015_v3, %v1646_v18  ;;  %v1648_v22 = vld [vmem:[%s4042_s0 + $0x658] sm:$0xff]  ;;  %1637 = vst [vmem:[%s4043_s1 + $0x2c] sm:$0xf] %v498_v13  ;;  %v1654_v28 = vld [vmem:[%s4042_s0 + $0x860] sm:$0xff] }
  0x35   :  { %1633 = vst [vmem:[%s4043_s1 + $0x2a8] sm:$0xf] %v488_v8  ;;  %v1650_v23 = vld [vmem:[%s4042_s0 + $0x358] sm:$0xff]  ;;  %1639 = vst [vmem:[%s4043_s1 + $0x1ac] sm:$0xf] %v503_v14  ;;  %v528_v25 = vpack.c.bf16 %v2015_v3, %v1648_v22  ;;  %v1656_v29 = vld [vmem:[%s4042_s0 + $0x560] sm:$0xff]  ;;  %v543_v31 = vpack.c.bf16 %v2015_v3, %v1654_v28 }
  0x36   :  { %1635 = vst [vmem:[%s4043_s1 + $0x428] sm:$0xf] %v493_v9  ;;  %v1652_v24 = vld [vmem:[%s4042_s0 + $0x58] sm:$0xff]  ;;  %1641 = vst [vmem:[%s4043_s1 + $0x32c] sm:$0xf] %v508_v15  ;;  %v533_v26 = vpack.c.bf16 %v2015_v3, %v1650_v23  ;;  %v1658_v30 = vld [vmem:[%s4042_s0 + $0x260] sm:$0xff]  ;;  %v548_v32 = vpack.c.bf16 %v2015_v3, %v1656_v29 }
  0x37   :  { %v538_v27 = vpack.c.bf16 %v2015_v3, %v1652_v24  ;;  %1643 = vst [vmem:[%s4043_s1 + $0xac] sm:$0xf] %v513_v19  ;;  %1645 = vst [vmem:[%s4043_s1 + $0x22c] sm:$0xf] %v518_v20  ;;  %v553_v33 = vpack.c.bf16 %v2015_v3, %v1658_v30  ;;  %v1660_v34 = vld [vmem:[%s4042_s0 + $0x760] sm:$0xff]  ;;  %v1672_v46 = vld [vmem:[%s4042_s0 + $0x868] sm:$0xff] }
  0x38   :  { %1647 = vst [vmem:[%s4043_s1 + $0x3ac] sm:$0xf] %v523_v21  ;;  %v1662_v35 = vld [vmem:[%s4042_s0 + $0x460] sm:$0xff]  ;;  %1649 = vst [vmem:[%s4043_s1 + $0x12c] sm:$0xf] %v528_v25  ;;  %v558_v37 = vpack.c.bf16 %v2015_v3, %v1660_v34  ;;  %v1674_v47 = vld [vmem:[%s4042_s0 + $0x568] sm:$0xff]  ;;  %v588_v49 = vpack.c.bf16 %v2015_v3, %v1672_v46 }
  0x39   :  { %v1664_v36 = vld [vmem:[%s4042_s0 + $0x160] sm:$0xff]  ;;  %1651 = vst [vmem:[%s4043_s1 + $0x2ac] sm:$0xf] %v533_v26  ;;  %1653 = vst [vmem:[%s4043_s1 + $0x42c] sm:$0xf] %v538_v27  ;;  %v563_v38 = vpack.c.bf16 %v2015_v3, %v1662_v35  ;;  %v1676_v48 = vld [vmem:[%s4042_s0 + $0x268] sm:$0xff]  ;;  %v593_v50 = vpack.c.bf16 %v2015_v3, %v1674_v47 }
  0x3a   :  { %v568_v39 = vpack.c.bf16 %v2015_v3, %v1664_v36  ;;  %v1666_v40 = vld [vmem:[%s4042_s0 + $0x660] sm:$0xff]  ;;  %1655 = vst [vmem:[%s4043_s1 + $0x30] sm:$0xf] %v543_v31  ;;  %1657 = vst [vmem:[%s4043_s1 + $0x1b0] sm:$0xf] %v548_v32  ;;  %v598_v51 = vpack.c.bf16 %v2015_v3, %v1676_v48  ;;  %v1678_v52 = vld [vmem:[%s4042_s0 + $0x768] sm:$0xff] }
  0x3b   :  { %v1668_v41 = vld [vmem:[%s4042_s0 + $0x360] sm:$0xff]  ;;  %1659 = vst [vmem:[%s4043_s1 + $0x330] sm:$0xf] %v553_v33  ;;  %v573_v43 = vpack.c.bf16 %v2015_v3, %v1666_v40  ;;  %1661 = vst [vmem:[%s4043_s1 + $0xb0] sm:$0xf] %v558_v37  ;;  %v1680_v53 = vld [vmem:[%s4042_s0 + $0x468] sm:$0xff]  ;;  %v603_v55 = vpack.c.bf16 %v2015_v3, %v1678_v52 }
  0x3c   :  { %v1670_v42 = vld [vmem:[%s4042_s0 + $0x60] sm:$0xff]  ;;  %v578_v44 = vpack.c.bf16 %v2015_v3, %v1668_v41  ;;  %1663 = vst [vmem:[%s4043_s1 + $0x230] sm:$0xf] %v563_v38  ;;  %1665 = vst [vmem:[%s4043_s1 + $0x3b0] sm:$0xf] %v568_v39  ;;  %v1682_v54 = vld [vmem:[%s4042_s0 + $0x168] sm:$0xff]  ;;  %v608_v56 = vpack.c.bf16 %v2015_v3, %v1680_v53 }
  0x3d   :  { %v583_v45 = vpack.c.bf16 %v2015_v3, %v1670_v42  ;;  %1667 = vst [vmem:[%s4043_s1 + $0x130] sm:$0xf] %v573_v43  ;;  %v613_v57 = vpack.c.bf16 %v2015_v3, %v1682_v54  ;;  %v1684_v58 = vld [vmem:[%s4042_s0 + $0x668] sm:$0xff]  ;;  %1673 = vst [vmem:[%s4043_s1 + $0x34] sm:$0xf] %v588_v49  ;;  %v1690_v0 = vld [vmem:[%s4042_s0 + $0x870] sm:$0xff] }
  0x3e   :  { %1669 = vst [vmem:[%s4043_s1 + $0x2b0] sm:$0xf] %v578_v44  ;;  %v1686_v59 = vld [vmem:[%s4042_s0 + $0x368] sm:$0xff]  ;;  %1675 = vst [vmem:[%s4043_s1 + $0x1b4] sm:$0xf] %v593_v50  ;;  %v618_v61 = vpack.c.bf16 %v2015_v3, %v1684_v58  ;;  %v1692_v1 = vld [vmem:[%s4042_s0 + $0x570] sm:$0xff]  ;;  %v633_v4 = vpack.c.bf16 %v2015_v3, %v1690_v0 }
  0x3f   :  { %1671 = vst [vmem:[%s4043_s1 + $0x430] sm:$0xf] %v583_v45  ;;  %v1688_v60 = vld [vmem:[%s4042_s0 + $0x68] sm:$0xff]  ;;  %1677 = vst [vmem:[%s4043_s1 + $0x334] sm:$0xf] %v598_v51  ;;  %v623_v62 = vpack.c.bf16 %v2015_v3, %v1686_v59  ;;  %v1694_v2 = vld [vmem:[%s4042_s0 + $0x270] sm:$0xff]  ;;  %v638_v5 = vpack.c.bf16 %v2015_v3, %v1692_v1 }
  0x40   :  { %v628_v63 = vpack.c.bf16 %v2015_v3, %v1688_v60  ;;  %1679 = vst [vmem:[%s4043_s1 + $0xb4] sm:$0xf] %v603_v55  ;;  %1681 = vst [vmem:[%s4043_s1 + $0x234] sm:$0xf] %v608_v56  ;;  %v643_v6 = vpack.c.bf16 %v2015_v3, %v1694_v2  ;;  %v1696_v7 = vld [vmem:[%s4042_s0 + $0x770] sm:$0xff]  ;;  %v1708_v19 = vld [vmem:[%s4042_s0 + $0x878] sm:$0xff] }
  0x41   :  { %1683 = vst [vmem:[%s4043_s1 + $0x3b4] sm:$0xf] %v613_v57  ;;  %v1698_v8 = vld [vmem:[%s4042_s0 + $0x470] sm:$0xff]  ;;  %1685 = vst [vmem:[%s4043_s1 + $0x134] sm:$0xf] %v618_v61  ;;  %v648_v10 = vpack.c.bf16 %v2015_v3, %v1696_v7  ;;  %v1710_v20 = vld [vmem:[%s4042_s0 + $0x578] sm:$0xff]  ;;  %v678_v22 = vpack.c.bf16 %v2015_v3, %v1708_v19 }
  0x42   :  { %v1700_v9 = vld [vmem:[%s4042_s0 + $0x170] sm:$0xff]  ;;  %1687 = vst [vmem:[%s4043_s1 + $0x2b4] sm:$0xf] %v623_v62  ;;  %1689 = vst [vmem:[%s4043_s1 + $0x434] sm:$0xf] %v628_v63  ;;  %v653_v11 = vpack.c.bf16 %v2015_v3, %v1698_v8  ;;  %v1712_v21 = vld [vmem:[%s4042_s0 + $0x278] sm:$0xff]  ;;  %v683_v23 = vpack.c.bf16 %v2015_v3, %v1710_v20 }
  0x43   :  { %v658_v12 = vpack.c.bf16 %v2015_v3, %v1700_v9  ;;  %v1702_v13 = vld [vmem:[%s4042_s0 + $0x670] sm:$0xff]  ;;  %1691 = vst [vmem:[%s4043_s1 + $0x38] sm:$0xf] %v633_v4  ;;  %1693 = vst [vmem:[%s4043_s1 + $0x1b8] sm:$0xf] %v638_v5  ;;  %v688_v24 = vpack.c.bf16 %v2015_v3, %v1712_v21  ;;  %v1714_v25 = vld [vmem:[%s4042_s0 + $0x778] sm:$0xff] }
  0x44   :  { %v1704_v14 = vld [vmem:[%s4042_s0 + $0x370] sm:$0xff]  ;;  %1695 = vst [vmem:[%s4043_s1 + $0x338] sm:$0xf] %v643_v6  ;;  %v663_v16 = vpack.c.bf16 %v2015_v3, %v1702_v13  ;;  %1697 = vst [vmem:[%s4043_s1 + $0xb8] sm:$0xf] %v648_v10  ;;  %v1716_v26 = vld [vmem:[%s4042_s0 + $0x478] sm:$0xff]  ;;  %v693_v28 = vpack.c.bf16 %v2015_v3, %v1714_v25 }
  0x45   :  { %v1706_v15 = vld [vmem:[%s4042_s0 + $0x70] sm:$0xff]  ;;  %v668_v17 = vpack.c.bf16 %v2015_v3, %v1704_v14  ;;  %1699 = vst [vmem:[%s4043_s1 + $0x238] sm:$0xf] %v653_v11  ;;  %1701 = vst [vmem:[%s4043_s1 + $0x3b8] sm:$0xf] %v658_v12  ;;  %v1718_v27 = vld [vmem:[%s4042_s0 + $0x178] sm:$0xff]  ;;  %v698_v29 = vpack.c.bf16 %v2015_v3, %v1716_v26 }
  0x46   :  { %v673_v18 = vpack.c.bf16 %v2015_v3, %v1706_v15  ;;  %1703 = vst [vmem:[%s4043_s1 + $0x138] sm:$0xf] %v663_v16  ;;  %v703_v30 = vpack.c.bf16 %v2015_v3, %v1718_v27  ;;  %v1720_v31 = vld [vmem:[%s4042_s0 + $0x678] sm:$0xff]  ;;  %1709 = vst [vmem:[%s4043_s1 + $0x3c] sm:$0xf] %v678_v22  ;;  %v1726_v37 = vld [vmem:[%s4042_s0 + $0x880] sm:$0xff] }
  0x47   :  { %1705 = vst [vmem:[%s4043_s1 + $0x2b8] sm:$0xf] %v668_v17  ;;  %v1722_v32 = vld [vmem:[%s4042_s0 + $0x378] sm:$0xff]  ;;  %1711 = vst [vmem:[%s4043_s1 + $0x1bc] sm:$0xf] %v683_v23  ;;  %v708_v34 = vpack.c.bf16 %v2015_v3, %v1720_v31  ;;  %v1728_v38 = vld [vmem:[%s4042_s0 + $0x580] sm:$0xff]  ;;  %v723_v40 = vpack.c.bf16 %v2015_v3, %v1726_v37 }
  0x48   :  { %1707 = vst [vmem:[%s4043_s1 + $0x438] sm:$0xf] %v673_v18  ;;  %v1724_v33 = vld [vmem:[%s4042_s0 + $0x78] sm:$0xff]  ;;  %1713 = vst [vmem:[%s4043_s1 + $0x33c] sm:$0xf] %v688_v24  ;;  %v713_v35 = vpack.c.bf16 %v2015_v3, %v1722_v32  ;;  %v1730_v39 = vld [vmem:[%s4042_s0 + $0x280] sm:$0xff]  ;;  %v728_v41 = vpack.c.bf16 %v2015_v3, %v1728_v38 }
  0x49   :  { %v718_v36 = vpack.c.bf16 %v2015_v3, %v1724_v33  ;;  %1715 = vst [vmem:[%s4043_s1 + $0xbc] sm:$0xf] %v693_v28  ;;  %1717 = vst [vmem:[%s4043_s1 + $0x23c] sm:$0xf] %v698_v29  ;;  %v733_v42 = vpack.c.bf16 %v2015_v3, %v1730_v39  ;;  %v1732_v43 = vld [vmem:[%s4042_s0 + $0x780] sm:$0xff]  ;;  %v1744_v55 = vld [vmem:[%s4042_s0 + $0x888] sm:$0xff] }
  0x4a   :  { %1719 = vst [vmem:[%s4043_s1 + $0x3bc] sm:$0xf] %v703_v30  ;;  %v1734_v44 = vld [vmem:[%s4042_s0 + $0x480] sm:$0xff]  ;;  %1721 = vst [vmem:[%s4043_s1 + $0x13c] sm:$0xf] %v708_v34  ;;  %v738_v46 = vpack.c.bf16 %v2015_v3, %v1732_v43  ;;  %v1746_v56 = vld [vmem:[%s4042_s0 + $0x588] sm:$0xff]  ;;  %v768_v58 = vpack.c.bf16 %v2015_v3, %v1744_v55 }
  0x4b   :  { %v1736_v45 = vld [vmem:[%s4042_s0 + $0x180] sm:$0xff]  ;;  %1723 = vst [vmem:[%s4043_s1 + $0x2bc] sm:$0xf] %v713_v35  ;;  %1725 = vst [vmem:[%s4043_s1 + $0x43c] sm:$0xf] %v718_v36  ;;  %v743_v47 = vpack.c.bf16 %v2015_v3, %v1734_v44  ;;  %v1748_v57 = vld [vmem:[%s4042_s0 + $0x288] sm:$0xff]  ;;  %v773_v59 = vpack.c.bf16 %v2015_v3, %v1746_v56 }
  0x4c   :  { %v748_v48 = vpack.c.bf16 %v2015_v3, %v1736_v45  ;;  %v1738_v49 = vld [vmem:[%s4042_s0 + $0x680] sm:$0xff]  ;;  %1727 = vst [vmem:[%s4043_s1 + $0x40] sm:$0xf] %v723_v40  ;;  %1729 = vst [vmem:[%s4043_s1 + $0x1c0] sm:$0xf] %v728_v41  ;;  %v778_v60 = vpack.c.bf16 %v2015_v3, %v1748_v57  ;;  %v1750_v61 = vld [vmem:[%s4042_s0 + $0x788] sm:$0xff] }
  0x4d   :  { %v1740_v50 = vld [vmem:[%s4042_s0 + $0x380] sm:$0xff]  ;;  %1731 = vst [vmem:[%s4043_s1 + $0x340] sm:$0xf] %v733_v42  ;;  %v753_v52 = vpack.c.bf16 %v2015_v3, %v1738_v49  ;;  %1733 = vst [vmem:[%s4043_s1 + $0xc0] sm:$0xf] %v738_v46  ;;  %v1752_v62 = vld [vmem:[%s4042_s0 + $0x488] sm:$0xff]  ;;  %v783_v0 = vpack.c.bf16 %v2015_v3, %v1750_v61 }
  0x4e   :  { %v1742_v51 = vld [vmem:[%s4042_s0 + $0x80] sm:$0xff]  ;;  %v758_v53 = vpack.c.bf16 %v2015_v3, %v1740_v50  ;;  %1735 = vst [vmem:[%s4043_s1 + $0x240] sm:$0xf] %v743_v47  ;;  %1737 = vst [vmem:[%s4043_s1 + $0x3c0] sm:$0xf] %v748_v48  ;;  %v1754_v63 = vld [vmem:[%s4042_s0 + $0x188] sm:$0xff]  ;;  %v788_v1 = vpack.c.bf16 %v2015_v3, %v1752_v62 }
  0x4f   :  { %v763_v54 = vpack.c.bf16 %v2015_v3, %v1742_v51  ;;  %1739 = vst [vmem:[%s4043_s1 + $0x140] sm:$0xf] %v753_v52  ;;  %v793_v2 = vpack.c.bf16 %v2015_v3, %v1754_v63  ;;  %v1756_v4 = vld [vmem:[%s4042_s0 + $0x688] sm:$0xff]  ;;  %1745 = vst [vmem:[%s4043_s1 + $0x44] sm:$0xf] %v768_v58  ;;  %v1762_v10 = vld [vmem:[%s4042_s0 + $0x890] sm:$0xff] }
  0x50   :  { %1741 = vst [vmem:[%s4043_s1 + $0x2c0] sm:$0xf] %v758_v53  ;;  %v1758_v5 = vld [vmem:[%s4042_s0 + $0x388] sm:$0xff]  ;;  %1747 = vst [vmem:[%s4043_s1 + $0x1c4] sm:$0xf] %v773_v59  ;;  %v798_v7 = vpack.c.bf16 %v2015_v3, %v1756_v4  ;;  %v1764_v11 = vld [vmem:[%s4042_s0 + $0x590] sm:$0xff]  ;;  %v813_v13 = vpack.c.bf16 %v2015_v3, %v1762_v10 }
  0x51   :  { %1743 = vst [vmem:[%s4043_s1 + $0x440] sm:$0xf] %v763_v54  ;;  %v1760_v6 = vld [vmem:[%s4042_s0 + $0x88] sm:$0xff]  ;;  %1749 = vst [vmem:[%s4043_s1 + $0x344] sm:$0xf] %v778_v60  ;;  %v803_v8 = vpack.c.bf16 %v2015_v3, %v1758_v5  ;;  %v1766_v12 = vld [vmem:[%s4042_s0 + $0x290] sm:$0xff]  ;;  %v818_v14 = vpack.c.bf16 %v2015_v3, %v1764_v11 }
  0x52   :  { %v808_v9 = vpack.c.bf16 %v2015_v3, %v1760_v6  ;;  %1751 = vst [vmem:[%s4043_s1 + $0xc4] sm:$0xf] %v783_v0  ;;  %1753 = vst [vmem:[%s4043_s1 + $0x244] sm:$0xf] %v788_v1  ;;  %v823_v15 = vpack.c.bf16 %v2015_v3, %v1766_v12  ;;  %v1768_v16 = vld [vmem:[%s4042_s0 + $0x790] sm:$0xff]  ;;  %v1780_v28 = vld [vmem:[%s4042_s0 + $0x898] sm:$0xff] }
  0x53   :  { %1755 = vst [vmem:[%s4043_s1 + $0x3c4] sm:$0xf] %v793_v2  ;;  %v1770_v17 = vld [vmem:[%s4042_s0 + $0x490] sm:$0xff]  ;;  %1757 = vst [vmem:[%s4043_s1 + $0x144] sm:$0xf] %v798_v7  ;;  %v828_v19 = vpack.c.bf16 %v2015_v3, %v1768_v16  ;;  %v1782_v29 = vld [vmem:[%s4042_s0 + $0x598] sm:$0xff]  ;;  %v858_v31 = vpack.c.bf16 %v2015_v3, %v1780_v28 }
  0x54   :  { %v1772_v18 = vld [vmem:[%s4042_s0 + $0x190] sm:$0xff]  ;;  %1759 = vst [vmem:[%s4043_s1 + $0x2c4] sm:$0xf] %v803_v8  ;;  %1761 = vst [vmem:[%s4043_s1 + $0x444] sm:$0xf] %v808_v9  ;;  %v833_v20 = vpack.c.bf16 %v2015_v3, %v1770_v17  ;;  %v1784_v30 = vld [vmem:[%s4042_s0 + $0x298] sm:$0xff]  ;;  %v863_v32 = vpack.c.bf16 %v2015_v3, %v1782_v29 }
  0x55   :  { %v838_v21 = vpack.c.bf16 %v2015_v3, %v1772_v18  ;;  %v1774_v22 = vld [vmem:[%s4042_s0 + $0x690] sm:$0xff]  ;;  %1763 = vst [vmem:[%s4043_s1 + $0x48] sm:$0xf] %v813_v13  ;;  %1765 = vst [vmem:[%s4043_s1 + $0x1c8] sm:$0xf] %v818_v14  ;;  %v868_v33 = vpack.c.bf16 %v2015_v3, %v1784_v30  ;;  %v1786_v34 = vld [vmem:[%s4042_s0 + $0x798] sm:$0xff] }
  0x56   :  { %v1776_v23 = vld [vmem:[%s4042_s0 + $0x390] sm:$0xff]  ;;  %1767 = vst [vmem:[%s4043_s1 + $0x348] sm:$0xf] %v823_v15  ;;  %v843_v25 = vpack.c.bf16 %v2015_v3, %v1774_v22  ;;  %1769 = vst [vmem:[%s4043_s1 + $0xc8] sm:$0xf] %v828_v19  ;;  %v1788_v35 = vld [vmem:[%s4042_s0 + $0x498] sm:$0xff]  ;;  %v873_v37 = vpack.c.bf16 %v2015_v3, %v1786_v34 }
  0x57   :  { %v1778_v24 = vld [vmem:[%s4042_s0 + $0x90] sm:$0xff]  ;;  %v848_v26 = vpack.c.bf16 %v2015_v3, %v1776_v23  ;;  %1771 = vst [vmem:[%s4043_s1 + $0x248] sm:$0xf] %v833_v20  ;;  %1773 = vst [vmem:[%s4043_s1 + $0x3c8] sm:$0xf] %v838_v21  ;;  %v1790_v36 = vld [vmem:[%s4042_s0 + $0x198] sm:$0xff]  ;;  %v878_v38 = vpack.c.bf16 %v2015_v3, %v1788_v35 }
  0x58   :  { %v853_v27 = vpack.c.bf16 %v2015_v3, %v1778_v24  ;;  %1775 = vst [vmem:[%s4043_s1 + $0x148] sm:$0xf] %v843_v25  ;;  %v883_v39 = vpack.c.bf16 %v2015_v3, %v1790_v36  ;;  %v1792_v40 = vld [vmem:[%s4042_s0 + $0x698] sm:$0xff]  ;;  %1781 = vst [vmem:[%s4043_s1 + $0x4c] sm:$0xf] %v858_v31  ;;  %v1798_v46 = vld [vmem:[%s4042_s0 + $0x8a0] sm:$0xff] }
  0x59   :  { %1777 = vst [vmem:[%s4043_s1 + $0x2c8] sm:$0xf] %v848_v26  ;;  %v1794_v41 = vld [vmem:[%s4042_s0 + $0x398] sm:$0xff]  ;;  %1783 = vst [vmem:[%s4043_s1 + $0x1cc] sm:$0xf] %v863_v32  ;;  %v888_v43 = vpack.c.bf16 %v2015_v3, %v1792_v40  ;;  %v1800_v47 = vld [vmem:[%s4042_s0 + $0x5a0] sm:$0xff]  ;;  %v903_v49 = vpack.c.bf16 %v2015_v3, %v1798_v46 }
  0x5a   :  { %1779 = vst [vmem:[%s4043_s1 + $0x448] sm:$0xf] %v853_v27  ;;  %v1796_v42 = vld [vmem:[%s4042_s0 + $0x98] sm:$0xff]  ;;  %1785 = vst [vmem:[%s4043_s1 + $0x34c] sm:$0xf] %v868_v33  ;;  %v893_v44 = vpack.c.bf16 %v2015_v3, %v1794_v41  ;;  %v1802_v48 = vld [vmem:[%s4042_s0 + $0x2a0] sm:$0xff]  ;;  %v908_v50 = vpack.c.bf16 %v2015_v3, %v1800_v47 }
  0x5b   :  { %v898_v45 = vpack.c.bf16 %v2015_v3, %v1796_v42  ;;  %1787 = vst [vmem:[%s4043_s1 + $0xcc] sm:$0xf] %v873_v37  ;;  %1789 = vst [vmem:[%s4043_s1 + $0x24c] sm:$0xf] %v878_v38  ;;  %v913_v51 = vpack.c.bf16 %v2015_v3, %v1802_v48  ;;  %v1804_v52 = vld [vmem:[%s4042_s0 + $0x7a0] sm:$0xff]  ;;  %v1816_v0 = vld [vmem:[%s4042_s0 + $0x8a8] sm:$0xff] }
  0x5c   :  { %1791 = vst [vmem:[%s4043_s1 + $0x3cc] sm:$0xf] %v883_v39  ;;  %v1806_v53 = vld [vmem:[%s4042_s0 + $0x4a0] sm:$0xff]  ;;  %1793 = vst [vmem:[%s4043_s1 + $0x14c] sm:$0xf] %v888_v43  ;;  %v918_v55 = vpack.c.bf16 %v2015_v3, %v1804_v52  ;;  %v1818_v1 = vld [vmem:[%s4042_s0 + $0x5a8] sm:$0xff]  ;;  %v948_v4 = vpack.c.bf16 %v2015_v3, %v1816_v0 }
  0x5d   :  { %v1808_v54 = vld [vmem:[%s4042_s0 + $0x1a0] sm:$0xff]  ;;  %1795 = vst [vmem:[%s4043_s1 + $0x2cc] sm:$0xf] %v893_v44  ;;  %1797 = vst [vmem:[%s4043_s1 + $0x44c] sm:$0xf] %v898_v45  ;;  %v923_v56 = vpack.c.bf16 %v2015_v3, %v1806_v53  ;;  %v1820_v2 = vld [vmem:[%s4042_s0 + $0x2a8] sm:$0xff]  ;;  %v953_v5 = vpack.c.bf16 %v2015_v3, %v1818_v1 }
  0x5e   :  { %v928_v57 = vpack.c.bf16 %v2015_v3, %v1808_v54  ;;  %v1810_v58 = vld [vmem:[%s4042_s0 + $0x6a0] sm:$0xff]  ;;  %1799 = vst [vmem:[%s4043_s1 + $0x50] sm:$0xf] %v903_v49  ;;  %1801 = vst [vmem:[%s4043_s1 + $0x1d0] sm:$0xf] %v908_v50  ;;  %v958_v6 = vpack.c.bf16 %v2015_v3, %v1820_v2  ;;  %v1822_v7 = vld [vmem:[%s4042_s0 + $0x7a8] sm:$0xff] }
  0x5f   :  { %v1812_v59 = vld [vmem:[%s4042_s0 + $0x3a0] sm:$0xff]  ;;  %1803 = vst [vmem:[%s4043_s1 + $0x350] sm:$0xf] %v913_v51  ;;  %v933_v61 = vpack.c.bf16 %v2015_v3, %v1810_v58  ;;  %1805 = vst [vmem:[%s4043_s1 + $0xd0] sm:$0xf] %v918_v55  ;;  %v1824_v8 = vld [vmem:[%s4042_s0 + $0x4a8] sm:$0xff]  ;;  %v963_v10 = vpack.c.bf16 %v2015_v3, %v1822_v7 }
  0x60   :  { %v1814_v60 = vld [vmem:[%s4042_s0 + $0xa0] sm:$0xff]  ;;  %v938_v62 = vpack.c.bf16 %v2015_v3, %v1812_v59  ;;  %1807 = vst [vmem:[%s4043_s1 + $0x250] sm:$0xf] %v923_v56  ;;  %1809 = vst [vmem:[%s4043_s1 + $0x3d0] sm:$0xf] %v928_v57  ;;  %v1826_v9 = vld [vmem:[%s4042_s0 + $0x1a8] sm:$0xff]  ;;  %v968_v11 = vpack.c.bf16 %v2015_v3, %v1824_v8 }
  0x61   :  { %v943_v63 = vpack.c.bf16 %v2015_v3, %v1814_v60  ;;  %1811 = vst [vmem:[%s4043_s1 + $0x150] sm:$0xf] %v933_v61  ;;  %v973_v12 = vpack.c.bf16 %v2015_v3, %v1826_v9  ;;  %v1828_v13 = vld [vmem:[%s4042_s0 + $0x6a8] sm:$0xff]  ;;  %1817 = vst [vmem:[%s4043_s1 + $0x54] sm:$0xf] %v948_v4  ;;  %v1834_v19 = vld [vmem:[%s4042_s0 + $0x8b0] sm:$0xff] }
  0x62   :  { %1813 = vst [vmem:[%s4043_s1 + $0x2d0] sm:$0xf] %v938_v62  ;;  %v1830_v14 = vld [vmem:[%s4042_s0 + $0x3a8] sm:$0xff]  ;;  %1819 = vst [vmem:[%s4043_s1 + $0x1d4] sm:$0xf] %v953_v5  ;;  %v978_v16 = vpack.c.bf16 %v2015_v3, %v1828_v13  ;;  %v1836_v20 = vld [vmem:[%s4042_s0 + $0x5b0] sm:$0xff]  ;;  %v993_v22 = vpack.c.bf16 %v2015_v3, %v1834_v19 }
  0x63   :  { %1815 = vst [vmem:[%s4043_s1 + $0x450] sm:$0xf] %v943_v63  ;;  %v1832_v15 = vld [vmem:[%s4042_s0 + $0xa8] sm:$0xff]  ;;  %1821 = vst [vmem:[%s4043_s1 + $0x354] sm:$0xf] %v958_v6  ;;  %v983_v17 = vpack.c.bf16 %v2015_v3, %v1830_v14  ;;  %v1838_v21 = vld [vmem:[%s4042_s0 + $0x2b0] sm:$0xff]  ;;  %v998_v23 = vpack.c.bf16 %v2015_v3, %v1836_v20 }
  0x64   :  { %v988_v18 = vpack.c.bf16 %v2015_v3, %v1832_v15  ;;  %1823 = vst [vmem:[%s4043_s1 + $0xd4] sm:$0xf] %v963_v10  ;;  %1825 = vst [vmem:[%s4043_s1 + $0x254] sm:$0xf] %v968_v11  ;;  %v1003_v24 = vpack.c.bf16 %v2015_v3, %v1838_v21  ;;  %v1840_v25 = vld [vmem:[%s4042_s0 + $0x7b0] sm:$0xff]  ;;  %v1852_v37 = vld [vmem:[%s4042_s0 + $0x8b8] sm:$0xff] }
  0x65   :  { %1827 = vst [vmem:[%s4043_s1 + $0x3d4] sm:$0xf] %v973_v12  ;;  %v1842_v26 = vld [vmem:[%s4042_s0 + $0x4b0] sm:$0xff]  ;;  %1829 = vst [vmem:[%s4043_s1 + $0x154] sm:$0xf] %v978_v16  ;;  %v1008_v28 = vpack.c.bf16 %v2015_v3, %v1840_v25  ;;  %v1854_v38 = vld [vmem:[%s4042_s0 + $0x5b8] sm:$0xff]  ;;  %v1038_v40 = vpack.c.bf16 %v2015_v3, %v1852_v37 }
  0x66   :  { %v1844_v27 = vld [vmem:[%s4042_s0 + $0x1b0] sm:$0xff]  ;;  %1831 = vst [vmem:[%s4043_s1 + $0x2d4] sm:$0xf] %v983_v17  ;;  %1833 = vst [vmem:[%s4043_s1 + $0x454] sm:$0xf] %v988_v18  ;;  %v1013_v29 = vpack.c.bf16 %v2015_v3, %v1842_v26  ;;  %v1856_v39 = vld [vmem:[%s4042_s0 + $0x2b8] sm:$0xff]  ;;  %v1043_v41 = vpack.c.bf16 %v2015_v3, %v1854_v38 }
  0x67   :  { %v1018_v30 = vpack.c.bf16 %v2015_v3, %v1844_v27  ;;  %v1846_v31 = vld [vmem:[%s4042_s0 + $0x6b0] sm:$0xff]  ;;  %1835 = vst [vmem:[%s4043_s1 + $0x58] sm:$0xf] %v993_v22  ;;  %1837 = vst [vmem:[%s4043_s1 + $0x1d8] sm:$0xf] %v998_v23  ;;  %v1048_v42 = vpack.c.bf16 %v2015_v3, %v1856_v39  ;;  %v1858_v43 = vld [vmem:[%s4042_s0 + $0x7b8] sm:$0xff] }
  0x68   :  { %v1848_v32 = vld [vmem:[%s4042_s0 + $0x3b0] sm:$0xff]  ;;  %1839 = vst [vmem:[%s4043_s1 + $0x358] sm:$0xf] %v1003_v24  ;;  %v1023_v34 = vpack.c.bf16 %v2015_v3, %v1846_v31  ;;  %1841 = vst [vmem:[%s4043_s1 + $0xd8] sm:$0xf] %v1008_v28  ;;  %v1860_v44 = vld [vmem:[%s4042_s0 + $0x4b8] sm:$0xff]  ;;  %v1053_v46 = vpack.c.bf16 %v2015_v3, %v1858_v43 }
  0x69   :  { %v1850_v33 = vld [vmem:[%s4042_s0 + $0xb0] sm:$0xff]  ;;  %v1028_v35 = vpack.c.bf16 %v2015_v3, %v1848_v32  ;;  %1843 = vst [vmem:[%s4043_s1 + $0x258] sm:$0xf] %v1013_v29  ;;  %1845 = vst [vmem:[%s4043_s1 + $0x3d8] sm:$0xf] %v1018_v30  ;;  %v1862_v45 = vld [vmem:[%s4042_s0 + $0x1b8] sm:$0xff]  ;;  %v1058_v47 = vpack.c.bf16 %v2015_v3, %v1860_v44 }
  0x6a   :  { %v1033_v36 = vpack.c.bf16 %v2015_v3, %v1850_v33  ;;  %1847 = vst [vmem:[%s4043_s1 + $0x158] sm:$0xf] %v1023_v34  ;;  %v1063_v48 = vpack.c.bf16 %v2015_v3, %v1862_v45  ;;  %v1864_v49 = vld [vmem:[%s4042_s0 + $0x6b8] sm:$0xff]  ;;  %1853 = vst [vmem:[%s4043_s1 + $0x5c] sm:$0xf] %v1038_v40  ;;  %v1870_v55 = vld [vmem:[%s4042_s0 + $0x8c0] sm:$0xff] }
  0x6b   :  { %1849 = vst [vmem:[%s4043_s1 + $0x2d8] sm:$0xf] %v1028_v35  ;;  %v1866_v50 = vld [vmem:[%s4042_s0 + $0x3b8] sm:$0xff]  ;;  %1855 = vst [vmem:[%s4043_s1 + $0x1dc] sm:$0xf] %v1043_v41  ;;  %v1068_v52 = vpack.c.bf16 %v2015_v3, %v1864_v49  ;;  %v1872_v56 = vld [vmem:[%s4042_s0 + $0x5c0] sm:$0xff]  ;;  %v1083_v58 = vpack.c.bf16 %v2015_v3, %v1870_v55 }
  0x6c   :  { %1851 = vst [vmem:[%s4043_s1 + $0x458] sm:$0xf] %v1033_v36  ;;  %v1868_v51 = vld [vmem:[%s4042_s0 + $0xb8] sm:$0xff]  ;;  %1857 = vst [vmem:[%s4043_s1 + $0x35c] sm:$0xf] %v1048_v42  ;;  %v1073_v53 = vpack.c.bf16 %v2015_v3, %v1866_v50  ;;  %v1874_v57 = vld [vmem:[%s4042_s0 + $0x2c0] sm:$0xff]  ;;  %v1088_v59 = vpack.c.bf16 %v2015_v3, %v1872_v56 }
  0x6d   :  { %v1078_v54 = vpack.c.bf16 %v2015_v3, %v1868_v51  ;;  %1859 = vst [vmem:[%s4043_s1 + $0xdc] sm:$0xf] %v1053_v46  ;;  %1861 = vst [vmem:[%s4043_s1 + $0x25c] sm:$0xf] %v1058_v47  ;;  %v1093_v60 = vpack.c.bf16 %v2015_v3, %v1874_v57  ;;  %v1876_v61 = vld [vmem:[%s4042_s0 + $0x7c0] sm:$0xff]  ;;  %v1888_v10 = vld [vmem:[%s4042_s0 + $0x8c8] sm:$0xff] }
  0x6e   :  { %1863 = vst [vmem:[%s4043_s1 + $0x3dc] sm:$0xf] %v1063_v48  ;;  %v1878_v62 = vld [vmem:[%s4042_s0 + $0x4c0] sm:$0xff]  ;;  %1865 = vst [vmem:[%s4043_s1 + $0x15c] sm:$0xf] %v1068_v52  ;;  %v1098_v0 = vpack.c.bf16 %v2015_v3, %v1876_v61  ;;  %v1890_v11 = vld [vmem:[%s4042_s0 + $0x5c8] sm:$0xff]  ;;  %v1128_v13 = vpack.c.bf16 %v2015_v3, %v1888_v10 }
  0x6f   :  { %v1880_v63 = vld [vmem:[%s4042_s0 + $0x1c0] sm:$0xff]  ;;  %1867 = vst [vmem:[%s4043_s1 + $0x2dc] sm:$0xf] %v1073_v53  ;;  %1869 = vst [vmem:[%s4043_s1 + $0x45c] sm:$0xf] %v1078_v54  ;;  %v1103_v1 = vpack.c.bf16 %v2015_v3, %v1878_v62  ;;  %v1892_v12 = vld [vmem:[%s4042_s0 + $0x2c8] sm:$0xff]  ;;  %v1133_v14 = vpack.c.bf16 %v2015_v3, %v1890_v11 }
  0x70   :  { %v1108_v2 = vpack.c.bf16 %v2015_v3, %v1880_v63  ;;  %v1882_v4 = vld [vmem:[%s4042_s0 + $0x6c0] sm:$0xff]  ;;  %1871 = vst [vmem:[%s4043_s1 + $0x60] sm:$0xf] %v1083_v58  ;;  %1873 = vst [vmem:[%s4043_s1 + $0x1e0] sm:$0xf] %v1088_v59  ;;  %v1138_v15 = vpack.c.bf16 %v2015_v3, %v1892_v12  ;;  %v1894_v16 = vld [vmem:[%s4042_s0 + $0x7c8] sm:$0xff] }
  0x71   :  { %v1884_v5 = vld [vmem:[%s4042_s0 + $0x3c0] sm:$0xff]  ;;  %1875 = vst [vmem:[%s4043_s1 + $0x360] sm:$0xf] %v1093_v60  ;;  %v1113_v7 = vpack.c.bf16 %v2015_v3, %v1882_v4  ;;  %1877 = vst [vmem:[%s4043_s1 + $0xe0] sm:$0xf] %v1098_v0  ;;  %v1896_v17 = vld [vmem:[%s4042_s0 + $0x4c8] sm:$0xff]  ;;  %v1143_v19 = vpack.c.bf16 %v2015_v3, %v1894_v16 }
  0x72   :  { %v1886_v6 = vld [vmem:[%s4042_s0 + $0xc0] sm:$0xff]  ;;  %v1118_v8 = vpack.c.bf16 %v2015_v3, %v1884_v5  ;;  %1879 = vst [vmem:[%s4043_s1 + $0x260] sm:$0xf] %v1103_v1  ;;  %1881 = vst [vmem:[%s4043_s1 + $0x3e0] sm:$0xf] %v1108_v2  ;;  %v1898_v18 = vld [vmem:[%s4042_s0 + $0x1c8] sm:$0xff]  ;;  %v1148_v20 = vpack.c.bf16 %v2015_v3, %v1896_v17 }
  0x73   :  { %v1123_v9 = vpack.c.bf16 %v2015_v3, %v1886_v6  ;;  %1883 = vst [vmem:[%s4043_s1 + $0x160] sm:$0xf] %v1113_v7  ;;  %v1153_v21 = vpack.c.bf16 %v2015_v3, %v1898_v18  ;;  %v1900_v22 = vld [vmem:[%s4042_s0 + $0x6c8] sm:$0xff]  ;;  %1889 = vst [vmem:[%s4043_s1 + $0x64] sm:$0xf] %v1128_v13  ;;  %v1906_v28 = vld [vmem:[%s4042_s0 + $0x8d0] sm:$0xff] }
  0x74   :  { %1885 = vst [vmem:[%s4043_s1 + $0x2e0] sm:$0xf] %v1118_v8  ;;  %v1902_v23 = vld [vmem:[%s4042_s0 + $0x3c8] sm:$0xff]  ;;  %1891 = vst [vmem:[%s4043_s1 + $0x1e4] sm:$0xf] %v1133_v14  ;;  %v1158_v25 = vpack.c.bf16 %v2015_v3, %v1900_v22  ;;  %v1908_v29 = vld [vmem:[%s4042_s0 + $0x5d0] sm:$0xff]  ;;  %v1173_v31 = vpack.c.bf16 %v2015_v3, %v1906_v28 }
  0x75   :  { %1887 = vst [vmem:[%s4043_s1 + $0x460] sm:$0xf] %v1123_v9  ;;  %v1904_v24 = vld [vmem:[%s4042_s0 + $0xc8] sm:$0xff]  ;;  %1893 = vst [vmem:[%s4043_s1 + $0x364] sm:$0xf] %v1138_v15  ;;  %v1163_v26 = vpack.c.bf16 %v2015_v3, %v1902_v23  ;;  %v1910_v30 = vld [vmem:[%s4042_s0 + $0x2d0] sm:$0xff]  ;;  %v1178_v32 = vpack.c.bf16 %v2015_v3, %v1908_v29 }
  0x76   :  { %v1168_v27 = vpack.c.bf16 %v2015_v3, %v1904_v24  ;;  %1895 = vst [vmem:[%s4043_s1 + $0xe4] sm:$0xf] %v1143_v19  ;;  %1897 = vst [vmem:[%s4043_s1 + $0x264] sm:$0xf] %v1148_v20  ;;  %v1183_v33 = vpack.c.bf16 %v2015_v3, %v1910_v30  ;;  %v1912_v34 = vld [vmem:[%s4042_s0 + $0x7d0] sm:$0xff]  ;;  %v1924_v46 = vld [vmem:[%s4042_s0 + $0x8d8] sm:$0xff] }
  0x77   :  { %1899 = vst [vmem:[%s4043_s1 + $0x3e4] sm:$0xf] %v1153_v21  ;;  %v1914_v35 = vld [vmem:[%s4042_s0 + $0x4d0] sm:$0xff]  ;;  %1901 = vst [vmem:[%s4043_s1 + $0x164] sm:$0xf] %v1158_v25  ;;  %v1188_v37 = vpack.c.bf16 %v2015_v3, %v1912_v34  ;;  %v1926_v47 = vld [vmem:[%s4042_s0 + $0x5d8] sm:$0xff]  ;;  %v1218_v49 = vpack.c.bf16 %v2015_v3, %v1924_v46 }
  0x78   :  { %v1916_v36 = vld [vmem:[%s4042_s0 + $0x1d0] sm:$0xff]  ;;  %1903 = vst [vmem:[%s4043_s1 + $0x2e4] sm:$0xf] %v1163_v26  ;;  %1905 = vst [vmem:[%s4043_s1 + $0x464] sm:$0xf] %v1168_v27  ;;  %v1193_v38 = vpack.c.bf16 %v2015_v3, %v1914_v35  ;;  %v1928_v48 = vld [vmem:[%s4042_s0 + $0x2d8] sm:$0xff]  ;;  %v1223_v50 = vpack.c.bf16 %v2015_v3, %v1926_v47 }
  0x79   :  { %v1198_v39 = vpack.c.bf16 %v2015_v3, %v1916_v36  ;;  %v1918_v40 = vld [vmem:[%s4042_s0 + $0x6d0] sm:$0xff]  ;;  %1907 = vst [vmem:[%s4043_s1 + $0x68] sm:$0xf] %v1173_v31  ;;  %1909 = vst [vmem:[%s4043_s1 + $0x1e8] sm:$0xf] %v1178_v32  ;;  %v1228_v51 = vpack.c.bf16 %v2015_v3, %v1928_v48  ;;  %v1930_v52 = vld [vmem:[%s4042_s0 + $0x7d8] sm:$0xff] }
  0x7a   :  { %v1920_v41 = vld [vmem:[%s4042_s0 + $0x3d0] sm:$0xff]  ;;  %1911 = vst [vmem:[%s4043_s1 + $0x368] sm:$0xf] %v1183_v33  ;;  %v1203_v43 = vpack.c.bf16 %v2015_v3, %v1918_v40  ;;  %1913 = vst [vmem:[%s4043_s1 + $0xe8] sm:$0xf] %v1188_v37  ;;  %v1932_v53 = vld [vmem:[%s4042_s0 + $0x4d8] sm:$0xff]  ;;  %v1233_v55 = vpack.c.bf16 %v2015_v3, %v1930_v52 }
  0x7b   :  { %v1922_v42 = vld [vmem:[%s4042_s0 + $0xd0] sm:$0xff]  ;;  %v1208_v44 = vpack.c.bf16 %v2015_v3, %v1920_v41  ;;  %1915 = vst [vmem:[%s4043_s1 + $0x268] sm:$0xf] %v1193_v38  ;;  %1917 = vst [vmem:[%s4043_s1 + $0x3e8] sm:$0xf] %v1198_v39  ;;  %v1934_v54 = vld [vmem:[%s4042_s0 + $0x1d8] sm:$0xff]  ;;  %v1238_v56 = vpack.c.bf16 %v2015_v3, %v1932_v53 }
  0x7c   :  { %v1213_v45 = vpack.c.bf16 %v2015_v3, %v1922_v42  ;;  %1919 = vst [vmem:[%s4043_s1 + $0x168] sm:$0xf] %v1203_v43  ;;  %v1243_v57 = vpack.c.bf16 %v2015_v3, %v1934_v54  ;;  %v1936_v58 = vld [vmem:[%s4042_s0 + $0x6d8] sm:$0xff]  ;;  %1925 = vst [vmem:[%s4043_s1 + $0x6c] sm:$0xf] %v1218_v49  ;;  %v1942_v0 = vld [vmem:[%s4042_s0 + $0x8e0] sm:$0xff] }
  0x7d   :  { %1921 = vst [vmem:[%s4043_s1 + $0x2e8] sm:$0xf] %v1208_v44  ;;  %v1938_v59 = vld [vmem:[%s4042_s0 + $0x3d8] sm:$0xff]  ;;  %1927 = vst [vmem:[%s4043_s1 + $0x1ec] sm:$0xf] %v1223_v50  ;;  %v1248_v61 = vpack.c.bf16 %v2015_v3, %v1936_v58  ;;  %v1944_v1 = vld [vmem:[%s4042_s0 + $0x5e0] sm:$0xff]  ;;  %v1263_v4 = vpack.c.bf16 %v2015_v3, %v1942_v0 }
  0x7e   :  { %1923 = vst [vmem:[%s4043_s1 + $0x468] sm:$0xf] %v1213_v45  ;;  %v1940_v60 = vld [vmem:[%s4042_s0 + $0xd8] sm:$0xff]  ;;  %1929 = vst [vmem:[%s4043_s1 + $0x36c] sm:$0xf] %v1228_v51  ;;  %v1253_v62 = vpack.c.bf16 %v2015_v3, %v1938_v59  ;;  %v1946_v2 = vld [vmem:[%s4042_s0 + $0x2e0] sm:$0xff]  ;;  %v1268_v5 = vpack.c.bf16 %v2015_v3, %v1944_v1 }
  0x7f   :  { %v1258_v63 = vpack.c.bf16 %v2015_v3, %v1940_v60  ;;  %1931 = vst [vmem:[%s4043_s1 + $0xec] sm:$0xf] %v1233_v55  ;;  %1933 = vst [vmem:[%s4043_s1 + $0x26c] sm:$0xf] %v1238_v56  ;;  %v1273_v6 = vpack.c.bf16 %v2015_v3, %v1946_v2  ;;  %v1948_v7 = vld [vmem:[%s4042_s0 + $0x7e0] sm:$0xff]  ;;  %v1960_v19 = vld [vmem:[%s4042_s0 + $0x8e8] sm:$0xff] }
  0x80   :  { %1935 = vst [vmem:[%s4043_s1 + $0x3ec] sm:$0xf] %v1243_v57  ;;  %v1950_v8 = vld [vmem:[%s4042_s0 + $0x4e0] sm:$0xff]  ;;  %1937 = vst [vmem:[%s4043_s1 + $0x16c] sm:$0xf] %v1248_v61  ;;  %v1278_v10 = vpack.c.bf16 %v2015_v3, %v1948_v7  ;;  %v1962_v20 = vld [vmem:[%s4042_s0 + $0x5e8] sm:$0xff]  ;;  %v1308_v22 = vpack.c.bf16 %v2015_v3, %v1960_v19 }
  0x81   :  { %v1952_v9 = vld [vmem:[%s4042_s0 + $0x1e0] sm:$0xff]  ;;  %1939 = vst [vmem:[%s4043_s1 + $0x2ec] sm:$0xf] %v1253_v62  ;;  %1941 = vst [vmem:[%s4043_s1 + $0x46c] sm:$0xf] %v1258_v63  ;;  %v1283_v11 = vpack.c.bf16 %v2015_v3, %v1950_v8  ;;  %v1964_v21 = vld [vmem:[%s4042_s0 + $0x2e8] sm:$0xff]  ;;  %v1313_v23 = vpack.c.bf16 %v2015_v3, %v1962_v20 }
  0x82   :  { %v1288_v12 = vpack.c.bf16 %v2015_v3, %v1952_v9  ;;  %v1954_v13 = vld [vmem:[%s4042_s0 + $0x6e0] sm:$0xff]  ;;  %1943 = vst [vmem:[%s4043_s1 + $0x70] sm:$0xf] %v1263_v4  ;;  %1945 = vst [vmem:[%s4043_s1 + $0x1f0] sm:$0xf] %v1268_v5  ;;  %v1318_v24 = vpack.c.bf16 %v2015_v3, %v1964_v21  ;;  %v1966_v25 = vld [vmem:[%s4042_s0 + $0x7e8] sm:$0xff] }
  0x83   :  { %v1956_v14 = vld [vmem:[%s4042_s0 + $0x3e0] sm:$0xff]  ;;  %1947 = vst [vmem:[%s4043_s1 + $0x370] sm:$0xf] %v1273_v6  ;;  %v1293_v16 = vpack.c.bf16 %v2015_v3, %v1954_v13  ;;  %1949 = vst [vmem:[%s4043_s1 + $0xf0] sm:$0xf] %v1278_v10  ;;  %v1968_v26 = vld [vmem:[%s4042_s0 + $0x4e8] sm:$0xff]  ;;  %v1323_v28 = vpack.c.bf16 %v2015_v3, %v1966_v25 }
  0x84   :  { %v1958_v15 = vld [vmem:[%s4042_s0 + $0xe0] sm:$0xff]  ;;  %v1298_v17 = vpack.c.bf16 %v2015_v3, %v1956_v14  ;;  %1951 = vst [vmem:[%s4043_s1 + $0x270] sm:$0xf] %v1283_v11  ;;  %1953 = vst [vmem:[%s4043_s1 + $0x3f0] sm:$0xf] %v1288_v12  ;;  %v1970_v27 = vld [vmem:[%s4042_s0 + $0x1e8] sm:$0xff]  ;;  %v1328_v29 = vpack.c.bf16 %v2015_v3, %v1968_v26 }
  0x85   :  { %v1303_v18 = vpack.c.bf16 %v2015_v3, %v1958_v15  ;;  %1955 = vst [vmem:[%s4043_s1 + $0x170] sm:$0xf] %v1293_v16  ;;  %v1333_v30 = vpack.c.bf16 %v2015_v3, %v1970_v27  ;;  %v1972_v31 = vld [vmem:[%s4042_s0 + $0x6e8] sm:$0xff]  ;;  %1961 = vst [vmem:[%s4043_s1 + $0x74] sm:$0xf] %v1308_v22  ;;  %v1978_v37 = vld [vmem:[%s4042_s0 + $0x8f0] sm:$0xff] }
  0x86   :  { %1957 = vst [vmem:[%s4043_s1 + $0x2f0] sm:$0xf] %v1298_v17  ;;  %v1974_v32 = vld [vmem:[%s4042_s0 + $0x3e8] sm:$0xff]  ;;  %1963 = vst [vmem:[%s4043_s1 + $0x1f4] sm:$0xf] %v1313_v23  ;;  %v1338_v34 = vpack.c.bf16 %v2015_v3, %v1972_v31  ;;  %v1980_v38 = vld [vmem:[%s4042_s0 + $0x5f0] sm:$0xff]  ;;  %v1353_v40 = vpack.c.bf16 %v2015_v3, %v1978_v37 }
  0x87   :  { %1959 = vst [vmem:[%s4043_s1 + $0x470] sm:$0xf] %v1303_v18  ;;  %v1976_v33 = vld [vmem:[%s4042_s0 + $0xe8] sm:$0xff]  ;;  %1965 = vst [vmem:[%s4043_s1 + $0x374] sm:$0xf] %v1318_v24  ;;  %v1343_v35 = vpack.c.bf16 %v2015_v3, %v1974_v32  ;;  %v1982_v39 = vld [vmem:[%s4042_s0 + $0x2f0] sm:$0xff]  ;;  %v1358_v41 = vpack.c.bf16 %v2015_v3, %v1980_v38 }
  0x88   :  { %v1348_v36 = vpack.c.bf16 %v2015_v3, %v1976_v33  ;;  %1967 = vst [vmem:[%s4043_s1 + $0xf4] sm:$0xf] %v1323_v28  ;;  %1969 = vst [vmem:[%s4043_s1 + $0x274] sm:$0xf] %v1328_v29  ;;  %v1363_v42 = vpack.c.bf16 %v2015_v3, %v1982_v39  ;;  %v1984_v43 = vld [vmem:[%s4042_s0 + $0x7f0] sm:$0xff]  ;;  %v1996_v55 = vld [vmem:[%s4042_s0 + $0x8f8] sm:$0xff] }
  0x89   :  { %1971 = vst [vmem:[%s4043_s1 + $0x3f4] sm:$0xf] %v1333_v30  ;;  %v1986_v44 = vld [vmem:[%s4042_s0 + $0x4f0] sm:$0xff]  ;;  %1973 = vst [vmem:[%s4043_s1 + $0x174] sm:$0xf] %v1338_v34  ;;  %v1368_v46 = vpack.c.bf16 %v2015_v3, %v1984_v43  ;;  %v1998_v56 = vld [vmem:[%s4042_s0 + $0x5f8] sm:$0xff]  ;;  %v1398_v58 = vpack.c.bf16 %v2015_v3, %v1996_v55 }
  0x8a   :  { %v1988_v45 = vld [vmem:[%s4042_s0 + $0x1f0] sm:$0xff]  ;;  %1975 = vst [vmem:[%s4043_s1 + $0x2f4] sm:$0xf] %v1343_v35  ;;  %1977 = vst [vmem:[%s4043_s1 + $0x474] sm:$0xf] %v1348_v36  ;;  %v1373_v47 = vpack.c.bf16 %v2015_v3, %v1986_v44  ;;  %v2000_v57 = vld [vmem:[%s4042_s0 + $0x2f8] sm:$0xff]  ;;  %v1403_v59 = vpack.c.bf16 %v2015_v3, %v1998_v56 }
  0x8b   :  { %v1378_v48 = vpack.c.bf16 %v2015_v3, %v1988_v45  ;;  %v1990_v49 = vld [vmem:[%s4042_s0 + $0x6f0] sm:$0xff]  ;;  %1979 = vst [vmem:[%s4043_s1 + $0x78] sm:$0xf] %v1353_v40  ;;  %1981 = vst [vmem:[%s4043_s1 + $0x1f8] sm:$0xf] %v1358_v41  ;;  %v1408_v60 = vpack.c.bf16 %v2015_v3, %v2000_v57  ;;  %v2002_v61 = vld [vmem:[%s4042_s0 + $0x7f8] sm:$0xff] }
  0x8c   :  { %v1992_v50 = vld [vmem:[%s4042_s0 + $0x3f0] sm:$0xff]  ;;  %1983 = vst [vmem:[%s4043_s1 + $0x378] sm:$0xf] %v1363_v42  ;;  %v1383_v52 = vpack.c.bf16 %v2015_v3, %v1990_v49  ;;  %1985 = vst [vmem:[%s4043_s1 + $0xf8] sm:$0xf] %v1368_v46  ;;  %v2004_v62 = vld [vmem:[%s4042_s0 + $0x4f8] sm:$0xff]  ;;  %v1413_v0 = vpack.c.bf16 %v2015_v3, %v2002_v61 }
  0x8d   :  { %v1994_v51 = vld [vmem:[%s4042_s0 + $0xf0] sm:$0xff]  ;;  %v1388_v53 = vpack.c.bf16 %v2015_v3, %v1992_v50  ;;  %1987 = vst [vmem:[%s4043_s1 + $0x278] sm:$0xf] %v1373_v47  ;;  %1989 = vst [vmem:[%s4043_s1 + $0x3f8] sm:$0xf] %v1378_v48  ;;  %v2006_v63 = vld [vmem:[%s4042_s0 + $0x1f8] sm:$0xff]  ;;  %v1418_v1 = vpack.c.bf16 %v2015_v3, %v2004_v62 }
  0x8e   :  { %v1393_v54 = vpack.c.bf16 %v2015_v3, %v1994_v51  ;;  %1991 = vst [vmem:[%s4043_s1 + $0x178] sm:$0xf] %v1383_v52  ;;  %v1423_v2 = vpack.c.bf16 %v2015_v3, %v2006_v63  ;;  %v2008_v4 = vld [vmem:[%s4042_s0 + $0x6f8] sm:$0xff]  ;;  %1997 = vst [vmem:[%s4043_s1 + $0x7c] sm:$0xf] %v1398_v58 }
  0x8f   :  { %1993 = vst [vmem:[%s4043_s1 + $0x2f8] sm:$0xf] %v1388_v53  ;;  %v2010_v5 = vld [vmem:[%s4042_s0 + $0x3f8] sm:$0xff]  ;;  %1999 = vst [vmem:[%s4043_s1 + $0x1fc] sm:$0xf] %v1403_v59  ;;  %v1428_v7 = vpack.c.bf16 %v2015_v3, %v2008_v4 }
  0x90   :  { %1995 = vst [vmem:[%s4043_s1 + $0x478] sm:$0xf] %v1393_v54  ;;  %v2012_v6 = vld [vmem:[%s4042_s0 + $0xf8] sm:$0xff]  ;;  %2001 = vst [vmem:[%s4043_s1 + $0x37c] sm:$0xf] %v1408_v60  ;;  %v1433_v8 = vpack.c.bf16 %v2015_v3, %v2010_v5 }
  0x91   :  { %v1438_v3 = vpack.c.bf16 %v2015_v3, %v2012_v6  ;;  %2003 = vst [vmem:[%s4043_s1 + $0xfc] sm:$0xf] %v1413_v0  ;;  %2005 = vst [vmem:[%s4043_s1 + $0x27c] sm:$0xf] %v1418_v1 }
  0x92   :  { %2007 = vst [vmem:[%s4043_s1 + $0x3fc] sm:$0xf] %v1423_v2  ;;  %2009 = vst [vmem:[%s4043_s1 + $0x17c] sm:$0xf] %v1428_v7 }
  0x93   :  { %2011 = vst [vmem:[%s4043_s1 + $0x2fc] sm:$0xf] %v1433_v8  ;;  %2013 = vst [vmem:[%s4043_s1 + $0x47c] sm:$0xf] %v1438_v3 }

// kernel: scorenet_forward.15
= control target key start
LH: loop header
LB: loop body
LE: loop exit
PB: predicated region body
PF: predicated region fallthrough
CT: control target
= control target key end

     0   :  { %s2521_s18 = smov 0   ;;  %s4679_s0 = inlined_call_operand.vmem [shape: f32[2,676,32], index: 0, kind: input, shape index: {}]   ;;  %s4680_s1 = inlined_call_operand.vmem [shape: f32[2,1,32], index: 1, kind: input, shape index: {}]   ;;  %s4681_s2 = inlined_call_operand.vmem [shape: f32[1,32], index: 2, kind: input, shape index: {}]   ;;  %s4682_s3 = inlined_call_operand.vmem [shape: f32[1,32], index: 3, kind: input, shape index: {}]   ;;  %s4683_s4 = inlined_call_operand.vmem [shape: f32[32,32], index: 4, kind: input, shape index: {}]   ;;  %s4684_s5 = inlined_call_operand.vmem [shape: f32[2,676,32], index: 5, kind: output, shape index: {}]  }
   0x1 LB: > { %s2012_s19 = sadd.s32 4294967295, %s2486_s18   ;;  %p2016_p0 = scmp.ge.s32.totalorder %s2486_s18, 1  ;;  %s2486_s18 = sphi %s2521_s18, %s15_s18  }
   0x2   : > { %p195_p1 = scmp.lt.s32.totalorder %s2486_s18, 3 }
   0x4   : > { %p196_p2 = pnand %p2016_p0, %p195_p1 }
   0x6   : > { %199 = sbr.rel (%p196_p2) target bundleno = 978 (0x3d2), region = 40 }
   0xd   : > { %v853_v0 = vld [vmem:[%s4683_s4] sm:$0xff]  ;;  %v854_v1 = vld [vmem:[%s4683_s4 + $0x8] sm:$0xff]  ;;  %v855_v2 = vld [vmem:[%s4683_s4 + $0x10] sm:$0xff]  ;;  %v4685_v3 = vmov 0.0|0.0   ;;  %p226_p3 = scmp.lt.s32.totalorder %s2012_s19, 1  ;;  %vm2489_vm0 = vmmov 0  }
   0xe   : > { %2098 = vmatprep.subr.bf16.mxu0 %v4685_v3  ;;  %v2539_v4 = vpack.c.bf16 %v854_v1, %v853_v0  ;;  %2104 = vmatprep.subr.bf16.mxu1 %v4685_v3  ;;  %v856_v5 = vld [vmem:[%s4683_s4 + $0x18] sm:$0xff]  ;;  %v4687_v6 = vmov 0.0   ;;  %vm416_vm1 = vcmask 261120   ;;  %vm584_vm2 = vcmask 257024  }
   0xf   : > { %2062 = vmatprep.mubr.msk.f32.mxu0 %vm2489_vm0, %v4687_v6  ;;  %2073 = vmatprep.mubr.msk.f32.mxu1 %vm2489_vm0, %v4687_v6  ;;  %v2551_v7 = vpack.c.bf16 %v856_v5, %v855_v2  ;;  %s5353_s19 = smov (!%p226_p3, %s2012_s19), 1  ;;  %vm3262_vm3 = vmpackc.low %vm416_vm1, %vm416_vm1 }
  0x10   : > { %4860 = vst [vmem:[#allocation2_spill] sm:$0xff] %v2539_v4  ;;  %2100 = vmatpush3.bf16.msra.mxu0 %v2539_v4  ;;  %2106 = vmatpush3.bf16.msra.mxu1 %v2539_v4  ;;  %s2126_s28 = smul.u32 680, %s5353_s19  ;;  %s233_s6 = scalar_lea.vmem %s4680_s1, %s5353_s19 }
  0x11   : > { %4861 = vst [vmem:[#allocation3_spill] sm:$0xff] %v2551_v7  ;;  %2101 = vmatprep.subr.bf16.mxu0 %v4685_v3  ;;  %2107 = vmatprep.subr.bf16.mxu1 %v4685_v3  ;;  %v2562_v8 = vld [vmem:[%s233_s6] ss:$0 sm:$0xff] }
  0x12   : > { %s2571_s9 = scalar_lea.vmem %s4679_s0, %s2126_s28  ;;  %s4348_s16 = scalar_lea.vmem %s4684_s5, %s2126_s28 }
  0x13   : > { %v239_v9 = vld [vmem:[%s2571_s9] sm:$0xff]  ;;  %v240_v10 = vld [vmem:[%s2571_s9 + $0x8] sm:$0xff]  ;;  %v241_v11 = vld [vmem:[%s2571_s9 + $0x10] sm:$0xff] }
  0x14   : > { %2103 = vmatpush3.bf16.msra.mxu0 %v2551_v7  ;;  %2109 = vmatpush3.bf16.msra.mxu1 %v2551_v7  ;;  %v242_v12 = vld [vmem:[%s2571_s9 + $0x18] sm:$0xff]  ;;  %v2580_v13 = vadd.f32 %v2562_v8, %v239_v9  ;;  %v2583_v14 = vadd.f32 %v2562_v8, %v240_v10  ;;  %v2586_v15 = vadd.f32 %v2562_v8, %v241_v11  ;;  %v243_v16 = vld [vmem:[%s2571_s9 + $0x20] sm:$0xff]  ;;  %v244_v20 = vld [vmem:[%s2571_s9 + $0x28] sm:$0xff] }
  0x15   : > { %2110 = vmatprep.subr.bf16.mxu0 %v4685_v3  ;;  %2118 = vmatprep.subr.bf16.mxu1 %v4685_v3  ;;  %v2592_v18 = vadd.f32 %v2562_v8, %v242_v12  ;;  %v245_v21 = vld [vmem:[%s2571_s9 + $0x30] sm:$0xff]  ;;  %v246_v22 = vld [vmem:[%s2571_s9 + $0x38] sm:$0xff]  ;;  %v247_v24 = vld [vmem:[%s2571_s9 + $0x40] sm:$0xff]  ;;  %v2603_v27 = vadd.f32 %v2562_v8, %v243_v16  ;;  %v2614_v36 = vadd.f32 %v2562_v8, %v244_v20 }
  0x16   : > { %4862 = vst [vmem:[#allocation4_spill] sm:$0xff] %v2580_v13  ;;  %4863 = vst [vmem:[#allocation5_spill] sm:$0xff] %v2583_v14  ;;  %v417_v17 = vsel %vm416_vm1, %v2580_v13, 0.0  ;;  %v418_v19 = vsel %vm416_vm1, %v2583_v14, 0.0  ;;  %v248_v25 = vld [vmem:[%s2571_s9 + $0x48] sm:$0xff]  ;;  %v249_v26 = vld [vmem:[%s2571_s9 + $0x50] sm:$0xff]  ;;  %v2617_v37 = vadd.f32 %v2562_v8, %v245_v21  ;;  %v2620_v38 = vadd.f32 %v2562_v8, %v246_v22 }
  0x17   : > { %4864 = vst [vmem:[#allocation6_spill] sm:$0xff] %v2586_v15  ;;  %4865 = vst [vmem:[#allocation7_spill] sm:$0xff] %v2592_v18  ;;  %v419_v23 = vadd.f32 %v418_v19, %v417_v17  ;;  %v420_v28 = vsel %vm416_vm1, %v2586_v15, 0.0  ;;  %v250_v29 = vld [vmem:[%s2571_s9 + $0x58] sm:$0xff]  ;;  %v251_v30 = vld [vmem:[%s2571_s9 + $0x60] sm:$0xff]  ;;  %v422_v39 = vsel %vm416_vm1, %v2592_v18, 0.0  ;;  %v2625_v40 = vadd.f32 %v2562_v8, %v247_v24 }
  0x18   : > { %4866 = vst [vmem:[#allocation8_spill] sm:$0xff] %v2603_v27  ;;  %v252_v31 = vld [vmem:[%s2571_s9 + $0x68] sm:$0xff]  ;;  %v253_v33 = vld [vmem:[%s2571_s9 + $0x70] sm:$0xff]  ;;  %v254_v34 = vld [vmem:[%s2571_s9 + $0x78] sm:$0xff]  ;;  %v2628_v41 = vadd.f32 %v2562_v8, %v248_v25  ;;  %v2631_v42 = vadd.f32 %v2562_v8, %v249_v26  ;;  %v2634_v44 = vadd.f32 %v2562_v8, %v250_v29  ;;  %v2637_v45 = vadd.f32 %v2562_v8, %v251_v30 }
  0x19   : > { %v421_v32 = vadd.f32 %v420_v28, %v419_v23  ;;  %v255_v35 = vld [vmem:[%s2571_s9 + $0x80] sm:$0xff]  ;;  %v2640_v46 = vadd.f32 %v2562_v8, %v252_v31  ;;  %v424_v47 = vsel %vm416_vm1, %v2603_v27, 0.0  ;;  %v272_v48 = vld [vmem:[%s2571_s9 + $0x108] sm:$0xff]  ;;  %v273_v49 = vld [vmem:[%s2571_s9 + $0x110] sm:$0xff]  ;;  %v2648_v51 = vadd.f32 %v2562_v8, %v253_v33 }
  0x1a   : > { %v274_v50 = vld [vmem:[%s2571_s9 + $0x118] sm:$0xff]  ;;  %v2651_v52 = vadd.f32 %v2562_v8, %v254_v34  ;;  %v2654_v53 = vadd.f32 %v2562_v8, %v255_v35  ;;  %v275_v55 = vld [vmem:[%s2571_s9 + $0x120] sm:$0xff]  ;;  %v276_v56 = vld [vmem:[%s2571_s9 + $0x128] sm:$0xff]  ;;  %v2660_v58 = vadd.f32 %v2562_v8, %v272_v48  ;;  %v2663_v59 = vadd.f32 %v2562_v8, %v273_v49 }
  0x1b   : > { %v423_v43 = vadd.f32 %v422_v39, %v421_v32  ;;  %v277_v57 = vld [vmem:[%s2571_s9 + $0x130] sm:$0xff]  ;;  %v2666_v60 = vadd.f32 %v2562_v8, %v274_v50  ;;  %v426_v61 = vsel %vm416_vm1, %v2614_v36, 0.0  ;;  %v278_v62 = vld [vmem:[%s2571_s9 + $0x138] sm:$0xff]  ;;  %v279_v63 = vld [vmem:[%s2571_s9 + $0x140] sm:$0xff]  ;;  %v2674_v1 = vadd.f32 %v2562_v8, %v275_v55 }
  0x1c   : > { %4867 = vst [vmem:[#allocation9_spill] sm:$0xff] %v2651_v52  ;;  %4868 = vst [vmem:[#allocation10_spill] sm:$0xff] %v2654_v53  ;;  %v280_v0 = vld [vmem:[%s2571_s9 + $0x148] sm:$0xff]  ;;  %v2677_v2 = vadd.f32 %v2562_v8, %v276_v56  ;;  %v2680_v5 = vadd.f32 %v2562_v8, %v277_v57  ;;  %v281_v10 = vld [vmem:[%s2571_s9 + $0x150] sm:$0xff]  ;;  %v2686_v16 = vadd.f32 %v2562_v8, %v278_v62  ;;  %v428_v20 = vsel %vm416_vm1, %v2617_v37, 0.0 }
  0x1d   : > { %v425_v54 = vadd.f32 %v424_v47, %v423_v43  ;;  %4869 = vst [vmem:[#allocation11_spill] sm:$0xff] %v2660_v58  ;;  %4870 = vst [vmem:[#allocation12_spill] sm:$0xff] %v2663_v59  ;;  %v282_v11 = vld [vmem:[%s2571_s9 + $0x158] sm:$0xff]  ;;  %v283_v12 = vld [vmem:[%s2571_s9 + $0x160] sm:$0xff]  ;;  %v2689_v17 = vadd.f32 %v2562_v8, %v279_v63  ;;  %v2692_v19 = vadd.f32 %v2562_v8, %v280_v0  ;;  %v430_v35 = vsel %vm416_vm1, %v2620_v38, 0.0 }
  0x1e   : > { %4871 = vst [vmem:[#allocation13_spill] sm:$0xff] %v2666_v60  ;;  %4872 = vst [vmem:[#allocation14_spill] sm:$0xff] %v2674_v1  ;;  %v284_v21 = vld [vmem:[%s2571_s9 + $0x168] sm:$0xff]  ;;  %v285_v22 = vld [vmem:[%s2571_s9 + $0x170] sm:$0xff]  ;;  %v2700_v24 = vadd.f32 %v2562_v8, %v281_v10  ;;  %v2703_v25 = vadd.f32 %v2562_v8, %v282_v11  ;;  %v2706_v26 = vadd.f32 %v2562_v8, %v283_v12  ;;  %v432_v0 = vsel %vm416_vm1, %v2625_v40, 0.0 }
  0x1f   : > { %4873 = vst [vmem:[#allocation15_spill] sm:$0xff] %v2677_v2  ;;  %4874 = vst [vmem:[#allocation16_spill] sm:$0xff] %v2680_v5  ;;  %v427_v9 = vadd.f32 %v426_v61, %v425_v54  ;;  %v286_v23 = vld [vmem:[%s2571_s9 + $0x178] sm:$0xff]  ;;  %v287_v29 = vld [vmem:[%s2571_s9 + $0x180] sm:$0xff]  ;;  %v2712_v32 = vadd.f32 %v2562_v8, %v284_v21  ;;  %v2715_v33 = vadd.f32 %v2562_v8, %v285_v22 }
  0x20   : > { %4875 = vst [vmem:[#allocation17_spill] sm:$0xff] %v2686_v16  ;;  %4876 = vst [vmem:[#allocation18_spill] sm:$0xff] %v2689_v17  ;;  %v288_v30 = vld [vmem:[%s2571_s9 + $0x188] sm:$0xff]  ;;  %v289_v31 = vld [vmem:[%s2571_s9 + $0x190] sm:$0xff]  ;;  %v2718_v34 = vadd.f32 %v2562_v8, %v286_v23  ;;  %v2726_v48 = vadd.f32 %v2562_v8, %v287_v29 }
  0x21   : > { %4877 = vst [vmem:[#allocation19_spill] sm:$0xff] %v2692_v19  ;;  %4878 = vst [vmem:[#allocation20_spill] sm:$0xff] %v2700_v24  ;;  %v429_v28 = vadd.f32 %v428_v20, %v427_v9  ;;  %v290_v39 = vld [vmem:[%s2571_s9 + $0x198] sm:$0xff]  ;;  %v291_v43 = vld [vmem:[%s2571_s9 + $0x1a0] sm:$0xff]  ;;  %v2729_v49 = vadd.f32 %v2562_v8, %v288_v30  ;;  %v2732_v50 = vadd.f32 %v2562_v8, %v289_v31 }
  0x22   : > { %4879 = vst [vmem:[#allocation21_spill] sm:$0xff] %v2703_v25  ;;  %4880 = vst [vmem:[#allocation22_spill] sm:$0xff] %v2706_v26  ;;  %v292_v47 = vld [vmem:[%s2571_s9 + $0x1a8] sm:$0xff]  ;;  %v293_v55 = vld [vmem:[%s2571_s9 + $0x1b0] sm:$0xff]  ;;  %v2738_v61 = vadd.f32 %v2562_v8, %v290_v39  ;;  %v2741_v62 = vadd.f32 %v2562_v8, %v291_v43  ;;  %v434_v39 = vsel %vm416_vm1, %v2628_v41, 0.0 }
  0x23   : > { %4881 = vst [vmem:[#allocation23_spill] sm:$0xff] %v2712_v32  ;;  %4882 = vst [vmem:[#allocation24_spill] sm:$0xff] %v2715_v33  ;;  %v431_v54 = vadd.f32 %v430_v35, %v429_v28  ;;  %v294_v56 = vld [vmem:[%s2571_s9 + $0x1b8] sm:$0xff]  ;;  %v295_v57 = vld [vmem:[%s2571_s9 + $0x1c0] sm:$0xff]  ;;  %v2744_v63 = vadd.f32 %v2562_v8, %v292_v47  ;;  %v2752_v12 = vadd.f32 %v2562_v8, %v293_v55 }
  0x24   : > { %4883 = vst [vmem:[#allocation25_spill] sm:$0xff] %v2718_v34  ;;  %4884 = vst [vmem:[#allocation26_spill] sm:$0xff] %v2726_v48  ;;  %v296_v9 = vld [vmem:[%s2571_s9 + $0x1c8] sm:$0xff]  ;;  %v297_v10 = vld [vmem:[%s2571_s9 + $0x1d0] sm:$0xff]  ;;  %v2755_v20 = vadd.f32 %v2562_v8, %v294_v56  ;;  %v2758_v21 = vadd.f32 %v2562_v8, %v295_v57 }
  0x25   : > { %4885 = vst [vmem:[#allocation27_spill] sm:$0xff] %v2729_v49  ;;  %4886 = vst [vmem:[#allocation28_spill] sm:$0xff] %v2732_v50  ;;  %v298_v11 = vld [vmem:[%s2571_s9 + $0x1d8] sm:$0xff]  ;;  %v433_v22 = vadd.f32 %v432_v0, %v431_v54  ;;  %v299_v23 = vld [vmem:[%s2571_s9 + $0x1e0] sm:$0xff]  ;;  %v2764_v30 = vadd.f32 %v2562_v8, %v296_v9  ;;  %v2767_v31 = vadd.f32 %v2562_v8, %v297_v10 }
  0x26   : > { %4887 = vst [vmem:[#allocation29_spill] sm:$0xff] %v2758_v21  ;;  %v300_v28 = vld [vmem:[%s2571_s9 + $0x1e8] sm:$0xff]  ;;  %v301_v29 = vld [vmem:[%s2571_s9 + $0x1f0] sm:$0xff]  ;;  %v2770_v35 = vadd.f32 %v2562_v8, %v298_v11  ;;  %v302_v43 = vld [vmem:[%s2571_s9 + $0x1f8] sm:$0xff]  ;;  %v2778_v55 = vadd.f32 %v2562_v8, %v299_v23 }
  0x27   : > { %4888 = vst [vmem:[#allocation30_spill] sm:$0xff] %v2764_v30  ;;  %4889 = vst [vmem:[#allocation31_spill] sm:$0xff] %v2767_v31  ;;  %v303_v47 = vld [vmem:[%s2571_s9 + $0x200] sm:$0xff]  ;;  %v304_v54 = vld [vmem:[%s2571_s9 + $0x208] sm:$0xff]  ;;  %v2781_v56 = vadd.f32 %v2562_v8, %v300_v28  ;;  %v2784_v57 = vadd.f32 %v2562_v8, %v301_v29  ;;  %v435_v0 = vadd.f32 %v434_v39, %v433_v22  ;;  %v436_v28 = vsel %vm416_vm1, %v2631_v42, 0.0 }
  0x28   : > { %4890 = vst [vmem:[#allocation32_spill] sm:$0xff] %v2770_v35  ;;  %4891 = vst [vmem:[#allocation33_spill] sm:$0xff] %v2778_v55  ;;  %v305_v9 = vld [vmem:[%s2571_s9 + $0x210] sm:$0xff]  ;;  %v306_v10 = vld [vmem:[%s2571_s9 + $0x218] sm:$0xff]  ;;  %v2790_v3 = vadd.f32 %v2562_v8, %v302_v43  ;;  %v2793_v6 = vadd.f32 %v2562_v8, %v303_v47  ;;  %v2796_v23 = vadd.f32 %v2562_v8, %v304_v54 }
  0x29   : > { %4892 = vst [vmem:[#allocation34_spill] sm:$0xff] %v2781_v56  ;;  %4893 = vst [vmem:[#allocation35_spill] sm:$0xff] %v2784_v57  ;;  %v307_v11 = vld [vmem:[%s2571_s9 + $0x220] sm:$0xff]  ;;  %v308_v22 = vld [vmem:[%s2571_s9 + $0x228] sm:$0xff]  ;;  %v2804_v7 = vadd.f32 %v2562_v8, %v305_v9  ;;  %v2807_v43 = vadd.f32 %v2562_v8, %v306_v10  ;;  %v437_v54 = vadd.f32 %v436_v28, %v435_v0  ;;  %v438_v10 = vsel %vm416_vm1, %v2634_v44, 0.0 }
  0x2a   : > { %4894 = vst [vmem:[#allocation36_spill] sm:$0xff] %v2790_v3  ;;  %4895 = vst [vmem:[#allocation37_spill] sm:$0xff] %v2793_v6  ;;  %v309_v29 = vld [vmem:[%s2571_s9 + $0x230] sm:$0xff]  ;;  %v310_v39 = vld [vmem:[%s2571_s9 + $0x238] sm:$0xff]  ;;  %v2810_v47 = vadd.f32 %v2562_v8, %v307_v11  ;;  %v2816_v3 = vadd.f32 %v2562_v8, %v308_v22 }
  0x2b   : > { %4896 = vst [vmem:[#allocation38_spill] sm:$0xff] %v2796_v23  ;;  %4897 = vst [vmem:[#allocation39_spill] sm:$0xff] %v2804_v7  ;;  %v311_v4 = vld [vmem:[%s2571_s9 + $0x240] sm:$0xff]  ;;  %v312_v23 = vld [vmem:[%s2571_s9 + $0x248] sm:$0xff]  ;;  %v2819_v57 = vadd.f32 %v2562_v8, %v309_v29  ;;  %v2822_v9 = vadd.f32 %v2562_v8, %v310_v39  ;;  %v439_v39 = vadd.f32 %v438_v10, %v437_v54 }
  0x2c   : > { %4898 = vst [vmem:[#allocation40_spill] sm:$0xff] %v2807_v43  ;;  %4899 = vst [vmem:[#allocation41_spill] sm:$0xff] %v2810_v47  ;;  %v313_v6 = vld [vmem:[%s2571_s9 + $0x250] sm:$0xff]  ;;  %v256_v0 = vld [vmem:[%s2571_s9 + $0x88] sm:$0xff]  ;;  %v2831_v43 = vadd.f32 %v2562_v8, %v311_v4  ;;  %v2834_v22 = vadd.f32 %v2562_v8, %v312_v23  ;;  %v440_v23 = vsel %vm416_vm1, %v2637_v45, 0.0 }
  0x2d   : > { %4900 = vst [vmem:[#allocation42_spill] sm:$0xff] %v2816_v3  ;;  %4901 = vst [vmem:[#allocation43_spill] sm:$0xff] %v2819_v57  ;;  %v314_v11 = vld [vmem:[%s2571_s9 + $0x258] sm:$0xff]  ;;  %v315_v28 = vld [vmem:[%s2571_s9 + $0x260] sm:$0xff]  ;;  %v2837_v29 = vadd.f32 %v2562_v8, %v313_v6 }
  0x2e   : > { %4902 = vst [vmem:[#allocation44_spill] sm:$0xff] %v2822_v9  ;;  %v316_v47 = vld [vmem:[%s2571_s9 + $0x268] sm:$0xff]  ;;  %4903 = vst [vmem:[#allocation45_spill] sm:$0xff] %v2831_v43  ;;  %v317_v9 = vld [vmem:[%s2571_s9 + $0x270] sm:$0xff]  ;;  %v2843_v7 = vadd.f32 %v2562_v8, %v314_v11  ;;  %v2846_v56 = vadd.f32 %v2562_v8, %v315_v28  ;;  %v441_v28 = vadd.f32 %v440_v23, %v439_v39  ;;  %v444_v23 = vsel %vm416_vm1, %v2648_v51, 0.0 }
  0x2f   : > { %4904 = vst [vmem:[#allocation46_spill] sm:$0xff] %v2834_v22  ;;  %4905 = vst [vmem:[#allocation47_spill] sm:$0xff] %v2837_v29  ;;  %v318_v57 = vld [vmem:[%s2571_s9 + $0x278] sm:$0xff]  ;;  %v319_v3 = vld [vmem:[%s2571_s9 + $0x280] sm:$0xff]  ;;  %v2849_v4 = vadd.f32 %v2562_v8, %v316_v47  ;;  %v2857_v54 = vadd.f32 %v2562_v8, %v317_v9 }
  0x30   : > { %4906 = vst [vmem:[#allocation48_spill] sm:$0xff] %v2843_v7  ;;  %4907 = vst [vmem:[#allocation49_spill] sm:$0xff] %v2846_v56  ;;  %v320_v6 = vld [vmem:[%s2571_s9 + $0x288] sm:$0xff]  ;;  %v321_v29 = vld [vmem:[%s2571_s9 + $0x290] sm:$0xff]  ;;  %v2860_v10 = vadd.f32 %v2562_v8, %v318_v57  ;;  %v2863_v11 = vadd.f32 %v2562_v8, %v319_v3  ;;  %v442_v57 = vsel %vm416_vm1, %v2640_v46, 0.0 }
  0x31   : > { %4908 = vst [vmem:[#allocation50_spill] sm:$0xff] %v2849_v4  ;;  %v322_v22 = vld [vmem:[%s2571_s9 + $0x298] sm:$0xff]  ;;  %4909 = vst [vmem:[#allocation51_spill] sm:$0xff] %v2857_v54  ;;  %v323_v47 = vld [vmem:[%s2571_s9 + $0x2a0] sm:$0xf]  ;;  %v2867_v4 = vadd.f32 %v2562_v8, %v320_v6  ;;  %v2870_v56 = vadd.f32 %v2562_v8, %v321_v29  ;;  %v443_v39 = vadd.f32 %v442_v57, %v441_v28 }
  0x32   : > { %4910 = vst [vmem:[#allocation52_spill] sm:$0xff] %v2860_v10  ;;  %4911 = vst [vmem:[#allocation53_spill] sm:$0xff] %v2863_v11  ;;  %v2873_v7 = vadd.f32 %v2562_v8, %v322_v22  ;;  %v257_v9 = vld [vmem:[%s2571_s9 + $0x90] sm:$0xff]  ;;  %v2879_v3 = vadd.f32 %v2562_v8, %v323_v47  ;;  %v2884_v6 = vadd.f32 %v2562_v8, %v256_v0  ;;  %v446_v22 = vsel %vm416_vm1, %v2651_v52, 0.0  ;;  %v258_v29 = vld [vmem:[%s2571_s9 + $0x98] sm:$0xff] }
  0x33   : > { %4912 = vst [vmem:[#allocation54_spill] sm:$0xff] %v2867_v4  ;;  %4913 = vst [vmem:[#allocation55_spill] sm:$0xff] %v2870_v56  ;;  %v2890_v56 = vadd.f32 %v2562_v8, %v257_v9  ;;  %v448_v47 = vsel %vm416_vm1, %v2654_v53, 0.0  ;;  %v259_v28 = vld [vmem:[%s2571_s9 + $0xa0] sm:$0xff]  ;;  %v260_v4 = vld [vmem:[%s2571_s9 + $0xa8] sm:$0xff] }
  0x34   : > { %4914 = vst [vmem:[#allocation56_spill] sm:$0xff] %v2873_v7  ;;  %4915 = vst [vmem:[#allocation57_spill] sm:$0xff] %v2879_v3  ;;  %v445_v7 = vadd.f32 %v444_v23, %v443_v39  ;;  %v2896_v3 = vadd.f32 %v2562_v8, %v258_v29  ;;  %v450_v0 = vsel %vm416_vm1, %v2884_v6, 0.0  ;;  %v2902_v39 = vadd.f32 %v2562_v8, %v259_v28  ;;  %v261_v23 = vld [vmem:[%s2571_s9 + $0xb0] sm:$0xff]  ;;  %v262_v29 = vld [vmem:[%s2571_s9 + $0xb8] sm:$0xff] }
  0x35   : > { %4916 = vst [vmem:[#allocation58_spill] sm:$0xff] %v2884_v6  ;;  %4917 = vst [vmem:[#allocation59_spill] sm:$0xff] %v2890_v56  ;;  %v452_v9 = vsel %vm416_vm1, %v2890_v56, 0.0 }
  0x36   : > { %v447_v57 = vadd.f32 %v446_v22, %v445_v7  ;;  %4918 = vst [vmem:[#allocation60_spill] sm:$0xff] %v2896_v3  ;;  %4919 = vst [vmem:[#allocation61_spill] sm:$0xff] %v2902_v39  ;;  %v2908_v7 = vadd.f32 %v2562_v8, %v260_v4  ;;  %v454_v22 = vsel %vm416_vm1, %v2896_v3, 0.0  ;;  %v456_v28 = vsel %vm416_vm1, %v2902_v39, 0.0 }
  0x38   : > { %v449_v11 = vadd.f32 %v448_v47, %v447_v57  ;;  %4920 = vst [vmem:[#allocation62_spill] sm:$0xff] %v2908_v7  ;;  %v2914_v47 = vadd.f32 %v2562_v8, %v261_v23  ;;  %v263_v57 = vld [vmem:[%s2571_s9 + $0xc0] sm:$0xff]  ;;  %v458_v4 = vsel %vm416_vm1, %v2908_v7, 0.0  ;;  %v265_v23 = vld [vmem:[%s2571_s9 + $0xd0] sm:$0xff] }
  0x3a   : > { %v451_v10 = vadd.f32 %v450_v0, %v449_v11  ;;  %4921 = vst [vmem:[#allocation63_spill] sm:$0xff] %v2914_v47  ;;  %v2920_v11 = vadd.f32 %v2562_v8, %v262_v29  ;;  %v264_v0 = vld [vmem:[%s2571_s9 + $0xc8] sm:$0xff]  ;;  %v266_v29 = vld [vmem:[%s2571_s9 + $0xd8] sm:$0xff] }
  0x3c   : > { %v453_v54 = vadd.f32 %v452_v9, %v451_v10  ;;  %4922 = vst [vmem:[#allocation64_spill] sm:$0xff] %v2920_v11  ;;  %v2926_v10 = vadd.f32 %v2562_v8, %v263_v57  ;;  %v460_v9 = vsel %vm416_vm1, %v2914_v47, 0.0  ;;  %v267_v57 = vld [vmem:[%s2571_s9 + $0xe0] sm:$0xff] }
  0x3d   : > { %v2950_v21 = vadd.f32 %v2562_v8, %v267_v57 }
  0x3e   : > { %v455_v43 = vadd.f32 %v454_v22, %v453_v54  ;;  %4923 = vst [vmem:[#allocation65_spill] sm:$0xff] %v2926_v10  ;;  %v2932_v54 = vadd.f32 %v2562_v8, %v264_v0  ;;  %v462_v22 = vsel %vm416_vm1, %v2920_v11, 0.0  ;;  %v268_v0 = vld [vmem:[%s2571_s9 + $0xe8] sm:$0xff] }
  0x3f   : > { %4927 = vst [vmem:[#allocation69_spill] sm:$0xff] %v2950_v21 }
  0x40   : > { %v457_v55 = vadd.f32 %v456_v28, %v455_v43  ;;  %4924 = vst [vmem:[#allocation66_spill] sm:$0xff] %v2932_v54  ;;  %v2938_v43 = vadd.f32 %v2562_v8, %v265_v23  ;;  %v464_v28 = vsel %vm416_vm1, %v2926_v10, 0.0  ;;  %v2956_v10 = vadd.f32 %v2562_v8, %v268_v0 }
  0x42   : > { %v459_v35 = vadd.f32 %v458_v4, %v457_v55  ;;  %4925 = vst [vmem:[#allocation67_spill] sm:$0xff] %v2938_v43  ;;  %v2944_v55 = vadd.f32 %v2562_v8, %v266_v29  ;;  %v466_v4 = vsel %vm416_vm1, %v2932_v54, 0.0  ;;  %4928 = vst [vmem:[#allocation70_spill] sm:$0xff] %v2956_v10 }
  0x44   : > { %v461_v31 = vadd.f32 %v460_v9, %v459_v35  ;;  %4926 = vst [vmem:[#allocation68_spill] sm:$0xff] %v2944_v55  ;;  %v468_v35 = vsel %vm416_vm1, %v2938_v43, 0.0  ;;  %v269_v9 = vld [vmem:[%s2571_s9 + $0xf0] sm:$0xff] }
  0x45   : > { %v2962_v54 = vadd.f32 %v2562_v8, %v269_v9 }
  0x46   : > { %v463_v30 = vadd.f32 %v462_v22, %v461_v31  ;;  %v470_v31 = vsel %vm416_vm1, %v2944_v55, 0.0  ;;  %v270_v22 = vld [vmem:[%s2571_s9 + $0xf8] sm:$0xff] }
  0x47   : > { %4929 = vst [vmem:[#allocation71_spill] sm:$0xff] %v2962_v54  ;;  %v2968_v43 = vadd.f32 %v2562_v8, %v270_v22 }
  0x48   : > { %v465_v11 = vadd.f32 %v464_v28, %v463_v30  ;;  %v472_v30 = vsel %vm416_vm1, %v2950_v21, 0.0  ;;  %v271_v28 = vld [vmem:[%s2571_s9 + $0x100] sm:$0xff] }
  0x49   : > { %4930 = vst [vmem:[#allocation72_spill] sm:$0xff] %v2968_v43  ;;  %v2973_v0 = vadd.f32 %v2562_v8, %v271_v28  ;;  %v484_v8 = vsel %vm416_vm1, %v2663_v59, 0.0  ;;  %v486_v28 = vsel %vm416_vm1, %v2666_v60, 0.0 }
  0x4a   : > { %v467_v23 = vadd.f32 %v466_v4, %v465_v11  ;;  %v474_v11 = vsel %vm416_vm1, %v2956_v10, 0.0 }
  0x4b   : > { %4931 = vst [vmem:[#allocation73_spill] sm:$0xff] %v2973_v0 }
  0x4c   : > { %v469_v29 = vadd.f32 %v468_v35, %v467_v23  ;;  %v476_v35 = vsel %vm416_vm1, %v2962_v54, 0.0  ;;  %v478_v23 = vsel %vm416_vm1, %v2968_v43, 0.0 }
  0x4e   : > { %v471_v57 = vadd.f32 %v470_v31, %v469_v29  ;;  %v480_v31 = vsel %vm416_vm1, %v2973_v0, 0.0  ;;  %v482_v29 = vsel %vm416_vm1, %v2660_v58, 0.0 }
  0x50   : > { %v473_v4 = vadd.f32 %v472_v30, %v471_v57  ;;  %v593_v57 = vmul.f32 %v2580_v13, %v2580_v13 }
  0x52   : > { %v475_v9 = vadd.f32 %v474_v11, %v473_v4  ;;  %v594_v11 = vmul.f32 %v2583_v14, %v2583_v14  ;;  %v492_v14 = vsel %vm416_vm1, %v2680_v5, 0.0 }
  0x54   : > { %v477_v21 = vadd.f32 %v476_v35, %v475_v9  ;;  %v488_v35 = vsel %vm416_vm1, %v2674_v1, 0.0  ;;  %v596_v9 = vmul.f32 %v2592_v18, %v2592_v18 }
  0x56   : > { %v479_v22 = vadd.f32 %v478_v23, %v477_v21  ;;  %v595_v21 = vmul.f32 %v2586_v15, %v2586_v15  ;;  %v490_v23 = vsel %vm416_vm1, %v2677_v2, 0.0 }
  0x58   : > { %v481_v10 = vadd.f32 %v480_v31, %v479_v22  ;;  %v597_v31 = vmul.f32 %v2603_v27, %v2603_v27  ;;  %v678_v22 = vsel %vm416_vm1, %v593_v57, 0.0  ;;  %v681_v15 = vsel %vm416_vm1, %v595_v21, 0.0 }
  0x59   : > { %v494_v27 = vsel %vm416_vm1, %v2686_v16, 0.0  ;;  %v599_v57 = vmul.f32 %v2617_v37, %v2617_v37 }
  0x5a   : > { %v483_v30 = vadd.f32 %v482_v29, %v481_v10  ;;  %v679_v29 = vsel %vm416_vm1, %v594_v11, 0.0  ;;  %v685_v11 = vsel %vm416_vm1, %v597_v31, 0.0 }
  0x5b   : > { %v689_v31 = vsel %vm416_vm1, %v599_v57, 0.0 }
  0x5c   : > { %v485_v4 = vadd.f32 %v484_v8, %v483_v30  ;;  %v680_v30 = vadd.f32 %v679_v29, %v678_v22  ;;  %v600_v22 = vmul.f32 %v2620_v38, %v2620_v38  ;;  %v498_v29 = vsel %vm416_vm1, %v2692_v19, 0.0 }
  0x5e   : > { %v487_v10 = vadd.f32 %v486_v28, %v485_v4  ;;  %v598_v28 = vmul.f32 %v2614_v36, %v2614_v36  ;;  %v683_v4 = vsel %vm416_vm1, %v596_v9, 0.0  ;;  %v682_v13 = vadd.f32 %v681_v15, %v680_v30 }
  0x5f   : > { %v602_v30 = vmul.f32 %v2628_v41, %v2628_v41 }
  0x60   : > { %v489_v8 = vadd.f32 %v488_v35, %v487_v10  ;;  %v684_v35 = vadd.f32 %v683_v4, %v682_v13  ;;  %v496_v10 = vsel %vm416_vm1, %v2689_v17, 0.0  ;;  %v687_v9 = vsel %vm416_vm1, %v598_v28, 0.0 }
  0x61   : > { %v691_v28 = vsel %vm416_vm1, %v600_v22, 0.0  ;;  %v695_v22 = vsel %vm416_vm1, %v602_v30, 0.0 }
  0x62   : > { %v491_v18 = vadd.f32 %v490_v23, %v489_v8  ;;  %v686_v15 = vadd.f32 %v685_v11, %v684_v35  ;;  %v601_v8 = vmul.f32 %v2625_v40, %v2625_v40  ;;  %v502_v11 = vsel %vm416_vm1, %v2703_v25, 0.0 }
  0x64   : > { %v493_v21 = vadd.f32 %v492_v14, %v491_v18  ;;  %v688_v13 = vadd.f32 %v687_v9, %v686_v15  ;;  %v500_v18 = vsel %vm416_vm1, %v2700_v24, 0.0  ;;  %v693_v57 = vsel %vm416_vm1, %v601_v8, 0.0 }
  0x65   : > { %v504_v9 = vsel %vm416_vm1, %v2706_v26, 0.0 }
  0x66   : > { %v495_v23 = vadd.f32 %v494_v27, %v493_v21  ;;  %v690_v4 = vadd.f32 %v689_v31, %v688_v13  ;;  %v603_v21 = vmul.f32 %v2631_v42, %v2631_v42  ;;  %v506_v31 = vsel %vm416_vm1, %v2712_v32, 0.0 }
  0x68   : > { %v497_v14 = vadd.f32 %v496_v10, %v495_v23  ;;  %v692_v10 = vadd.f32 %v691_v28, %v690_v4  ;;  %v604_v23 = vmul.f32 %v2634_v44, %v2634_v44  ;;  %v697_v8 = vsel %vm416_vm1, %v603_v21, 0.0 }
  0x69   : > { %v508_v28 = vsel %vm416_vm1, %v2715_v33, 0.0 }
  0x6a   : > { %v499_v27 = vadd.f32 %v498_v29, %v497_v14  ;;  %v694_v29 = vadd.f32 %v693_v57, %v692_v10  ;;  %v605_v14 = vmul.f32 %v2637_v45, %v2637_v45  ;;  %v699_v30 = vsel %vm416_vm1, %v604_v23, 0.0 }
  0x6b   : > { %v510_v57 = vsel %vm416_vm1, %v2718_v34, 0.0 }
  0x6c   : > { %v501_v35 = vadd.f32 %v500_v18, %v499_v27  ;;  %v696_v18 = vadd.f32 %v695_v22, %v694_v29  ;;  %v606_v27 = vmul.f32 %v2640_v46, %v2640_v46  ;;  %v701_v21 = vsel %vm416_vm1, %v605_v14, 0.0 }
  0x6d   : > { %v512_v22 = vsel %vm416_vm1, %v2726_v48, 0.0 }
  0x6e   : > { %v503_v15 = vadd.f32 %v502_v11, %v501_v35  ;;  %v698_v11 = vadd.f32 %v697_v8, %v696_v18  ;;  %v607_v35 = vmul.f32 %v2648_v51, %v2648_v51  ;;  %v703_v23 = vsel %vm416_vm1, %v606_v27, 0.0 }
  0x6f   : > { %v514_v8 = vsel %vm416_vm1, %v2729_v49, 0.0 }
  0x70   : > { %v505_v13 = vadd.f32 %v504_v9, %v503_v15  ;;  %v700_v9 = vadd.f32 %v699_v30, %v698_v11  ;;  %v608_v15 = vmul.f32 %v2651_v52, %v2651_v52  ;;  %v705_v14 = vsel %vm416_vm1, %v607_v35, 0.0 }
  0x71   : > { %v516_v30 = vsel %vm416_vm1, %v2732_v50, 0.0 }
  0x72   : > { %v507_v4 = vadd.f32 %v506_v31, %v505_v13  ;;  %v702_v31 = vadd.f32 %v701_v21, %v700_v9  ;;  %v609_v13 = vmul.f32 %v2654_v53, %v2654_v53  ;;  %v707_v27 = vsel %vm416_vm1, %v608_v15, 0.0  ;;  %v4944_v53 = vld [vmem:[#allocation70_spill] sm:$0xff] }
  0x73   : > { %v518_v21 = vsel %vm416_vm1, %v2738_v61, 0.0 }
  0x74   : > { %v509_v10 = vadd.f32 %v508_v28, %v507_v4  ;;  %v704_v28 = vadd.f32 %v703_v23, %v702_v31  ;;  %v610_v4 = vmul.f32 %v2884_v6, %v2884_v6  ;;  %v709_v35 = vsel %vm416_vm1, %v609_v13, 0.0  ;;  %v4942_v6 = vld [vmem:[#allocation69_spill] sm:$0xff] }
  0x75   : > { %v520_v23 = vsel %vm416_vm1, %v2741_v62, 0.0 }
  0x76   : > { %v511_v29 = vadd.f32 %v510_v57, %v509_v10  ;;  %v706_v57 = vadd.f32 %v705_v14, %v704_v28  ;;  %v611_v10 = vmul.f32 %v2890_v56, %v2890_v56  ;;  %v711_v15 = vsel %vm416_vm1, %v610_v4, 0.0  ;;  %v4939_v56 = vld [vmem:[#allocation67_spill] sm:$0xff] }
  0x77   : > { %v522_v14 = vsel %vm416_vm1, %v2744_v63, 0.0 }
  0x78   : > { %v513_v18 = vadd.f32 %v512_v22, %v511_v29  ;;  %v708_v22 = vadd.f32 %v707_v27, %v706_v57  ;;  %v612_v29 = vmul.f32 %v2896_v3, %v2896_v3  ;;  %v713_v13 = vsel %vm416_vm1, %v611_v10, 0.0  ;;  %v4937_v3 = vld [vmem:[#allocation66_spill] sm:$0xff] }
  0x79   : > { %v524_v27 = vsel %vm416_vm1, %v2752_v12, 0.0 }
  0x7a   : > { %v515_v11 = vadd.f32 %v514_v8, %v513_v18  ;;  %v710_v8 = vadd.f32 %v709_v35, %v708_v22  ;;  %v613_v18 = vmul.f32 %v2902_v39, %v2902_v39  ;;  %v715_v4 = vsel %vm416_vm1, %v612_v29, 0.0  ;;  %v4935_v39 = vld [vmem:[#allocation65_spill] sm:$0xff] }
  0x7b   : > { %v526_v35 = vsel %vm416_vm1, %v2755_v20, 0.0 }
  0x7c   : > { %v517_v9 = vadd.f32 %v516_v30, %v515_v11  ;;  %v712_v30 = vadd.f32 %v711_v15, %v710_v8  ;;  %v614_v11 = vmul.f32 %v2908_v7, %v2908_v7  ;;  %v717_v10 = vsel %vm416_vm1, %v613_v18, 0.0  ;;  %v4932_v15 = vld [vmem:[#allocation29_spill] sm:$0xff]  ;;  %v4933_v8 = vld [vmem:[#allocation64_spill] sm:$0xff] }
  0x7d   : > { %v616_v7 = vmul.f32 %v4933_v8, %v4933_v8  ;;  %v618_v8 = vmul.f32 %v4937_v3, %v4937_v3  ;;  %v620_v3 = vmul.f32 %v2944_v55, %v2944_v55  ;;  %v622_v55 = vmul.f32 %v4944_v53, %v4944_v53 }
  0x7e   : > { %v519_v31 = vadd.f32 %v518_v21, %v517_v9  ;;  %v714_v21 = vadd.f32 %v713_v13, %v712_v30  ;;  %v615_v9 = vmul.f32 %v2914_v47, %v2914_v47  ;;  %v719_v29 = vsel %vm416_vm1, %v614_v11, 0.0 }
  0x7f   : > { %v617_v47 = vmul.f32 %v4935_v39, %v4935_v39  ;;  %v723_v11 = vsel %vm416_vm1, %v616_v7, 0.0  ;;  %v619_v39 = vmul.f32 %v4939_v56, %v4939_v56  ;;  %v727_v7 = vsel %vm416_vm1, %v618_v8, 0.0 }
  0x80   : > { %v521_v28 = vadd.f32 %v520_v23, %v519_v31  ;;  %v716_v23 = vadd.f32 %v715_v4, %v714_v21  ;;  %v528_v31 = vsel %vm416_vm1, %v4932_v15, 0.0  ;;  %v721_v18 = vsel %vm416_vm1, %v615_v9, 0.0 }
  0x81   : > { %v725_v9 = vsel %vm416_vm1, %v617_v47, 0.0  ;;  %v621_v56 = vmul.f32 %v4942_v6, %v4942_v6  ;;  %v729_v47 = vsel %vm416_vm1, %v619_v39, 0.0  ;;  %v731_v8 = vsel %vm416_vm1, %v620_v3, 0.0 }
  0x82   : > { %v523_v57 = vadd.f32 %v522_v14, %v521_v28  ;;  %v718_v13 = vadd.f32 %v717_v10, %v716_v23  ;;  %v4934_v28 = vld [vmem:[#allocation30_spill] sm:$0xff]  ;;  %v623_v6 = vmul.f32 %v2962_v54, %v2962_v54  ;;  %v624_v53 = vmul.f32 %v2968_v43, %v2968_v43 }
  0x83   : > { %v530_v30 = vsel %vm416_vm1, %v4934_v28, 0.0  ;;  %v733_v39 = vsel %vm416_vm1, %v621_v56, 0.0  ;;  %v735_v3 = vsel %vm416_vm1, %v622_v55, 0.0  ;;  %v625_v54 = vmul.f32 %v2973_v0, %v2973_v0 }
  0x84   : > { %v525_v22 = vadd.f32 %v524_v27, %v523_v57  ;;  %v720_v4 = vadd.f32 %v719_v29, %v718_v13  ;;  %v4936_v57 = vld [vmem:[#allocation31_spill] sm:$0xff]  ;;  %v737_v56 = vsel %vm416_vm1, %v623_v6, 0.0  ;;  %v626_v43 = vmul.f32 %v2660_v58, %v2660_v58 }
  0x85   : > { %v532_v21 = vsel %vm416_vm1, %v4936_v57, 0.0  ;;  %v739_v55 = vsel %vm416_vm1, %v624_v53, 0.0  ;;  %v627_v0 = vmul.f32 %v2663_v59, %v2663_v59  ;;  %v741_v6 = vsel %vm416_vm1, %v625_v54, 0.0 }
  0x86   : > { %v527_v14 = vadd.f32 %v526_v35, %v525_v22  ;;  %v722_v10 = vadd.f32 %v721_v18, %v720_v4  ;;  %v4938_v22 = vld [vmem:[#allocation32_spill] sm:$0xff]  ;;  %v628_v58 = vmul.f32 %v2666_v60, %v2666_v60  ;;  %v743_v53 = vsel %vm416_vm1, %v626_v43, 0.0 }
  0x87   : > { %v534_v23 = vsel %vm416_vm1, %v4938_v22, 0.0  ;;  %v629_v59 = vmul.f32 %v2674_v1, %v2674_v1  ;;  %v745_v54 = vsel %vm416_vm1, %v627_v0, 0.0  ;;  %v630_v60 = vmul.f32 %v2677_v2, %v2677_v2 }
  0x88   : > { %v529_v27 = vadd.f32 %v528_v31, %v527_v14  ;;  %v724_v29 = vadd.f32 %v723_v11, %v722_v10  ;;  %v4940_v14 = vld [vmem:[#allocation33_spill] sm:$0xff]  ;;  %v747_v43 = vsel %vm416_vm1, %v628_v58, 0.0  ;;  %v631_v1 = vmul.f32 %v2680_v5, %v2680_v5 }
  0x89   : > { %v536_v13 = vsel %vm416_vm1, %v4940_v14, 0.0  ;;  %v749_v0 = vsel %vm416_vm1, %v629_v59, 0.0  ;;  %v632_v2 = vmul.f32 %v2686_v16, %v2686_v16  ;;  %v751_v58 = vsel %vm416_vm1, %v630_v60, 0.0 }
  0x8a   : > { %v531_v35 = vadd.f32 %v530_v30, %v529_v27  ;;  %v726_v18 = vadd.f32 %v725_v9, %v724_v29  ;;  %v4941_v27 = vld [vmem:[#allocation34_spill] sm:$0xff]  ;;  %v633_v5 = vmul.f32 %v2689_v17, %v2689_v17  ;;  %v753_v59 = vsel %vm416_vm1, %v631_v1, 0.0 }
  0x8b   : > { %v538_v4 = vsel %vm416_vm1, %v4941_v27, 0.0  ;;  %v634_v16 = vmul.f32 %v2692_v19, %v2692_v19  ;;  %v755_v60 = vsel %vm416_vm1, %v632_v2, 0.0  ;;  %v635_v17 = vmul.f32 %v2700_v24, %v2700_v24 }
  0x8c   : > { %v533_v31 = vadd.f32 %v532_v21, %v531_v35  ;;  %v728_v11 = vadd.f32 %v727_v7, %v726_v18  ;;  %v4943_v35 = vld [vmem:[#allocation35_spill] sm:$0xff]  ;;  %v757_v1 = vsel %vm416_vm1, %v633_v5, 0.0  ;;  %v636_v19 = vmul.f32 %v2703_v25, %v2703_v25 }
  0x8d   : > { %v540_v10 = vsel %vm416_vm1, %v4943_v35, 0.0  ;;  %v759_v2 = vsel %vm416_vm1, %v634_v16, 0.0  ;;  %v637_v24 = vmul.f32 %v2706_v26, %v2706_v26  ;;  %v761_v5 = vsel %vm416_vm1, %v635_v17, 0.0 }
  0x8e   : > { %v535_v30 = vadd.f32 %v534_v23, %v533_v31  ;;  %v730_v9 = vadd.f32 %v729_v47, %v728_v11  ;;  %v4945_v31 = vld [vmem:[#allocation36_spill] sm:$0xff]  ;;  %v638_v25 = vmul.f32 %v2712_v32, %v2712_v32  ;;  %v763_v16 = vsel %vm416_vm1, %v636_v19, 0.0 }
  0x8f   : > { %v542_v29 = vsel %vm416_vm1, %v4945_v31, 0.0  ;;  %v639_v26 = vmul.f32 %v2715_v33, %v2715_v33  ;;  %v765_v17 = vsel %vm416_vm1, %v637_v24, 0.0  ;;  %v640_v32 = vmul.f32 %v2718_v34, %v2718_v34 }
  0x90   : > { %v537_v21 = vadd.f32 %v536_v13, %v535_v30  ;;  %v732_v7 = vadd.f32 %v731_v8, %v730_v9  ;;  %v4946_v30 = vld [vmem:[#allocation37_spill] sm:$0xff]  ;;  %v767_v19 = vsel %vm416_vm1, %v638_v25, 0.0  ;;  %v641_v33 = vmul.f32 %v2726_v48, %v2726_v48 }
  0x91   : > { %v544_v18 = vsel %vm416_vm1, %v4946_v30, 0.0  ;;  %v769_v24 = vsel %vm416_vm1, %v639_v26, 0.0  ;;  %v642_v34 = vmul.f32 %v2729_v49, %v2729_v49  ;;  %v771_v25 = vsel %vm416_vm1, %v640_v32, 0.0 }
  0x92   : > { %v539_v23 = vadd.f32 %v538_v4, %v537_v21  ;;  %v734_v47 = vadd.f32 %v733_v39, %v732_v7  ;;  %v4947_v21 = vld [vmem:[#allocation38_spill] sm:$0xff]  ;;  %v643_v48 = vmul.f32 %v2732_v50, %v2732_v50  ;;  %v773_v26 = vsel %vm416_vm1, %v641_v33, 0.0 }
  0x93   : > { %v546_v11 = vsel %vm416_vm1, %v4947_v21, 0.0  ;;  %v644_v49 = vmul.f32 %v2738_v61, %v2738_v61  ;;  %v775_v32 = vsel %vm416_vm1, %v642_v34, 0.0  ;;  %v646_v33 = vmul.f32 %v2744_v63, %v2744_v63 }
  0x94   : > { %v541_v13 = vadd.f32 %v540_v10, %v539_v23  ;;  %v736_v8 = vadd.f32 %v735_v3, %v734_v47  ;;  %v4948_v23 = vld [vmem:[#allocation39_spill] sm:$0xff] }
  0x95   : > { %v548_v9 = vsel %vm416_vm1, %v4948_v23, 0.0 }
  0x96   : > { %v543_v4 = vadd.f32 %v542_v29, %v541_v13  ;;  %v738_v39 = vadd.f32 %v737_v56, %v736_v8  ;;  %v4949_v13 = vld [vmem:[#allocation40_spill] sm:$0xff] }
  0x97   : > { %v550_v7 = vsel %vm416_vm1, %v4949_v13, 0.0 }
  0x98   : > { %v545_v10 = vadd.f32 %v544_v18, %v543_v4  ;;  %v740_v3 = vadd.f32 %v739_v55, %v738_v39  ;;  %v4950_v4 = vld [vmem:[#allocation41_spill] sm:$0xff] }
  0x99   : > { %v552_v47 = vsel %vm416_vm1, %v4950_v4, 0.0 }
  0x9a   : > { %v547_v29 = vadd.f32 %v546_v11, %v545_v10  ;;  %v742_v56 = vadd.f32 %v741_v6, %v740_v3  ;;  %v4951_v10 = vld [vmem:[#allocation42_spill] sm:$0xff] }
  0x9b   : > { %v554_v8 = vsel %vm416_vm1, %v4951_v10, 0.0 }
  0x9c   : > { %v549_v18 = vadd.f32 %v548_v9, %v547_v29  ;;  %v744_v55 = vadd.f32 %v743_v53, %v742_v56  ;;  %v4952_v29 = vld [vmem:[#allocation43_spill] sm:$0xff] }
  0x9d   : > { %v556_v39 = vsel %vm416_vm1, %v4952_v29, 0.0 }
  0x9e   : > { %v551_v11 = vadd.f32 %v550_v7, %v549_v18  ;;  %v746_v6 = vadd.f32 %v745_v54, %v744_v55  ;;  %v4953_v18 = vld [vmem:[#allocation44_spill] sm:$0xff] }
  0x9f   : > { %v558_v3 = vsel %vm416_vm1, %v4953_v18, 0.0 }
  0xa0   : > { %v553_v9 = vadd.f32 %v552_v47, %v551_v11  ;;  %v748_v53 = vadd.f32 %v747_v43, %v746_v6  ;;  %v4954_v11 = vld [vmem:[#allocation45_spill] sm:$0xff] }
  0xa1   : > { %v560_v56 = vsel %vm416_vm1, %v4954_v11, 0.0 }
  0xa2   : > { %v555_v7 = vadd.f32 %v554_v8, %v553_v9  ;;  %v750_v54 = vadd.f32 %v749_v0, %v748_v53  ;;  %v4955_v9 = vld [vmem:[#allocation46_spill] sm:$0xff] }
  0xa3   : > { %v562_v55 = vsel %vm416_vm1, %v4955_v9, 0.0 }
  0xa4   : > { %v557_v47 = vadd.f32 %v556_v39, %v555_v7  ;;  %v752_v43 = vadd.f32 %v751_v58, %v750_v54  ;;  %v4956_v7 = vld [vmem:[#allocation47_spill] sm:$0xff] }
  0xa5   : > { %v564_v6 = vsel %vm416_vm1, %v4956_v7, 0.0 }
  0xa6   : > { %v559_v8 = vadd.f32 %v558_v3, %v557_v47  ;;  %v754_v0 = vadd.f32 %v753_v59, %v752_v43  ;;  %v4957_v47 = vld [vmem:[#allocation48_spill] sm:$0xff] }
  0xa7   : > { %v566_v53 = vsel %vm416_vm1, %v4957_v47, 0.0 }
  0xa8   : > { %v561_v39 = vadd.f32 %v560_v56, %v559_v8  ;;  %v756_v58 = vadd.f32 %v755_v60, %v754_v0  ;;  %v4958_v8 = vld [vmem:[#allocation49_spill] sm:$0xff] }
  0xa9   : > { %v568_v54 = vsel %vm416_vm1, %v4958_v8, 0.0 }
  0xaa   : > { %v563_v3 = vadd.f32 %v562_v55, %v561_v39  ;;  %v758_v59 = vadd.f32 %v757_v1, %v756_v58  ;;  %v4959_v39 = vld [vmem:[#allocation50_spill] sm:$0xff] }
  0xab   : > { %v570_v43 = vsel %vm416_vm1, %v4959_v39, 0.0 }
  0xac   : > { %v565_v56 = vadd.f32 %v564_v6, %v563_v3  ;;  %v760_v60 = vadd.f32 %v759_v2, %v758_v59  ;;  %v4960_v3 = vld [vmem:[#allocation51_spill] sm:$0xff] }
  0xad   : > { %v572_v0 = vsel %vm416_vm1, %v4960_v3, 0.0 }
  0xae   : > { %v567_v55 = vadd.f32 %v566_v53, %v565_v56  ;;  %v762_v1 = vadd.f32 %v761_v5, %v760_v60  ;;  %v4961_v56 = vld [vmem:[#allocation52_spill] sm:$0xff] }
  0xaf   : > { %v574_v58 = vsel %vm416_vm1, %v4961_v56, 0.0 }
  0xb0   : > { %v569_v6 = vadd.f32 %v568_v54, %v567_v55  ;;  %v764_v2 = vadd.f32 %v763_v16, %v762_v1  ;;  %v4962_v55 = vld [vmem:[#allocation53_spill] sm:$0xff] }
  0xb1   : > { %v576_v59 = vsel %vm416_vm1, %v4962_v55, 0.0 }
  0xb2   : > { %v571_v53 = vadd.f32 %v570_v43, %v569_v6  ;;  %v766_v5 = vadd.f32 %v765_v17, %v764_v2  ;;  %v4963_v6 = vld [vmem:[#allocation54_spill] sm:$0xff] }
  0xb3   : > { %v578_v60 = vsel %vm416_vm1, %v4963_v6, 0.0 }
  0xb4   : > { %v573_v54 = vadd.f32 %v572_v0, %v571_v53  ;;  %v768_v16 = vadd.f32 %v767_v19, %v766_v5  ;;  %v4964_v53 = vld [vmem:[#allocation55_spill] sm:$0xff] }
  0xb5   : > { %v580_v1 = vsel %vm416_vm1, %v4964_v53, 0.0 }
  0xb6   : > { %v575_v43 = vadd.f32 %v574_v58, %v573_v54  ;;  %v770_v17 = vadd.f32 %v769_v24, %v768_v16  ;;  %v4965_v54 = vld [vmem:[#allocation56_spill] sm:$0xff]  ;;  %v777_v16 = vsel %vm416_vm1, %v643_v48, 0.0  ;;  %v783_v48 = vsel %vm416_vm1, %v646_v33, 0.0 }
  0xb7   : > { %v582_v2 = vsel %vm416_vm1, %v4965_v54, 0.0 }
  0xb8   : > { %v577_v0 = vadd.f32 %v576_v59, %v575_v43  ;;  %v772_v19 = vadd.f32 %v771_v25, %v770_v17  ;;  %v4966_v43 = vld [vmem:[#allocation57_spill] sm:$0xff]  ;;  %v647_v17 = vmul.f32 %v2752_v12, %v2752_v12 }
  0xb9   : > { %v585_v5 = vsel %vm584_vm2, %v4966_v43, 0.0 }
  0xba   : > { %v579_v58 = vadd.f32 %v578_v60, %v577_v0  ;;  %v774_v24 = vadd.f32 %v773_v26, %v772_v19  ;;  %v645_v0 = vmul.f32 %v2741_v62, %v2741_v62 }
  0xbc   : > { %v581_v59 = vadd.f32 %v580_v1, %v579_v58  ;;  %v776_v52 = vadd.f32 %v775_v32, %v774_v24  ;;  %v779_v1 = vsel %vm416_vm1, %v644_v49, 0.0  ;;  %v781_v34 = vsel %vm416_vm1, %v645_v0, 0.0 }
  0xbd   : > { %v649_v32 = vmul.f32 %v4932_v15, %v4932_v15  ;;  %v785_v49 = vsel %vm416_vm1, %v647_v17, 0.0  ;;  %v650_v24 = vmul.f32 %v4934_v28, %v4934_v28  ;;  %v1173_v17 = vlaneseq }
  0xbe   : > { %v583_v60 = vadd.f32 %v582_v2, %v581_v59  ;;  %v778_v58 = vadd.f32 %v777_v16, %v776_v52  ;;  %v648_v59 = vmul.f32 %v2755_v20, %v2755_v20 }
  0xbf   : > { %v789_v33 = vsel %vm416_vm1, %v649_v32, 0.0 }
  0xc0   : > { %v586_v50 = vadd.f32 %v585_v5, %v583_v60  ;;  %v780_v26 = vadd.f32 %v779_v1, %v778_v58  ;;  %v651_v1 = vmul.f32 %v4936_v57, %v4936_v57 }
  0xc2   : > { %v587_v25 = vrot.slane %v586_v50, 4  ;;  %v782_v5 = vadd.f32 %v781_v34, %v780_v26  ;;  %v652_v34 = vmul.f32 %v4938_v22, %v4938_v22 }
  0xc4   : > { %v588_v2 = vadd.f32 %v587_v25, %v586_v50  ;;  %v784_v60 = vadd.f32 %v783_v48, %v782_v5  ;;  %v787_v50 = vsel %vm416_vm1, %v648_v59, 0.0  ;;  %v653_v59 = vmul.f32 %v4940_v14, %v4940_v14 }
  0xc5   : > { %v793_v48 = vsel %vm416_vm1, %v651_v1, 0.0  ;;  %v4970_v5 = vmov 0.0   ;;  %v656_v1 = vmul.f32 %v4945_v31, %v4945_v31 }
  0xc6   : > { %v589_v19 = vrot.slane %v588_v2, 2  ;;  %v786_v16 = vadd.f32 %v785_v49, %v784_v60  ;;  %v4971_v49 = vmov 0.0|0.0   ;;  %v795_v60 = vsel %vm416_vm1, %v652_v34, 0.0 }
  0xc8   : > { %v590_v52 = vadd.f32 %v589_v19, %v588_v2  ;;  %v788_v58 = vadd.f32 %v787_v50, %v786_v16  ;;  %v791_v2 = vsel %vm416_vm1, %v650_v24, 0.0  ;;  %v4969_v19 = vld [vmem:[#allocation2_spill] sm:$0xff]  ;;  %v655_v50 = vmul.f32 %v4943_v35, %v4943_v35 }
  0xca   : > { %v591_v0 = vrot.slane %v590_v52, 1  ;;  %v790_v26 = vadd.f32 %v789_v33, %v788_v58  ;;  %v657_v58 = vmul.f32 %v4946_v30, %v4946_v30 }
  0xcc   : > { %v592_v25 = vadd.f32 %v591_v0, %v590_v52  ;;  %v792_v32 = vadd.f32 %v791_v2, %v790_v26  ;;  %v654_v52 = vmul.f32 %v4941_v27, %v4941_v27  ;;  %v797_v0 = vsel %vm416_vm1, %v653_v59, 0.0  ;;  %v4972_v26 = vld [vmem:[#allocation3_spill] sm:$0xff] }
  0xcd   : > { %v801_v2 = vsel %vm416_vm1, %v655_v50, 0.0  ;;  %v658_v59 = vmul.f32 %v4947_v21, %v4947_v21  ;;  %v660_v50 = vmul.f32 %v4949_v13, %v4949_v13 }
  0xce   : > { %2063 = vmatmul.mubr.msk.f32.vlgmr.msra.gmra.mrb[0].mxu0 %vm416_vm1, %v592_v25  ;;  %v794_v24 = vadd.f32 %v793_v48, %v792_v32  ;;  %v799_v33 = vsel %vm416_vm1, %v654_v52, 0.0  ;;  %v803_v48 = vsel %vm416_vm1, %v656_v1, 0.0  ;;  %v659_v52 = vmul.f32 %v4948_v23, %v4948_v23 }
  0xcf   : > { %2113 = vmatpush3.bf16.xpose.msk.msra.mxu0 %vm3262_vm3, %v4969_v19  ;;  %2084 = vmatprep.mubr.msk.f32.mxu0 %vm2489_vm0, %v4970_v5  ;;  %v662_v1 = vmul.f32 %v4951_v10, %v4951_v10 }
  0xd0   : > { %2114 = vmatprep.subr.bf16.mxu0 %v4971_v49  ;;  %v796_v16 = vadd.f32 %v795_v60, %v794_v24  ;;  %v805_v60 = vsel %vm416_vm1, %v657_v58, 0.0  ;;  %v663_v58 = vmul.f32 %v4952_v29, %v4952_v29 }
  0xd2   : > { %v798_v25 = vadd.f32 %v797_v0, %v796_v16  ;;  %v807_v0 = vsel %vm416_vm1, %v658_v59, 0.0  ;;  %v664_v59 = vmul.f32 %v4953_v18, %v4953_v18 }
  0xd4   : > { %v800_v34 = vadd.f32 %v799_v33, %v798_v25  ;;  %v661_v33 = vmul.f32 %v4950_v4, %v4950_v4  ;;  %v809_v25 = vsel %vm416_vm1, %v659_v52, 0.0  ;;  %v665_v52 = vmul.f32 %v4954_v11, %v4954_v11 }
  0xd6   : > { %v802_v32 = vadd.f32 %v801_v2, %v800_v34  ;;  %v811_v2 = vsel %vm416_vm1, %v660_v50, 0.0  ;;  %v819_v50 = vsel %vm416_vm1, %v664_v59, 0.0  ;;  %v670_v59 = vmul.f32 %v4959_v39, %v4959_v39 }
  0xd7   : > { %2117 = vmatpush3.bf16.xpose.msk.msra.mxu0 %vm3262_vm3, %v4972_v26 }
  0xd8   : > { %v804_v24 = vadd.f32 %v803_v48, %v802_v32  ;;  %v813_v48 = vsel %vm416_vm1, %v661_v33, 0.0  ;;  %v667_v33 = vmul.f32 %v4956_v7, %v4956_v7 }
  0xda   : > { %v806_v16 = vadd.f32 %v805_v60, %v804_v24  ;;  %v815_v60 = vsel %vm416_vm1, %v662_v1, 0.0  ;;  %v668_v1 = vmul.f32 %v4957_v47, %v4957_v47 }
  0xdc   : > { %v808_v21 = vadd.f32 %v807_v0, %v806_v16  ;;  %v817_v0 = vsel %vm416_vm1, %v663_v58, 0.0  ;;  %v669_v58 = vmul.f32 %v4958_v8, %v4958_v8 }
  0xde   : > { %v810_v34 = vadd.f32 %v809_v25, %v808_v21  ;;  %v666_v21 = vmul.f32 %v4955_v9, %v4955_v9 }
  0xe0   : > { %v812_v32 = vadd.f32 %v811_v2, %v810_v34  ;;  %v821_v2 = vsel %vm416_vm1, %v665_v52, 0.0  ;;  %v671_v52 = vmul.f32 %v4960_v3, %v4960_v3 }
  0xe2   : > { %v814_v24 = vadd.f32 %v813_v48, %v812_v32  ;;  %v823_v48 = vsel %vm416_vm1, %v666_v21, 0.0  ;;  %v672_v21 = vmul.f32 %v4961_v56, %v4961_v56 }
  0xe4   : > { %v816_v16 = vadd.f32 %v815_v60, %v814_v24  ;;  %v825_v60 = vsel %vm416_vm1, %v667_v33, 0.0  ;;  %v673_v33 = vmul.f32 %v4962_v55, %v4962_v55 }
  0xe6   : > { %v818_v25 = vadd.f32 %v817_v0, %v816_v16  ;;  %v827_v0 = vsel %vm416_vm1, %v668_v1, 0.0  ;;  %v674_v1 = vmul.f32 %v4963_v6, %v4963_v6 }
  0xe8   : > { %v820_v34 = vadd.f32 %v819_v50, %v818_v25  ;;  %v829_v50 = vsel %vm416_vm1, %v669_v58, 0.0  ;;  %v675_v58 = vmul.f32 %v4964_v53, %v4964_v53 }
  0xea   : > { %v822_v32 = vadd.f32 %v821_v2, %v820_v34  ;;  %v831_v2 = vsel %vm416_vm1, %v670_v59, 0.0  ;;  %v676_v59 = vmul.f32 %v4965_v54, %v4965_v54 }
  0xec   : > { %v824_v24 = vadd.f32 %v823_v48, %v822_v32  ;;  %v833_v48 = vsel %vm416_vm1, %v671_v52, 0.0  ;;  %v677_v52 = vmul.f32 %v4966_v43, %v4966_v43 }
  0xee   : > { %v826_v16 = vadd.f32 %v825_v60, %v824_v24  ;;  %v835_v60 = vsel %vm416_vm1, %v672_v21, 0.0  ;;  %v843_v21 = vsel %vm416_vm1, %v676_v59, 0.0 }
  0xf0   : > { %v828_v25 = vadd.f32 %v827_v0, %v826_v16  ;;  %v837_v0 = vsel %vm416_vm1, %v673_v33, 0.0 }
  0xf2   : > { %v830_v34 = vadd.f32 %v829_v50, %v828_v25  ;;  %v839_v50 = vsel %vm416_vm1, %v674_v1, 0.0 }
  0xf4   : > { %v832_v32 = vadd.f32 %v831_v2, %v830_v34  ;;  %v841_v2 = vsel %vm416_vm1, %v675_v58, 0.0 }
  0xf6   : > { %v834_v24 = vadd.f32 %v833_v48, %v832_v32  ;;  %v845_v32 = vsel %vm584_vm2, %v677_v52, 0.0  ;;  %v1168_v52 = vld [vmem:[%s4681_s2] sm:$0x1] }
  0xf8   : > { %v836_v16 = vadd.f32 %v835_v60, %v834_v24 }
  0xfa   : > { %v838_v25 = vadd.f32 %v837_v0, %v836_v16 }
  0xfc   : > { %v840_v34 = vadd.f32 %v839_v50, %v838_v25 }
  0xfe   : > { %v842_v48 = vadd.f32 %v841_v2, %v840_v34 }
 0x100   : > { %v844_v53 = vadd.f32 %v843_v21, %v842_v48 }
 0x102   : > { %v846_v33 = vadd.f32 %v845_v32, %v844_v53  ;;  %v3377_v32 = vld [vmem:[%s4682_s3] sm:$0x1] }
 0x104   : > { %v847_v60 = vrot.slane %v846_v33, 4 }
 0x106   : > { %v848_v24 = vadd.f32 %v847_v60, %v846_v33 }
 0x108   : > { %v849_v6 = vrot.slane %v848_v24, 2 }
 0x10a   : > { %v850_v54 = vadd.f32 %v849_v6, %v848_v24  ;;  %v4991_v24 = vld [vmem:[#allocation65_spill] sm:$0xff] }
 0x10c   : > { %v851_v55 = vrot.slane %v850_v54, 1 }
 0x10e   : > { %v852_v1 = vadd.f32 %v851_v55, %v850_v54 }
 0x110   : > { %2074 = vmatmul.mubr.msk.f32.vlgmr.msra.gmra.mrb[0].mxu1 %vm416_vm1, %v852_v1  ;;  %v4973_v1 = vld [vmem:[#allocation4_spill] sm:$0xff] }
 0x111   : > { %2121 = vmatpush3.bf16.xpose.msk.msra.mxu1 %vm3262_vm3, %v4969_v19  ;;  %2095 = vmatprep.mubr.msk.f32.mxu1 %vm2489_vm0, %v4970_v5 }
 0x112   : > { %2122 = vmatprep.subr.bf16.mxu1 %v4971_v49 }
 0x119   : > { %2125 = vmatpush3.bf16.xpose.msk.msra.mxu1 %vm3262_vm3, %v4972_v26  ;;  %v3368_v26 = vshrl.u32 %v1173_v17, 7 }
 0x11b   : > { %v4774_v2 = vsub.s32 0, %v3368_v26 }
 0x1a1   : > { %v926_v53 = vpop.f32.mrb[0].mxu0 }
 0x1a2   : > { %v930_v58 = vmul.f32 0.00147929, %v926_v53  ;;  %v2064_v6 = vpop.f32.mrb[1].mxu0 }
 0x1a4   : > { %2085 = vmatmul.mubr.msk.f32.vlgmr.msra.gmra.mrb[2].mxu0 %vm416_vm1, %v930_v58  ;;  %v1005_v55 = vmul.f32 %v930_v58, %v930_v58  ;;  %v4974_v58 = vld [vmem:[#allocation5_spill] sm:$0xff] }
 0x1e3   : > { %v1000_v54 = vpop.f32.mrb[0].mxu1 }
 0x1e4   : > { %v1004_v0 = vmul.f32 0.00147929, %v1000_v54  ;;  %v2075_v16 = vpop.f32.mrb[1].mxu1 }
 0x1e6   : > { %v1006_v59 = vsub.f32 %v1004_v0, %v1005_v55  ;;  %v4975_v55 = vld [vmem:[#allocation6_spill] sm:$0xff]  ;;  %v4976_v0 = vld [vmem:[#allocation7_spill] sm:$0xff] }
 0x1e8   : > { %v1007_v19 = vmax.f32 %v1006_v59, 0.0  ;;  %v4977_v59 = vld [vmem:[#allocation8_spill] sm:$0xff] }
 0x1ea   : > { %v1008_v50 = vadd.f32 1e-05, %v1007_v19 }
 0x1ec   : > { %2138 = vrsqrt.f32 %v1008_v50 }
 0x1f6   : > { %v2139_v5 = vpop.eup %2138 }
 0x1f7   : > { %2096 = vmatmul.mubr.msk.f32.vlgmr.msra.gmra.mrb[2].mxu1 %vm416_vm1, %v2139_v5 }
 0x277   : > { %v1091_v49 = vpop.f32.mrb[2].mxu0 }
 0x278   : > { %v2086_v25 = vpop.f32.mrb[3].mxu0 }
 0x2ca   : > { %v1164_v34 = vpop.f32.mrb[2].mxu1 }
 0x2cb   : > { %v1169_v21 = vmul.f32 %v1168_v52, %v1164_v34  ;;  %v2097_v48 = vpop.f32.mrb[3].mxu1  ;;  %v4978_v52 = vld [vmem:[#allocation9_spill] sm:$0xff]  ;;  %v4979_v34 = vld [vmem:[#allocation10_spill] sm:$0xff] }
 0x2cc   : > { %v4981_v48 = vld [vmem:[#allocation59_spill] sm:$0xff] }
 0x2cd   : > { %v3379_v33 = vmul.f32 %v1169_v21, %v1091_v49  ;;  %v3383_v60 = vrot.slane %v1169_v21, %v4774_v2  ;;  %v4980_v21 = vld [vmem:[#allocation58_spill] sm:$0xff] }
 0x2ce   : > { %v4993_v2 = vld [vmem:[#allocation66_spill] sm:$0xff] }
 0x2cf   : > { %v3389_v53 = vmul.f32 %v3383_v60, %v4973_v1  ;;  %v3393_v6 = vmul.f32 %v3383_v60, %v4974_v58  ;;  %v3397_v54 = vmul.f32 %v3383_v60, %v4975_v55  ;;  %v3401_v16 = vmul.f32 %v3383_v60, %v4976_v0  ;;  %v4982_v1 = vld [vmem:[#allocation60_spill] sm:$0xff]  ;;  %v4983_v58 = vld [vmem:[#allocation61_spill] sm:$0xff]  ;;  %v4985_v0 = vld [vmem:[#allocation62_spill] sm:$0xff] }
 0x2d0   : > { %v3405_v19 = vmul.f32 %v3383_v60, %v4977_v59  ;;  %v3409_v50 = vmul.f32 %v3383_v60, %v2614_v36  ;;  %v3413_v5 = vmul.f32 %v3383_v60, %v2617_v37  ;;  %v3417_v49 = vmul.f32 %v3383_v60, %v2620_v38 }
 0x2d1   : > { %v3421_v25 = vmul.f32 %v3383_v60, %v2625_v40  ;;  %v3425_v17 = vmul.f32 %v3383_v60, %v2628_v41  ;;  %v3429_v36 = vmul.f32 %v3383_v60, %v2631_v42  ;;  %v3433_v37 = vmul.f32 %v3383_v60, %v2634_v44 }
 0x2d2   : > { %v3437_v38 = vmul.f32 %v3383_v60, %v2637_v45  ;;  %v3441_v40 = vmul.f32 %v3383_v60, %v2640_v46  ;;  %v3445_v41 = vmul.f32 %v3383_v60, %v2648_v51  ;;  %v3449_v42 = vmul.f32 %v3383_v60, %v4978_v52  ;;  %v4987_v52 = vld [vmem:[#allocation63_spill] sm:$0xff] }
 0x2d3   : > { %v3453_v44 = vmul.f32 %v3383_v60, %v4979_v34  ;;  %v3457_v45 = vmul.f32 %v3383_v60, %v4980_v21  ;;  %v3461_v46 = vmul.f32 %v3383_v60, %v4981_v48  ;;  %v3465_v51 = vmul.f32 %v3383_v60, %v4982_v1  ;;  %v4989_v21 = vld [vmem:[#allocation64_spill] sm:$0xff] }
 0x2d4   : > { %v3469_v55 = vmul.f32 %v3383_v60, %v4983_v58  ;;  %v3473_v59 = vmul.f32 %v3383_v60, %v4985_v0  ;;  %v3477_v34 = vmul.f32 %v3383_v60, %v4987_v52  ;;  %v3481_v48 = vmul.f32 %v3383_v60, %v4989_v21 }
 0x2d5   : > { %v3485_v1 = vmul.f32 %v3383_v60, %v4991_v24  ;;  %v3489_v58 = vmul.f32 %v3383_v60, %v4993_v2 }
 0x2d6   : > { %4984 = vst [vmem:[#allocation29_spill] sm:$0xff] %v3469_v55  ;;  %4986 = vst [vmem:[#allocation30_spill] sm:$0xff] %v3473_v59  ;;  %v4995_v55 = vld [vmem:[#allocation67_spill] sm:$0xff]  ;;  %v4997_v59 = vld [vmem:[#allocation68_spill] sm:$0xff] }
 0x2d7   : > { %4988 = vst [vmem:[#allocation31_spill] sm:$0xff] %v3477_v34  ;;  %4990 = vst [vmem:[#allocation32_spill] sm:$0xff] %v3481_v48  ;;  %v3493_v0 = vmul.f32 %v3383_v60, %v4995_v55  ;;  %v3497_v52 = vmul.f32 %v3383_v60, %v4997_v59  ;;  %v4999_v34 = vld [vmem:[#allocation69_spill] sm:$0xff]  ;;  %v5001_v48 = vld [vmem:[#allocation70_spill] sm:$0xff] }
 0x2d8   : > { %4992 = vst [vmem:[#allocation33_spill] sm:$0xff] %v3485_v1  ;;  %4994 = vst [vmem:[#allocation34_spill] sm:$0xff] %v3489_v58  ;;  %v3501_v21 = vmul.f32 %v3383_v60, %v4999_v34  ;;  %v3505_v24 = vmul.f32 %v3383_v60, %v5001_v48  ;;  %v5003_v1 = vld [vmem:[#allocation71_spill] sm:$0xff]  ;;  %v5005_v58 = vld [vmem:[#allocation72_spill] sm:$0xff] }
 0x2d9   : > { %4996 = vst [vmem:[#allocation35_spill] sm:$0xff] %v3493_v0  ;;  %4998 = vst [vmem:[#allocation36_spill] sm:$0xff] %v3497_v52  ;;  %v3509_v2 = vmul.f32 %v3383_v60, %v5003_v1  ;;  %v3513_v55 = vmul.f32 %v3383_v60, %v5005_v58  ;;  %v5007_v0 = vld [vmem:[#allocation73_spill] sm:$0xff]  ;;  %v5009_v52 = vld [vmem:[#allocation11_spill] sm:$0xff] }
 0x2da   : > { %5000 = vst [vmem:[#allocation37_spill] sm:$0xff] %v3501_v21  ;;  %5002 = vst [vmem:[#allocation39_spill] sm:$0xff] %v3505_v24  ;;  %v3517_v59 = vmul.f32 %v3383_v60, %v5007_v0  ;;  %v3521_v34 = vmul.f32 %v3383_v60, %v5009_v52  ;;  %v5011_v21 = vld [vmem:[#allocation12_spill] sm:$0xff]  ;;  %v5013_v24 = vld [vmem:[#allocation13_spill] sm:$0xff] }
 0x2db   : > { %5004 = vst [vmem:[#allocation40_spill] sm:$0xff] %v3509_v2  ;;  %5006 = vst [vmem:[#allocation41_spill] sm:$0xff] %v3513_v55  ;;  %v3525_v48 = vmul.f32 %v3383_v60, %v5011_v21  ;;  %v3529_v1 = vmul.f32 %v3383_v60, %v5013_v24  ;;  %v5015_v2 = vld [vmem:[#allocation14_spill] sm:$0xff]  ;;  %v5017_v55 = vld [vmem:[#allocation15_spill] sm:$0xff] }
 0x2dc   : > { %5008 = vst [vmem:[#allocation42_spill] sm:$0xff] %v3517_v59  ;;  %5010 = vst [vmem:[#allocation43_spill] sm:$0xff] %v3521_v34  ;;  %v3533_v58 = vmul.f32 %v3383_v60, %v5015_v2  ;;  %v3537_v0 = vmul.f32 %v3383_v60, %v5017_v55  ;;  %v5019_v59 = vld [vmem:[#allocation16_spill] sm:$0xff]  ;;  %v5021_v34 = vld [vmem:[#allocation17_spill] sm:$0xff] }
 0x2dd   : > { %5012 = vst [vmem:[#allocation44_spill] sm:$0xff] %v3525_v48  ;;  %5014 = vst [vmem:[#allocation45_spill] sm:$0xff] %v3529_v1  ;;  %v3541_v52 = vmul.f32 %v3383_v60, %v5019_v59  ;;  %v3545_v21 = vmul.f32 %v3383_v60, %v5021_v34  ;;  %v5023_v48 = vld [vmem:[#allocation18_spill] sm:$0xff]  ;;  %v5025_v1 = vld [vmem:[#allocation19_spill] sm:$0xff] }
 0x2de   : > { %5016 = vst [vmem:[#allocation46_spill] sm:$0xff] %v3533_v58  ;;  %5018 = vst [vmem:[#allocation47_spill] sm:$0xff] %v3537_v0  ;;  %v3549_v24 = vmul.f32 %v3383_v60, %v5023_v48  ;;  %v3553_v2 = vmul.f32 %v3383_v60, %v5025_v1  ;;  %v5027_v58 = vld [vmem:[#allocation20_spill] sm:$0xff]  ;;  %v5029_v0 = vld [vmem:[#allocation21_spill] sm:$0xff] }
 0x2df   : > { %5020 = vst [vmem:[#allocation48_spill] sm:$0xff] %v3541_v52  ;;  %5022 = vst [vmem:[#allocation49_spill] sm:$0xff] %v3545_v21  ;;  %v3557_v55 = vmul.f32 %v3383_v60, %v5027_v58  ;;  %v3561_v59 = vmul.f32 %v3383_v60, %v5029_v0  ;;  %v5031_v52 = vld [vmem:[#allocation22_spill] sm:$0xff]  ;;  %v5033_v21 = vld [vmem:[#allocation23_spill] sm:$0xff] }
 0x2e0   : > { %5024 = vst [vmem:[#allocation50_spill] sm:$0xff] %v3549_v24  ;;  %5026 = vst [vmem:[#allocation51_spill] sm:$0xff] %v3553_v2  ;;  %v3565_v34 = vmul.f32 %v3383_v60, %v5031_v52  ;;  %v3569_v48 = vmul.f32 %v3383_v60, %v5033_v21  ;;  %v5034_v24 = vld [vmem:[#allocation24_spill] sm:$0xff]  ;;  %v5035_v2 = vld [vmem:[#allocation25_spill] sm:$0xff] }
 0x2e1   : > { %5028 = vst [vmem:[#allocation52_spill] sm:$0xff] %v3557_v55  ;;  %5030 = vst [vmem:[#allocation57_spill] sm:$0xff] %v3561_v59  ;;  %v3573_v1 = vmul.f32 %v3383_v60, %v5034_v24  ;;  %v3577_v58 = vmul.f32 %v3383_v60, %v5035_v2  ;;  %v5036_v55 = vld [vmem:[#allocation26_spill] sm:$0xff]  ;;  %v5037_v59 = vld [vmem:[#allocation27_spill] sm:$0xff]  ;;  %v3593_v24 = vmul.f32 %v3383_v60, %v2738_v61 }
 0x2e2   : > { %5032 = vst [vmem:[#allocation2_spill] sm:$0xff] %v3565_v34  ;;  %v3581_v0 = vmul.f32 %v3383_v60, %v5036_v55  ;;  %v3585_v52 = vmul.f32 %v3383_v60, %v5037_v59  ;;  %v5038_v34 = vld [vmem:[#allocation28_spill] sm:$0xff]  ;;  %v3597_v2 = vmul.f32 %v3383_v60, %v2741_v62  ;;  %v3601_v55 = vmul.f32 %v3383_v60, %v2744_v63 }
 0x2e3   : > { %v3589_v21 = vmul.f32 %v3383_v60, %v5038_v34  ;;  %v3605_v59 = vmul.f32 %v3383_v60, %v2752_v12  ;;  %v3609_v34 = vmul.f32 %v3383_v60, %v2755_v20  ;;  %v3613_v61 = vmul.f32 %v3383_v60, %v4932_v15 }
 0x2e4   : > { %v3617_v62 = vmul.f32 %v3383_v60, %v4934_v28  ;;  %v3621_v63 = vmul.f32 %v3383_v60, %v4936_v57  ;;  %v3625_v12 = vmul.f32 %v3383_v60, %v4938_v22  ;;  %v3629_v20 = vmul.f32 %v3383_v60, %v4940_v14 }
 0x2e5   : > { %v3633_v15 = vmul.f32 %v3383_v60, %v4941_v27  ;;  %v3637_v28 = vmul.f32 %v3383_v60, %v4943_v35  ;;  %v3641_v57 = vmul.f32 %v3383_v60, %v4945_v31  ;;  %v3645_v22 = vmul.f32 %v3383_v60, %v4946_v30 }
 0x2e6   : > { %5039 = vst [vmem:[#allocation3_spill] sm:$0xff] %v3625_v12  ;;  %v5040_v12 = vld [vmem:[#allocation38_spill] sm:$0xff]  ;;  %v3653_v27 = vmul.f32 %v3383_v60, %v4948_v23  ;;  %v3657_v35 = vmul.f32 %v3383_v60, %v4949_v13  ;;  %v3661_v31 = vmul.f32 %v3383_v60, %v4950_v4  ;;  %v3665_v30 = vmul.f32 %v3383_v60, %v4951_v10 }
 0x2e7   : > { %v3649_v14 = vmul.f32 %v3383_v60, %v5040_v12  ;;  %v3669_v12 = vmul.f32 %v3383_v60, %v4952_v29  ;;  %v3673_v23 = vmul.f32 %v3383_v60, %v4953_v18  ;;  %v3677_v13 = vmul.f32 %v3383_v60, %v4954_v11 }
 0x2e8   : > { %v3681_v4 = vmul.f32 %v3383_v60, %v4955_v9  ;;  %v3685_v10 = vmul.f32 %v3383_v60, %v4956_v7  ;;  %v3689_v29 = vmul.f32 %v3383_v60, %v4957_v47  ;;  %v3693_v18 = vmul.f32 %v3383_v60, %v4958_v8 }
 0x2e9   : > { %v3697_v11 = vmul.f32 %v3383_v60, %v4959_v39  ;;  %v3701_v9 = vmul.f32 %v3383_v60, %v4960_v3  ;;  %v3705_v7 = vmul.f32 %v3383_v60, %v4961_v56  ;;  %v5049_v8 = vsub.f32 %v3377_v32, %v3379_v33  ;;  %v5050_v39 = vld [vmem:[#allocation54_spill] sm:$0xff]  ;;  %v5051_v3 = vld [vmem:[#allocation55_spill] sm:$0xff]  ;;  %v5052_v56 = vld [vmem:[#allocation56_spill] sm:$0xff] }
 0x2ea   : > { %5041 = vst [vmem:[#allocation4_spill] sm:$0xff] %v3685_v10  ;;  %5042 = vst [vmem:[#allocation5_spill] sm:$0xff] %v3689_v29  ;;  %v5047_v10 = vld [vmem:[#allocation53_spill] sm:$0xff]  ;;  %v5048_v29 = vsub.s32 0, %v3368_v26  ;;  %v3732_v26 = vmul.f32 %v3383_v60, %v4966_v43 }
 0x2eb   : > { %5043 = vst [vmem:[#allocation6_spill] sm:$0xff] %v3693_v18  ;;  %5044 = vst [vmem:[#allocation7_spill] sm:$0xff] %v3697_v11  ;;  %v3709_v47 = vmul.f32 %v3383_v60, %v5047_v10  ;;  %v3720_v11 = vmul.f32 %v3383_v60, %v5050_v39  ;;  %v5077_v39 = vld [vmem:[#allocation31_spill] sm:$0xff] }
 0x2ec   : > { %5045 = vst [vmem:[#allocation8_spill] sm:$0xff] %v3701_v9  ;;  %5046 = vst [vmem:[#allocation9_spill] sm:$0xff] %v3705_v7  ;;  %v3716_v18 = vrot.slane %v5049_v8, %v5048_v29  ;;  %v3724_v9 = vmul.f32 %v3383_v60, %v5051_v3  ;;  %v3728_v7 = vmul.f32 %v3383_v60, %v5052_v56  ;;  %v5075_v8 = vld [vmem:[#allocation30_spill] sm:$0xff]  ;;  %v5079_v3 = vld [vmem:[#allocation32_spill] sm:$0xff] }
 0x2ed   : > { %v5081_v56 = vld [vmem:[#allocation33_spill] sm:$0xff] }
 0x2ee   : > { %v3736_v32 = vadd.f32 %v3716_v18, %v3389_v53  ;;  %v3740_v33 = vadd.f32 %v3716_v18, %v3393_v6  ;;  %v3744_v10 = vadd.f32 %v3716_v18, %v3397_v54  ;;  %v3748_v29 = vadd.f32 %v3716_v18, %v3401_v16 }
 0x2ef   : > { %v3752_v43 = vadd.f32 %v3716_v18, %v3405_v19  ;;  %v3756_v60 = vadd.f32 %v3716_v18, %v3409_v50  ;;  %v3760_v53 = vadd.f32 %v3716_v18, %v3413_v5  ;;  %v3764_v6 = vadd.f32 %v3716_v18, %v3417_v49 }
 0x2f0   : > { %5053 = vst [vmem:[#allocation10_spill] sm:$0xff] %v3736_v32  ;;  %5054 = vst [vmem:[#allocation58_spill] sm:$0xff] %v3740_v33  ;;  %v3768_v54 = vadd.f32 %v3716_v18, %v3421_v25  ;;  %v3772_v16 = vadd.f32 %v3716_v18, %v3425_v17  ;;  %v3776_v19 = vadd.f32 %v3716_v18, %v3429_v36 }
 0x2f1   : > { %5055 = vst [vmem:[#allocation59_spill] sm:$0xff] %v3744_v10  ;;  %5056 = vst [vmem:[#allocation60_spill] sm:$0xff] %v3748_v29  ;;  %v3780_v50 = vadd.f32 %v3716_v18, %v3433_v37  ;;  %v3784_v5 = vadd.f32 %v3716_v18, %v3437_v38  ;;  %v3788_v49 = vadd.f32 %v3716_v18, %v3441_v40 }
 0x2f2   : > { %5057 = vst [vmem:[#allocation61_spill] sm:$0xff] %v3752_v43  ;;  %5058 = vst [vmem:[#allocation62_spill] sm:$0xff] %v3756_v60  ;;  %v3792_v25 = vadd.f32 %v3716_v18, %v3445_v41  ;;  %v3796_v17 = vadd.f32 %v3716_v18, %v3449_v42  ;;  %v3800_v36 = vadd.f32 %v3716_v18, %v3453_v44  ;;  %v5073_v41 = vld [vmem:[#allocation29_spill] sm:$0xff] }
 0x2f3   : > { %5059 = vst [vmem:[#allocation63_spill] sm:$0xff] %v3760_v53  ;;  %5060 = vst [vmem:[#allocation64_spill] sm:$0xff] %v3764_v6  ;;  %v3804_v37 = vadd.f32 %v3716_v18, %v3457_v45  ;;  %v3808_v38 = vadd.f32 %v3716_v18, %v3461_v46  ;;  %v3812_v40 = vadd.f32 %v3716_v18, %v3465_v51 }
 0x2f4   : > { %5061 = vst [vmem:[#allocation65_spill] sm:$0xff] %v3768_v54  ;;  %5062 = vst [vmem:[#allocation66_spill] sm:$0xff] %v3772_v16  ;;  %v3816_v42 = vadd.f32 %v3716_v18, %v5073_v41  ;;  %v3820_v44 = vadd.f32 %v3716_v18, %v5075_v8  ;;  %v3824_v45 = vadd.f32 %v3716_v18, %v5077_v39 }
 0x2f5   : > { %5063 = vst [vmem:[#allocation67_spill] sm:$0xff] %v3776_v19  ;;  %5064 = vst [vmem:[#allocation68_spill] sm:$0xff] %v3780_v50  ;;  %v3828_v46 = vadd.f32 %v3716_v18, %v5079_v3  ;;  %v3832_v51 = vadd.f32 %v3716_v18, %v5081_v56 }
 0x2f6   : > { %5065 = vst [vmem:[#allocation69_spill] sm:$0xff] %v3784_v5  ;;  %5066 = vst [vmem:[#allocation70_spill] sm:$0xff] %v3788_v49 }
 0x2f7   : > { %5067 = vst [vmem:[#allocation71_spill] sm:$0xff] %v3792_v25  ;;  %5068 = vst [vmem:[#allocation72_spill] sm:$0xff] %v3796_v17 }
 0x2f8   : > { %5069 = vst [vmem:[#allocation73_spill] sm:$0xff] %v3800_v36  ;;  %5070 = vst [vmem:[#allocation11_spill] sm:$0xff] %v3804_v37 }
 0x2f9   : > { %5071 = vst [vmem:[#allocation12_spill] sm:$0xff] %v3808_v38  ;;  %5072 = vst [vmem:[#allocation13_spill] sm:$0xff] %v3812_v40  ;;  %v5083_v40 = vld [vmem:[#allocation34_spill] sm:$0xff] }
 0x2fa   : > { %5074 = vst [vmem:[#allocation14_spill] sm:$0xff] %v3816_v42  ;;  %5076 = vst [vmem:[#allocation15_spill] sm:$0xff] %v3820_v44  ;;  %v3836_v41 = vadd.f32 %v3716_v18, %v5083_v40  ;;  %v5085_v42 = vld [vmem:[#allocation35_spill] sm:$0xff]  ;;  %v5087_v44 = vld [vmem:[#allocation36_spill] sm:$0xff] }
 0x2fb   : > { %5078 = vst [vmem:[#allocation16_spill] sm:$0xff] %v3824_v45  ;;  %5080 = vst [vmem:[#allocation17_spill] sm:$0xff] %v3828_v46  ;;  %v3840_v8 = vadd.f32 %v3716_v18, %v5085_v42  ;;  %v3844_v39 = vadd.f32 %v3716_v18, %v5087_v44  ;;  %v5089_v45 = vld [vmem:[#allocation37_spill] sm:$0xff]  ;;  %v5091_v46 = vld [vmem:[#allocation39_spill] sm:$0xff] }
 0x2fc   : > { %5082 = vst [vmem:[#allocation18_spill] sm:$0xff] %v3832_v51  ;;  %5084 = vst [vmem:[#allocation19_spill] sm:$0xff] %v3836_v41  ;;  %v3848_v3 = vadd.f32 %v3716_v18, %v5089_v45  ;;  %v3852_v56 = vadd.f32 %v3716_v18, %v5091_v46  ;;  %v5093_v51 = vld [vmem:[#allocation40_spill] sm:$0xff]  ;;  %v5095_v41 = vld [vmem:[#allocation41_spill] sm:$0xff] }
 0x2fd   : > { %5086 = vst [vmem:[#allocation20_spill] sm:$0xff] %v3840_v8  ;;  %5088 = vst [vmem:[#allocation21_spill] sm:$0xff] %v3844_v39  ;;  %v3856_v40 = vadd.f32 %v3716_v18, %v5093_v51  ;;  %v3860_v42 = vadd.f32 %v3716_v18, %v5095_v41  ;;  %v5097_v8 = vld [vmem:[#allocation42_spill] sm:$0xff]  ;;  %v5099_v39 = vld [vmem:[#allocation43_spill] sm:$0xff] }
 0x2fe   : > { %5090 = vst [vmem:[#allocation22_spill] sm:$0xff] %v3848_v3  ;;  %5092 = vst [vmem:[#allocation23_spill] sm:$0xff] %v3852_v56  ;;  %v3864_v44 = vadd.f32 %v3716_v18, %v5097_v8  ;;  %v3868_v45 = vadd.f32 %v3716_v18, %v5099_v39  ;;  %v5101_v3 = vld [vmem:[#allocation44_spill] sm:$0xff]  ;;  %v5103_v56 = vld [vmem:[#allocation45_spill] sm:$0xff] }
 0x2ff   : > { %5094 = vst [vmem:[#allocation24_spill] sm:$0xff] %v3856_v40  ;;  %5096 = vst [vmem:[#allocation25_spill] sm:$0xff] %v3860_v42  ;;  %v3872_v46 = vadd.f32 %v3716_v18, %v5101_v3  ;;  %v3876_v51 = vadd.f32 %v3716_v18, %v5103_v56  ;;  %v5105_v40 = vld [vmem:[#allocation46_spill] sm:$0xff]  ;;  %v5107_v42 = vld [vmem:[#allocation47_spill] sm:$0xff] }
 0x300   : > { %5098 = vst [vmem:[#allocation26_spill] sm:$0xff] %v3864_v44  ;;  %5100 = vst [vmem:[#allocation27_spill] sm:$0xff] %v3868_v45  ;;  %v3880_v41 = vadd.f32 %v3716_v18, %v5105_v40  ;;  %v3884_v8 = vadd.f32 %v3716_v18, %v5107_v42  ;;  %v5109_v44 = vld [vmem:[#allocation48_spill] sm:$0xff]  ;;  %v5111_v45 = vld [vmem:[#allocation49_spill] sm:$0xff] }
 0x301   : > { %5102 = vst [vmem:[#allocation28_spill] sm:$0xff] %v3872_v46  ;;  %5104 = vst [vmem:[#allocation38_spill] sm:$0xff] %v3876_v51  ;;  %v3888_v39 = vadd.f32 %v3716_v18, %v5109_v44  ;;  %v3892_v3 = vadd.f32 %v3716_v18, %v5111_v45  ;;  %v5113_v46 = vld [vmem:[#allocation50_spill] sm:$0xff]  ;;  %v5115_v51 = vld [vmem:[#allocation51_spill] sm:$0xff] }
 0x302   : > { %5106 = vst [vmem:[#allocation53_spill] sm:$0xff] %v3880_v41  ;;  %5108 = vst [vmem:[#allocation54_spill] sm:$0xff] %v3884_v8  ;;  %v3896_v56 = vadd.f32 %v3716_v18, %v5113_v46  ;;  %v3900_v40 = vadd.f32 %v3716_v18, %v5115_v51  ;;  %v5117_v41 = vld [vmem:[#allocation52_spill] sm:$0xff]  ;;  %v5119_v8 = vld [vmem:[#allocation57_spill] sm:$0xff]  ;;  %v3916_v46 = vadd.f32 %v3716_v18, %v3569_v48 }
 0x303   : > { %5110 = vst [vmem:[#allocation55_spill] sm:$0xff] %v3888_v39  ;;  %5112 = vst [vmem:[#allocation56_spill] sm:$0xff] %v3892_v3  ;;  %v3904_v42 = vadd.f32 %v3716_v18, %v5117_v41  ;;  %v3908_v44 = vadd.f32 %v3716_v18, %v5119_v8  ;;  %v5121_v39 = vld [vmem:[#allocation2_spill] sm:$0xff]  ;;  %v3920_v51 = vadd.f32 %v3716_v18, %v3573_v1 }
 0x304   : > { %5114 = vst [vmem:[#allocation29_spill] sm:$0xff] %v3896_v56  ;;  %5116 = vst [vmem:[#allocation30_spill] sm:$0xff] %v3900_v40  ;;  %v3912_v45 = vadd.f32 %v3716_v18, %v5121_v39  ;;  %v3924_v41 = vadd.f32 %v3716_v18, %v3577_v58  ;;  %v3928_v8 = vadd.f32 %v3716_v18, %v3581_v0 }
 0x305   : > { %5118 = vst [vmem:[#allocation31_spill] sm:$0xff] %v3904_v42  ;;  %5120 = vst [vmem:[#allocation32_spill] sm:$0xff] %v3908_v44  ;;  %v3932_v39 = vadd.f32 %v3716_v18, %v3585_v52  ;;  %v3936_v48 = vadd.f32 %v3716_v18, %v3589_v21  ;;  %v3940_v1 = vadd.f32 %v3716_v18, %v3593_v24 }
 0x306   : > { %5122 = vst [vmem:[#allocation33_spill] sm:$0xff] %v3912_v45  ;;  %5123 = vst [vmem:[#allocation34_spill] sm:$0xff] %v3916_v46  ;;  %v3944_v58 = vadd.f32 %v3716_v18, %v3597_v2  ;;  %v3948_v0 = vadd.f32 %v3716_v18, %v3601_v55  ;;  %v3952_v52 = vadd.f32 %v3716_v18, %v3605_v59 }
 0x307   : > { %5124 = vst [vmem:[#allocation35_spill] sm:$0xff] %v3920_v51  ;;  %5125 = vst [vmem:[#allocation36_spill] sm:$0xff] %v3924_v41  ;;  %v3956_v21 = vadd.f32 %v3716_v18, %v3609_v34  ;;  %v3960_v24 = vadd.f32 %v3716_v18, %v3613_v61  ;;  %v3964_v2 = vadd.f32 %v3716_v18, %v3617_v62 }
 0x308   : > { %5126 = vst [vmem:[#allocation37_spill] sm:$0xff] %v3928_v8  ;;  %5127 = vst [vmem:[#allocation39_spill] sm:$0xff] %v3932_v39  ;;  %v3968_v55 = vadd.f32 %v3716_v18, %v3621_v63  ;;  %v3976_v34 = vadd.f32 %v3716_v18, %v3629_v20  ;;  %v3980_v61 = vadd.f32 %v3716_v18, %v3633_v15 }
 0x309   : > { %5128 = vst [vmem:[#allocation40_spill] sm:$0xff] %v3936_v48  ;;  %5129 = vst [vmem:[#allocation41_spill] sm:$0xff] %v3940_v1  ;;  %v3984_v62 = vadd.f32 %v3716_v18, %v3637_v28  ;;  %v3988_v63 = vadd.f32 %v3716_v18, %v3641_v57  ;;  %v3996_v20 = vadd.f32 %v3716_v18, %v3649_v14 }
 0x30a   : > { %5130 = vst [vmem:[#allocation42_spill] sm:$0xff] %v3944_v58  ;;  %5131 = vst [vmem:[#allocation43_spill] sm:$0xff] %v3948_v0  ;;  %v5137_v0 = vld [vmem:[#allocation3_spill] sm:$0xff]  ;;  %v4000_v15 = vadd.f32 %v3716_v18, %v3653_v27  ;;  %v4004_v28 = vadd.f32 %v3716_v18, %v3657_v35  ;;  %v4008_v57 = vadd.f32 %v3716_v18, %v3661_v31 }
 0x30b   : > { %5132 = vst [vmem:[#allocation44_spill] sm:$0xff] %v3952_v52  ;;  %5133 = vst [vmem:[#allocation45_spill] sm:$0xff] %v3956_v21  ;;  %v3972_v59 = vadd.f32 %v3716_v18, %v5137_v0  ;;  %v3992_v0 = vadd.f32 %v3716_v18, %v3645_v22  ;;  %v4012_v22 = vadd.f32 %v3716_v18, %v3665_v30 }
 0x30c   : > { %5134 = vst [vmem:[#allocation46_spill] sm:$0xff] %v3960_v24  ;;  %5135 = vst [vmem:[#allocation47_spill] sm:$0xff] %v3964_v2  ;;  %v4016_v14 = vadd.f32 %v3716_v18, %v3669_v12  ;;  %v4020_v27 = vadd.f32 %v3716_v18, %v3673_v23  ;;  %v4024_v35 = vadd.f32 %v3716_v18, %v3677_v13 }
 0x30d   : > { %5136 = vst [vmem:[#allocation48_spill] sm:$0xff] %v3968_v55  ;;  %5138 = vst [vmem:[#allocation49_spill] sm:$0xff] %v3972_v59  ;;  %v4028_v31 = vadd.f32 %v3716_v18, %v3681_v4 }
 0x30e   : > { %5139 = vst [vmem:[#allocation50_spill] sm:$0xff] %v3976_v34  ;;  %5140 = vst [vmem:[#allocation51_spill] sm:$0xff] %v3980_v61 }
 0x30f   : > { %5141 = vst [vmem:[#allocation52_spill] sm:$0xff] %v3984_v62  ;;  %5142 = vst [vmem:[#allocation57_spill] sm:$0xff] %v3988_v63 }
 0x310   : > { %5143 = vst [vmem:[#allocation2_spill] sm:$0xff] %v3992_v0  ;;  %5144 = vst [vmem:[#allocation3_spill] sm:$0xff] %v3996_v20 }
 0x311   : > { %5145 = vst [vmem:[#allocation74_spill] sm:$0xff] %v4000_v15  ;;  %5146 = vst [vmem:[#allocation75_spill] sm:$0xff] %v4004_v28 }
 0x312   : > { %5147 = vst [vmem:[#allocation76_spill] sm:$0xff] %v4008_v57  ;;  %5148 = vst [vmem:[#allocation77_spill] sm:$0xff] %v4012_v22  ;;  %v5153_v57 = vld [vmem:[#allocation4_spill] sm:$0xff]  ;;  %v5155_v22 = vld [vmem:[#allocation5_spill] sm:$0xff] }
 0x313   : > { %5149 = vst [vmem:[#allocation78_spill] sm:$0xff] %v4016_v14  ;;  %5150 = vst [vmem:[#allocation79_spill] sm:$0xff] %v4020_v27  ;;  %v4032_v30 = vadd.f32 %v3716_v18, %v5153_v57  ;;  %v4036_v12 = vadd.f32 %v3716_v18, %v5155_v22  ;;  %v5157_v14 = vld [vmem:[#allocation6_spill] sm:$0xff]  ;;  %v5159_v27 = vld [vmem:[#allocation7_spill] sm:$0xff]  ;;  %v4056_v22 = vadd.f32 %v3716_v18, %v3709_v47  ;;  %v1354_v47 = vsub.f32 0.0, %v3740_v33 }
 0x314   : > { %5151 = vst [vmem:[#allocation80_spill] sm:$0xff] %v4024_v35  ;;  %5152 = vst [vmem:[#allocation81_spill] sm:$0xff] %v4028_v31  ;;  %v4040_v23 = vadd.f32 %v3716_v18, %v5157_v14  ;;  %v4044_v13 = vadd.f32 %v3716_v18, %v5159_v27  ;;  %v5161_v35 = vld [vmem:[#allocation8_spill] sm:$0xff]  ;;  %v5163_v31 = vld [vmem:[#allocation9_spill] sm:$0xff]  ;;  %v4060_v14 = vadd.f32 %v3716_v18, %v3720_v11  ;;  %v1356_v11 = vsub.f32 0.0, %v3748_v29 }
 0x315   : > { %5154 = vst [vmem:[#allocation4_spill] sm:$0xff] %v4032_v30  ;;  %5156 = vst [vmem:[#allocation5_spill] sm:$0xff] %v4036_v12  ;;  %v4048_v4 = vadd.f32 %v3716_v18, %v5161_v35  ;;  %v4052_v57 = vadd.f32 %v3716_v18, %v5163_v31  ;;  %v4064_v27 = vadd.f32 %v3716_v18, %v3724_v9  ;;  %v1358_v9 = vsub.f32 0.0, %v3756_v60 }
 0x316   : > { %5158 = vst [vmem:[#allocation6_spill] sm:$0xff] %v4040_v23  ;;  %5160 = vst [vmem:[#allocation7_spill] sm:$0xff] %v4044_v13  ;;  %v4068_v35 = vadd.f32 %v3716_v18, %v3728_v7  ;;  %v4072_v31 = vadd.f32 %v3716_v18, %v3732_v26  ;;  %v1444_v26 = vmul.f32 1.442695, %v1356_v11  ;;  %v1366_v11 = vsub.f32 0.0, %v3788_v49 }
 0x317   : > { %5162 = vst [vmem:[#allocation8_spill] sm:$0xff] %v4048_v4  ;;  %5164 = vst [vmem:[#allocation9_spill] sm:$0xff] %v4052_v57  ;;  %v1353_v57 = vsub.f32 0.0, %v3736_v32  ;;  %v1360_v4 = vsub.f32 0.0, %v3764_v6  ;;  %v1361_v32 = vsub.f32 0.0, %v3768_v54 }
 0x318   : > { %5165 = vst [vmem:[#allocation82_spill] sm:$0xff] %v4056_v22  ;;  %5166 = vst [vmem:[#allocation83_spill] sm:$0xff] %v4060_v14  ;;  %v1355_v22 = vsub.f32 0.0, %v3744_v10  ;;  %v1357_v14 = vsub.f32 0.0, %v3752_v43  ;;  %v1362_v10 = vsub.f32 0.0, %v3772_v16  ;;  %v1363_v43 = vsub.f32 0.0, %v3776_v19 }
 0x319   : > { %5167 = vst [vmem:[#allocation84_spill] sm:$0xff] %v4064_v27  ;;  %5168 = vst [vmem:[#allocation85_spill] sm:$0xff] %v4068_v35  ;;  %v1359_v27 = vsub.f32 0.0, %v3760_v53  ;;  %v1438_v7 = vmul.f32 1.442695, %v1353_v57  ;;  %v1364_v53 = vsub.f32 0.0, %v3780_v50 }
 0x31a   : > { %5169 = vst [vmem:[#allocation86_spill] sm:$0xff] %v4072_v31  ;;  %v1440_v35 = vmul.f32 1.442695, %v1354_v47  ;;  %v1442_v18 = vmul.f32 1.442695, %v1355_v22  ;;  %v1365_v47 = vsub.f32 0.0, %v3784_v5 }
 0x31b   : > { %2140 = vpow2.f32 %v1438_v7  ;;  %v1446_v33 = vmul.f32 1.442695, %v1357_v14  ;;  %v1448_v29 = vmul.f32 1.442695, %v1358_v9  ;;  %v1450_v60 = vmul.f32 1.442695, %v1359_v27 }
 0x31c   : > { %2142 = vpow2.f32 %v1440_v35  ;;  %v1452_v57 = vmul.f32 1.442695, %v1360_v4  ;;  %v1454_v22 = vmul.f32 1.442695, %v1361_v32  ;;  %v1456_v14 = vmul.f32 1.442695, %v1362_v10 }
 0x31d   : > { %2144 = vpow2.f32 %v1442_v18  ;;  %v1367_v7 = vsub.f32 0.0, %v3792_v25  ;;  %v1458_v35 = vmul.f32 1.442695, %v1363_v43  ;;  %v1368_v9 = vsub.f32 0.0, %v3796_v17  ;;  %v5170_v43 = vld [vmem:[#allocation13_spill] sm:$0xff] }
 0x31e   : > { %2146 = vpow2.f32 %v1444_v26  ;;  %v1460_v27 = vmul.f32 1.442695, %v1364_v53  ;;  %v1369_v18 = vsub.f32 0.0, %v3800_v36  ;;  %v1462_v4 = vmul.f32 1.442695, %v1365_v47 }
 0x31f   : > { %2148 = vpow2.f32 %v1446_v33  ;;  %v1370_v26 = vsub.f32 0.0, %v3804_v37  ;;  %v1464_v32 = vmul.f32 1.442695, %v1366_v11  ;;  %v1371_v10 = vsub.f32 0.0, %v3808_v38  ;;  %v5172_v11 = vld [vmem:[#allocation15_spill] sm:$0xff] }
 0x320   : > { %2150 = vpow2.f32 %v1448_v29  ;;  %v1466_v29 = vmul.f32 1.442695, %v1367_v7  ;;  %v1372_v17 = vsub.f32 0.0, %v5170_v43  ;;  %v1468_v53 = vmul.f32 1.442695, %v1368_v9  ;;  %v5173_v7 = vld [vmem:[#allocation16_spill] sm:$0xff] }
 0x321   : > { %2152 = vpow2.f32 %v1450_v60  ;;  %v1470_v37 = vmul.f32 1.442695, %v1369_v18  ;;  %v1374_v36 = vsub.f32 0.0, %v5172_v11  ;;  %v1472_v38 = vmul.f32 1.442695, %v1370_v26  ;;  %v5174_v9 = vld [vmem:[#allocation17_spill] sm:$0xff] }
 0x322   : > { %2154 = vpow2.f32 %v1452_v57  ;;  %v1375_v25 = vsub.f32 0.0, %v5173_v7  ;;  %v1474_v43 = vmul.f32 1.442695, %v1371_v10  ;;  %v1376_v49 = vsub.f32 0.0, %v5174_v9  ;;  %v5175_v18 = vld [vmem:[#allocation18_spill] sm:$0xff]  ;;  %v5176_v26 = vld [vmem:[#allocation19_spill] sm:$0xff] }
 0x323   : > { %2156 = vpow2.f32 %v1454_v22  ;;  %v5171_v22 = vld [vmem:[#allocation14_spill] sm:$0xff]  ;;  %v1377_v5 = vsub.f32 0.0, %v5175_v18  ;;  %v1378_v50 = vsub.f32 0.0, %v5176_v26  ;;  %v1480_v7 = vmul.f32 1.442695, %v1374_v36  ;;  %v5177_v10 = vld [vmem:[#allocation20_spill] sm:$0xff] }
 0x324   : > { %2158 = vpow2.f32 %v1456_v14  ;;  %v1373_v47 = vsub.f32 0.0, %v5171_v22  ;;  %v1476_v22 = vmul.f32 1.442695, %v1372_v17  ;;  %v1379_v19 = vsub.f32 0.0, %v5177_v10  ;;  %v5179_v17 = vld [vmem:[#allocation21_spill] sm:$0xff]  ;;  %v5183_v36 = vld [vmem:[#allocation23_spill] sm:$0xff] }
 0x325   : > { %v4092_v33 = vpop.eup %2140  ;;  %2160 = vpow2.f32 %v1458_v35  ;;  %v1482_v9 = vmul.f32 1.442695, %v1375_v25  ;;  %v1380_v16 = vsub.f32 0.0, %v5179_v17  ;;  %v1484_v18 = vmul.f32 1.442695, %v1376_v49  ;;  %v5185_v25 = vld [vmem:[#allocation24_spill] sm:$0xff] }
 0x326   : > { %v4095_v60 = vpop.eup %2142  ;;  %2162 = vpow2.f32 %v1460_v27  ;;  %v1478_v11 = vmul.f32 1.442695, %v1373_v47  ;;  %v5181_v47 = vld [vmem:[#allocation22_spill] sm:$0xff]  ;;  %v1486_v26 = vmul.f32 1.442695, %v1377_v5  ;;  %v1382_v6 = vsub.f32 0.0, %v5183_v36 }
 0x327   : > { %v4098_v57 = vpop.eup %2144  ;;  %2164 = vpow2.f32 %v1462_v4  ;;  %v1381_v54 = vsub.f32 0.0, %v5181_v47  ;;  %v1488_v10 = vmul.f32 1.442695, %v1378_v50  ;;  %v1490_v17 = vmul.f32 1.442695, %v1379_v19  ;;  %v5187_v49 = vld [vmem:[#allocation25_spill] sm:$0xff] }
 0x328   : > { %v4101_v14 = vpop.eup %2146  ;;  %2166 = vpow2.f32 %v1464_v32  ;;  %v1492_v47 = vmul.f32 1.442695, %v1380_v16  ;;  %v5189_v5 = vld [vmem:[#allocation26_spill] sm:$0xff]  ;;  %v5191_v50 = vld [vmem:[#allocation27_spill] sm:$0xff]  ;;  %v5193_v19 = vld [vmem:[#allocation28_spill] sm:$0xff] }
 0x329   : > { %v4104_v35 = vpop.eup %2148  ;;  %2168 = vpow2.f32 %v1466_v29  ;;  %v1494_v36 = vmul.f32 1.442695, %v1381_v54  ;;  %v5195_v16 = vld [vmem:[#allocation38_spill] sm:$0xff]  ;;  %v5196_v54 = vld [vmem:[#allocation53_spill] sm:$0xff] }
 0x32a   : > { %v4107_v27 = vpop.eup %2150  ;;  %2170 = vpow2.f32 %v1468_v53 }
 0x32b   : > { %v4110_v4 = vpop.eup %2152  ;;  %2172 = vpow2.f32 %v1470_v37 }
 0x32c   : > { %v4113_v32 = vpop.eup %2154  ;;  %2174 = vpow2.f32 %v1472_v38 }
 0x32d   : > { %v4116_v29 = vpop.eup %2156  ;;  %2176 = vpow2.f32 %v1474_v43 }
 0x32e   : > { %v4119_v53 = vpop.eup %2158  ;;  %2178 = vpow2.f32 %v1476_v22 }
 0x32f   : > { %5178 = vst [vmem:[#allocation87_spill] sm:$0xff] %v4119_v53  ;;  %v4122_v37 = vpop.eup %2160  ;;  %2180 = vpow2.f32 %v1478_v11  ;;  %v1383_v53 = vsub.f32 0.0, %v5185_v25  ;;  %v1496_v25 = vmul.f32 1.442695, %v1382_v6  ;;  %v5197_v6 = vld [vmem:[#allocation54_spill] sm:$0xff] }
 0x330   : > { %5180 = vst [vmem:[#allocation88_spill] sm:$0xff] %v4122_v37  ;;  %v4125_v38 = vpop.eup %2162  ;;  %2182 = vpow2.f32 %v1480_v7  ;;  %v1384_v37 = vsub.f32 0.0, %v5187_v49 }
 0x331   : > { %5182 = vst [vmem:[#allocation89_spill] sm:$0xff] %v4125_v38  ;;  %v4128_v43 = vpop.eup %2164  ;;  %2184 = vpow2.f32 %v1482_v9  ;;  %v1385_v38 = vsub.f32 0.0, %v5189_v5  ;;  %v1498_v49 = vmul.f32 1.442695, %v1383_v53  ;;  %v5198_v53 = vld [vmem:[#allocation55_spill] sm:$0xff] }
 0x332   : > { %5184 = vst [vmem:[#allocation90_spill] sm:$0xff] %v4128_v43  ;;  %v4131_v22 = vpop.eup %2166  ;;  %2186 = vpow2.f32 %v1484_v18  ;;  %v1386_v43 = vsub.f32 0.0, %v5191_v50  ;;  %v1500_v5 = vmul.f32 1.442695, %v1384_v37  ;;  %v1392_v37 = vsub.f32 0.0, %v3892_v3 }
 0x333   : > { %5186 = vst [vmem:[#allocation91_spill] sm:$0xff] %v4131_v22  ;;  %v4134_v11 = vpop.eup %2168  ;;  %2188 = vpow2.f32 %v1486_v26  ;;  %v1387_v22 = vsub.f32 0.0, %v5193_v19  ;;  %v1502_v50 = vmul.f32 1.442695, %v1385_v38  ;;  %v1393_v38 = vsub.f32 0.0, %v3896_v56 }
 0x334   : > { %5188 = vst [vmem:[#allocation92_spill] sm:$0xff] %v4134_v11  ;;  %v4137_v7 = vpop.eup %2170  ;;  %2190 = vpow2.f32 %v1488_v10  ;;  %v1388_v11 = vsub.f32 0.0, %v5195_v16  ;;  %v1504_v19 = vmul.f32 1.442695, %v1386_v43  ;;  %v1394_v43 = vsub.f32 0.0, %v3900_v40 }
 0x335   : > { %5190 = vst [vmem:[#allocation93_spill] sm:$0xff] %v4137_v7  ;;  %v4140_v9 = vpop.eup %2172  ;;  %2192 = vpow2.f32 %v1490_v17  ;;  %v1389_v7 = vsub.f32 0.0, %v5196_v54  ;;  %v1506_v16 = vmul.f32 1.442695, %v1387_v22  ;;  %v1395_v22 = vsub.f32 0.0, %v3904_v42 }
 0x336   : > { %5192 = vst [vmem:[#allocation94_spill] sm:$0xff] %v4140_v9  ;;  %v4143_v18 = vpop.eup %2174  ;;  %2194 = vpow2.f32 %v1492_v47  ;;  %v1390_v9 = vsub.f32 0.0, %v5197_v6  ;;  %v1508_v54 = vmul.f32 1.442695, %v1388_v11  ;;  %v1396_v11 = vsub.f32 0.0, %v3908_v44 }
 0x337   : > { %5194 = vst [vmem:[#allocation95_spill] sm:$0xff] %v4143_v18  ;;  %v4146_v26 = vpop.eup %2176  ;;  %2196 = vpow2.f32 %v1494_v36  ;;  %v1391_v18 = vsub.f32 0.0, %v5198_v53  ;;  %v1510_v6 = vmul.f32 1.442695, %v1389_v7  ;;  %v1516_v56 = vmul.f32 1.442695, %v1392_v37 }
 0x338   : > { %v4149_v10 = vpop.eup %2178  ;;  %2198 = vpow2.f32 %v1496_v25  ;;  %v1512_v53 = vmul.f32 1.442695, %v1390_v9  ;;  %v1397_v7 = vsub.f32 0.0, %v3912_v45  ;;  %v1518_v40 = vmul.f32 1.442695, %v1393_v38 }
 0x339   : > { %v4152_v17 = vpop.eup %2180  ;;  %2200 = vpow2.f32 %v1498_v49  ;;  %v1514_v3 = vmul.f32 1.442695, %v1391_v18  ;;  %v1398_v9 = vsub.f32 0.0, %v3916_v46  ;;  %v1520_v42 = vmul.f32 1.442695, %v1394_v43 }
 0x33a   : > { %v4155_v47 = vpop.eup %2182  ;;  %2202 = vpow2.f32 %v1500_v5  ;;  %v1399_v18 = vsub.f32 0.0, %v3920_v51  ;;  %v1522_v44 = vmul.f32 1.442695, %v1395_v22  ;;  %v1400_v37 = vsub.f32 0.0, %v3924_v41 }
 0x33b   : > { %v4158_v36 = vpop.eup %2184  ;;  %2204 = vpow2.f32 %v1502_v50  ;;  %v1524_v45 = vmul.f32 1.442695, %v1396_v11  ;;  %v1401_v38 = vsub.f32 0.0, %v3928_v8  ;;  %v1526_v46 = vmul.f32 1.442695, %v1397_v7 }
 0x33c   : > { %v4161_v25 = vpop.eup %2186  ;;  %2206 = vpow2.f32 %v1504_v19  ;;  %v1402_v43 = vsub.f32 0.0, %v3932_v39  ;;  %v1528_v51 = vmul.f32 1.442695, %v1398_v9  ;;  %v1403_v22 = vsub.f32 0.0, %v3936_v48  ;;  %v5200_v9 = vld [vmem:[#allocation43_spill] sm:$0xff] }
 0x33d   : > { %v4164_v49 = vpop.eup %2188  ;;  %2208 = vpow2.f32 %v1506_v16  ;;  %v1530_v41 = vmul.f32 1.442695, %v1399_v18  ;;  %v1404_v11 = vsub.f32 0.0, %v3940_v1  ;;  %v1532_v8 = vmul.f32 1.442695, %v1400_v37 }
 0x33e   : > { %v4167_v5 = vpop.eup %2190  ;;  %2210 = vpow2.f32 %v1508_v54  ;;  %v1405_v7 = vsub.f32 0.0, %v3944_v58  ;;  %v1534_v39 = vmul.f32 1.442695, %v1401_v38  ;;  %v1536_v48 = vmul.f32 1.442695, %v1402_v43 }
 0x33f   : > { %v4170_v50 = vpop.eup %2192  ;;  %2212 = vpow2.f32 %v1510_v6  ;;  %v1407_v18 = vsub.f32 0.0, %v3952_v52  ;;  %v1538_v1 = vmul.f32 1.442695, %v1403_v22  ;;  %v1408_v37 = vsub.f32 0.0, %v3956_v21 }
 0x340   : > { %v4173_v19 = vpop.eup %2194  ;;  %2214 = vpow2.f32 %v1512_v53  ;;  %v1540_v58 = vmul.f32 1.442695, %v1404_v11  ;;  %v1409_v38 = vsub.f32 0.0, %v3960_v24  ;;  %v1410_v43 = vsub.f32 0.0, %v3964_v2 }
 0x341   : > { %v4176_v16 = vpop.eup %2196  ;;  %2216 = vpow2.f32 %v1514_v3  ;;  %v1411_v22 = vsub.f32 0.0, %v3968_v55  ;;  %v1546_v21 = vmul.f32 1.442695, %v1407_v18  ;;  %v1412_v11 = vsub.f32 0.0, %v3972_v59 }
 0x342   : > { %v4179_v54 = vpop.eup %2198  ;;  %2218 = vpow2.f32 %v1516_v56  ;;  %v1548_v24 = vmul.f32 1.442695, %v1408_v37  ;;  %v1550_v2 = vmul.f32 1.442695, %v1409_v38  ;;  %v1552_v55 = vmul.f32 1.442695, %v1410_v43 }
 0x343   : > { %v4182_v6 = vpop.eup %2200  ;;  %2220 = vpow2.f32 %v1518_v40  ;;  %v1415_v18 = vsub.f32 0.0, %v3984_v62  ;;  %v1554_v59 = vmul.f32 1.442695, %v1411_v22  ;;  %v1416_v37 = vsub.f32 0.0, %v3988_v63 }
 0x344   : > { %v4185_v53 = vpop.eup %2202  ;;  %2222 = vpow2.f32 %v1520_v42  ;;  %v1417_v38 = vsub.f32 0.0, %v3992_v0  ;;  %v1418_v43 = vsub.f32 0.0, %v3996_v20  ;;  %v1419_v22 = vsub.f32 0.0, %v4000_v15 }
 0x345   : > { %v4188_v3 = vpop.eup %2204  ;;  %2224 = vpow2.f32 %v1522_v44  ;;  %v1562_v63 = vmul.f32 1.442695, %v1415_v18  ;;  %v1564_v0 = vmul.f32 1.442695, %v1416_v37  ;;  %v5209_v18 = vld [vmem:[#allocation78_spill] sm:$0xff]  ;;  %v5210_v37 = vld [vmem:[#allocation79_spill] sm:$0xff] }
 0x346   : > { %5199 = vst [vmem:[#allocation96_spill] sm:$0xff] %v4188_v3  ;;  %v4191_v56 = vpop.eup %2206  ;;  %2226 = vpow2.f32 %v1524_v45  ;;  %v1406_v3 = vsub.f32 0.0, %v5200_v9  ;;  %v1542_v9 = vmul.f32 1.442695, %v1405_v7  ;;  %v1413_v7 = vsub.f32 0.0, %v3976_v34 }
 0x347   : > { %v4194_v40 = vpop.eup %2208  ;;  %2228 = vpow2.f32 %v1526_v46  ;;  %v1556_v34 = vmul.f32 1.442695, %v1412_v11  ;;  %v1420_v11 = vsub.f32 0.0, %v4004_v28  ;;  %v1566_v20 = vmul.f32 1.442695, %v1417_v38  ;;  %v5211_v38 = vld [vmem:[#allocation80_spill] sm:$0xff] }
 0x348   : > { %v4197_v42 = vpop.eup %2210  ;;  %2230 = vpow2.f32 %v1528_v51  ;;  %v1544_v52 = vmul.f32 1.442695, %v1406_v3  ;;  %v1414_v3 = vsub.f32 0.0, %v3980_v61  ;;  %v1558_v61 = vmul.f32 1.442695, %v1413_v7  ;;  %v5205_v7 = vld [vmem:[#allocation76_spill] sm:$0xff] }
 0x349   : > { %v4200_v44 = vpop.eup %2212  ;;  %2232 = vpow2.f32 %v1530_v41  ;;  %v1568_v15 = vmul.f32 1.442695, %v1418_v43  ;;  %v1570_v28 = vmul.f32 1.442695, %v1419_v22  ;;  %v5212_v43 = vld [vmem:[#allocation81_spill] sm:$0xff]  ;;  %v1427_v22 = vsub.f32 0.0, %v4032_v30 }
 0x34a   : > { %v4203_v45 = vpop.eup %2214  ;;  %2234 = vpow2.f32 %v1532_v8  ;;  %v1560_v62 = vmul.f32 1.442695, %v1414_v3  ;;  %v5207_v3 = vld [vmem:[#allocation77_spill] sm:$0xff] }
 0x34b   : > { %v4206_v46 = vpop.eup %2216  ;;  %2236 = vpow2.f32 %v1534_v39 }
 0x34c   : > { %v4209_v51 = vpop.eup %2218  ;;  %2238 = vpow2.f32 %v1536_v48 }
 0x34d   : > { %v4212_v41 = vpop.eup %2220  ;;  %2240 = vpow2.f32 %v1538_v1 }
 0x34e   : > { %v4215_v8 = vpop.eup %2222  ;;  %2242 = vpow2.f32 %v1540_v58 }
 0x34f   : > { %v4218_v39 = vpop.eup %2224  ;;  %2244 = vpow2.f32 %v1542_v9 }
 0x350   : > { %v4221_v48 = vpop.eup %2226  ;;  %2246 = vpow2.f32 %v1544_v52 }
 0x351   : > { %v4224_v1 = vpop.eup %2228  ;;  %2248 = vpow2.f32 %v1546_v21 }
 0x352   : > { %v4227_v58 = vpop.eup %2230  ;;  %2250 = vpow2.f32 %v1548_v24 }
 0x353   : > { %v4230_v9 = vpop.eup %2232  ;;  %2252 = vpow2.f32 %v1550_v2 }
 0x354   : > { %v4233_v52 = vpop.eup %2234  ;;  %2254 = vpow2.f32 %v1552_v55 }
 0x355   : > { %5201 = vst [vmem:[#allocation97_spill] sm:$0xff] %v4233_v52  ;;  %v4236_v21 = vpop.eup %2236  ;;  %2256 = vpow2.f32 %v1554_v59  ;;  %v1421_v52 = vsub.f32 0.0, %v5205_v7  ;;  %v1572_v7 = vmul.f32 1.442695, %v1420_v11  ;;  %v1428_v11 = vsub.f32 0.0, %v4036_v12 }
 0x356   : > { %5202 = vst [vmem:[#allocation98_spill] sm:$0xff] %v4236_v21  ;;  %v4239_v24 = vpop.eup %2238  ;;  %2258 = vpow2.f32 %v1556_v34  ;;  %v1422_v21 = vsub.f32 0.0, %v5207_v3  ;;  %v1586_v12 = vmul.f32 1.442695, %v1427_v22  ;;  %v5224_v22 = vld [vmem:[#allocation84_spill] sm:$0xff] }
 0x357   : > { %5203 = vst [vmem:[#allocation99_spill] sm:$0xff] %v4239_v24  ;;  %v4242_v2 = vpop.eup %2240  ;;  %2260 = vpow2.f32 %v1558_v61  ;;  %v1423_v24 = vsub.f32 0.0, %v5209_v18  ;;  %v1574_v3 = vmul.f32 1.442695, %v1421_v52  ;;  %v1429_v52 = vsub.f32 0.0, %v4040_v23 }
 0x358   : > { %5204 = vst [vmem:[#allocation100_spill] sm:$0xff] %v4242_v2  ;;  %v4245_v55 = vpop.eup %2242  ;;  %2262 = vpow2.f32 %v1560_v62  ;;  %v1424_v2 = vsub.f32 0.0, %v5210_v37  ;;  %v1576_v18 = vmul.f32 1.442695, %v1422_v21  ;;  %v1430_v21 = vsub.f32 0.0, %v4044_v13 }
 0x359   : > { %5206 = vst [vmem:[#allocation101_spill] sm:$0xff] %v4245_v55  ;;  %v4248_v59 = vpop.eup %2244  ;;  %2264 = vpow2.f32 %v1562_v63  ;;  %v1425_v55 = vsub.f32 0.0, %v5211_v38  ;;  %v1578_v37 = vmul.f32 1.442695, %v1423_v24  ;;  %v5217_v24 = vld [vmem:[#allocation8_spill] sm:$0xff] }
 0x35a   : > { %5208 = vst [vmem:[#allocation102_spill] sm:$0xff] %v4248_v59  ;;  %v4251_v34 = vpop.eup %2246  ;;  %2266 = vpow2.f32 %v1564_v0  ;;  %v1426_v59 = vsub.f32 0.0, %v5212_v43  ;;  %v1580_v38 = vmul.f32 1.442695, %v1424_v2  ;;  %v5219_v2 = vld [vmem:[#allocation9_spill] sm:$0xff] }
 0x35b   : > { %v4254_v61 = vpop.eup %2248  ;;  %2268 = vpow2.f32 %v1566_v20  ;;  %v1582_v43 = vmul.f32 1.442695, %v1425_v55  ;;  %v1588_v23 = vmul.f32 1.442695, %v1428_v11  ;;  %v5221_v55 = vld [vmem:[#allocation82_spill] sm:$0xff]  ;;  %v5225_v11 = vld [vmem:[#allocation85_spill] sm:$0xff] }
 0x35c   : > { %v4257_v62 = vpop.eup %2250  ;;  %2270 = vpow2.f32 %v1568_v15  ;;  %v1584_v30 = vmul.f32 1.442695, %v1426_v59  ;;  %v1590_v13 = vmul.f32 1.442695, %v1429_v52  ;;  %v5222_v59 = vld [vmem:[#allocation83_spill] sm:$0xff]  ;;  %v1437_v52 = vsub.f32 0.0, %v4072_v31 }
 0x35d   : > { %v4260_v63 = vpop.eup %2252  ;;  %2272 = vpow2.f32 %v1570_v28 }
 0x35e   : > { %v4263_v0 = vpop.eup %2254  ;;  %2274 = vpow2.f32 %v1572_v7 }
 0x35f   : > { %5213 = vst [vmem:[#allocation103_spill] sm:$0xff] %v4263_v0  ;;  %v4266_v20 = vpop.eup %2256  ;;  %2276 = vpow2.f32 %v1574_v3  ;;  %v1431_v0 = vsub.f32 0.0, %v5217_v24  ;;  %v1592_v24 = vmul.f32 1.442695, %v1430_v21 }
 0x360   : > { %5214 = vst [vmem:[#allocation104_spill] sm:$0xff] %v4266_v20  ;;  %v4269_v15 = vpop.eup %2258  ;;  %2278 = vpow2.f32 %v1576_v18  ;;  %v1432_v20 = vsub.f32 0.0, %v5219_v2 }
 0x361   : > { %5215 = vst [vmem:[#allocation105_spill] sm:$0xff] %v4269_v15  ;;  %v4272_v28 = vpop.eup %2260  ;;  %2280 = vpow2.f32 %v1578_v37  ;;  %v1433_v15 = vsub.f32 0.0, %v5221_v55  ;;  %v1594_v2 = vmul.f32 1.442695, %v1431_v0 }
 0x362   : > { %5216 = vst [vmem:[#allocation106_spill] sm:$0xff] %v4272_v28  ;;  %v4275_v7 = vpop.eup %2262  ;;  %2282 = vpow2.f32 %v1580_v38  ;;  %v1434_v28 = vsub.f32 0.0, %v5222_v59  ;;  %v1596_v55 = vmul.f32 1.442695, %v1432_v20  ;;  %v1606_v20 = vmul.f32 1.442695, %v1437_v52 }
 0x363   : > { %5218 = vst [vmem:[#allocation107_spill] sm:$0xff] %v4275_v7  ;;  %v4278_v3 = vpop.eup %2264  ;;  %2284 = vpow2.f32 %v1582_v43  ;;  %v1435_v7 = vsub.f32 0.0, %v5224_v22  ;;  %v1598_v59 = vmul.f32 1.442695, %v1433_v15  ;;  %v1613_v52 = vadd.f32 1.0, %v4107_v27 }
 0x364   : > { %5220 = vst [vmem:[#allocation108_spill] sm:$0xff] %v4278_v3  ;;  %v4281_v18 = vpop.eup %2266  ;;  %2286 = vpow2.f32 %v1584_v30  ;;  %v1436_v3 = vsub.f32 0.0, %v5225_v11  ;;  %v1600_v21 = vmul.f32 1.442695, %v1434_v28  ;;  %v1609_v28 = vadd.f32 1.0, %v4095_v60 }
 0x365   : > { %v4284_v37 = vpop.eup %2268  ;;  %2288 = vpow2.f32 %v1586_v12  ;;  %v1602_v12 = vmul.f32 1.442695, %v1435_v7  ;;  %v1610_v7 = vadd.f32 1.0, %v4098_v57 }
 0x366   : > { %5223 = vst [vmem:[#allocation109_spill] sm:$0xff] %v4284_v37  ;;  %v4287_v38 = vpop.eup %2270  ;;  %2290 = vpow2.f32 %v1588_v23  ;;  %v1604_v11 = vmul.f32 1.442695, %v1436_v3  ;;  %v1611_v3 = vadd.f32 1.0, %v4101_v14 }
 0x367   : > { %v4290_v43 = vpop.eup %2272  ;;  %2292 = vpow2.f32 %v1590_v13  ;;  %v1608_v13 = vadd.f32 1.0, %v4092_v33 }
 0x368   : > { %v4293_v30 = vpop.eup %2274  ;;  %2294 = vpow2.f32 %v1592_v24 }
 0x369   : > { %v4295_v37 = vpop.eup %2276  ;;  %2296 = vpow2.f32 %v1594_v2 }
 0x36a   : > { %v4297_v0 = vpop.eup %2278  ;;  %2298 = vpow2.f32 %v1596_v55 }
 0x36b   : > { %v4299_v23 = vpop.eup %2280  ;;  %2300 = vpow2.f32 %v1598_v59  ;;  %v1612_v59 = vadd.f32 1.0, %v4104_v35  ;;  %v1616_v35 = vadd.f32 1.0, %v4116_v29  ;;  %v5237_v29 = vld [vmem:[#allocation90_spill] sm:$0xff] }
 0x36c   : > { %v4301_v22 = vpop.eup %2282  ;;  %2302 = vpow2.f32 %v1600_v21  ;;  %v1615_v21 = vadd.f32 1.0, %v4113_v32  ;;  %v5235_v32 = vld [vmem:[#allocation89_spill] sm:$0xff] }
 0x36d   : > { %v4304_v15 = vpop.eup %2284  ;;  %2304 = vpow2.f32 %v1602_v12 }
 0x36e   : > { %v4307_v24 = vpop.eup %2286  ;;  %2306 = vpow2.f32 %v1604_v11  ;;  %v1614_v11 = vadd.f32 1.0, %v4110_v4  ;;  %v5233_v4 = vld [vmem:[#allocation88_spill] sm:$0xff] }
 0x36f   : > { %v4310_v2 = vpop.eup %2288  ;;  %2308 = vpow2.f32 %v1606_v20  ;;  %v5231_v20 = vld [vmem:[#allocation87_spill] sm:$0xff] }
 0x370   : > { %v4313_v55 = vpop.eup %2290  ;;  %2310 = vrcp.f32 %v1608_v13  ;;  %v1617_v27 = vadd.f32 1.0, %v5231_v20 }
 0x371   : > { %v4316_v33 = vpop.eup %2292  ;;  %2312 = vrcp.f32 %v1609_v28  ;;  %v1618_v28 = vadd.f32 1.0, %v5233_v4 }
 0x372   : > { %5226 = vst [vmem:[#allocation110_spill] sm:$0xff] %v4316_v33  ;;  %v4319_v60 = vpop.eup %2294  ;;  %2314 = vrcp.f32 %v1610_v7 }
 0x373   : > { %5227 = vst [vmem:[#allocation111_spill] sm:$0xff] %v4319_v60  ;;  %v4322_v57 = vpop.eup %2296  ;;  %2316 = vrcp.f32 %v1611_v3  ;;  %v1619_v3 = vadd.f32 1.0, %v5235_v32  ;;  %v5241_v32 = vld [vmem:[#allocation93_spill] sm:$0xff]  ;;  %v5245_v60 = vld [vmem:[#allocation95_spill] sm:$0xff] }
 0x374   : > { %5228 = vst [vmem:[#allocation112_spill] sm:$0xff] %v4322_v57  ;;  %v4325_v14 = vpop.eup %2298  ;;  %2318 = vrcp.f32 %v1612_v59  ;;  %v1620_v59 = vadd.f32 1.0, %v5237_v29  ;;  %v1623_v29 = vadd.f32 1.0, %v5241_v32  ;;  %v1625_v33 = vadd.f32 1.0, %v5245_v60  ;;  %v5248_v60 = vld [vmem:[#allocation61_spill] sm:$0xff] }
 0x375   : > { %5229 = vst [vmem:[#allocation113_spill] sm:$0xff] %v4325_v14  ;;  %v4328_v12 = vpop.eup %2300  ;;  %2320 = vrcp.f32 %v1613_v52  ;;  %v5239_v14 = vld [vmem:[#allocation91_spill] sm:$0xff] }
 0x376   : > { %5230 = vst [vmem:[#allocation114_spill] sm:$0xff] %v4328_v12  ;;  %v4331_v13 = vpop.eup %2302  ;;  %2322 = vrcp.f32 %v1614_v11  ;;  %v1621_v20 = vadd.f32 1.0, %v5239_v14  ;;  %v5240_v11 = vld [vmem:[#allocation92_spill] sm:$0xff] }
 0x377   : > { %5232 = vst [vmem:[#allocation87_spill] sm:$0xff] %v4331_v13  ;;  %v4334_v7 = vpop.eup %2304  ;;  %2324 = vrcp.f32 %v1615_v21  ;;  %v1622_v21 = vadd.f32 1.0, %v5240_v11  ;;  %v5246_v11 = vld [vmem:[#allocation59_spill] sm:$0xff] }
 0x378   : > { %5234 = vst [vmem:[#allocation88_spill] sm:$0xff] %v4334_v7  ;;  %v4337_v31 = vpop.eup %2306  ;;  %2326 = vrcp.f32 %v1616_v35  ;;  %v5242_v35 = vld [vmem:[#allocation10_spill] sm:$0xff] }
 0x379   : > { %5236 = vst [vmem:[#allocation89_spill] sm:$0xff] %v4337_v31  ;;  %v4340_v12 = vpop.eup %2308  ;;  %2328 = vrcp.f32 %v1617_v27  ;;  %v5243_v27 = vld [vmem:[#allocation94_spill] sm:$0xff] }
 0x37a   : > { %5238 = vst [vmem:[#allocation90_spill] sm:$0xff] %v4340_v12  ;;  %v2311_v52 = vpop.eup %2310  ;;  %2330 = vrcp.f32 %v1618_v28  ;;  %v1624_v31 = vadd.f32 1.0, %v5243_v27  ;;  %v5244_v7 = vld [vmem:[#allocation58_spill] sm:$0xff]  ;;  %v1630_v27 = vadd.f32 1.0, %v4158_v36 }
 0x37b   : > { %v2313_v4 = vpop.eup %2312  ;;  %2332 = vrcp.f32 %v1619_v3  ;;  %v1778_v12 = vmul.f32 %v2311_v52, %v5242_v35  ;;  %v1626_v3 = vadd.f32 1.0, %v4146_v26  ;;  %v5247_v52 = vld [vmem:[#allocation60_spill] sm:$0xff]  ;;  %v5249_v26 = vld [vmem:[#allocation62_spill] sm:$0xff] }
 0x37c   : > { %v2315_v14 = vpop.eup %2314  ;;  %2334 = vrcp.f32 %v1620_v59  ;;  %v1779_v13 = vmul.f32 %v2313_v4, %v5244_v7  ;;  %v1627_v7 = vadd.f32 1.0, %v4149_v10  ;;  %v5250_v10 = vld [vmem:[#allocation63_spill] sm:$0xff]  ;;  %v5253_v36 = vld [vmem:[#allocation66_spill] sm:$0xff] }
 0x37d   : > { %v2317_v57 = vpop.eup %2316  ;;  %2336 = vrcp.f32 %v1621_v20  ;;  %v1780_v28 = vmul.f32 %v2315_v14, %v5246_v11  ;;  %1863 = vst.msk [vmem:[%s4348_s16] sm:$0xff] %vm416_vm1, %v1778_v12  ;;  %v1628_v12 = vadd.f32 1.0, %v4152_v17  ;;  %v5251_v17 = vld [vmem:[#allocation64_spill] sm:$0xff] }
 0x37e   : > { %v2319_v32 = vpop.eup %2318  ;;  %2338 = vrcp.f32 %v1622_v21  ;;  %v1781_v35 = vmul.f32 %v2317_v57, %v5247_v52  ;;  %1864 = vst.msk [vmem:[%s4348_s16 + $0x8] sm:$0xff] %vm416_vm1, %v1779_v13  ;;  %v1629_v13 = vadd.f32 1.0, %v4155_v47  ;;  %v5252_v47 = vld [vmem:[#allocation65_spill] sm:$0xff]  ;;  %v1632_v52 = vadd.f32 1.0, %v4164_v49  ;;  %v5255_v49 = vld [vmem:[#allocation68_spill] sm:$0xff] }
 0x37f   : > { %v2321_v59 = vpop.eup %2320  ;;  %2340 = vrcp.f32 %v1623_v29  ;;  %v1782_v20 = vmul.f32 %v2319_v32, %v5248_v60  ;;  %1865 = vst.msk [vmem:[%s4348_s16 + $0x10] sm:$0xff] %vm416_vm1, %v1780_v28  ;;  %v1631_v28 = vadd.f32 1.0, %v4161_v25  ;;  %v5254_v25 = vld [vmem:[#allocation67_spill] sm:$0xff] }
 0x380   : > { %v2323_v4 = vpop.eup %2322  ;;  %2342 = vrcp.f32 %v1624_v31  ;;  %v1783_v21 = vmul.f32 %v2321_v59, %v5249_v26  ;;  %1866 = vst.msk [vmem:[%s4348_s16 + $0x18] sm:$0xff] %vm416_vm1, %v1781_v35  ;;  %v1633_v59 = vadd.f32 1.0, %v4167_v5  ;;  %v1635_v26 = vadd.f32 1.0, %v4173_v19  ;;  %v5256_v5 = vld [vmem:[#allocation69_spill] sm:$0xff]  ;;  %v5258_v19 = vld [vmem:[#allocation71_spill] sm:$0xff] }
 0x381   : > { %v2325_v57 = vpop.eup %2324  ;;  %2344 = vrcp.f32 %v1625_v33  ;;  %v1784_v29 = vmul.f32 %v2323_v4, %v5250_v10  ;;  %1867 = vst.msk [vmem:[%s4348_s16 + $0x20] sm:$0xff] %vm416_vm1, %v1782_v20  ;;  %v1634_v20 = vadd.f32 1.0, %v4170_v50  ;;  %v5257_v50 = vld [vmem:[#allocation70_spill] sm:$0xff] }
 0x382   : > { %v2327_v14 = vpop.eup %2326  ;;  %2346 = vrcp.f32 %v1626_v3  ;;  %v1785_v31 = vmul.f32 %v2325_v57, %v5251_v17  ;;  %1868 = vst.msk [vmem:[%s4348_s16 + $0x28] sm:$0xff] %vm416_vm1, %v1783_v21 }
 0x383   : > { %v2329_v11 = vpop.eup %2328  ;;  %2348 = vrcp.f32 %v1627_v7  ;;  %v1786_v33 = vmul.f32 %v2327_v14, %v5252_v47  ;;  %1869 = vst.msk [vmem:[%s4348_s16 + $0x30] sm:$0xff] %vm416_vm1, %v1784_v29  ;;  %v1637_v14 = vadd.f32 1.0, %v4179_v54  ;;  %v1639_v47 = vadd.f32 1.0, %v4185_v53  ;;  %v5260_v54 = vld [vmem:[#allocation73_spill] sm:$0xff]  ;;  %v5263_v53 = vld [vmem:[#allocation12_spill] sm:$0xff] }
 0x384   : > { %v2331_v32 = vpop.eup %2330  ;;  %2350 = vrcp.f32 %v1628_v12  ;;  %v1787_v3 = vmul.f32 %v2329_v11, %v5253_v36  ;;  %1870 = vst.msk [vmem:[%s4348_s16 + $0x38] sm:$0xff] %vm416_vm1, %v1785_v31  ;;  %v1638_v31 = vadd.f32 1.0, %v4182_v6  ;;  %v5262_v6 = vld [vmem:[#allocation11_spill] sm:$0xff] }
 0x385   : > { %v2333_v35 = vpop.eup %2332  ;;  %2352 = vrcp.f32 %v1629_v13  ;;  %v1788_v7 = vmul.f32 %v2331_v32, %v5254_v25  ;;  %1871 = vst.msk [vmem:[%s4348_s16 + $0x40] sm:$0xff] %vm416_vm1, %v1786_v33  ;;  %v1636_v13 = vadd.f32 1.0, %v4176_v16  ;;  %v5259_v16 = vld [vmem:[#allocation72_spill] sm:$0xff] }
 0x386   : > { %v2335_v60 = vpop.eup %2334  ;;  %2354 = vrcp.f32 %v1630_v27  ;;  %v1789_v4 = vmul.f32 %v2333_v35, %v5255_v49  ;;  %1872 = vst.msk [vmem:[%s4348_s16 + $0x48] sm:$0xff] %vm416_vm1, %v1787_v3 }
 0x387   : > { %v2337_v12 = vpop.eup %2336  ;;  %2356 = vrcp.f32 %v1631_v28  ;;  %v1790_v21 = vmul.f32 %v2335_v60, %v5256_v5  ;;  %1873 = vst.msk [vmem:[%s4348_s16 + $0x50] sm:$0xff] %vm416_vm1, %v1788_v7  ;;  %v1642_v60 = vadd.f32 1.0, %v4194_v40  ;;  %v5266_v40 = vld [vmem:[#allocation15_spill] sm:$0xff] }
 0x388   : > { %v2339_v57 = vpop.eup %2338  ;;  %2358 = vrcp.f32 %v1632_v52  ;;  %v1791_v10 = vmul.f32 %v2337_v12, %v5257_v50  ;;  %1874 = vst.msk [vmem:[%s4348_s16 + $0x58] sm:$0xff] %vm416_vm1, %v1789_v4  ;;  %v5261_v52 = vld [vmem:[#allocation96_spill] sm:$0xff]  ;;  %v1643_v12 = vadd.f32 1.0, %v4197_v42  ;;  %v1645_v50 = vadd.f32 1.0, %v4203_v45  ;;  %v5269_v45 = vld [vmem:[#allocation18_spill] sm:$0xff] }
 0x389   : > { %v2341_v29 = vpop.eup %2340  ;;  %2360 = vrcp.f32 %v1633_v59  ;;  %v1792_v27 = vmul.f32 %v2339_v57, %v5258_v19  ;;  %1875 = vst.msk [vmem:[%s4348_s16 + $0x60] sm:$0xff] %vm416_vm1, %v1790_v21  ;;  %v1640_v36 = vadd.f32 1.0, %v5261_v52  ;;  %v1641_v59 = vadd.f32 1.0, %v4191_v56  ;;  %v5265_v56 = vld [vmem:[#allocation14_spill] sm:$0xff]  ;;  %v5267_v42 = vld [vmem:[#allocation16_spill] sm:$0xff] }
 0x38a   : > { %v2343_v17 = vpop.eup %2342  ;;  %2362 = vrcp.f32 %v1634_v20  ;;  %v1793_v11 = vmul.f32 %v2341_v29, %v5259_v16  ;;  %1876 = vst.msk [vmem:[%s4348_s16 + $0x68] sm:$0xff] %vm416_vm1, %v1791_v10  ;;  %v5264_v20 = vld [vmem:[#allocation13_spill] sm:$0xff]  ;;  %v1644_v21 = vadd.f32 1.0, %v4200_v44  ;;  %v1650_v52 = vadd.f32 1.0, %v4218_v39  ;;  %v5274_v39 = vld [vmem:[#allocation23_spill] sm:$0xff] }
 0x38b   : > { %v2345_v28 = vpop.eup %2344  ;;  %2364 = vrcp.f32 %v1635_v26  ;;  %v1794_v33 = vmul.f32 %v2343_v17, %v5260_v54  ;;  %1877 = vst.msk [vmem:[%s4348_s16 + $0x70] sm:$0xff] %vm416_vm1, %v1792_v27  ;;  %v5268_v44 = vld [vmem:[#allocation17_spill] sm:$0xff]  ;;  %v1647_v17 = vadd.f32 1.0, %v4209_v51  ;;  %v1649_v54 = vadd.f32 1.0, %v4215_v8  ;;  %v5271_v51 = vld [vmem:[#allocation20_spill] sm:$0xff]  ;;  %v5273_v8 = vld [vmem:[#allocation22_spill] sm:$0xff] }
 0x38c   : > { %v2347_v32 = vpop.eup %2346  ;;  %2366 = vrcp.f32 %v1636_v13  ;;  %v1795_v3 = vmul.f32 %v2345_v28, %v5262_v6  ;;  %1878 = vst.msk [vmem:[%s4348_s16 + $0x78] sm:$0xff] %vm416_vm1, %v1793_v11  ;;  %v1648_v11 = vadd.f32 1.0, %v4212_v41  ;;  %v5272_v41 = vld [vmem:[#allocation21_spill] sm:$0xff] }
 0x38d   : > { %v2349_v35 = vpop.eup %2348  ;;  %2368 = vrcp.f32 %v1637_v14  ;;  %v1796_v25 = vmul.f32 %v2347_v32, %v5263_v53  ;;  %1879 = vst.msk [vmem:[%s4348_s16 + $0x80] sm:$0xff] %vm416_vm1, %v1794_v33  ;;  %v1646_v14 = vadd.f32 1.0, %v4206_v46  ;;  %v5270_v46 = vld [vmem:[#allocation19_spill] sm:$0xff]  ;;  %v1652_v53 = vadd.f32 1.0, %v4224_v1  ;;  %v5276_v1 = vld [vmem:[#allocation25_spill] sm:$0xff] }
 0x38e   : > { %v2351_v7 = vpop.eup %2350  ;;  %2370 = vrcp.f32 %v1638_v31  ;;  %v1797_v49 = vmul.f32 %v2349_v35, %v5264_v20  ;;  %1880 = vst.msk [vmem:[%s4348_s16 + $0x88] sm:$0xff] %vm416_vm1, %v1795_v3  ;;  %v1651_v3 = vadd.f32 1.0, %v4221_v48  ;;  %v5275_v48 = vld [vmem:[#allocation24_spill] sm:$0xff] }
 0x38f   : > { %v2353_v4 = vpop.eup %2352  ;;  %2372 = vrcp.f32 %v1639_v47  ;;  %v1798_v26 = vmul.f32 %v2351_v7, %v5265_v56  ;;  %1881 = vst.msk [vmem:[%s4348_s16 + $0x90] sm:$0xff] %vm416_vm1, %v1796_v25 }
 0x390   : > { %v2355_v5 = vpop.eup %2354  ;;  %2374 = vrcp.f32 %v1640_v36  ;;  %v1799_v57 = vmul.f32 %v2353_v4, %v5266_v40  ;;  %1882 = vst.msk [vmem:[%s4348_s16 + $0x98] sm:$0xff] %vm416_vm1, %v1797_v49  ;;  %v1654_v4 = vadd.f32 1.0, %v4230_v9  ;;  %v5280_v9 = vld [vmem:[#allocation27_spill] sm:$0xff] }
 0x391   : > { %v2357_v13 = vpop.eup %2356  ;;  %2376 = vrcp.f32 %v1641_v59  ;;  %v1800_v10 = vmul.f32 %v2355_v5, %v5267_v42  ;;  %1883 = vst.msk [vmem:[%s4348_s16 + $0xa0] sm:$0xff] %vm416_vm1, %v1798_v26  ;;  %v5277_v26 = vld [vmem:[#allocation97_spill] sm:$0xff] }
 0x392   : > { %v2359_v29 = vpop.eup %2358  ;;  %2378 = vrcp.f32 %v1642_v60  ;;  %v1801_v19 = vmul.f32 %v2357_v13, %v5268_v44  ;;  %1884 = vst.msk [vmem:[%s4348_s16 + $0xa8] sm:$0xff] %vm416_vm1, %v1799_v57  ;;  %v1653_v60 = vadd.f32 1.0, %v4227_v58  ;;  %v1655_v5 = vadd.f32 1.0, %v5277_v26  ;;  %v5278_v58 = vld [vmem:[#allocation26_spill] sm:$0xff]  ;;  %v5295_v26 = vld [vmem:[#allocation104_spill] sm:$0xff] }
 0x393   : > { %v2361_v27 = vpop.eup %2360  ;;  %2380 = vrcp.f32 %v1643_v12  ;;  %v1802_v31 = vmul.f32 %v2359_v29, %v5269_v45  ;;  %1885 = vst.msk [vmem:[%s4348_s16 + $0xb0] sm:$0xff] %vm416_vm1, %v1800_v10  ;;  %v5279_v57 = vld [vmem:[#allocation98_spill] sm:$0xff]  ;;  %v5281_v10 = vld [vmem:[#allocation99_spill] sm:$0xff] }
 0x394   : > { %v2363_v16 = vpop.eup %2362  ;;  %2382 = vrcp.f32 %v1644_v21  ;;  %v1803_v28 = vmul.f32 %v2361_v27, %v5270_v46  ;;  %1886 = vst.msk [vmem:[%s4348_s16 + $0xb8] sm:$0xff] %vm416_vm1, %v1801_v19  ;;  %v1656_v13 = vadd.f32 1.0, %v5279_v57  ;;  %v1657_v29 = vadd.f32 1.0, %v5281_v10  ;;  %v5283_v27 = vld [vmem:[#allocation100_spill] sm:$0xff]  ;;  %v5284_v45 = vld [vmem:[#allocation38_spill] sm:$0xff] }
 0x395   : > { %v2365_v47 = vpop.eup %2364  ;;  %2384 = vrcp.f32 %v1645_v50  ;;  %v1804_v33 = vmul.f32 %v2363_v16, %v5271_v51  ;;  %1887 = vst.msk [vmem:[%s4348_s16 + $0xc0] sm:$0xff] %vm416_vm1, %v1802_v31  ;;  %v5287_v51 = vld [vmem:[#allocation102_spill] sm:$0xff] }
 0x396   : > { %v2367_v32 = vpop.eup %2366  ;;  %2386 = vrcp.f32 %v1646_v14  ;;  %v1805_v36 = vmul.f32 %v2365_v47, %v5272_v41  ;;  %1888 = vst.msk [vmem:[%s4348_s16 + $0xc8] sm:$0xff] %vm416_vm1, %v1803_v28  ;;  %v5282_v14 = vld [vmem:[#allocation28_spill] sm:$0xff]  ;;  %v5286_v28 = vld [vmem:[#allocation53_spill] sm:$0xff] }
 0x397   : > { %v2369_v6 = vpop.eup %2368  ;;  %2388 = vrcp.f32 %v1647_v17  ;;  %v1806_v35 = vmul.f32 %v2367_v32, %v5273_v8  ;;  %1889 = vst.msk [vmem:[%s4348_s16 + $0xd0] sm:$0xff] %vm416_vm1, %v1804_v33  ;;  %v1658_v17 = vadd.f32 1.0, %v5283_v27  ;;  %v1660_v33 = vadd.f32 1.0, %v5287_v51  ;;  %v5288_v32 = vld [vmem:[#allocation54_spill] sm:$0xff]  ;;  %v5305_v51 = vld [vmem:[#allocation37_spill] sm:$0xff] }
 0x398   : > { %v2371_v59 = vpop.eup %2370  ;;  %2390 = vrcp.f32 %v1648_v11  ;;  %v1807_v25 = vmul.f32 %v2369_v6, %v5274_v39  ;;  %1890 = vst.msk [vmem:[%s4348_s16 + $0xd8] sm:$0xff] %vm416_vm1, %v1805_v36  ;;  %v5285_v11 = vld [vmem:[#allocation101_spill] sm:$0xff]  ;;  %v1661_v36 = vadd.f32 1.0, %v4251_v34  ;;  %v5289_v6 = vld [vmem:[#allocation55_spill] sm:$0xff] }
 0x399   : > { %v2373_v7 = vpop.eup %2372  ;;  %2392 = vrcp.f32 %v1649_v54  ;;  %v1808_v20 = vmul.f32 %v2371_v59, %v5275_v48  ;;  %1891 = vst.msk [vmem:[%s4348_s16 + $0xe0] sm:$0xff] %vm416_vm1, %v1806_v35  ;;  %v1659_v46 = vadd.f32 1.0, %v5285_v11  ;;  %v1662_v35 = vadd.f32 1.0, %v4254_v61  ;;  %v5290_v59 = vld [vmem:[#allocation56_spill] sm:$0xff]  ;;  %v5291_v34 = vld [vmem:[#allocation29_spill] sm:$0xff]  ;;  %v5292_v61 = vld [vmem:[#allocation30_spill] sm:$0xff] }
 0x39a   : > { %v2375_v49 = vpop.eup %2374  ;;  %2394 = vrcp.f32 %v1650_v52  ;;  %v1809_v12 = vmul.f32 %v2373_v7, %v5276_v1  ;;  %1892 = vst.msk [vmem:[%s4348_s16 + $0xe8] sm:$0xff] %vm416_vm1, %v1807_v25  ;;  %v1663_v25 = vadd.f32 1.0, %v4257_v62  ;;  %v1664_v48 = vadd.f32 1.0, %v4260_v63  ;;  %v5294_v62 = vld [vmem:[#allocation31_spill] sm:$0xff]  ;;  %v5296_v63 = vld [vmem:[#allocation32_spill] sm:$0xff] }
 0x39b   : > { %v2377_v56 = vpop.eup %2376  ;;  %2396 = vrcp.f32 %v1651_v3  ;;  %v1810_v21 = vmul.f32 %v2375_v49, %v5278_v58  ;;  %1893 = vst.msk [vmem:[%s4348_s16 + $0xf0] sm:$0xff] %vm416_vm1, %v1808_v20 }
 0x39c   : > { %v2379_v40 = vpop.eup %2378  ;;  %2398 = vrcp.f32 %v1652_v53  ;;  %v1811_v50 = vmul.f32 %v2377_v56, %v5280_v9  ;;  %1894 = vst.msk [vmem:[%s4348_s16 + $0xf8] sm:$0xff] %vm416_vm1, %v1809_v12 }
 0x39d   : > { %v2381_v42 = vpop.eup %2380  ;;  %2400 = vrcp.f32 %v1653_v60  ;;  %v1812_v44 = vmul.f32 %v2379_v40, %v5282_v14  ;;  %1895 = vst.msk [vmem:[%s4348_s16 + $0x100] sm:$0xff] %vm416_vm1, %v1810_v21  ;;  %v5297_v40 = vld [vmem:[#allocation105_spill] sm:$0xff] }
 0x39e   : > { %v2383_v19 = vpop.eup %2382  ;;  %2402 = vrcp.f32 %v1654_v4  ;;  %v1813_v31 = vmul.f32 %v2381_v42, %v5284_v45  ;;  %1896 = vst.msk [vmem:[%s4348_s16 + $0x108] sm:$0xff] %vm416_vm1, %v1811_v50  ;;  %v5293_v4 = vld [vmem:[#allocation103_spill] sm:$0xff]  ;;  %v1667_v57 = vadd.f32 1.0, %v5297_v40  ;;  %v5299_v42 = vld [vmem:[#allocation106_spill] sm:$0xff] }
 0x39f   : > { %v2385_v16 = vpop.eup %2384  ;;  %2404 = vrcp.f32 %v1655_v5  ;;  %v1814_v47 = vmul.f32 %v2383_v19, %v5286_v28  ;;  %1897 = vst.msk [vmem:[%s4348_s16 + $0x110] sm:$0xff] %vm416_vm1, %v1812_v44  ;;  %v1665_v1 = vadd.f32 1.0, %v5293_v4  ;;  %v1666_v5 = vadd.f32 1.0, %v5295_v26  ;;  %v5301_v19 = vld [vmem:[#allocation107_spill] sm:$0xff] }
 0x3a0   : > { %v2387_v54 = vpop.eup %2386  ;;  %2406 = vrcp.f32 %v1656_v13  ;;  %v1815_v52 = vmul.f32 %v2385_v16, %v5288_v32  ;;  %1898 = vst.msk [vmem:[%s4348_s16 + $0x118] sm:$0xff] %vm416_vm1, %v1813_v31  ;;  %v5298_v13 = vld [vmem:[#allocation33_spill] sm:$0xff]  ;;  %v1668_v10 = vadd.f32 1.0, %v5299_v42  ;;  %v1669_v27 = vadd.f32 1.0, %v5301_v19  ;;  %v5303_v16 = vld [vmem:[#allocation108_spill] sm:$0xff] }
 0x3a1   : > { %v2389_v41 = vpop.eup %2388  ;;  %2408 = vrcp.f32 %v1657_v29  ;;  %v1816_v3 = vmul.f32 %v2387_v54, %v5289_v6  ;;  %1899 = vst.msk [vmem:[%s4348_s16 + $0x120] sm:$0xff] %vm416_vm1, %v1814_v47  ;;  %v5300_v29 = vld [vmem:[#allocation34_spill] sm:$0xff]  ;;  %v1670_v11 = vadd.f32 1.0, %v5303_v16  ;;  %v1671_v54 = vadd.f32 1.0, %v4281_v18  ;;  %v5308_v18 = vld [vmem:[#allocation40_spill] sm:$0xff]  ;;  %v5321_v16 = vld [vmem:[#allocation111_spill] sm:$0xff] }
 0x3a2   : > { %v2391_v8 = vpop.eup %2390  ;;  %2410 = vrcp.f32 %v1658_v17  ;;  %v1817_v53 = vmul.f32 %v2389_v41, %v5290_v59  ;;  %1900 = vst.msk [vmem:[%s4348_s16 + $0x128] sm:$0xff] %vm416_vm1, %v1815_v52  ;;  %v5302_v17 = vld [vmem:[#allocation35_spill] sm:$0xff]  ;;  %v5306_v52 = vld [vmem:[#allocation109_spill] sm:$0xff]  ;;  %v1677_v4 = vadd.f32 1.0, %v4297_v0  ;;  %v5314_v0 = vld [vmem:[#allocation46_spill] sm:$0xff]  ;;  %v1682_v42 = vadd.f32 1.0, %v4310_v2 }
 0x3a3   : > { %v2393_v39 = vpop.eup %2392  ;;  %2412 = vrcp.f32 %v1659_v46  ;;  %v1818_v7 = vmul.f32 %v2391_v8, %v5291_v34  ;;  %1901 = vst.msk [vmem:[%s4348_s16 + $0x130] sm:$0xff] %vm416_vm1, %v1816_v3  ;;  %v5304_v46 = vld [vmem:[#allocation36_spill] sm:$0xff]  ;;  %v1672_v41 = vadd.f32 1.0, %v5306_v52  ;;  %v1673_v8 = vadd.f32 1.0, %v4287_v38  ;;  %v5310_v38 = vld [vmem:[#allocation42_spill] sm:$0xff]  ;;  %v5320_v2 = vld [vmem:[#allocation51_spill] sm:$0xff] }
 0x3a4   : > { %v2395_v60 = vpop.eup %2394  ;;  %2414 = vrcp.f32 %v1660_v33  ;;  %v1819_v20 = vmul.f32 %v2393_v39, %v5292_v61  ;;  %1902 = vst.msk [vmem:[%s4348_s16 + $0x138] sm:$0xff] %vm416_vm1, %v1817_v53  ;;  %v1674_v53 = vadd.f32 1.0, %v4290_v43  ;;  %v5309_v39 = vld [vmem:[#allocation41_spill] sm:$0xff]  ;;  %v1676_v61 = vadd.f32 1.0, %v4295_v37  ;;  %v5311_v43 = vld [vmem:[#allocation43_spill] sm:$0xff] }
 0x3a5   : > { %v2397_v49 = vpop.eup %2396  ;;  %2416 = vrcp.f32 %v1661_v36  ;;  %v1820_v12 = vmul.f32 %v2395_v60, %v5294_v62  ;;  %1903 = vst.msk [vmem:[%s4348_s16 + $0x140] sm:$0xff] %vm416_vm1, %v1818_v7  ;;  %v5307_v36 = vld [vmem:[#allocation39_spill] sm:$0xff]  ;;  %v1675_v7 = vadd.f32 1.0, %v4293_v30  ;;  %v5312_v30 = vld [vmem:[#allocation44_spill] sm:$0xff]  ;;  %v5313_v37 = vld [vmem:[#allocation45_spill] sm:$0xff] }
 0x3a6   : > { %v2399_v56 = vpop.eup %2398  ;;  %2418 = vrcp.f32 %v1662_v35  ;;  %v1821_v58 = vmul.f32 %v2397_v49, %v5296_v63  ;;  %1904 = vst.msk [vmem:[%s4348_s16 + $0x148] sm:$0xff] %vm416_vm1, %v1819_v20  ;;  %v5325_v52 = vld [vmem:[#allocation113_spill] sm:$0xff] }
 0x3a7   : > { %v2401_v21 = vpop.eup %2400  ;;  %2420 = vrcp.f32 %v1663_v25  ;;  %v1822_v9 = vmul.f32 %v2399_v56, %v5298_v13  ;;  %1905 = vst.msk [vmem:[%s4348_s16 + $0x150] sm:$0xff] %vm416_vm1, %v1820_v12  ;;  %v1678_v12 = vadd.f32 1.0, %v4299_v23  ;;  %v5315_v23 = vld [vmem:[#allocation47_spill] sm:$0xff]  ;;  %v1681_v13 = vadd.f32 1.0, %v4307_v24  ;;  %v5318_v24 = vld [vmem:[#allocation50_spill] sm:$0xff] }
 0x3a8   : > { %v2403_v50 = vpop.eup %2402  ;;  %2422 = vrcp.f32 %v1664_v48  ;;  %v1823_v14 = vmul.f32 %v2401_v21, %v5300_v29  ;;  %1906 = vst.msk [vmem:[%s4348_s16 + $0x158] sm:$0xff] %vm416_vm1, %v1821_v58  ;;  %v1680_v21 = vadd.f32 1.0, %v4304_v15  ;;  %v5317_v15 = vld [vmem:[#allocation49_spill] sm:$0xff] }
 0x3a9   : > { %v2405_v44 = vpop.eup %2404  ;;  %2424 = vrcp.f32 %v1665_v1  ;;  %v1824_v45 = vmul.f32 %v2403_v50, %v5302_v17  ;;  %1907 = vst.msk [vmem:[%s4348_s16 + $0x160] sm:$0xff] %vm416_vm1, %v1822_v9 }
 0x3aa   : > { %v2407_v31 = vpop.eup %2406  ;;  %2426 = vrcp.f32 %v1666_v5  ;;  %v1825_v28 = vmul.f32 %v2405_v44, %v5304_v46  ;;  %1908 = vst.msk [vmem:[%s4348_s16 + $0x168] sm:$0xff] %vm416_vm1, %v1823_v14  ;;  %v1679_v5 = vadd.f32 1.0, %v4301_v22  ;;  %v5316_v22 = vld [vmem:[#allocation48_spill] sm:$0xff]  ;;  %v1683_v14 = vadd.f32 1.0, %v4313_v55 }
 0x3ab   : > { %v2409_v47 = vpop.eup %2408  ;;  %2428 = vrcp.f32 %v1667_v57  ;;  %v1826_v33 = vmul.f32 %v2407_v31, %v5305_v51  ;;  %1909 = vst.msk [vmem:[%s4348_s16 + $0x170] sm:$0xff] %vm416_vm1, %v1824_v45  ;;  %v5322_v55 = vld [vmem:[#allocation52_spill] sm:$0xff]  ;;  %v5324_v51 = vld [vmem:[#allocation57_spill] sm:$0xff] }
 0x3ac   : > { %v2411_v32 = vpop.eup %2410  ;;  %2430 = vrcp.f32 %v1668_v10  ;;  %v1827_v6 = vmul.f32 %v2409_v47, %v5307_v36  ;;  %1910 = vst.msk [vmem:[%s4348_s16 + $0x178] sm:$0xff] %vm416_vm1, %v1825_v28  ;;  %v5323_v47 = vld [vmem:[#allocation112_spill] sm:$0xff]  ;;  %v5326_v36 = vld [vmem:[#allocation2_spill] sm:$0xff] }
 0x3ad   : > { %v2413_v3 = vpop.eup %2412  ;;  %2432 = vrcp.f32 %v1669_v27  ;;  %v1828_v35 = vmul.f32 %v2411_v32, %v5308_v18  ;;  %1911 = vst.msk [vmem:[%s4348_s16 + $0x180] sm:$0xff] %vm416_vm1, %v1826_v33  ;;  %v5319_v27 = vld [vmem:[#allocation110_spill] sm:$0xff] }
 0x3ae   : > { %v2415_v59 = vpop.eup %2414  ;;  %2434 = vrcp.f32 %v1670_v11  ;;  %v1829_v25 = vmul.f32 %v2413_v3, %v5309_v39  ;;  %1912 = vst.msk [vmem:[%s4348_s16 + $0x188] sm:$0xff] %vm416_vm1, %v1827_v6  ;;  %v1684_v17 = vadd.f32 1.0, %v5319_v27  ;;  %v1685_v11 = vadd.f32 1.0, %v5321_v16  ;;  %v5329_v39 = vld [vmem:[#allocation87_spill] sm:$0xff]  ;;  %v5345_v16 = vld [vmem:[#allocation8_spill] sm:$0xff] }
 0x3af   : > { %v2417_v34 = vpop.eup %2416  ;;  %2436 = vrcp.f32 %v1671_v54  ;;  %v1830_v60 = vmul.f32 %v2415_v59, %v5310_v38  ;;  %1913 = vst.msk [vmem:[%s4348_s16 + $0x190] sm:$0xff] %vm416_vm1, %v1828_v35  ;;  %v1686_v54 = vadd.f32 1.0, %v5323_v47  ;;  %v5328_v35 = vld [vmem:[#allocation3_spill] sm:$0xff] }
 0x3b0   : > { %v2419_v48 = vpop.eup %2418  ;;  %2438 = vrcp.f32 %v1672_v41  ;;  %v1831_v20 = vmul.f32 %v2417_v34, %v5311_v43  ;;  %1914 = vst.msk [vmem:[%s4348_s16 + $0x198] sm:$0xff] %vm416_vm1, %v1829_v25  ;;  %v1687_v41 = vadd.f32 1.0, %v5325_v52  ;;  %v1689_v25 = vadd.f32 1.0, %v5329_v39  ;;  %v5330_v34 = vld [vmem:[#allocation74_spill] sm:$0xff] }
 0x3b1   : > { %v2421_v49 = vpop.eup %2420  ;;  %2440 = vrcp.f32 %v1673_v8  ;;  %v1832_v1 = vmul.f32 %v2419_v48, %v5312_v30  ;;  %1915 = vst.msk [vmem:[%s4348_s16 + $0x1a0] sm:$0xff] %vm416_vm1, %v1830_v60  ;;  %v5327_v8 = vld [vmem:[#allocation114_spill] sm:$0xff]  ;;  %v5331_v60 = vld [vmem:[#allocation88_spill] sm:$0xff] }
 0x3b2   : > { %v2423_v62 = vpop.eup %2422  ;;  %2442 = vrcp.f32 %v1674_v53  ;;  %v1833_v56 = vmul.f32 %v2421_v49, %v5313_v37  ;;  %1916 = vst.msk [vmem:[%s4348_s16 + $0x1a8] sm:$0xff] %vm416_vm1, %v1831_v20  ;;  %v1688_v18 = vadd.f32 1.0, %v5327_v8  ;;  %v1690_v48 = vadd.f32 1.0, %v5331_v60  ;;  %v5333_v49 = vld [vmem:[#allocation89_spill] sm:$0xff]  ;;  %v5334_v30 = vld [vmem:[#allocation76_spill] sm:$0xff] }
 0x3b3   : > { %v2425_v26 = vpop.eup %2424  ;;  %2444 = vrcp.f32 %v1675_v7  ;;  %v1834_v63 = vmul.f32 %v2423_v62, %v5314_v0  ;;  %1917 = vst.msk [vmem:[%s4348_s16 + $0x1b0] sm:$0xff] %vm416_vm1, %v1832_v1  ;;  %v5337_v0 = vld [vmem:[#allocation78_spill] sm:$0xff]  ;;  %v5350_v8 = vld [vmem:[#allocation85_spill] sm:$0xff] }
 0x3b4   : > { %v2427_v58 = vpop.eup %2426  ;;  %2446 = vrcp.f32 %v1676_v61  ;;  %v1835_v40 = vmul.f32 %v2425_v26, %v5315_v23  ;;  %1918 = vst.msk [vmem:[%s4348_s16 + $0x1b8] sm:$0xff] %vm416_vm1, %v1833_v56  ;;  %v5332_v61 = vld [vmem:[#allocation75_spill] sm:$0xff]  ;;  %v5336_v56 = vld [vmem:[#allocation77_spill] sm:$0xff] }
 0x3b5   : > { %v2429_v57 = vpop.eup %2428  ;;  %2448 = vrcp.f32 %v1677_v4  ;;  %v1836_v9 = vmul.f32 %v2427_v58, %v5316_v22  ;;  %1919 = vst.msk [vmem:[%s4348_s16 + $0x1c0] sm:$0xff] %vm416_vm1, %v1834_v63  ;;  %v1691_v4 = vadd.f32 1.0, %v5333_v49 }
 0x3b6   : > { %v2431_v50 = vpop.eup %2430  ;;  %2450 = vrcp.f32 %v1678_v12  ;;  %v1837_v10 = vmul.f32 %v2429_v57, %v5317_v15  ;;  %1920 = vst.msk [vmem:[%s4348_s16 + $0x1c8] sm:$0xff] %vm416_vm1, %v1835_v40  ;;  %v5335_v12 = vld [vmem:[#allocation90_spill] sm:$0xff]  ;;  %v5339_v57 = vld [vmem:[#allocation80_spill] sm:$0xff] }
 0x3b7   : > { %v2433_v29 = vpop.eup %2432  ;;  %2452 = vrcp.f32 %v1679_v5  ;;  %v1838_v44 = vmul.f32 %v2431_v50, %v5318_v24  ;;  %1921 = vst.msk [vmem:[%s4348_s16 + $0x1d0] sm:$0xff] %vm416_vm1, %v1836_v9  ;;  %v1692_v37 = vadd.f32 1.0, %v5335_v12  ;;  %v5340_v9 = vld [vmem:[#allocation81_spill] sm:$0xff]  ;;  %v5341_v15 = vld [vmem:[#allocation4_spill] sm:$0xff] }
 0x3b8   : > { %v2435_v19 = vpop.eup %2434  ;;  %2454 = vrcp.f32 %v1680_v21  ;;  %v1839_v45 = vmul.f32 %v2433_v29, %v5320_v2  ;;  %1922 = vst.msk [vmem:[%s4348_s16 + $0x1d8] sm:$0xff] %vm416_vm1, %v1837_v10  ;;  %v5338_v21 = vld [vmem:[#allocation79_spill] sm:$0xff] }
 0x3b9   : > { %v2437_v31 = vpop.eup %2436  ;;  %2456 = vrcp.f32 %v1681_v13  ;;  %v1840_v46 = vmul.f32 %v2435_v19, %v5322_v55  ;;  %1923 = vst.msk [vmem:[%s4348_s16 + $0x1e0] sm:$0xff] %vm416_vm1, %v1838_v44  ;;  %v5343_v19 = vld [vmem:[#allocation6_spill] sm:$0xff]  ;;  %v5344_v2 = vld [vmem:[#allocation7_spill] sm:$0xff] }
 0x3ba   : > { %v2439_v28 = vpop.eup %2438  ;;  %2458 = vrcp.f32 %v1682_v42  ;;  %v1841_v33 = vmul.f32 %v2437_v31, %v5324_v51  ;;  %1924 = vst.msk [vmem:[%s4348_s16 + $0x1e8] sm:$0xff] %vm416_vm1, %v1839_v45 }
 0x3bb   : > { %v2441_v32 = vpop.eup %2440  ;;  %2460 = vrcp.f32 %v1683_v14  ;;  %v1842_v6 = vmul.f32 %v2439_v28, %v5326_v36  ;;  %1925 = vst.msk [vmem:[%s4348_s16 + $0x1f0] sm:$0xff] %vm416_vm1, %v1840_v46  ;;  %v5342_v14 = vld [vmem:[#allocation5_spill] sm:$0xff]  ;;  %v5349_v36 = vld [vmem:[#allocation84_spill] sm:$0xff] }
 0x3bc   : > { %v2443_v3 = vpop.eup %2442  ;;  %2462 = vrcp.f32 %v1684_v17  ;;  %v1843_v59 = vmul.f32 %v2441_v32, %v5328_v35  ;;  %1926 = vst.msk [vmem:[%s4348_s16 + $0x1f8] sm:$0xff] %vm416_vm1, %v1841_v33  ;;  %v5346_v46 = vld [vmem:[#allocation9_spill] sm:$0xff]  ;;  %v5348_v32 = vld [vmem:[#allocation83_spill] sm:$0xff]  ;;  %v5351_v35 = vld [vmem:[#allocation86_spill] sm:$0xff] }
 0x3bd   : > { %v2445_v53 = vpop.eup %2444  ;;  %2464 = vrcp.f32 %v1685_v11  ;;  %v1844_v7 = vmul.f32 %v2443_v3, %v5330_v34  ;;  %1927 = vst.msk [vmem:[%s4348_s16 + $0x200] sm:$0xff] %vm416_vm1, %v1842_v6 }
 0x3be   : > { %v2447_v38 = vpop.eup %2446  ;;  %2466 = vrcp.f32 %v1686_v54  ;;  %v1845_v43 = vmul.f32 %v2445_v53, %v5332_v61  ;;  %1928 = vst.msk [vmem:[%s4348_s16 + $0x208] sm:$0xff] %vm416_vm1, %v1843_v59  ;;  %v5347_v54 = vld [vmem:[#allocation82_spill] sm:$0xff] }
 0x3bf   : > { %v2449_v20 = vpop.eup %2448  ;;  %2468 = vrcp.f32 %v1687_v41  ;;  %v1846_v1 = vmul.f32 %v2447_v38, %v5334_v30  ;;  %1929 = vst.msk [vmem:[%s4348_s16 + $0x210] sm:$0xff] %vm416_vm1, %v1844_v7 }
 0x3c0   : > { %v2451_v62 = vpop.eup %2450  ;;  %2470 = vrcp.f32 %v1688_v18  ;;  %v1847_v26 = vmul.f32 %v2449_v20, %v5336_v56  ;;  %1930 = vst.msk [vmem:[%s4348_s16 + $0x218] sm:$0xff] %vm416_vm1, %v1845_v43 }
 0x3c1   : > { %v2453_v5 = vpop.eup %2452  ;;  %2472 = vrcp.f32 %v1689_v25  ;;  %v1848_v63 = vmul.f32 %v2451_v62, %v5337_v0  ;;  %1931 = vst.msk [vmem:[%s4348_s16 + $0x220] sm:$0xff] %vm416_vm1, %v1846_v1 }
 0x3c2   : > { %v2455_v58 = vpop.eup %2454  ;;  %2474 = vrcp.f32 %v1690_v48  ;;  %v1849_v23 = vmul.f32 %v2453_v5, %v5338_v21  ;;  %1932 = vst.msk [vmem:[%s4348_s16 + $0x228] sm:$0xff] %vm416_vm1, %v1847_v26 }
 0x3c3   : > { %v2457_v40 = vpop.eup %2456  ;;  %2476 = vrcp.f32 %v1691_v4  ;;  %v1850_v13 = vmul.f32 %v2455_v58, %v5339_v57  ;;  %1933 = vst.msk [vmem:[%s4348_s16 + $0x230] sm:$0xff] %vm416_vm1, %v1848_v63 }
 0x3c4   : > { %v2459_v22 = vpop.eup %2458  ;;  %2478 = vrcp.f32 %v1692_v37  ;;  %v1851_v50 = vmul.f32 %v2457_v40, %v5340_v9  ;;  %1934 = vst.msk [vmem:[%s4348_s16 + $0x238] sm:$0xff] %vm416_vm1, %v1849_v23 }
 0x3c5   : > { %v2461_v42 = vpop.eup %2460  ;;  %v1852_v10 = vmul.f32 %v2459_v22, %v5341_v15  ;;  %1935 = vst.msk [vmem:[%s4348_s16 + $0x240] sm:$0xff] %vm416_vm1, %v1850_v13 }
 0x3c6   : > { %v2463_v29 = vpop.eup %2462  ;;  %v1853_v24 = vmul.f32 %v2461_v42, %v5342_v14  ;;  %1936 = vst.msk [vmem:[%s4348_s16 + $0x248] sm:$0xff] %vm416_vm1, %v1851_v50 }
 0x3c7   : > { %v2465_v44 = vpop.eup %2464  ;;  %v1854_v27 = vmul.f32 %v2463_v29, %v5343_v19  ;;  %1937 = vst.msk [vmem:[%s4348_s16 + $0x250] sm:$0xff] %vm416_vm1, %v1852_v10 }
 0x3c8   : > { %v2467_v17 = vpop.eup %2466  ;;  %v1855_v45 = vmul.f32 %v2465_v44, %v5344_v2  ;;  %1938 = vst.msk [vmem:[%s4348_s16 + $0x258] sm:$0xff] %vm416_vm1, %v1853_v24 }
 0x3c9   : > { %v2469_v31 = vpop.eup %2468  ;;  %v1856_v11 = vmul.f32 %v2467_v17, %v5345_v16  ;;  %1939 = vst.msk [vmem:[%s4348_s16 + $0x260] sm:$0xff] %vm416_vm1, %v1854_v27 }
 0x3ca   : > { %v2471_v55 = vpop.eup %2470  ;;  %v1857_v28 = vmul.f32 %v2469_v31, %v5346_v46  ;;  %1940 = vst.msk [vmem:[%s4348_s16 + $0x268] sm:$0xff] %vm416_vm1, %v1855_v45 }
 0x3cb   : > { %v2473_v47 = vpop.eup %2472  ;;  %v1858_v51 = vmul.f32 %v2471_v55, %v5347_v54  ;;  %1941 = vst.msk [vmem:[%s4348_s16 + $0x270] sm:$0xff] %vm416_vm1, %v1856_v11 }
 0x3cc   : > { %v2475_v33 = vpop.eup %2474  ;;  %v1859_v52 = vmul.f32 %v2473_v47, %v5348_v32  ;;  %1942 = vst.msk [vmem:[%s4348_s16 + $0x278] sm:$0xff] %vm416_vm1, %v1857_v28 }
 0x3cd   : > { %v2477_v41 = vpop.eup %2476  ;;  %v1860_v6 = vmul.f32 %v2475_v33, %v5349_v36  ;;  %1943 = vst.msk [vmem:[%s4348_s16 + $0x280] sm:$0xff] %vm416_vm1, %v1858_v51 }
 0x3ce   : > { %v2479_v3 = vpop.eup %2478  ;;  %v1861_v18 = vmul.f32 %v2477_v41, %v5350_v8  ;;  %1944 = vst.msk [vmem:[%s4348_s16 + $0x288] sm:$0xff] %vm416_vm1, %v1859_v52 }
 0x3cf   : > { %v1862_v59 = vmul.f32 %v2479_v3, %v5351_v35  ;;  %1945 = vst.msk [vmem:[%s4348_s16 + $0x290] sm:$0xff] %vm416_vm1, %v1860_v6 }
 0x3d0   : > { %1946 = vst.msk [vmem:[%s4348_s16 + $0x298] sm:$0xff] %vm416_vm1, %v1861_v18 }
 0x3d1   : > { %1947 = vst.msk [vmem:[%s4348_s16 + $0x2a0] sm:$0xf] %vm584_vm2, %v1862_v59 }
 0x3d2 PF: > { %s15_s18 = sadd.s32 1, %s2486_s18  }
 0x3d3   : > { %p12_p4 = scmp.ge.s32.totalorder %s15_s18, 4  }
 0x3d5   :  { %14 = sbr.rel (!%p12_p4) target bundleno = 1 (0x1), region = 73 }

</bundles_post_ra>
